<compile_context>
chip_gen: v6e
topology: v6e:2x2x1
jax: 0.10.0
libtpu: 0.0.40
codegen_flags: <defaults>
</compile_context>

<pallas_src>
import jax
import jax.numpy as jnp
from jax.experimental import pallas as pl
from jax.experimental.pallas import tpu as pltpu


def _round_up(x, m):
    return ((x + m - 1) // m) * m


def _leaky_relu(x, alpha=0.2):
    return jnp.where(x > 0, x, alpha * x)


def _choose_batch_tile(B, tb_max=2048):
    """Batch tile: multiple of 256 (full MXU M-passes on v6e/v7x, also 128/8-aligned
    for v5e), capped at tb_max for VMEM, and sized so there are >=2 grid steps when
    the batch allows it (v7x megacore via dimension_semantics=('parallel',))."""
    half = (B + 1) // 2
    tb = min(tb_max, _round_up(half, 256))
    return max(tb, 256)


def discriminator_mlp_kernel(x_ref, w1_ref, b1_ref, w2_ref, b2_ref,
                             w3_ref, b3_ref, out_ref):
    # x_ref: [TB, D_in] f32 ; w1_ref: [D_in, H1] bf16 ; w2_ref: [H1, H2] bf16
    # w3_ref: [1, H2] f32 (row) ; biases f32 ; out_ref: [TB, 1] f32
    x = x_ref[...].astype(jnp.bfloat16)      # f32 -> bf16 on the VPU (hidden under MXU)

    # Layer 1: bf16 MXU matmul, f32 accumulation; bias + LeakyReLU in f32.
    h = jnp.dot(x, w1_ref[...], preferred_element_type=jnp.float32)   # [TB, H1]
    h = _leaky_relu(h + b1_ref[...])
    # dropout (eval mode) -> identity

    # Layer 2: bf16 MXU matmul, f32 accumulation.
    h = jnp.dot(h.astype(jnp.bfloat16), w2_ref[...],
                preferred_element_type=jnp.float32)                   # [TB, H2]
    h = _leaky_relu(h + b2_ref[...])
    # dropout (eval mode) -> identity

    # Output layer (N=1): VPU multiply + cross-lane (XLU) reduction; store the
    # [TB, 1] logits directly (compact writeback, no broadcast slab).
    logit = jnp.sum(h * w3_ref[...], axis=-1, keepdims=True) + b3_ref[...]
    out_ref[...] = logit.astype(out_ref.dtype)


def prepare_kernel_params(params):
    """One-time prep: cast matmul weights to bf16, reshape final layer as a row."""
    return {
        "w1": params["w1"].astype(jnp.bfloat16),   # [D_in, H1]
        "b1": params["b1"],                        # [1, H1] f32
        "w2": params["w2"].astype(jnp.bfloat16),   # [H1, H2]
        "b2": params["b2"],                        # [1, H2] f32
        "w3_row": params["w3"].reshape(1, -1),     # [1, H2] f32 (VPU head)
        "b3": params["b3"],                        # [1, 1]  f32
    }


def discriminator_mlp_forward(x, kparams, *, tb_max=2048):
    """x: [B, C, H, W] float32. kparams: output of prepare_kernel_params. -> [B, 1]"""
    B = x.shape[0]
    flat = x.reshape(B, -1)                        # stays f32; no extra cast/pad passes
    D_in = flat.shape[1]
    H1 = kparams["w1"].shape[1]
    H2 = kparams["w2"].shape[1]

    TB = _choose_batch_tile(B, tb_max)
    num_blocks = pl.cdiv(B, TB)
    Bp = num_blocks * TB                           # output allocated padded; rows >= B sliced off

    # Advisory cost hint for XLA scheduling around the custom call.
    flops = 2 * Bp * (D_in * H1 + H1 * H2 + H2)
    bytes_accessed = (B * D_in * 4                 # x (f32, read in-kernel)
                      + (D_in * H1 + H1 * H2) * 2  # bf16 weights
                      + (H1 + 2 * H2 + 1) * 4      # biases + w3 row
                      + Bp * 4)                    # compact [Bp,1] output

    const = lambda i: (0, 0)                       # weights/biases: resident, DMA'd once

    out = pl.pallas_call(
        discriminator_mlp_kernel,
        out_shape=jax.ShapeDtypeStruct((Bp, 1), jnp.float32),
        grid=(num_blocks,),
        in_specs=[
            pl.BlockSpec((TB, D_in), lambda i: (i, 0)),   # x tile (pipelined; ragged last block OK)
            pl.BlockSpec((D_in, H1), const),              # w1 (resident)
            pl.BlockSpec((1, H1), const),                 # b1
            pl.BlockSpec((H1, H2), const),                # w2 (resident)
            pl.BlockSpec((1, H2), const),                 # b2
            pl.BlockSpec((1, H2), const),                 # w3 row
            pl.BlockSpec((1, 1), const),                  # b3
        ],
        out_specs=pl.BlockSpec((TB, 1), lambda i: (i, 0)),
        compiler_params=pltpu.CompilerParams(
            dimension_semantics=("parallel",),            # megacore on v7x (>=2 blocks when possible)
            vmem_limit_bytes=48 * 1024 * 1024,            # ~28 MiB used at TB=2048; < 64 MiB v7x physical
        ),
        cost_estimate=pl.CostEstimate(
            flops=flops, transcendentals=0, bytes_accessed=bytes_accessed),
    )(flat, kparams["w1"], kparams["b1"], kparams["w2"], kparams["b2"],
      kparams["w3_row"], kparams["b3"])

    return out[:B]                                        # [B, 1] logits


def init_params(key, input_dims, hidden_dims):
    """Deterministic init mimicking nn.Linear's U(-1/sqrt(fan_in), 1/sqrt(fan_in)).
    Weights stored transposed ([in, out]) so the kernel does x @ W directly."""
    dims = [input_dims] + list(hidden_dims) + [1]
    params = {}
    for i in range(len(dims) - 1):
        fan_in, fan_out = dims[i], dims[i + 1]
        key, kw, kb = jax.random.split(key, 3)
        bound = 1.0 / jnp.sqrt(jnp.float32(fan_in))
        w = jax.random.uniform(kw, (fan_in, fan_out), jnp.float32, -bound, bound)
        b = jax.random.uniform(kb, (1, fan_out), jnp.float32, -bound, bound)
        params[f"w{i+1}"] = w
        params[f"b{i+1}"] = b
    return params


def reference_forward(x, params):
    """Pure-JAX reference with kernel-matched numerics (bf16 matmuls, f32 accumulate)."""
    h = x.reshape(x.shape[0], -1).astype(jnp.bfloat16)
    h = jnp.dot(h, params["w1"].astype(jnp.bfloat16),
                preferred_element_type=jnp.float32) + params["b1"]
    h = jnp.where(h > 0, h, 0.2 * h)
    h = jnp.dot(h.astype(jnp.bfloat16), params["w2"].astype(jnp.bfloat16),
                preferred_element_type=jnp.float32) + params["b2"]
    h = jnp.where(h > 0, h, 0.2 * h)
    return jnp.dot(h, params["w3"], preferred_element_type=jnp.float32) + params["b3"]


if __name__ == "__main__":
    key = jax.random.PRNGKey(0)
    k_x, k_x2, k_p = jax.random.split(key, 3)

    # Small example input consistent with the module: [B, C, H, W] = [2, 4, 16, 16]
    # -> input_dims = 4*16*16 = 1024, hidden_dims = [512, 256]
    B, C, H, W = 2, 4, 16, 16
    input_dims = C * H * W
    hidden_dims = [512, 256]

    params = init_params(k_p, input_dims, hidden_dims)
    kparams = prepare_kernel_params(params)   # one-time bf16 cast / layout prep

    # Primary small test (single, partial block).
    x = jax.random.normal(k_x, (B, C, H, W), jnp.float32)
    preds = jax.block_until_ready(discriminator_mlp_forward(x, kparams))
    ref = reference_forward(x, params)
    assert preds.shape == (B, 1)
    assert jnp.allclose(preds, ref, atol=1e-2, rtol=1e-2), float(jnp.max(jnp.abs(preds - ref)))

    # Secondary check: ragged multi-block path (B not a multiple of TB, 2 grid steps).
    B2 = 600
    x2 = jax.random.normal(k_x2, (B2, C, H, W), jnp.float32)
    preds2 = jax.block_until_ready(discriminator_mlp_forward(x2, kparams))
    ref2 = reference_forward(x2, params)
    assert preds2.shape == (B2, 1)
    assert jnp.allclose(preds2, ref2, atol=1e-2, rtol=1e-2), float(jnp.max(jnp.abs(preds2 - ref2)))

    print("KERNEL_OK")
</pallas_src>

<mosaic_0001>
module attributes {stable_mosaic.version = 11 : i64} {
  func.func @discriminator_mlp_kernel(%arg0: i32, %arg1: memref<256x1024xf32, #tpu.memory_space<vmem>>, %arg2: memref<1024x512xbf16, #tpu.memory_space<vmem>>, %arg3: memref<1x512xf32, #tpu.memory_space<vmem>>, %arg4: memref<512x256xbf16, #tpu.memory_space<vmem>>, %arg5: memref<1x256xf32, #tpu.memory_space<vmem>>, %arg6: memref<1x256xf32, #tpu.memory_space<vmem>>, %arg7: memref<1x1xf32, #tpu.memory_space<vmem>>, %arg8: memref<256x1xf32, #tpu.memory_space<vmem>>) attributes {dimension_semantics = [#tpu.dimension_semantics<parallel>], iteration_bounds = array<i64: 1>, scalar_prefetch = 0 : i64, scratch_operands = 0 : i64, tpu.core_type = #tpu.core_type<tc>, window_params = [{transform_indices = @transform_0, window_bounds = array<i64: 256, 1024>}, {pipeline_mode = #tpu.pipeline_mode<synchronous>, transform_indices = @transform_1, window_bounds = array<i64: 1024, 512>}, {pipeline_mode = #tpu.pipeline_mode<synchronous>, transform_indices = @transform_2, window_bounds = array<i64: 1, 512>}, {pipeline_mode = #tpu.pipeline_mode<synchronous>, transform_indices = @transform_3, window_bounds = array<i64: 512, 256>}, {pipeline_mode = #tpu.pipeline_mode<synchronous>, transform_indices = @transform_4, window_bounds = array<i64: 1, 256>}, {pipeline_mode = #tpu.pipeline_mode<synchronous>, transform_indices = @transform_5, window_bounds = array<i64: 1, 256>}, {pipeline_mode = #tpu.pipeline_mode<synchronous>, transform_indices = @transform_6, window_bounds = array<i64: 1, 1>}, {transform_indices = @transform_7, window_bounds = array<i64: 256, 1>}]} {
    %c0 = arith.constant 0 : index
    %c0_0 = arith.constant 0 : index
    %0 = vector.load %arg1[%c0, %c0_0] : memref<256x1024xf32, #tpu.memory_space<vmem>>, vector<256x1024xf32>
    %1 = arith.truncf %0 : vector<256x1024xf32> to vector<256x1024xbf16>
    %c0_1 = arith.constant 0 : index
    %c0_2 = arith.constant 0 : index
    %2 = vector.load %arg2[%c0_1, %c0_2] : memref<1024x512xbf16, #tpu.memory_space<vmem>>, vector<1024x512xbf16>
    %cst = arith.constant dense<0.000000e+00> : vector<256x512xf32>
    %3 = tpu.matmul %1, %2, %cst {dimension_numbers = #tpu.dot_dimension_numbers<[1], [0], [0], [1], [0, 0, 1, 1], [], []>} : vector<256x1024xbf16>, vector<1024x512xbf16>, vector<256x512xf32> -> vector<256x512xf32>
    %c0_3 = arith.constant 0 : index
    %c0_4 = arith.constant 0 : index
    %4 = vector.load %arg3[%c0_3, %c0_4] : memref<1x512xf32, #tpu.memory_space<vmem>>, vector<1x512xf32>
    %5 = vector.broadcast %4 : vector<1x512xf32> to vector<256x512xf32>
    %6 = arith.addf %3, %5 : vector<256x512xf32>
    %cst_5 = arith.constant 0.000000e+00 : f32
    %7 = vector.broadcast %cst_5 : f32 to vector<256x512xf32>
    %8 = arith.cmpf ogt, %6, %7 : vector<256x512xf32>
    %cst_6 = arith.constant 2.000000e-01 : f32
    %9 = vector.broadcast %cst_6 : f32 to vector<256x512xf32>
    %10 = arith.mulf %9, %6 : vector<256x512xf32>
    %11 = arith.select %8, %6, %10 : vector<256x512xi1>, vector<256x512xf32>
    %12 = arith.truncf %11 : vector<256x512xf32> to vector<256x512xbf16>
    %c0_7 = arith.constant 0 : index
    %c0_8 = arith.constant 0 : index
    %13 = vector.load %arg4[%c0_7, %c0_8] : memref<512x256xbf16, #tpu.memory_space<vmem>>, vector<512x256xbf16>
    %cst_9 = arith.constant dense<0.000000e+00> : vector<256x256xf32>
    %14 = tpu.matmul %12, %13, %cst_9 {dimension_numbers = #tpu.dot_dimension_numbers<[1], [0], [0], [1], [0, 0, 1, 1], [], []>} : vector<256x512xbf16>, vector<512x256xbf16>, vector<256x256xf32> -> vector<256x256xf32>
    %c0_10 = arith.constant 0 : index
    %c0_11 = arith.constant 0 : index
    %15 = vector.load %arg5[%c0_10, %c0_11] : memref<1x256xf32, #tpu.memory_space<vmem>>, vector<1x256xf32>
    %16 = vector.broadcast %15 : vector<1x256xf32> to vector<256x256xf32>
    %17 = arith.addf %14, %16 : vector<256x256xf32>
    %cst_12 = arith.constant 0.000000e+00 : f32
    %18 = vector.broadcast %cst_12 : f32 to vector<256x256xf32>
    %19 = arith.cmpf ogt, %17, %18 : vector<256x256xf32>
    %cst_13 = arith.constant 2.000000e-01 : f32
    %20 = vector.broadcast %cst_13 : f32 to vector<256x256xf32>
    %21 = arith.mulf %20, %17 : vector<256x256xf32>
    %22 = arith.select %19, %17, %21 : vector<256x256xi1>, vector<256x256xf32>
    %c0_14 = arith.constant 0 : index
    %c0_15 = arith.constant 0 : index
    %23 = vector.load %arg6[%c0_14, %c0_15] : memref<1x256xf32, #tpu.memory_space<vmem>>, vector<1x256xf32>
    %24 = vector.broadcast %23 : vector<1x256xf32> to vector<256x256xf32>
    %25 = arith.mulf %22, %24 : vector<256x256xf32>
    %cst_16 = arith.constant dense<0.000000e+00> : vector<256xf32>
    %26 = vector.multi_reduction <add>, %25, %cst_16 [1] : vector<256x256xf32> to vector<256xf32>
    %27 = vector.shape_cast %26 : vector<256xf32> to vector<256x1xf32>
    %c0_17 = arith.constant 0 : index
    %c0_18 = arith.constant 0 : index
    %28 = vector.load %arg7[%c0_17, %c0_18] : memref<1x1xf32, #tpu.memory_space<vmem>>, vector<1x1xf32>
    %29 = vector.broadcast %28 : vector<1x1xf32> to vector<256x1xf32>
    %30 = arith.addf %27, %29 : vector<256x1xf32>
    %c0_19 = arith.constant 0 : index
    %c0_20 = arith.constant 0 : index
    %31 = vector.load %arg8[%c0_19, %c0_20] : memref<256x1xf32, #tpu.memory_space<vmem>>, vector<256x1xf32>
    tpu.vector_store %arg8[%c0_19, %c0_20], %30 {strides = array<i32>} : memref<256x1xf32, #tpu.memory_space<vmem>>, vector<256x1xf32>,
    return
  }
  func.func @transform_0(%arg0: i32) -> (i32, i32) {
    %c0_i32 = arith.constant 0 : i32
    %c0_i32_0 = arith.constant 0 : i32
    return %arg0, %c0_i32 : i32, i32
  }
  func.func @transform_1(%arg0: i32) -> (i32, i32) {
    %c0_i32 = arith.constant 0 : i32
    %c0_i32_0 = arith.constant 0 : i32
    %c0_i32_1 = arith.constant 0 : i32
    return %c0_i32, %c0_i32_0 : i32, i32
  }
  func.func @transform_2(%arg0: i32) -> (i32, i32) {
    %c0_i32 = arith.constant 0 : i32
    %c0_i32_0 = arith.constant 0 : i32
    %c0_i32_1 = arith.constant 0 : i32
    return %c0_i32, %c0_i32_0 : i32, i32
  }
  func.func @transform_3(%arg0: i32) -> (i32, i32) {
    %c0_i32 = arith.constant 0 : i32
    %c0_i32_0 = arith.constant 0 : i32
    %c0_i32_1 = arith.constant 0 : i32
    return %c0_i32, %c0_i32_0 : i32, i32
  }
  func.func @transform_4(%arg0: i32) -> (i32, i32) {
    %c0_i32 = arith.constant 0 : i32
    %c0_i32_0 = arith.constant 0 : i32
    %c0_i32_1 = arith.constant 0 : i32
    return %c0_i32, %c0_i32_0 : i32, i32
  }
  func.func @transform_5(%arg0: i32) -> (i32, i32) {
    %c0_i32 = arith.constant 0 : i32
    %c0_i32_0 = arith.constant 0 : i32
    %c0_i32_1 = arith.constant 0 : i32
    return %c0_i32, %c0_i32_0 : i32, i32
  }
  func.func @transform_6(%arg0: i32) -> (i32, i32) {
    %c0_i32 = arith.constant 0 : i32
    %c0_i32_0 = arith.constant 0 : i32
    %c0_i32_1 = arith.constant 0 : i32
    return %c0_i32, %c0_i32_0 : i32, i32
  }
  func.func @transform_7(%arg0: i32) -> (i32, i32) {
    %c0_i32 = arith.constant 0 : i32
    %c0_i32_0 = arith.constant 0 : i32
    return %arg0, %c0_i32 : i32, i32
  }
}

</mosaic_0001>

<bundles_post_ra>
// kernel: tpu_custom_call.1
= control target key start
LH: loop header
LB: loop body
LE: loop exit
PB: predicated region body
PF: predicated region fallthrough
CT: control target
= control target key end

     0   :  { %s12466_s0 = inlined_call_operand.hbm [shape: f32[2,1024], index: 0, kind: input, shape index: {}]   ;;  %s12467_s1 = inlined_call_operand.hbm [shape: bf16[1024,512], index: 1, kind: input, shape index: {}]   ;;  %s12468_s2 = inlined_call_operand.vmem [shape: f32[1,512], index: 2, kind: input, shape index: {}]   ;;  %s12469_s3 = inlined_call_operand.hbm [shape: bf16[512,256], index: 3, kind: input, shape index: {}]   ;;  %s12470_s4 = inlined_call_operand.vmem [shape: f32[1,256], index: 4, kind: input, shape index: {}]   ;;  %s12471_s5 = inlined_call_operand.vmem [shape: f32[1,256], index: 5, kind: input, shape index: {}]   ;;  %s12472_s6 = inlined_call_operand.<no memory space> [shape: f32[1,1], index: 6, kind: input, shape index: {}]   ;;  %s12473_s7 = inlined_call_operand.vmem [shape: f32[256,1], index: 7, kind: output, shape index: {}]  }
   0x1   :  { %v12_v0 = vstv %s12472_s6 }
   0x2   :  { %13 = vst [vmem:[#allocation2] sm:$0x1] %v12_v0 }
   0x3   :  { %14 = vsyncpa [#allocation4], 0 }
   0x4   :  { %15 = vsyncpa [#allocation6], 0 }
   0x5   :  { %20 = vsyncadd [#allocation4], 32512  ;;  %s9301_s26 = smov [#allocation5]   ;;  %s9302_s28 = smov [#allocation3]  }
   0x6   :  { %s33_s27 = sshll.u32 %s9301_s26, 4  ;;  %s21_s29 = sshll.u32 %s9302_s28, 4  ;;  %s34_s27 = int_to_ptr.vmem [resolvable:$true] %s33_s27  ;;  %s22_s29 = int_to_ptr.vmem [resolvable:$true] %s21_s29 }
   0x7   :  { %s9245_s30 = scalar_lea.vmem %s34_s27, 32768  ;;  %p9250_p1 = scmp.lt.s32.totalorder %s34_s27, %s34_s27 }
   0x8   :  { %p9246_p0 = scmp.ne.s32.totalorder %s34_s27, %s9245_s30  ;;  %p9251_p2 = scmp.lt.s32.totalorder %s9245_s30, %s9245_s30 }
   0xa   :  { %p9252_p3 = por %p9251_p2, %p9250_p1 }
   0xc   :  { %p9253_p4 = pnand %p9252_p3, %p9246_p0 }
   0xe   :  { %9256 = shalt.err (!%p9253_p4)
}
   0xf   :  { %s9303_s8 = smov 256   ;;  %s9304_s9 = smov 16  }
  0x10   :  { %39 = dma.hbm_to_vmem [thread:$0]  %s12467_s1, 32768, %s34_s27, [#allocation6], %s9303_s8, %s9303_s8, %s9304_s9  }
  0x11   :  { %s9265_s11 = scalar_lea.vmem %s22_s29, 256  ;;  %s9269_s12 = scalar_lea.vmem %s22_s29, 32768 }
  0x12   :  { %p9266_p5 = scmp.ne.s32.totalorder %s22_s29, %s9265_s11  ;;  %p9270_p6 = scmp.lt.s32.totalorder %s22_s29, %s22_s29 }
  0x13   :  { %p9271_p7 = scmp.lt.s32.totalorder %s9269_s12, %s9265_s11 }
  0x15   :  { %p9272_p8 = por %p9271_p7, %p9270_p6 }
  0x17   :  { %p9273_p9 = pnand %p9272_p8, %p9266_p5 }
  0x19   :  { %9276 = shalt.err (!%p9273_p9)
}
  0x1a   :  { %27 = dma.hbm_to_vmem [thread:$0]  %s12466_s0, 256, %s22_s29, [#allocation4], %s9303_s8, %s9303_s8, %s9304_s9  }
  0x1b   :  { %s9305_s15 = smov [#allocation7]  }
  0x1c   :  { %s47_s16 = sshll.u32 %s9305_s15, 4  ;;  %s48_s16 = int_to_ptr.vmem [resolvable:$true] %s47_s16 }
  0x1d   :  { %s9285_s17 = scalar_lea.vmem %s48_s16, 8192  ;;  %p9290_p11 = scmp.lt.s32.totalorder %s48_s16, %s48_s16 }
  0x1e   :  { %p9286_p10 = scmp.ne.s32.totalorder %s48_s16, %s9285_s17  ;;  %p9291_p12 = scmp.lt.s32.totalorder %s9285_s17, %s9285_s17 }
  0x20   :  { %p9292_p13 = por %p9291_p12, %p9290_p11 }
  0x22   :  { %p9293_p0 = pnand %p9292_p13, %p9286_p10 }
  0x24   :  { %9296 = shalt.err (!%p9293_p0)
}
  0x25   :  { %s9306_s1 = smov 128   ;;  %s9307_s18 = smov 8  }
  0x26   :  { %53 = dma.hbm_to_vmem [thread:$0]  %s12469_s3, 8192, %s48_s16, [#allocation6], %s9306_s1, %s9306_s1, %s9307_s18  }
  0x27   :  { %9297 = dma.done.wait [#allocation4], 32768  }
  0x28   :  { %9298 = vsyncadd [#allocation4], 4294934528 }
  0x29   :  { %9299 = dma.done.wait [#allocation6], 40960  }
  0x2a   :  { %9300 = vsyncadd [#allocation6], 4294926336  ;;  %v8372_v1 = vld [vmem:[#allocation5 + $0xe4] ss:$16 sps:$4 sm:$0xff]   ;;  %v8376_v3 = vld [vmem:[#allocation5 + $0xe0] ss:$16 sps:$4 sm:$0xff]   ;;  %v588_v42 = vlaneseq }
  0x2b   :  { %v8374_v2 = vld [vmem:[#allocation5 + $0x2e4] ss:$16 sps:$4 sm:$0xff]   ;;  %4827 = vmatprep.subr.bf16.mxu0 %v8372_v1  ;;  %v8377_v4 = vld [vmem:[#allocation5 + $0x2e0] ss:$16 sps:$4 sm:$0xff]   ;;  %v9308_v40 = vmov 1983009808  }
  0x2c   :  { %5020 = vmatprep.subr.bf16.mxu1 %v8374_v2  ;;  %v8378_v5 = vld [vmem:[#allocation5 + $0xc4] ss:$16 sps:$4 sm:$0xff]   ;;  %4828 = vmatpush1.bf16.msra.mxu0 %v8376_v3  ;;  %v8382_v7 = vld [vmem:[#allocation5 + $0xc0] ss:$16 sps:$4 sm:$0xff]   ;;  %v586_v41 = vunpack.c.l.s4 %v9308_v40  ;;  %v9361_v49 = vshrl.u32 %v588_v42, 7 }
  0x2d   :  { %5021 = vmatpush1.bf16.msra.mxu1 %v8377_v4  ;;  %v8380_v6 = vld [vmem:[#allocation5 + $0x2c4] ss:$16 sps:$4 sm:$0xff]   ;;  %4829 = vmatprep.subr.bf16.mxu0 %v8378_v5  ;;  %v8383_v8 = vld [vmem:[#allocation5 + $0x2c0] ss:$16 sps:$4 sm:$0xff]  }
  0x2e   :  { %5022 = vmatprep.subr.bf16.mxu1 %v8380_v6  ;;  %v8384_v9 = vld [vmem:[#allocation5 + $0xa4] ss:$16 sps:$4 sm:$0xff]   ;;  %v8388_v11 = vld [vmem:[#allocation5 + $0xa0] ss:$16 sps:$4 sm:$0xff]   ;;  %v587_v48 = vunpack.c.0.s8 %v586_v41  ;;  %12613 = vst [vmem:[#allocation10_spill] sm:$0xff] %v9361_v49 }
  0x2f   :  { %v8386_v10 = vld [vmem:[#allocation5 + $0x2a4] ss:$16 sps:$4 sm:$0xff]   ;;  %v8389_v12 = vld [vmem:[#allocation5 + $0x2a0] ss:$16 sps:$4 sm:$0xff]  }
  0x30   :  { %4830 = vmatpush1.bf16.msra.mxu0 %v8382_v7  ;;  %v8390_v13 = vld [vmem:[#allocation5 + $0x84] ss:$16 sps:$4 sm:$0xff]   ;;  %v8394_v15 = vld [vmem:[#allocation5 + $0x80] ss:$16 sps:$4 sm:$0xff]   ;;  %v9364_v56 = vsub.s32 %v587_v48, %v9361_v49 }
  0x31   :  { %5023 = vmatpush1.bf16.msra.mxu1 %v8383_v8  ;;  %4831 = vmatprep.subr.bf16.mxu0 %v8384_v9  ;;  %v8392_v14 = vld [vmem:[#allocation5 + $0x284] ss:$16 sps:$4 sm:$0xff]   ;;  %v8395_v16 = vld [vmem:[#allocation5 + $0x280] ss:$16 sps:$4 sm:$0xff]  }
  0x32   :  { %5024 = vmatprep.subr.bf16.mxu1 %v8386_v10  ;;  %v8396_v17 = vld [vmem:[#allocation5 + $0x64] ss:$16 sps:$4 sm:$0xff]   ;;  %v8400_v19 = vld [vmem:[#allocation5 + $0x60] ss:$16 sps:$4 sm:$0xff]  }
  0x33   :  { %v8398_v18 = vld [vmem:[#allocation5 + $0x264] ss:$16 sps:$4 sm:$0xff]   ;;  %v8401_v20 = vld [vmem:[#allocation5 + $0x260] ss:$16 sps:$4 sm:$0xff]  }
  0x34   :  { %4832 = vmatpush1.bf16.msra.mxu0 %v8388_v11  ;;  %v8402_v21 = vld [vmem:[#allocation5 + $0x44] ss:$16 sps:$4 sm:$0xff]   ;;  %v8406_v23 = vld [vmem:[#allocation5 + $0x40] ss:$16 sps:$4 sm:$0xff]  }
  0x35   :  { %5025 = vmatpush1.bf16.msra.mxu1 %v8389_v12  ;;  %4833 = vmatprep.subr.bf16.mxu0 %v8390_v13  ;;  %v8404_v22 = vld [vmem:[#allocation5 + $0x244] ss:$16 sps:$4 sm:$0xff]   ;;  %v8407_v24 = vld [vmem:[#allocation5 + $0x240] ss:$16 sps:$4 sm:$0xff]  }
  0x36   :  { %5026 = vmatprep.subr.bf16.mxu1 %v8392_v14  ;;  %v8408_v25 = vld [vmem:[#allocation5 + $0x24] ss:$16 sps:$4 sm:$0xff]   ;;  %v8412_v27 = vld [vmem:[#allocation5 + $0x20] ss:$16 sps:$4 sm:$0xff]  }
  0x37   :  { %v8410_v26 = vld [vmem:[#allocation5 + $0x224] ss:$16 sps:$4 sm:$0xff]   ;;  %v8413_v28 = vld [vmem:[#allocation5 + $0x220] ss:$16 sps:$4 sm:$0xff]  }
  0x38   :  { %4834 = vmatpush1.bf16.msra.mxu0 %v8394_v15  ;;  %v8414_v29 = vld [vmem:[#allocation5 + $0x4] ss:$16 sps:$4 sm:$0xff]   ;;  %v8418_v31 = vld [vmem:[#allocation5] ss:$16 sps:$4 sm:$0xff]  }
  0x39   :  { %5027 = vmatpush1.bf16.msra.mxu1 %v8395_v16  ;;  %4835 = vmatprep.subr.bf16.mxu0 %v8396_v17  ;;  %v8416_v30 = vld [vmem:[#allocation5 + $0x204] ss:$16 sps:$4 sm:$0xff]   ;;  %v8419_v32 = vld [vmem:[#allocation5 + $0x200] ss:$16 sps:$4 sm:$0xff]  }
  0x3a   :  { %5028 = vmatprep.subr.bf16.mxu1 %v8398_v18  ;;  %v8420_v33 = vld [vmem:[#allocation5 + $0x1e4] ss:$16 sps:$4 sm:$0xff]   ;;  %v8424_v35 = vld [vmem:[#allocation5 + $0x1e0] ss:$16 sps:$4 sm:$0xff]  }
  0x3b   :  { %v8422_v34 = vld [vmem:[#allocation5 + $0x3e4] ss:$16 sps:$4 sm:$0xff]   ;;  %v8425_v36 = vld [vmem:[#allocation5 + $0x3e0] ss:$16 sps:$4 sm:$0xff]  }
  0x3c   :  { %4836 = vmatpush1.bf16.msra.mxu0 %v8400_v19  ;;  %v8426_v37 = vld [vmem:[#allocation5 + $0x1c4] ss:$16 sps:$4 sm:$0xff]   ;;  %v8430_v39 = vld [vmem:[#allocation5 + $0x1c0] ss:$16 sps:$4 sm:$0xff]  }
  0x3d   :  { %5029 = vmatpush1.bf16.msra.mxu1 %v8401_v20  ;;  %4837 = vmatprep.subr.bf16.mxu0 %v8402_v21  ;;  %v8428_v38 = vld [vmem:[#allocation5 + $0x3c4] ss:$16 sps:$4 sm:$0xff]   ;;  %v8431_v43 = vld [vmem:[#allocation5 + $0x3c0] ss:$16 sps:$4 sm:$0xff]  }
  0x3e   :  { %5030 = vmatprep.subr.bf16.mxu1 %v8404_v22  ;;  %v8432_v44 = vld [vmem:[#allocation5 + $0x1a4] ss:$16 sps:$4 sm:$0xff]   ;;  %v8436_v46 = vld [vmem:[#allocation5 + $0x1a0] ss:$16 sps:$4 sm:$0xff]  }
  0x3f   :  { %v8434_v45 = vld [vmem:[#allocation5 + $0x3a4] ss:$16 sps:$4 sm:$0xff]   ;;  %v8437_v47 = vld [vmem:[#allocation5 + $0x3a0] ss:$16 sps:$4 sm:$0xff]  }
  0x40   :  { %4838 = vmatpush1.bf16.msra.mxu0 %v8406_v23  ;;  %v8438_v50 = vld [vmem:[#allocation5 + $0x184] ss:$16 sps:$4 sm:$0xff]   ;;  %v8442_v52 = vld [vmem:[#allocation5 + $0x180] ss:$16 sps:$4 sm:$0xff]  }
  0x41   :  { %5031 = vmatpush1.bf16.msra.mxu1 %v8407_v24  ;;  %4839 = vmatprep.subr.bf16.mxu0 %v8408_v25  ;;  %v8440_v51 = vld [vmem:[#allocation5 + $0x384] ss:$16 sps:$4 sm:$0xff]   ;;  %v8443_v53 = vld [vmem:[#allocation5 + $0x380] ss:$16 sps:$4 sm:$0xff]  }
  0x42   :  { %5032 = vmatprep.subr.bf16.mxu1 %v8410_v26  ;;  %v8444_v54 = vld [vmem:[#allocation5 + $0x164] ss:$16 sps:$4 sm:$0xff]   ;;  %v8468_v57 = vld [vmem:[#allocation3] ss:$16 sps:$4 sm:$0xff]  }
  0x43   :  { %v8446_v55 = vld [vmem:[#allocation5 + $0x364] ss:$16 sps:$4 sm:$0xff]   ;;  %v8470_v58 = vld [vmem:[#allocation3 + $0x20] ss:$16 sps:$4 sm:$0xff]   ;;  %v9367_v0 = vrot.slane %v8468_v57, %v9364_v56 }
  0x44   :  { %4840 = vmatpush1.bf16.msra.mxu0 %v8412_v27  ;;  %v8448_v59 = vld [vmem:[#allocation5 + $0x160] ss:$16 sps:$4 sm:$0xff]   ;;  %v8476_v63 = vld [vmem:[#allocation3 + $0x4] ss:$16 sps:$4 sm:$0xff]   ;;  %v9370_v1 = vrot.slane %v8470_v58, %v9364_v56 }
  0x45   :  { %5033 = vmatpush1.bf16.msra.mxu1 %v8413_v28  ;;  %4841 = vmatprep.subr.bf16.mxu0 %v8414_v29  ;;  %v8449_v60 = vld [vmem:[#allocation5 + $0x360] ss:$16 sps:$4 sm:$0xff]   ;;  %v8477_v2 = vld [vmem:[#allocation3 + $0x24] ss:$16 sps:$4 sm:$0xff]   ;;  %v9379_v8 = vrot.slane %v8476_v63, %v9364_v56 }
  0x46   :  { %5034 = vmatprep.subr.bf16.mxu1 %v8416_v30  ;;  %v8472_v61 = vld [vmem:[#allocation3 + $0x40] ss:$16 sps:$4 sm:$0xff]   ;;  %v8478_v3 = vld [vmem:[#allocation3 + $0x44] ss:$16 sps:$4 sm:$0xff]   ;;  %v614_v10 = vcombine.high %v9367_v0, %v9370_v1  ;;  %v612_v11 = vrot.slane %v8477_v2, %v9364_v56 }
  0x47   :  { %v8474_v62 = vld [vmem:[#allocation3 + $0x60] ss:$16 sps:$4 sm:$0xff]   ;;  %v8479_v4 = vld [vmem:[#allocation3 + $0x64] ss:$16 sps:$4 sm:$0xff]   ;;  %v9373_v6 = vrot.slane %v8472_v61, %v9364_v56  ;;  %v670_v12 = vrot.slane %v8478_v3, %v9364_v56 }
  0x48   :  { %4842 = vmatpush1.bf16.msra.mxu0 %v8418_v31  ;;  %v8450_v5 = vld [vmem:[#allocation5 + $0x144] ss:$16 sps:$4 sm:$0xff]   ;;  %v9376_v7 = vrot.slane %v8474_v62, %v9364_v56  ;;  %v8454_v13 = vld [vmem:[#allocation5 + $0x140] ss:$16 sps:$4 sm:$0xff]   ;;  %v684_v16 = vrot.slane %v8479_v4, %v9364_v56  ;;  %v616_v19 = vcombine.high %v9379_v8, %v612_v11 }
  0x49   :  { %5035 = vmatpush1.bf16.msra.mxu1 %v8419_v32  ;;  %4843 = vmatprep.subr.bf16.mxu0 %v8420_v33  ;;  %v8452_v9 = vld [vmem:[#allocation5 + $0x344] ss:$16 sps:$4 sm:$0xff]   ;;  %v8455_v14 = vld [vmem:[#allocation5 + $0x340] ss:$16 sps:$4 sm:$0xff]  }
  0x4a   :  { %5036 = vmatprep.subr.bf16.mxu1 %v8422_v34  ;;  %v686_v15 = vcombine.high %v9373_v6, %v9376_v7  ;;  %v8456_v17 = vld [vmem:[#allocation5 + $0x124] ss:$16 sps:$4 sm:$0xff]   ;;  %v688_v21 = vcombine.high %v670_v12, %v684_v16  ;;  %v8486_v22 = vld [vmem:[#allocation3 + $0x80] ss:$16 sps:$4 sm:$0xff]  }
  0x4b   :  { %v8458_v18 = vld [vmem:[#allocation5 + $0x324] ss:$16 sps:$4 sm:$0xff]   ;;  %v8488_v23 = vld [vmem:[#allocation3 + $0xa0] ss:$16 sps:$4 sm:$0xff]   ;;  %v9395_v30 = vrot.slane %v8486_v22, %v9364_v56 }
  0x4c   :  { %4844 = vmatpush2.bf16.msra.mxu0 %v8424_v35  ;;  %v9389_v20 = vpack.c.bf16 %v686_v15, %v614_v10  ;;  %v8460_v24 = vld [vmem:[#allocation5 + $0x120] ss:$16 sps:$4 sm:$0xff]   ;;  %v9392_v26 = vpack.c.bf16 %v688_v21, %v616_v19  ;;  %v8494_v29 = vld [vmem:[#allocation3 + $0x84] ss:$16 sps:$4 sm:$0xff]   ;;  %v9398_v31 = vrot.slane %v8488_v23, %v9364_v56 }
  0x4d   :  { %5037 = vmatpush2.bf16.msra.mxu1 %v8425_v36  ;;  %4845 = vmatprep.subr.bf16.mxu0 %v8426_v37  ;;  %v8461_v25 = vld [vmem:[#allocation5 + $0x320] ss:$16 sps:$4 sm:$0xff]   ;;  %v8495_v32 = vld [vmem:[#allocation3 + $0xa4] ss:$16 sps:$4 sm:$0xff]   ;;  %v613_v36 = vcombine.low %v9367_v0, %v9370_v1  ;;  %v9409_v40 = vrot.slane %v8494_v29, %v9364_v56 }
  0x4e   :  { %5038 = vmatprep.subr.bf16.mxu1 %v8428_v38  ;;  %4859 = vmatprep.mubr.bf16.mxu0 %v9389_v20  ;;  %v8490_v27 = vld [vmem:[#allocation3 + $0xc0] ss:$16 sps:$4 sm:$0xff]   ;;  %v8496_v33 = vld [vmem:[#allocation3 + $0xc4] ss:$16 sps:$4 sm:$0xff]   ;;  %v9412_v41 = vrot.slane %v8495_v32, %v9364_v56  ;;  %v757_v2 = vcombine.low %v9395_v30, %v9398_v31 }
  0x4f   :  { %v8492_v28 = vld [vmem:[#allocation3 + $0xe0] ss:$16 sps:$4 sm:$0xff]   ;;  %v8497_v34 = vld [vmem:[#allocation3 + $0xe4] ss:$16 sps:$4 sm:$0xff]   ;;  %v9403_v37 = vrot.slane %v8490_v27, %v9364_v56  ;;  %v9415_v42 = vrot.slane %v8496_v33, %v9364_v56  ;;  %5052 = vmatprep.mubr.bf16.mxu1 %v9392_v26 }
  0x50   :  { %4846 = vmatpush2.bf16.msra.mxu0 %v8430_v39  ;;  %v8462_v35 = vld [vmem:[#allocation5 + $0x104] ss:$16 sps:$4 sm:$0xff]   ;;  %v9406_v38 = vrot.slane %v8492_v28, %v9364_v56  ;;  %v828_v48 = vrot.slane %v8497_v34, %v9364_v56  ;;  %v8504_v57 = vld [vmem:[#allocation3 + $0x100] ss:$16 sps:$4 sm:$0xff]  }
  0x51   :  { %5039 = vmatpush2.bf16.msra.mxu1 %v8431_v43  ;;  %4847 = vmatprep.subr.bf16.mxu0 %v8432_v44  ;;  %v8464_v39 = vld [vmem:[#allocation5 + $0x304] ss:$16 sps:$4 sm:$0xff]   ;;  %v8466_v43 = vld [vmem:[#allocation5 + $0x100] ss:$16 sps:$4 sm:$0xff]   ;;  %v9438_v3 = vrot.slane %v8504_v57, %v9364_v56 }
  0x52   :  { %5040 = vmatprep.subr.bf16.mxu1 %v8434_v45  ;;  %v8467_v44 = vld [vmem:[#allocation5 + $0x300] ss:$16 sps:$4 sm:$0xff]   ;;  %v685_v45 = vcombine.low %v9373_v6, %v9376_v7  ;;  %v8512_v0 = vld [vmem:[#allocation3 + $0x104] ss:$16 sps:$4 sm:$0xff]  }
  0x53   :  { %v8506_v58 = vld [vmem:[#allocation3 + $0x120] ss:$16 sps:$4 sm:$0xff]   ;;  %v8514_v6 = vld [vmem:[#allocation3 + $0x144] ss:$16 sps:$4 sm:$0xff]  }
  0x54   :  { %4848 = vmatpush2.bf16.msra.mxu0 %v8436_v46  ;;  %v615_v46 = vcombine.low %v9379_v8, %v612_v11  ;;  %v8480_v61 = vld [vmem:[#allocation5 + $0x4e0] ss:$16 sps:$4 sm:$0xff]   ;;  %v9441_v4 = vrot.slane %v8506_v58, %v9364_v56  ;;  %v8515_v7 = vld [vmem:[#allocation3 + $0x164] ss:$16 sps:$4 sm:$0xff]   ;;  %v9450_v11 = vrot.slane %v8512_v0, %v9364_v56  ;;  %v9458_v15 = vrot.slane %v8514_v6, %v9364_v56 }
  0x55   :  { %5041 = vmatpush2.bf16.msra.mxu1 %v8437_v47  ;;  %4849 = vmatprep.subr.bf16.mxu0 %v8438_v50  ;;  %v687_v47 = vcombine.low %v670_v12, %v684_v16  ;;  %v8482_v50 = vld [vmem:[#allocation5 + $0x4e4] ss:$16 sps:$4 sm:$0xff]   ;;  %v8508_v62 = vld [vmem:[#allocation3 + $0x140] ss:$16 sps:$4 sm:$0xff]   ;;  %v829_v16 = vcombine.low %v9403_v37, %v9406_v38  ;;  %v9466_v23 = vrot.slane %v8515_v7, %v9364_v56 }
  0x56   :  { %5042 = vmatprep.subr.bf16.mxu1 %v8440_v51  ;;  %v8485_v51 = vld [vmem:[#allocation5 + $0x6e4] ss:$16 sps:$4 sm:$0xff]   ;;  %v8510_v63 = vld [vmem:[#allocation3 + $0x160] ss:$16 sps:$4 sm:$0xff]  }
  0x57   :  { %v8483_v8 = vld [vmem:[#allocation5 + $0x6e0] ss:$16 sps:$4 sm:$0xff]   ;;  %v9447_v10 = vrot.slane %v8510_v63, %v9364_v56  ;;  %v8503_v22 = vld [vmem:[#allocation5 + $0x6c4] ss:$16 sps:$4 sm:$0xff]   ;;  %v9480_v33 = vpack.c.bf16 %v829_v16, %v757_v2 }
  0x58   :  { %4850 = vmatpush2.bf16.msra.mxu0 %v8442_v52  ;;  %v758_v52 = vcombine.high %v9395_v30, %v9398_v31  ;;  %v8498_v19 = vld [vmem:[#allocation5 + $0x4c0] ss:$16 sps:$4 sm:$0xff]   ;;  %v8518_v28 = vld [vmem:[#allocation5 + $0x4a4] ss:$16 sps:$4 sm:$0xff]   ;;  %v976_v30 = vcombine.high %v9458_v15, %v9466_v23 }
  0x59   :  { %5043 = vmatpush2.bf16.msra.mxu1 %v8443_v53  ;;  %4851 = vmatprep.subr.bf16.mxu0 %v8444_v54  ;;  %v830_v53 = vcombine.high %v9403_v37, %v9406_v38  ;;  %v760_v54 = vcombine.high %v9409_v40, %v9412_v41  ;;  %v8501_v21 = vld [vmem:[#allocation5 + $0x6c0] ss:$16 sps:$4 sm:$0xff]   ;;  %v8521_v29 = vld [vmem:[#allocation5 + $0x6a4] ss:$16 sps:$4 sm:$0xff]  }
  0x5a   :  { %5044 = vmatprep.subr.bf16.mxu1 %v8446_v55  ;;  %v832_v55 = vcombine.high %v9415_v42, %v828_v48  ;;  %v8522_v31 = vld [vmem:[#allocation3 + $0x180] ss:$16 sps:$4 sm:$0xff]   ;;  %v8530_v37 = vld [vmem:[#allocation3 + $0x184] ss:$16 sps:$4 sm:$0xff]  }
  0x5b   :  { %v9433_v1 = vpack.c.bf16 %v830_v53, %v758_v52  ;;  %v8524_v32 = vld [vmem:[#allocation3 + $0x1a0] ss:$16 sps:$4 sm:$0xff]   ;;  %v901_v53 = vcombine.low %v9438_v3, %v9441_v4  ;;  %v8536_v58 = vld [vmem:[#allocation5 + $0x484] ss:$16 sps:$4 sm:$0xff]  }
  0x5c   :  { %4852 = vmatpush2.bf16.msra.mxu0 %v8448_v59  ;;  %v9429_v59 = vpack.c.bf16 %v685_v45, %v613_v36  ;;  %v9452_v12 = vpack.c.bf16 %v832_v55, %v760_v54  ;;  %v8528_v36 = vld [vmem:[#allocation3 + $0x1e0] ss:$16 sps:$4 sm:$0xff]  }
  0x5d   :  { %5045 = vmatpush2.bf16.msra.mxu1 %v8449_v60  ;;  %4853 = vmatprep.subr.bf16.mxu0 %v8450_v5  ;;  %v9431_v60 = vpack.c.bf16 %v687_v47, %v615_v46  ;;  %v8513_v5 = vld [vmem:[#allocation3 + $0x124] ss:$16 sps:$4 sm:$0xff]   ;;  %v8516_v45 = vld [vmem:[#allocation5 + $0x4a0] ss:$16 sps:$4 sm:$0xff]   ;;  %v9498_v47 = vrot.slane %v8528_v36, %v9364_v56 }
  0x5e   :  { %5046 = vmatprep.subr.bf16.mxu1 %v8452_v9  ;;  %v9444_v9 = vrot.slane %v8508_v62, %v9364_v56  ;;  %v975_v62 = vcombine.low %v9458_v15, %v9466_v23  ;;  %v8534_v2 = vld [vmem:[#allocation5 + $0x480] ss:$16 sps:$4 sm:$0xff]  }
  0x5f   :  { %v8540_v6 = vld [vmem:[#allocation3 + $0x200] ss:$16 sps:$4 sm:$0xff]  }
  0x60   :  { %4854 = vmatpush2.bf16.msra.mxu0 %v8454_v13  ;;  %v8500_v13 = vld [vmem:[#allocation5 + $0x4c4] ss:$16 sps:$4 sm:$0xff]   ;;  %v973_v54 = vcombine.low %v9444_v9, %v9447_v10  ;;  %v8542_v7 = vld [vmem:[#allocation3 + $0x220] ss:$16 sps:$4 sm:$0xff]   ;;  %v9539_v15 = vrot.slane %v8540_v6, %v9364_v56 }
  0x61   :  { %5047 = vmatpush2.bf16.msra.mxu1 %v8455_v14  ;;  %4855 = vmatprep.subr.bf16.mxu0 %v8456_v17  ;;  %v9455_v14 = vrot.slane %v8513_v5, %v9364_v56  ;;  %v759_v17 = vcombine.low %v9409_v40, %v9412_v41  ;;  %v9489_v40 = vrot.slane %v8522_v31, %v9364_v56  ;;  %v8555_v36 = vld [vmem:[#allocation5 + $0x660] ss:$16 sps:$4 sm:$0xff]  }
  0x62   :  { %5048 = vmatprep.subr.bf16.mxu1 %v8458_v18  ;;  %v831_v18 = vcombine.low %v9415_v42, %v828_v48  ;;  %v9492_v41 = vrot.slane %v8524_v32, %v9364_v56  ;;  %v8531_v42 = vld [vmem:[#allocation3 + $0x1a4] ss:$16 sps:$4 sm:$0xff]   ;;  %v9501_v48 = vrot.slane %v8530_v37, %v9364_v56  ;;  %v9542_v16 = vrot.slane %v8542_v7, %v9364_v56 }
  0x63   :  { %v904_v27 = vcombine.high %v9450_v11, %v9455_v14  ;;  %v903_v55 = vcombine.low %v9450_v11, %v9455_v14  ;;  %v8548_v11 = vld [vmem:[#allocation3 + $0x204] ss:$16 sps:$4 sm:$0xff]  }
  0x64   :  { %4856 = vmatpush2.bf16.msra.mxu0 %v8460_v24  ;;  %v902_v24 = vcombine.high %v9438_v3, %v9441_v4  ;;  %v9482_v34 = vpack.c.bf16 %v831_v18, %v759_v17  ;;  %v1046_v63 = vcombine.high %v9489_v40, %v9492_v41  ;;  %v8537_v3 = vld [vmem:[#allocation5 + $0x680] ss:$16 sps:$4 sm:$0xff]   ;;  %v8549_v17 = vld [vmem:[#allocation3 + $0x224] ss:$16 sps:$4 sm:$0xff]  }
  0x65   :  { %5049 = vmatpush2.bf16.msra.mxu1 %v8461_v25  ;;  %4857 = vmatprep.subr.bf16.mxu0 %v8462_v35  ;;  %v974_v25 = vcombine.high %v9444_v9, %v9447_v10  ;;  %v8526_v35 = vld [vmem:[#allocation3 + $0x1c0] ss:$16 sps:$4 sm:$0xff]   ;;  %v8550_v18 = vld [vmem:[#allocation3 + $0x244] ss:$16 sps:$4 sm:$0xff]  }
  0x66   :  { %5050 = vmatprep.subr.bf16.mxu1 %v8464_v39  ;;  %v9486_v39 = vpack.c.bf16 %v976_v30, %v904_v27  ;;  %v9495_v46 = vrot.slane %v8526_v35, %v9364_v56  ;;  %v8544_v9 = vld [vmem:[#allocation3 + $0x240] ss:$16 sps:$4 sm:$0xff]   ;;  %v9556_v27 = vrot.slane %v8549_v17, %v9364_v56  ;;  %v1045_v30 = vcombine.low %v9489_v40, %v9492_v41  ;;  %v8557_v37 = vld [vmem:[#allocation5 + $0x664] ss:$16 sps:$4 sm:$0xff]  }
  0x67   :  { %v9484_v38 = vpack.c.bf16 %v974_v25, %v902_v24  ;;  %v8546_v10 = vld [vmem:[#allocation3 + $0x260] ss:$16 sps:$4 sm:$0xff]   ;;  %v9553_v24 = vrot.slane %v8548_v11, %v9364_v56  ;;  %v1190_v40 = vcombine.high %v9539_v15, %v9542_v16  ;;  %v8572_v7 = vld [vmem:[#allocation5 + $0x444] ss:$16 sps:$4 sm:$0xff]  }
  0x68   :  { %4858 = vmatpush2.bf16.msra.mxu0 %v8466_v43  ;;  %v8532_v43 = vld [vmem:[#allocation3 + $0x1c4] ss:$16 sps:$4 sm:$0xff]   ;;  %v1118_v0 = vcombine.high %v9495_v46, %v9498_v47  ;;  %v9550_v23 = vrot.slane %v8546_v10, %v9364_v56  ;;  %v8552_v25 = vld [vmem:[#allocation5 + $0x460] ss:$16 sps:$4 sm:$0xff]   ;;  %v1117_v31 = vcombine.low %v9495_v46, %v9498_v47 }
  0x69   :  { %5051 = vmatpush2.bf16.msra.mxu1 %v8467_v44  ;;  %5213 = vmatprep.subr.bf16.mxu0 %v8482_v50  ;;  %v8533_v44 = vld [vmem:[#allocation3 + $0x1e4] ss:$16 sps:$4 sm:$0xff]   ;;  %v8519_v50 = vld [vmem:[#allocation5 + $0x6a0] ss:$16 sps:$4 sm:$0xff]   ;;  %v9507_v52 = vrot.slane %v8532_v43, %v9364_v56  ;;  %v1192_v43 = vcombine.high %v9553_v24, %v9556_v27  ;;  %v1191_v11 = vcombine.low %v9553_v24, %v9556_v27 }
  0x6a   :  { %5406 = vmatprep.subr.bf16.mxu1 %v8485_v51  ;;  %v9504_v51 = vrot.slane %v8531_v42, %v9364_v56  ;;  %v9516_v57 = vrot.slane %v8533_v44, %v9364_v56  ;;  %v9536_v14 = vpack.c.bf16 %v1118_v0, %v1046_v63  ;;  %v8560_v46 = vld [vmem:[#allocation3 + $0x2a0] ss:$16 sps:$4 sm:$0xff]   ;;  %v9584_v47 = vpack.c.bf16 %v1117_v31, %v1045_v30  ;;  %v8584_v30 = vld [vmem:[#allocation3 + $0x304] ss:$16 sps:$4 sm:$0xff]  }
  0x6b   :  { %4860 = vmatmul.mubr.bf16.vlgmr.msra.gmra.mxu0 %v9429_v59  ;;  %v8573_v17 = vld [vmem:[#allocation5 + $0x640] ss:$16 sps:$4 sm:$0xff]  }
  0x6c   :  { %5053 = vmatmul.mubr.bf16.vlgmr.msra.gmra.mxu1 %v9431_v60  ;;  %5214 = vmatpush1.bf16.msra.mxu0 %v8480_v61  ;;  %v8539_v61 = vld [vmem:[#allocation5 + $0x684] ss:$16 sps:$4 sm:$0xff]   ;;  %v1048_v4 = vcombine.high %v9501_v48, %v9504_v51  ;;  %v1120_v5 = vcombine.high %v9507_v52, %v9516_v57  ;;  %v1047_v32 = vcombine.low %v9501_v48, %v9504_v51  ;;  %v8562_v48 = vld [vmem:[#allocation3 + $0x2c0] ss:$16 sps:$4 sm:$0xff]  }
  0x6d   :  { %5407 = vmatpush1.bf16.msra.mxu1 %v8483_v8  ;;  %4869 = vmatprep.mubr.bf16.mxu0 %v9433_v1  ;;  %v9532_v8 = vpack.c.bf16 %v973_v54, %v901_v53  ;;  %v1119_v42 = vcombine.low %v9507_v52, %v9516_v57  ;;  %v8566_v51 = vld [vmem:[#allocation3 + $0x284] ss:$16 sps:$4 sm:$0xff]   ;;  %v9599_v63 = vrot.slane %v8562_v48, %v9364_v56  ;;  %v8578_v24 = vld [vmem:[#allocation3 + $0x320] ss:$16 sps:$4 sm:$0xff]  }
  0x6e   :  { %5062 = vmatprep.mubr.bf16.mxu1 %v9452_v12  ;;  %5215 = vmatprep.subr.bf16.mxu0 %v8500_v13  ;;  %v9534_v13 = vpack.c.bf16 %v975_v62, %v903_v55  ;;  %v9594_v55 = vrot.slane %v8560_v46, %v9364_v56  ;;  %v8567_v57 = vld [vmem:[#allocation3 + $0x2a4] ss:$16 sps:$4 sm:$0xff]   ;;  %v8588_v46 = vld [vmem:[#allocation5 + $0x420] ss:$16 sps:$4 sm:$0xff]  }
  0x6f   :  { %5408 = vmatprep.subr.bf16.mxu1 %v8503_v22  ;;  %v9547_v22 = vrot.slane %v8544_v9, %v9364_v56  ;;  %v9586_v52 = vpack.c.bf16 %v1119_v42, %v1047_v32  ;;  %v1189_v9 = vcombine.low %v9539_v15, %v9542_v16  ;;  %v8586_v42 = vld [vmem:[#allocation3 + $0x344] ss:$16 sps:$4 sm:$0xff]  }
  0x70   :  { %5216 = vmatpush1.bf16.msra.mxu0 %v8498_v19  ;;  %v8551_v19 = vld [vmem:[#allocation3 + $0x264] ss:$16 sps:$4 sm:$0xff]  }
  0x71   :  { %5409 = vmatpush1.bf16.msra.mxu1 %v8501_v21  ;;  %5217 = vmatprep.subr.bf16.mxu0 %v8518_v28  ;;  %v9544_v21 = vpack.c.bf16 %v1120_v5, %v1048_v4  ;;  %v9559_v28 = vrot.slane %v8550_v18, %v9364_v56  ;;  %v9568_v35 = vrot.slane %v8551_v19, %v9364_v56  ;;  %v8575_v18 = vld [vmem:[#allocation5 + $0x644] ss:$16 sps:$4 sm:$0xff]  }
  0x72   :  { %5410 = vmatprep.subr.bf16.mxu1 %v8521_v29  ;;  %v8554_v29 = vld [vmem:[#allocation5 + $0x464] ss:$16 sps:$4 sm:$0xff]   ;;  %v1262_v41 = vcombine.high %v9547_v22, %v9550_v23  ;;  %v9608_v4 = vrot.slane %v8567_v57, %v9364_v56  ;;  %v1261_v10 = vcombine.low %v9547_v22, %v9550_v23  ;;  %v8576_v23 = vld [vmem:[#allocation3 + $0x300] ss:$16 sps:$4 sm:$0xff]  }
  0x73   :  { %4870 = vmatmul.mubr.bf16.gmra.mxu0 %v9480_v33  ;;  %v1264_v44 = vcombine.high %v9559_v28, %v9568_v35  ;;  %v1263_v19 = vcombine.low %v9559_v28, %v9568_v35  ;;  %v8580_v28 = vld [vmem:[#allocation3 + $0x340] ss:$16 sps:$4 sm:$0xff]   ;;  %v9643_v35 = vrot.slane %v8576_v23, %v9364_v56  ;;  %v8590_v57 = vld [vmem:[#allocation5 + $0x424] ss:$16 sps:$4 sm:$0xff]  }
  0x74   :  { %5063 = vmatmul.mubr.bf16.gmra.mxu1 %v9482_v34  ;;  %4879 = vmatprep.mubr.bf16.mxu0 %v9484_v38  ;;  %v9588_v53 = vpack.c.bf16 %v1262_v41, %v1190_v40  ;;  %v9636_v27 = vpack.c.bf16 %v1261_v10, %v1189_v9  ;;  %v8587_v40 = vld [vmem:[#allocation3 + $0x364] ss:$16 sps:$4 sm:$0xff]  }
  0x75   :  { %5072 = vmatprep.mubr.bf16.mxu1 %v9486_v39  ;;  %5218 = vmatpush1.bf16.msra.mxu0 %v8516_v45  ;;  %v8558_v45 = vld [vmem:[#allocation3 + $0x280] ss:$16 sps:$4 sm:$0xff]   ;;  %v9596_v62 = vpack.c.bf16 %v1264_v44, %v1192_v43  ;;  %v9638_v31 = vpack.c.bf16 %v1263_v19, %v1191_v11  ;;  %v9651_v43 = vrot.slane %v8580_v28, %v9364_v56  ;;  %v8593_v9 = vld [vmem:[#allocation5 + $0x624] ss:$16 sps:$4 sm:$0xff]  }
  0x76   :  { %5411 = vmatpush1.bf16.msra.mxu1 %v8519_v50  ;;  %5219 = vmatprep.subr.bf16.mxu0 %v8536_v58  ;;  %v8564_v50 = vld [vmem:[#allocation3 + $0x2e0] ss:$16 sps:$4 sm:$0xff]   ;;  %v9591_v54 = vrot.slane %v8558_v45, %v9364_v56  ;;  %v8568_v58 = vld [vmem:[#allocation3 + $0x2c4] ss:$16 sps:$4 sm:$0xff]   ;;  %v9657_v45 = vrot.slane %v8584_v30, %v9364_v56 }
  0x77   :  { %5412 = vmatprep.subr.bf16.mxu1 %v8539_v61  ;;  %v8569_v61 = vld [vmem:[#allocation3 + $0x2e4] ss:$16 sps:$4 sm:$0xff]   ;;  %v9602_v0 = vrot.slane %v8564_v50, %v9364_v56  ;;  %v9611_v5 = vrot.slane %v8568_v58, %v9364_v56  ;;  %v9663_v50 = vrot.slane %v8586_v42, %v9364_v56 }
  0x78   :  { %v9614_v6 = vrot.slane %v8569_v61, %v9364_v56  ;;  %v1333_v58 = vcombine.low %v9591_v54, %v9594_v55  ;;  %v8605_v23 = vld [vmem:[#allocation3 + $0x3e4] ss:$16 sps:$4 sm:$0xff]  }
  0x79   :  { %5220 = vmatpush1.bf16.msra.mxu0 %v8534_v2  ;;  %v9605_v2 = vrot.slane %v8566_v51, %v9364_v56  ;;  %v1406_v15 = vcombine.high %v9599_v63, %v9602_v0  ;;  %v9666_v51 = vrot.slane %v8587_v40, %v9364_v56  ;;  %v1405_v61 = vcombine.low %v9599_v63, %v9602_v0  ;;  %v8594_v0 = vld [vmem:[#allocation3 + $0x380] ss:$16 sps:$4 sm:$0xff]  }
  0x7a   :  { %5413 = vmatpush1.bf16.msra.mxu1 %v8537_v3  ;;  %5221 = vmatprep.subr.bf16.mxu0 %v8554_v29  ;;  %v8570_v3 = vld [vmem:[#allocation5 + $0x440] ss:$16 sps:$4 sm:$0xff]   ;;  %v1408_v22 = vcombine.high %v9611_v5, %v9614_v6  ;;  %v1407_v10 = vcombine.low %v9611_v5, %v9614_v6 }
  0x7b   :  { %4880 = vmatmul.mubr.bf16.gmra.mxu0 %v9532_v8  ;;  %5414 = vmatprep.subr.bf16.mxu1 %v8557_v37  ;;  %v1336_v16 = vcombine.high %v9605_v2, %v9608_v4  ;;  %v8582_v29 = vld [vmem:[#allocation3 + $0x360] ss:$16 sps:$4 sm:$0xff]   ;;  %v8585_v37 = vld [vmem:[#allocation3 + $0x324] ss:$16 sps:$4 sm:$0xff]   ;;  %v1552_v63 = vcombine.high %v9663_v50, %v9666_v51 }
  0x7c   :  { %5073 = vmatmul.mubr.bf16.gmra.mxu1 %v9534_v13  ;;  %4889 = vmatprep.mubr.bf16.mxu0 %v9536_v14  ;;  %v9654_v44 = vrot.slane %v8582_v29, %v9364_v56  ;;  %v9660_v48 = vrot.slane %v8585_v37, %v9364_v56  ;;  %v8598_v5 = vld [vmem:[#allocation3 + $0x3c0] ss:$16 sps:$4 sm:$0xff]  }
  0x7d   :  { %5082 = vmatprep.mubr.bf16.mxu1 %v9544_v21  ;;  %5222 = vmatpush1.bf16.msra.mxu0 %v8552_v25  ;;  %v1334_v25 = vcombine.high %v9591_v54, %v9594_v55  ;;  %v9648_v41 = vpack.c.bf16 %v1408_v22, %v1336_v16  ;;  %v8600_v6 = vld [vmem:[#allocation3 + $0x3e0] ss:$16 sps:$4 sm:$0xff]   ;;  %v8603_v16 = vld [vmem:[#allocation3 + $0x3a4] ss:$16 sps:$4 sm:$0xff]   ;;  %v9703_v28 = vrot.slane %v8598_v5, %v9364_v56 }
  0x7e   :  { %5415 = vmatpush1.bf16.msra.mxu1 %v8555_v36  ;;  %5223 = vmatprep.subr.bf16.mxu0 %v8572_v7  ;;  %v9646_v36 = vrot.slane %v8578_v24, %v9364_v56  ;;  %v8591_v7 = vld [vmem:[#allocation5 + $0x620] ss:$16 sps:$4 sm:$0xff]   ;;  %v1550_v54 = vcombine.high %v9651_v43, %v9654_v44  ;;  %v1480_v55 = vcombine.high %v9657_v45, %v9660_v48  ;;  %v8604_v22 = vld [vmem:[#allocation3 + $0x3c4] ss:$16 sps:$4 sm:$0xff]  }
  0x7f   :  { %5416 = vmatprep.subr.bf16.mxu1 %v8575_v18  ;;  %v9640_v32 = vpack.c.bf16 %v1406_v15, %v1334_v25  ;;  %v9695_v25 = vrot.slane %v8594_v0, %v9364_v56  ;;  %v9706_v29 = vrot.slane %v8600_v6, %v9364_v56  ;;  %v8606_v37 = vld [vmem:[#allocation5 + $0x400] ss:$16 sps:$4 sm:$0xff]   ;;  %v9712_v42 = vrot.slane %v8603_v16, %v9364_v56  ;;  %v8621_v5 = vld [vmem:[#allocation3 + $0x424] ss:$16 sps:$4 sm:$0xff]  }
  0x80   :  { %v1478_v11 = vcombine.high %v9643_v35, %v9646_v36  ;;  %v9700_v24 = vpack.c.bf16 %v1552_v63, %v1480_v55  ;;  %v9715_v40 = vrot.slane %v8604_v22, %v9364_v56  ;;  %v8622_v6 = vld [vmem:[#allocation3 + $0x444] ss:$16 sps:$4 sm:$0xff]  }
  0x81   :  { %5224 = vmatpush1.bf16.msra.mxu0 %v8570_v3  ;;  %v1335_v3 = vcombine.low %v9605_v2, %v9608_v4  ;;  %v8596_v2 = vld [vmem:[#allocation3 + $0x3a0] ss:$16 sps:$4 sm:$0xff]   ;;  %v9688_v4 = vpack.c.bf16 %v1405_v61, %v1333_v58  ;;  %v1477_v58 = vcombine.low %v9643_v35, %v9646_v36  ;;  %v1549_v61 = vcombine.low %v9651_v43, %v9654_v44 }
  0x82   :  { %5417 = vmatpush1.bf16.msra.mxu1 %v8573_v17  ;;  %5225 = vmatprep.subr.bf16.mxu0 %v8590_v57  ;;  %v8602_v17 = vld [vmem:[#allocation3 + $0x384] ss:$16 sps:$4 sm:$0xff]   ;;  %v9692_v19 = vpack.c.bf16 %v1550_v54, %v1478_v11  ;;  %v9698_v15 = vrot.slane %v8596_v2, %v9364_v56  ;;  %v1694_v35 = vcombine.high %v9703_v28, %v9706_v29  ;;  %v8612_v44 = vld [vmem:[#allocation3 + $0x400] ss:$16 sps:$4 sm:$0xff]  }
  0x83   :  { %4890 = vmatmul.mubr.bf16.gmra.mxu0 %v9584_v47  ;;  %5418 = vmatprep.subr.bf16.mxu1 %v8593_v9  ;;  %v9690_v18 = vpack.c.bf16 %v1407_v10, %v1335_v3  ;;  %v9709_v30 = vrot.slane %v8602_v17, %v9364_v56  ;;  %v8608_v57 = vld [vmem:[#allocation5 + $0x404] ss:$16 sps:$4 sm:$0xff]   ;;  %v1479_v3 = vcombine.low %v9657_v45, %v9660_v48  ;;  %v8614_v45 = vld [vmem:[#allocation3 + $0x420] ss:$16 sps:$4 sm:$0xff]  }
  0x84   :  { %5083 = vmatmul.mubr.bf16.gmra.mxu1 %v9586_v52  ;;  %4899 = vmatprep.mubr.bf16.mxu0 %v9588_v53  ;;  %v8611_v9 = vld [vmem:[#allocation5 + $0x604] ss:$16 sps:$4 sm:$0xff]   ;;  %v1551_v10 = vcombine.low %v9663_v50, %v9666_v51  ;;  %v1622_v11 = vcombine.high %v9695_v25, %v9698_v15  ;;  %v9740_v48 = vpack.c.bf16 %v1549_v61, %v1477_v58  ;;  %v8616_v50 = vld [vmem:[#allocation3 + $0x440] ss:$16 sps:$4 sm:$0xff]  }
  0x85   :  { %5092 = vmatprep.mubr.bf16.mxu1 %v9596_v62  ;;  %5226 = vmatpush1.bf16.msra.mxu0 %v8588_v46  ;;  %v9718_v46 = vrot.slane %v8605_v23, %v9364_v56  ;;  %v1624_v36 = vcombine.high %v9709_v30, %v9712_v42  ;;  %v8618_v51 = vld [vmem:[#allocation3 + $0x460] ss:$16 sps:$4 sm:$0xff]   ;;  %v8620_v54 = vld [vmem:[#allocation3 + $0x404] ss:$16 sps:$4 sm:$0xff]   ;;  %v9747_v0 = vrot.slane %v8612_v44, %v9364_v56 }
  0x86   :  { %5419 = vmatpush1.bf16.msra.mxu1 %v8591_v7  ;;  %v8609_v7 = vld [vmem:[#allocation5 + $0x600] ss:$16 sps:$4 sm:$0xff]   ;;  %5227 = vmatprep.subr.bf16.mxu0 %v8608_v57  ;;  %v9742_v55 = vpack.c.bf16 %v1551_v10, %v1479_v3  ;;  %v9744_v63 = vpack.c.bf16 %v1694_v35, %v1622_v11  ;;  %v9750_v2 = vrot.slane %v8614_v45, %v9364_v56  ;;  %v8623_v17 = vld [vmem:[#allocation3 + $0x464] ss:$16 sps:$4 sm:$0xff]  }
  0x87   :  { %v1696_v43 = vcombine.high %v9715_v40, %v9718_v46  ;;  %5420 = vmatprep.subr.bf16.mxu1 %v8611_v9  ;;  %v9755_v22 = vrot.slane %v8616_v50, %v9364_v56  ;;  %v9758_v23 = vrot.slane %v8618_v51, %v9364_v56  ;;  %v8624_v57 = vld [vmem:[#allocation5 + $0x5e0] ss:$16 sps:$4 sm:$0xff]   ;;  %v9764_v58 = vrot.slane %v8621_v5, %v9364_v56  ;;  %v8638_v45 = vld [vmem:[#allocation3 + $0x484] ss:$16 sps:$4 sm:$0xff]  }
  0x88   :  { %12614 = vst [vmem:[#allocation11_spill] sm:$0xff] %v9742_v55  ;;  %12615 = vst [vmem:[#allocation12_spill] sm:$0xff] %v9744_v63  ;;  %v9767_v61 = vrot.slane %v8622_v6, %v9364_v56  ;;  %v9770_v3 = vrot.slane %v8623_v17, %v9364_v56  ;;  %v1621_v9 = vcombine.low %v9695_v25, %v9698_v15  ;;  %v8627_v35 = vld [vmem:[#allocation5 + $0x7e0] ss:$16 sps:$4 sm:$0xff]   ;;  %v8639_v6 = vld [vmem:[#allocation3 + $0x4a4] ss:$16 sps:$4 sm:$0xff]  }
  0x89   :  { %5228 = vmatpush1.bf16.msra.mxu0 %v8606_v37  ;;  %v9752_v16 = vpack.c.bf16 %v1696_v43, %v1624_v36  ;;  %v9761_v37 = vrot.slane %v8620_v54, %v9364_v56  ;;  %v1693_v10 = vcombine.low %v9703_v28, %v9706_v29  ;;  %v1623_v11 = vcombine.low %v9709_v30, %v9712_v42  ;;  %v8629_v36 = vld [vmem:[#allocation5 + $0x7e4] ss:$16 sps:$4 sm:$0xff]   ;;  %v8630_v29 = vld [vmem:[#allocation3 + $0x480] ss:$16 sps:$4 sm:$0xff]  }
  0x8a   :  { %5421 = vmatpush1.bf16.msra.mxu1 %v8609_v7  ;;  %v8626_v7 = vld [vmem:[#allocation5 + $0x5e4] ss:$16 sps:$4 sm:$0xff]   ;;  %v1695_v43 = vcombine.low %v9715_v40, %v9718_v46  ;;  %v1766_v44 = vcombine.high %v9747_v0, %v9750_v2  ;;  %v1838_v25 = vcombine.high %v9755_v22, %v9758_v23  ;;  %v1840_v28 = vcombine.high %v9767_v61, %v9770_v3  ;;  %v8632_v30 = vld [vmem:[#allocation3 + $0x4a0] ss:$16 sps:$4 sm:$0xff]  }
  0x8b   :  { %4900 = vmatmul.mubr.bf16.gmra.mxu0 %v9636_v27  ;;  %12616 = vst [vmem:[#allocation13_spill] sm:$0xff] %v9752_v16  ;;  %v1768_v15 = vcombine.high %v9761_v37, %v9764_v58  ;;  %5229 = vmatprep.subr.bf16.mxu0 %v8626_v7  ;;  %v9792_v42 = vpack.c.bf16 %v1693_v10, %v1621_v9  ;;  %v8634_v40 = vld [vmem:[#allocation3 + $0x4c0] ss:$16 sps:$4 sm:$0xff]   ;;  %v8640_v17 = vld [vmem:[#allocation3 + $0x4c4] ss:$16 sps:$4 sm:$0xff]  }
  0x8c   :  { %5093 = vmatmul.mubr.bf16.gmra.mxu1 %v9638_v31  ;;  %4909 = vmatprep.mubr.bf16.mxu0 %v9640_v32  ;;  %v8636_v46 = vld [vmem:[#allocation3 + $0x4e0] ss:$16 sps:$4 sm:$0xff]   ;;  %v9794_v50 = vpack.c.bf16 %v1695_v43, %v1623_v11  ;;  %v9796_v51 = vpack.c.bf16 %v1838_v25, %v1766_v44  ;;  %v9799_v54 = vrot.slane %v8630_v29, %v9364_v56  ;;  %v8641_v7 = vld [vmem:[#allocation3 + $0x4e4] ss:$16 sps:$4 sm:$0xff]  }
  0x8d   :  { %5102 = vmatprep.mubr.bf16.mxu1 %v9648_v41  ;;  %5422 = vmatprep.subr.bf16.mxu1 %v8629_v36  ;;  %12617 = vst [vmem:[#allocation14_spill] sm:$0xff] %v9792_v42  ;;  %v9802_v5 = vrot.slane %v8632_v30, %v9364_v56  ;;  %v9804_v9 = vpack.c.bf16 %v1840_v28, %v1768_v15  ;;  %v8644_v25 = vld [vmem:[#allocation5 + $0x5c4] ss:$16 sps:$4 sm:$0xff]   ;;  %v8645_v30 = vld [vmem:[#allocation5 + $0x7c0] ss:$16 sps:$4 sm:$0xff]  }
  0x8e   :  { %5230 = vmatpush2.bf16.msra.mxu0 %v8624_v57  ;;  %5423 = vmatpush2.bf16.msra.mxu1 %v8627_v35  ;;  %12618 = vst [vmem:[#allocation15_spill] sm:$0xff] %v9794_v50  ;;  %12619 = vst [vmem:[#allocation16_spill] sm:$0xff] %v9796_v51  ;;  %v9807_v57 = vrot.slane %v8634_v40, %v9364_v56  ;;  %v9810_v10 = vrot.slane %v8636_v46, %v9364_v56  ;;  %v8642_v35 = vld [vmem:[#allocation5 + $0x5c0] ss:$16 sps:$4 sm:$0xff]   ;;  %v8647_v40 = vld [vmem:[#allocation5 + $0x7c4] ss:$16 sps:$4 sm:$0xff]  }
  0x8f   :  { %12620 = vst [vmem:[#allocation17_spill] sm:$0xff] %v9804_v9  ;;  %v9813_v11 = vrot.slane %v8638_v45, %v9364_v56  ;;  %v9816_v36 = vrot.slane %v8639_v6, %v9364_v56  ;;  %v9819_v43 = vrot.slane %v8640_v17, %v9364_v56  ;;  %v9822_v44 = vrot.slane %v8641_v7, %v9364_v56  ;;  %v8656_v6 = vld [vmem:[#allocation3 + $0x504] ss:$16 sps:$4 sm:$0xff]  }
  0x90   :  { %v1765_v15 = vcombine.low %v9747_v0, %v9750_v2  ;;  %v1837_v28 = vcombine.low %v9755_v22, %v9758_v23  ;;  %v1767_v29 = vcombine.low %v9761_v37, %v9764_v58  ;;  %v1839_v46 = vcombine.low %v9767_v61, %v9770_v3  ;;  %5231 = vmatprep.subr.bf16.mxu0 %v8644_v25  ;;  %v8648_v23 = vld [vmem:[#allocation3 + $0x500] ss:$16 sps:$4 sm:$0xff]   ;;  %v8657_v25 = vld [vmem:[#allocation3 + $0x524] ss:$16 sps:$4 sm:$0xff]  }
  0x91   :  { %v1910_v45 = vcombine.high %v9799_v54, %v9802_v5  ;;  %v1982_v0 = vcombine.high %v9807_v57, %v9810_v10  ;;  %v1912_v2 = vcombine.high %v9813_v11, %v9816_v36  ;;  %v1984_v22 = vcombine.high %v9819_v43, %v9822_v44  ;;  %5424 = vmatprep.subr.bf16.mxu1 %v8647_v40  ;;  %v8650_v37 = vld [vmem:[#allocation3 + $0x520] ss:$16 sps:$4 sm:$0xff]   ;;  %v8658_v40 = vld [vmem:[#allocation3 + $0x544] ss:$16 sps:$4 sm:$0xff]  }
  0x92   :  { %v9844_v58 = vpack.c.bf16 %v1837_v28, %v1765_v15  ;;  %5232 = vmatpush2.bf16.msra.mxu0 %v8642_v35  ;;  %5425 = vmatpush2.bf16.msra.mxu1 %v8645_v30  ;;  %v8652_v61 = vld [vmem:[#allocation3 + $0x540] ss:$16 sps:$4 sm:$0xff]   ;;  %v9846_v17 = vpack.c.bf16 %v1839_v46, %v1767_v29  ;;  %v9865_v29 = vrot.slane %v8656_v6, %v9364_v56 }
  0x93   :  { %4910 = vmatmul.mubr.bf16.gmra.mxu0 %v9688_v4  ;;  %v8654_v3 = vld [vmem:[#allocation3 + $0x560] ss:$16 sps:$4 sm:$0xff]   ;;  %v9848_v7 = vpack.c.bf16 %v1982_v0, %v1910_v45  ;;  %v9856_v15 = vpack.c.bf16 %v1984_v22, %v1912_v2  ;;  %v9859_v35 = vrot.slane %v8652_v61, %v9364_v56  ;;  %v9868_v46 = vrot.slane %v8657_v25, %v9364_v56  ;;  %v8662_v2 = vld [vmem:[#allocation5 + $0x5a4] ss:$16 sps:$4 sm:$0xff]  }
  0x94   :  { %5103 = vmatmul.mubr.bf16.gmra.mxu1 %v9690_v18  ;;  %4919 = vmatprep.mubr.bf16.mxu0 %v9692_v19  ;;  %12621 = vst [vmem:[#allocation18_spill] sm:$0xff] %v9844_v58  ;;  %12622 = vst [vmem:[#allocation19_spill] sm:$0xff] %v9846_v17  ;;  %v9862_v28 = vrot.slane %v8654_v3, %v9364_v56  ;;  %v8660_v30 = vld [vmem:[#allocation5 + $0x5a0] ss:$16 sps:$4 sm:$0xff]   ;;  %v9871_v45 = vrot.slane %v8658_v40, %v9364_v56  ;;  %v8665_v3 = vld [vmem:[#allocation5 + $0x7a4] ss:$16 sps:$4 sm:$0xff]  }
  0x95   :  { %5112 = vmatprep.mubr.bf16.mxu1 %v9700_v24  ;;  %12623 = vst [vmem:[#allocation20_spill] sm:$0xff] %v9848_v7  ;;  %12624 = vst [vmem:[#allocation21_spill] sm:$0xff] %v9856_v15  ;;  %v1909_v22 = vcombine.low %v9799_v54, %v9802_v5  ;;  %v8663_v61 = vld [vmem:[#allocation5 + $0x7a0] ss:$16 sps:$4 sm:$0xff]   ;;  %v2056_v5 = vcombine.high %v9865_v29, %v9868_v46  ;;  %5233 = vmatprep.subr.bf16.mxu0 %v8662_v2  ;;  %v8674_v25 = vld [vmem:[#allocation3 + $0x584] ss:$16 sps:$4 sm:$0xff]  }
  0x96   :  { %v2126_v54 = vcombine.high %v9859_v35, %v9862_v28  ;;  %5426 = vmatprep.subr.bf16.mxu1 %v8665_v3  ;;  %5234 = vmatpush2.bf16.msra.mxu0 %v8660_v30  ;;  %v8675_v2 = vld [vmem:[#allocation3 + $0x5a4] ss:$16 sps:$4 sm:$0xff]  }
  0x97   :  { %5427 = vmatpush2.bf16.msra.mxu1 %v8663_v61  ;;  %v8676_v3 = vld [vmem:[#allocation3 + $0x5c4] ss:$16 sps:$4 sm:$0xff]   ;;  %v8678_v61 = vld [vmem:[#allocation5 + $0x580] ss:$16 sps:$4 sm:$0xff]  }
  0x9b   :  { %4920 = vmatmul.mubr.bf16.gmra.mxu0 %v9740_v48 }
  0x9c   :  { %5113 = vmatmul.mubr.bf16.gmra.mxu1 %v9742_v55  ;;  %4929 = vmatprep.mubr.bf16.mxu0 %v9744_v63 }
  0x9d   :  { %5122 = vmatprep.mubr.bf16.mxu1 %v9752_v16  ;;  %v8789_v16 = vld [vmem:[#allocation5 + $0x2c8] ss:$16 sps:$4 sm:$0xff]  }
  0xa3   :  { %4930 = vmatmul.mubr.bf16.gmra.mxu0 %v9792_v42 }
  0xa4   :  { %5123 = vmatmul.mubr.bf16.gmra.mxu1 %v9794_v50  ;;  %4939 = vmatprep.mubr.bf16.mxu0 %v9796_v51  ;;  %v9854_v51 = vrot.slane %v8650_v37, %v9364_v56  ;;  %v8659_v50 = vld [vmem:[#allocation3 + $0x564] ss:$16 sps:$4 sm:$0xff]   ;;  %v1911_v37 = vcombine.low %v9813_v11, %v9816_v36  ;;  %v8668_v11 = vld [vmem:[#allocation3 + $0x5a0] ss:$16 sps:$4 sm:$0xff]  }
  0xa5   :  { %5132 = vmatprep.mubr.bf16.mxu1 %v9804_v9  ;;  %v9851_v9 = vrot.slane %v8648_v23, %v9364_v56  ;;  %v9874_v0 = vrot.slane %v8659_v50, %v9364_v56  ;;  %v1981_v23 = vcombine.low %v9807_v57, %v9810_v10  ;;  %v1983_v50 = vcombine.low %v9819_v43, %v9822_v44  ;;  %v8666_v10 = vld [vmem:[#allocation3 + $0x580] ss:$16 sps:$4 sm:$0xff]  }
  0xa6   :  { %v8670_v43 = vld [vmem:[#allocation3 + $0x5c0] ss:$16 sps:$4 sm:$0xff]  }
  0xa7   :  { %v2054_v6 = vcombine.high %v9851_v9, %v9854_v51  ;;  %v2128_v57 = vcombine.high %v9871_v45, %v9874_v0  ;;  %v9896_v36 = vpack.c.bf16 %v1981_v23, %v1909_v22  ;;  %v8672_v44 = vld [vmem:[#allocation3 + $0x5e0] ss:$16 sps:$4 sm:$0xff]   ;;  %v9898_v40 = vpack.c.bf16 %v1983_v50, %v1911_v37 }
  0xa8   :  { %v9911_v30 = vrot.slane %v8670_v43, %v9364_v56  ;;  %v9914_v23 = vrot.slane %v8672_v44, %v9364_v56  ;;  %v9917_v37 = vrot.slane %v8674_v25, %v9364_v56  ;;  %v9920_v50 = vrot.slane %v8675_v2, %v9364_v56  ;;  %v8681_v43 = vld [vmem:[#allocation5 + $0x780] ss:$16 sps:$4 sm:$0xff]   ;;  %v8683_v44 = vld [vmem:[#allocation5 + $0x784] ss:$16 sps:$4 sm:$0xff]  }
  0xa9   :  { %12625 = vst [vmem:[#allocation22_spill] sm:$0xff] %v9896_v36  ;;  %12626 = vst [vmem:[#allocation23_spill] sm:$0xff] %v9898_v40  ;;  %v9908_v22 = vpack.c.bf16 %v2128_v57, %v2056_v5  ;;  %v8680_v5 = vld [vmem:[#allocation5 + $0x584] ss:$16 sps:$4 sm:$0xff]   ;;  %v2053_v57 = vcombine.low %v9851_v9, %v9854_v51  ;;  %5428 = vmatprep.subr.bf16.mxu1 %v8683_v44 }
  0xaa   :  { %v2270_v51 = vcombine.high %v9911_v30, %v9914_v23  ;;  %v2200_v9 = vcombine.high %v9917_v37, %v9920_v50  ;;  %5235 = vmatprep.subr.bf16.mxu0 %v8680_v5  ;;  %5429 = vmatpush2.bf16.msra.mxu1 %v8681_v43  ;;  %v8692_v2 = vld [vmem:[#allocation3 + $0x604] ss:$16 sps:$4 sm:$0xff]   ;;  %v8696_v43 = vld [vmem:[#allocation5 + $0x560] ss:$16 sps:$4 sm:$0xff]  }
  0xab   :  { %4940 = vmatmul.mubr.bf16.gmra.mxu0 %v9844_v58  ;;  %v8677_v58 = vld [vmem:[#allocation3 + $0x5e4] ss:$16 sps:$4 sm:$0xff]   ;;  %12628 = vst [vmem:[#allocation25_spill] sm:$0xff] %v9908_v22 }
  0xac   :  { %5133 = vmatmul.mubr.bf16.gmra.mxu1 %v9846_v17  ;;  %4949 = vmatprep.mubr.bf16.mxu0 %v9848_v7  ;;  %v9903_v7 = vrot.slane %v8666_v10, %v9364_v56  ;;  %v9906_v17 = vrot.slane %v8668_v11, %v9364_v56  ;;  %v2125_v10 = vcombine.low %v9859_v35, %v9862_v28  ;;  %v8684_v28 = vld [vmem:[#allocation3 + $0x600] ss:$16 sps:$4 sm:$0xff]   ;;  %v8693_v5 = vld [vmem:[#allocation3 + $0x624] ss:$16 sps:$4 sm:$0xff]  }
  0xad   :  { %5142 = vmatprep.mubr.bf16.mxu1 %v9856_v15  ;;  %v9900_v15 = vpack.c.bf16 %v2126_v54, %v2054_v6  ;;  %v9923_v6 = vrot.slane %v8676_v3, %v9364_v56  ;;  %v9926_v54 = vrot.slane %v8677_v58, %v9364_v56  ;;  %v2055_v11 = vcombine.low %v9865_v29, %v9868_v46  ;;  %v8686_v29 = vld [vmem:[#allocation3 + $0x620] ss:$16 sps:$4 sm:$0xff]   ;;  %v8694_v44 = vld [vmem:[#allocation3 + $0x644] ss:$16 sps:$4 sm:$0xff]  }
  0xae   :  { %v2127_v58 = vcombine.low %v9871_v45, %v9874_v0  ;;  %v2198_v25 = vcombine.high %v9903_v7, %v9906_v17  ;;  %v9948_v46 = vpack.c.bf16 %v2125_v10, %v2053_v57  ;;  %5236 = vmatpush2.bf16.msra.mxu0 %v8678_v61  ;;  %v8688_v45 = vld [vmem:[#allocation3 + $0x640] ss:$16 sps:$4 sm:$0xff]  }
  0xaf   :  { %12627 = vst [vmem:[#allocation24_spill] sm:$0xff] %v9900_v15  ;;  %v2272_v35 = vcombine.high %v9923_v6, %v9926_v54  ;;  %v8690_v0 = vld [vmem:[#allocation3 + $0x660] ss:$16 sps:$4 sm:$0xff]   ;;  %v9963_v61 = vrot.slane %v8688_v45, %v9364_v56 }
  0xb0   :  { %12629 = vst [vmem:[#allocation26_spill] sm:$0xff] %v9948_v46  ;;  %v9950_v3 = vpack.c.bf16 %v2127_v58, %v2055_v11  ;;  %v9966_v10 = vrot.slane %v8690_v0, %v9364_v56  ;;  %v9969_v11 = vrot.slane %v8692_v2, %v9364_v56  ;;  %v9972_v58 = vrot.slane %v8693_v5, %v9364_v56  ;;  %v8699_v45 = vld [vmem:[#allocation5 + $0x760] ss:$16 sps:$4 sm:$0xff]   ;;  %v8701_v0 = vld [vmem:[#allocation5 + $0x764] ss:$16 sps:$4 sm:$0xff]  }
  0xb1   :  { %v9960_v57 = vpack.c.bf16 %v2272_v35, %v2200_v9  ;;  %v8698_v9 = vld [vmem:[#allocation5 + $0x564] ss:$16 sps:$4 sm:$0xff]   ;;  %v2197_v35 = vcombine.low %v9903_v7, %v9906_v17  ;;  %5430 = vmatprep.subr.bf16.mxu1 %v8701_v0 }
  0xb2   :  { %12630 = vst [vmem:[#allocation27_spill] sm:$0xff] %v9950_v3  ;;  %v2414_v17 = vcombine.high %v9963_v61, %v9966_v10  ;;  %v2344_v7 = vcombine.high %v9969_v11, %v9972_v58  ;;  %5237 = vmatprep.subr.bf16.mxu0 %v8698_v9  ;;  %5431 = vmatpush2.bf16.msra.mxu1 %v8699_v45  ;;  %v8710_v5 = vld [vmem:[#allocation3 + $0x684] ss:$16 sps:$4 sm:$0xff]   ;;  %v8714_v45 = vld [vmem:[#allocation5 + $0x540] ss:$16 sps:$4 sm:$0xff]  }
  0xb3   :  { %4950 = vmatmul.mubr.bf16.gmra.mxu0 %v9896_v36  ;;  %v8695_v36 = vld [vmem:[#allocation3 + $0x664] ss:$16 sps:$4 sm:$0xff]   ;;  %12632 = vst [vmem:[#allocation29_spill] sm:$0xff] %v9960_v57 }
  0xb4   :  { %5143 = vmatmul.mubr.bf16.gmra.mxu1 %v9898_v40  ;;  %4959 = vmatprep.mubr.bf16.mxu0 %v9900_v15  ;;  %v9955_v15 = vrot.slane %v8684_v28, %v9364_v56  ;;  %v9958_v40 = vrot.slane %v8686_v29, %v9364_v56  ;;  %v2269_v28 = vcombine.low %v9911_v30, %v9914_v23  ;;  %v8702_v23 = vld [vmem:[#allocation3 + $0x680] ss:$16 sps:$4 sm:$0xff]   ;;  %v8711_v9 = vld [vmem:[#allocation3 + $0x6a4] ss:$16 sps:$4 sm:$0xff]  }
  0xb5   :  { %5152 = vmatprep.mubr.bf16.mxu1 %v9908_v22  ;;  %v9952_v22 = vpack.c.bf16 %v2270_v51, %v2198_v25  ;;  %v9975_v25 = vrot.slane %v8694_v44, %v9364_v56  ;;  %v9978_v51 = vrot.slane %v8695_v36, %v9364_v56  ;;  %v2199_v29 = vcombine.low %v9917_v37, %v9920_v50  ;;  %v8704_v37 = vld [vmem:[#allocation3 + $0x6a0] ss:$16 sps:$4 sm:$0xff]   ;;  %v8712_v0 = vld [vmem:[#allocation3 + $0x6c4] ss:$16 sps:$4 sm:$0xff]  }
  0xb6   :  { %v2271_v36 = vcombine.low %v9923_v6, %v9926_v54  ;;  %v2342_v2 = vcombine.high %v9955_v15, %v9958_v40  ;;  %v10000_v50 = vpack.c.bf16 %v2269_v28, %v2197_v35  ;;  %5238 = vmatpush2.bf16.msra.mxu0 %v8696_v43  ;;  %v8706_v6 = vld [vmem:[#allocation3 + $0x6c0] ss:$16 sps:$4 sm:$0xff]  }
  0xb7   :  { %12631 = vst [vmem:[#allocation28_spill] sm:$0xff] %v9952_v22  ;;  %v2416_v30 = vcombine.high %v9975_v25, %v9978_v51  ;;  %v8708_v54 = vld [vmem:[#allocation3 + $0x6e0] ss:$16 sps:$4 sm:$0xff]   ;;  %v10015_v43 = vrot.slane %v8706_v6, %v9364_v56 }
  0xb8   :  { %12633 = vst [vmem:[#allocation30_spill] sm:$0xff] %v10000_v50  ;;  %v10002_v44 = vpack.c.bf16 %v2271_v36, %v2199_v29  ;;  %v10018_v28 = vrot.slane %v8708_v54, %v9364_v56  ;;  %v10021_v29 = vrot.slane %v8710_v5, %v9364_v56  ;;  %v10024_v36 = vrot.slane %v8711_v9, %v9364_v56  ;;  %v8717_v6 = vld [vmem:[#allocation5 + $0x740] ss:$16 sps:$4 sm:$0xff]   ;;  %v8719_v54 = vld [vmem:[#allocation5 + $0x744] ss:$16 sps:$4 sm:$0xff]  }
  0xb9   :  { %v10012_v35 = vpack.c.bf16 %v2416_v30, %v2344_v7  ;;  %v8716_v7 = vld [vmem:[#allocation5 + $0x544] ss:$16 sps:$4 sm:$0xff]   ;;  %v2341_v30 = vcombine.low %v9955_v15, %v9958_v40  ;;  %5432 = vmatprep.subr.bf16.mxu1 %v8719_v54 }
  0xba   :  { %12634 = vst [vmem:[#allocation31_spill] sm:$0xff] %v10002_v44  ;;  %v2558_v15 = vcombine.high %v10015_v43, %v10018_v28  ;;  %v2488_v40 = vcombine.high %v10021_v29, %v10024_v36  ;;  %5239 = vmatprep.subr.bf16.mxu0 %v8716_v7  ;;  %5433 = vmatpush2.bf16.msra.mxu1 %v8717_v6  ;;  %v8728_v9 = vld [vmem:[#allocation3 + $0x704] ss:$16 sps:$4 sm:$0xff]   ;;  %v8732_v6 = vld [vmem:[#allocation5 + $0x520] ss:$16 sps:$4 sm:$0xff]  }
  0xbb   :  { %4960 = vmatmul.mubr.bf16.gmra.mxu0 %v9948_v46  ;;  %v8713_v46 = vld [vmem:[#allocation3 + $0x6e4] ss:$16 sps:$4 sm:$0xff]   ;;  %12636 = vst [vmem:[#allocation33_spill] sm:$0xff] %v10012_v35 }
  0xbc   :  { %5153 = vmatmul.mubr.bf16.gmra.mxu1 %v9950_v3  ;;  %4969 = vmatprep.mubr.bf16.mxu0 %v9952_v22  ;;  %v10007_v22 = vrot.slane %v8702_v23, %v9364_v56  ;;  %v10010_v3 = vrot.slane %v8704_v37, %v9364_v56  ;;  %v2413_v23 = vcombine.low %v9963_v61, %v9966_v10  ;;  %v8720_v10 = vld [vmem:[#allocation3 + $0x700] ss:$16 sps:$4 sm:$0xff]   ;;  %v8729_v7 = vld [vmem:[#allocation3 + $0x724] ss:$16 sps:$4 sm:$0xff]  }
  0xbd   :  { %5162 = vmatprep.mubr.bf16.mxu1 %v9960_v57  ;;  %v10004_v57 = vpack.c.bf16 %v2414_v17, %v2342_v2  ;;  %v10027_v2 = vrot.slane %v8712_v0, %v9364_v56  ;;  %v10030_v17 = vrot.slane %v8713_v46, %v9364_v56  ;;  %v2343_v37 = vcombine.low %v9969_v11, %v9972_v58  ;;  %v8722_v11 = vld [vmem:[#allocation3 + $0x720] ss:$16 sps:$4 sm:$0xff]   ;;  %v8730_v54 = vld [vmem:[#allocation3 + $0x744] ss:$16 sps:$4 sm:$0xff]  }
  0xbe   :  { %v2415_v46 = vcombine.low %v9975_v25, %v9978_v51  ;;  %v2486_v5 = vcombine.high %v10007_v22, %v10010_v3  ;;  %v10052_v58 = vpack.c.bf16 %v2413_v23, %v2341_v30  ;;  %5240 = vmatpush2.bf16.msra.mxu0 %v8714_v45  ;;  %v8724_v25 = vld [vmem:[#allocation3 + $0x740] ss:$16 sps:$4 sm:$0xff]  }
  0xbf   :  { %12635 = vst [vmem:[#allocation32_spill] sm:$0xff] %v10004_v57  ;;  %v2560_v61 = vcombine.high %v10027_v2, %v10030_v17  ;;  %v8726_v51 = vld [vmem:[#allocation3 + $0x760] ss:$16 sps:$4 sm:$0xff]   ;;  %v10067_v45 = vrot.slane %v8724_v25, %v9364_v56 }
  0xc0   :  { %12637 = vst [vmem:[#allocation34_spill] sm:$0xff] %v10052_v58  ;;  %v10054_v0 = vpack.c.bf16 %v2415_v46, %v2343_v37  ;;  %v10070_v23 = vrot.slane %v8726_v51, %v9364_v56  ;;  %v10073_v37 = vrot.slane %v8728_v9, %v9364_v56  ;;  %v10076_v46 = vrot.slane %v8729_v7, %v9364_v56  ;;  %v8735_v25 = vld [vmem:[#allocation5 + $0x720] ss:$16 sps:$4 sm:$0xff]   ;;  %v8737_v51 = vld [vmem:[#allocation5 + $0x724] ss:$16 sps:$4 sm:$0xff]  }
  0xc1   :  { %v10064_v30 = vpack.c.bf16 %v2560_v61, %v2488_v40  ;;  %v8734_v40 = vld [vmem:[#allocation5 + $0x524] ss:$16 sps:$4 sm:$0xff]   ;;  %v2485_v61 = vcombine.low %v10007_v22, %v10010_v3  ;;  %5434 = vmatprep.subr.bf16.mxu1 %v8737_v51 }
  0xc2   :  { %12638 = vst [vmem:[#allocation35_spill] sm:$0xff] %v10054_v0  ;;  %v2702_v22 = vcombine.high %v10067_v45, %v10070_v23  ;;  %v2632_v3 = vcombine.high %v10073_v37, %v10076_v46  ;;  %5241 = vmatprep.subr.bf16.mxu0 %v8734_v40  ;;  %5435 = vmatpush2.bf16.msra.mxu1 %v8735_v25  ;;  %v8746_v7 = vld [vmem:[#allocation3 + $0x784] ss:$16 sps:$4 sm:$0xff]   ;;  %v8750_v25 = vld [vmem:[#allocation5 + $0x500] ss:$16 sps:$4 sm:$0xff]  }
  0xc3   :  { %4970 = vmatmul.mubr.bf16.gmra.mxu0 %v10000_v50  ;;  %v8731_v50 = vld [vmem:[#allocation3 + $0x764] ss:$16 sps:$4 sm:$0xff]   ;;  %12640 = vst [vmem:[#allocation37_spill] sm:$0xff] %v10064_v30 }
  0xc4   :  { %5163 = vmatmul.mubr.bf16.gmra.mxu1 %v10002_v44  ;;  %4979 = vmatprep.mubr.bf16.mxu0 %v10004_v57  ;;  %v10059_v57 = vrot.slane %v8720_v10, %v9364_v56  ;;  %v10062_v44 = vrot.slane %v8722_v11, %v9364_v56  ;;  %v2557_v10 = vcombine.low %v10015_v43, %v10018_v28  ;;  %v8738_v28 = vld [vmem:[#allocation3 + $0x780] ss:$16 sps:$4 sm:$0xff]   ;;  %v8747_v40 = vld [vmem:[#allocation3 + $0x7a4] ss:$16 sps:$4 sm:$0xff]  }
  0xc5   :  { %5172 = vmatprep.mubr.bf16.mxu1 %v10012_v35  ;;  %v10056_v35 = vpack.c.bf16 %v2558_v15, %v2486_v5  ;;  %v10079_v5 = vrot.slane %v8730_v54, %v9364_v56  ;;  %v10082_v15 = vrot.slane %v8731_v50, %v9364_v56  ;;  %v2487_v11 = vcombine.low %v10021_v29, %v10024_v36  ;;  %v8740_v29 = vld [vmem:[#allocation3 + $0x7a0] ss:$16 sps:$4 sm:$0xff]   ;;  %v8748_v51 = vld [vmem:[#allocation3 + $0x7c4] ss:$16 sps:$4 sm:$0xff]  }
  0xc6   :  { %v2559_v50 = vcombine.low %v10027_v2, %v10030_v17  ;;  %v2630_v9 = vcombine.high %v10059_v57, %v10062_v44  ;;  %v10104_v36 = vpack.c.bf16 %v2557_v10, %v2485_v61  ;;  %5242 = vmatpush2.bf16.msra.mxu0 %v8732_v6  ;;  %v8742_v2 = vld [vmem:[#allocation3 + $0x7c0] ss:$16 sps:$4 sm:$0xff]  }
  0xc7   :  { %12639 = vst [vmem:[#allocation36_spill] sm:$0xff] %v10056_v35  ;;  %v2704_v43 = vcombine.high %v10079_v5, %v10082_v15  ;;  %v8744_v17 = vld [vmem:[#allocation3 + $0x7e0] ss:$16 sps:$4 sm:$0xff]   ;;  %v10119_v6 = vrot.slane %v8742_v2, %v9364_v56 }
  0xc8   :  { %12641 = vst [vmem:[#allocation38_spill] sm:$0xff] %v10104_v36  ;;  %v10106_v54 = vpack.c.bf16 %v2559_v50, %v2487_v11  ;;  %v10122_v10 = vrot.slane %v8744_v17, %v9364_v56  ;;  %v10125_v11 = vrot.slane %v8746_v7, %v9364_v56  ;;  %v10128_v50 = vrot.slane %v8747_v40, %v9364_v56  ;;  %v8753_v2 = vld [vmem:[#allocation5 + $0x700] ss:$16 sps:$4 sm:$0xff]   ;;  %v8755_v17 = vld [vmem:[#allocation5 + $0x704] ss:$16 sps:$4 sm:$0xff]  }
  0xc9   :  { %v10116_v61 = vpack.c.bf16 %v2704_v43, %v2632_v3  ;;  %v8752_v3 = vld [vmem:[#allocation5 + $0x504] ss:$16 sps:$4 sm:$0xff]   ;;  %v2629_v43 = vcombine.low %v10059_v57, %v10062_v44  ;;  %5436 = vmatprep.subr.bf16.mxu1 %v8755_v17  ;;  %v8764_v40 = vld [vmem:[#allocation3 + $0xc] ss:$16 sps:$4 sm:$0xff]  }
  0xca   :  { %12642 = vst [vmem:[#allocation39_spill] sm:$0xff] %v10106_v54  ;;  %v2846_v57 = vcombine.high %v10119_v6, %v10122_v10  ;;  %v2776_v44 = vcombine.high %v10125_v11, %v10128_v50  ;;  %5243 = vmatprep.subr.bf16.mxu0 %v8752_v3  ;;  %5437 = vmatpush2.bf16.msra.mxu1 %v8753_v2  ;;  %v8765_v3 = vld [vmem:[#allocation3 + $0x2c] ss:$16 sps:$4 sm:$0xff]  }
  0xcb   :  { %4980 = vmatmul.mubr.bf16.gmra.mxu0 %v10052_v58  ;;  %v8749_v58 = vld [vmem:[#allocation3 + $0x7e4] ss:$16 sps:$4 sm:$0xff]   ;;  %12644 = vst [vmem:[#allocation41_spill] sm:$0xff] %v10116_v61  ;;  %v8766_v17 = vld [vmem:[#allocation3 + $0x4c] ss:$16 sps:$4 sm:$0xff]   ;;  %v648_v2 = vrot.slane %v8765_v3, %v9364_v56 }
  0xcc   :  { %5173 = vmatmul.mubr.bf16.gmra.mxu1 %v10054_v0  ;;  %4989 = vmatprep.mubr.bf16.mxu0 %v10056_v35  ;;  %v10111_v35 = vrot.slane %v8738_v28, %v9364_v56  ;;  %v10114_v0 = vrot.slane %v8740_v29, %v9364_v56  ;;  %v2701_v28 = vcombine.low %v10067_v45, %v10070_v23  ;;  %v8756_v23 = vld [vmem:[#allocation3 + $0x8] ss:$16 sps:$4 sm:$0xff]  }
  0xcd   :  { %5182 = vmatprep.mubr.bf16.mxu1 %v10064_v30  ;;  %v10108_v30 = vpack.c.bf16 %v2702_v22, %v2630_v9  ;;  %v10131_v9 = vrot.slane %v8748_v51, %v9364_v56  ;;  %v10134_v22 = vrot.slane %v8749_v58, %v9364_v56  ;;  %v2631_v29 = vcombine.low %v10073_v37, %v10076_v46  ;;  %v8758_v37 = vld [vmem:[#allocation3 + $0x28] ss:$16 sps:$4 sm:$0xff]  }
  0xce   :  { %v2703_v58 = vcombine.low %v10079_v5, %v10082_v15  ;;  %v2774_v7 = vcombine.high %v10111_v35, %v10114_v0  ;;  %v10156_v46 = vpack.c.bf16 %v2701_v28, %v2629_v43  ;;  %5244 = vmatpush2.bf16.msra.mxu0 %v8750_v25  ;;  %v8760_v5 = vld [vmem:[#allocation3 + $0x48] ss:$16 sps:$4 sm:$0xff]   ;;  %v634_v28 = vrot.slane %v8764_v40, %v9364_v56 }
  0xcf   :  { %12643 = vst [vmem:[#allocation40_spill] sm:$0xff] %v10108_v30  ;;  %v2848_v45 = vcombine.high %v10131_v9, %v10134_v22  ;;  %v8762_v15 = vld [vmem:[#allocation3 + $0x68] ss:$16 sps:$4 sm:$0xff]   ;;  %v699_v25 = vrot.slane %v8760_v5, %v9364_v56 }
  0xd0   :  { %12645 = vst [vmem:[#allocation42_spill] sm:$0xff] %v10156_v46  ;;  %v10158_v51 = vpack.c.bf16 %v2703_v58, %v2631_v29  ;;  %v713_v43 = vrot.slane %v8762_v15, %v9364_v56  ;;  %v2773_v29 = vcombine.low %v10111_v35, %v10114_v0  ;;  %v706_v58 = vrot.slane %v8766_v17, %v9364_v56  ;;  %v8783_v17 = vld [vmem:[#allocation3 + $0xac] ss:$16 sps:$4 sm:$0xff]  }
  0xd1   :  { %v10166_v42 = vpack.c.bf16 %v2848_v45, %v2776_v44  ;;  %v2775_v44 = vcombine.low %v10125_v11, %v10128_v50  ;;  %v2847_v45 = vcombine.low %v10131_v9, %v10134_v22  ;;  %v652_v5 = vcombine.high %v634_v28, %v648_v2  ;;  %v8776_v11 = vld [vmem:[#allocation3 + $0xa8] ss:$16 sps:$4 sm:$0xff]   ;;  %v8782_v9 = vld [vmem:[#allocation3 + $0x8c] ss:$16 sps:$4 sm:$0xff]  }
  0xd2   :  { %12646 = vst [vmem:[#allocation43_spill] sm:$0xff] %v10158_v51  ;;  %v722_v0 = vcombine.high %v699_v25, %v713_v43  ;;  %v8778_v50 = vld [vmem:[#allocation3 + $0xc8] ss:$16 sps:$4 sm:$0xff]  }
  0xd3   :  { %4990 = vmatmul.mubr.bf16.gmra.mxu0 %v10104_v36  ;;  %v8767_v36 = vld [vmem:[#allocation3 + $0x6c] ss:$16 sps:$4 sm:$0xff]   ;;  %12648 = vst [vmem:[#allocation45_spill] sm:$0xff] %v10166_v42  ;;  %v10189_v15 = vpack.c.bf16 %v2847_v45, %v2775_v44  ;;  %v792_v44 = vrot.slane %v8783_v17, %v9364_v56 }
  0xd4   :  { %5183 = vmatmul.mubr.bf16.gmra.mxu1 %v10106_v54  ;;  %4999 = vmatprep.mubr.bf16.mxu0 %v10108_v30  ;;  %v10163_v30 = vrot.slane %v8756_v23, %v9364_v56  ;;  %v641_v54 = vrot.slane %v8758_v37, %v9364_v56  ;;  %v720_v23 = vrot.slane %v8767_v36, %v9364_v56  ;;  %v8773_v37 = vld [vmem:[#allocation5 + $0x2ec] ss:$16 sps:$4 sm:$0xff]   ;;  %v8780_v36 = vld [vmem:[#allocation3 + $0xe8] ss:$16 sps:$4 sm:$0xff]  }
  0xd5   :  { %5192 = vmatprep.mubr.bf16.mxu1 %v10116_v61  ;;  %v10160_v61 = vpack.c.bf16 %v2846_v57, %v2774_v7  ;;  %v8770_v7 = vld [vmem:[#allocation5 + $0xec] ss:$16 sps:$4 sm:$0xff]   ;;  %v2845_v57 = vcombine.low %v10119_v6, %v10122_v10  ;;  %5792 = vmatprep.subr.bf16.mxu1 %v8773_v37  ;;  %v8774_v10 = vld [vmem:[#allocation3 + $0x88] ss:$16 sps:$4 sm:$0xff]   ;;  %12650 = vst [vmem:[#allocation47_spill] sm:$0xff] %v10189_v15 }
  0xd6   :  { %v650_v35 = vcombine.high %v10163_v30, %v641_v54  ;;  %v724_v6 = vcombine.high %v706_v58, %v720_v23  ;;  %5599 = vmatprep.subr.bf16.mxu0 %v8770_v7  ;;  %v10199_v7 = vrot.slane %v8776_v11, %v9364_v56  ;;  %v10202_v37 = vrot.slane %v8778_v50, %v9364_v56 }
  0xd7   :  { %12647 = vst [vmem:[#allocation44_spill] sm:$0xff] %v10160_v61  ;;  %v10187_v22 = vpack.c.bf16 %v2845_v57, %v2773_v29  ;;  %v857_v29 = vrot.slane %v8780_v36, %v9364_v56  ;;  %v778_v57 = vrot.slane %v8782_v9, %v9364_v56  ;;  %v8792_v36 = vld [vmem:[#allocation3 + $0x108] ss:$16 sps:$4 sm:$0xff]  }
  0xd8   :  { %v10191_v40 = vpack.c.bf16 %v722_v0, %v650_v35  ;;  %v10193_v3 = vpack.c.bf16 %v724_v6, %v652_v5  ;;  %v649_v0 = vcombine.low %v10163_v30, %v641_v54  ;;  %v721_v5 = vcombine.low %v699_v25, %v713_v43  ;;  %v8794_v30 = vld [vmem:[#allocation3 + $0x128] ss:$16 sps:$4 sm:$0xff]  }
  0xd9   :  { %12649 = vst [vmem:[#allocation46_spill] sm:$0xff] %v10187_v22  ;;  %v651_v6 = vcombine.low %v634_v28, %v648_v2  ;;  %v796_v50 = vcombine.high %v778_v57, %v792_v44  ;;  %v8768_v25 = vld [vmem:[#allocation5 + $0xe8] ss:$16 sps:$4 sm:$0xff]   ;;  %v8800_v28 = vld [vmem:[#allocation3 + $0x10c] ss:$16 sps:$4 sm:$0xff]   ;;  %v10227_v17 = vrot.slane %v8794_v30, %v9364_v56 }
  0xda   :  { %12651 = vst [vmem:[#allocation48_spill] sm:$0xff] %v10191_v40  ;;  %12652 = vst [vmem:[#allocation49_spill] sm:$0xff] %v10193_v3  ;;  %v10217_v54 = vpack.c.bf16 %v721_v5, %v649_v0  ;;  %v8796_v43 = vld [vmem:[#allocation3 + $0x148] ss:$16 sps:$4 sm:$0xff]  }
  0xdb   :  { %5000 = vmatmul.mubr.bf16.gmra.mxu0 %v10156_v46  ;;  %v8798_v9 = vld [vmem:[#allocation3 + $0x168] ss:$16 sps:$4 sm:$0xff]  }
  0xdc   :  { %5193 = vmatmul.mubr.bf16.gmra.mxu1 %v10158_v51  ;;  %5009 = vmatprep.mubr.bf16.mxu0 %v10160_v61  ;;  %v8784_v61 = vld [vmem:[#allocation3 + $0xcc] ss:$16 sps:$4 sm:$0xff]   ;;  %12653 = vst [vmem:[#allocation50_spill] sm:$0xff] %v10217_v54  ;;  %v8771_v0 = vld [vmem:[#allocation5 + $0x2e8] ss:$16 sps:$4 sm:$0xff]  }
  0xdd   :  { %5202 = vmatprep.mubr.bf16.mxu1 %v10166_v42  ;;  %v8785_v51 = vld [vmem:[#allocation3 + $0xec] ss:$16 sps:$4 sm:$0xff]   ;;  %v10196_v42 = vrot.slane %v8774_v10, %v9364_v56  ;;  %v850_v45 = vrot.slane %v8784_v61, %v9364_v56  ;;  %v723_v10 = vcombine.low %v706_v58, %v720_v23  ;;  %v866_v61 = vcombine.high %v10202_v37, %v857_v29  ;;  %v8786_v46 = vld [vmem:[#allocation5 + $0xc8] ss:$16 sps:$4 sm:$0xff]  }
  0xde   :  { %v864_v35 = vrot.slane %v8785_v51, %v9364_v56  ;;  %v10224_v23 = vrot.slane %v8792_v36, %v9364_v56 }
  0xdf   :  { %v794_v11 = vcombine.high %v10196_v42, %v10199_v7  ;;  %v10219_v2 = vpack.c.bf16 %v723_v10, %v651_v6  ;;  %v793_v58 = vcombine.low %v10196_v42, %v10199_v7  ;;  %v10235_v6 = vrot.slane %v8798_v9, %v9364_v56  ;;  %v8788_v10 = vld [vmem:[#allocation5 + $0xcc] ss:$16 sps:$4 sm:$0xff]  }
  0xe0   :  { %v868_v51 = vcombine.high %v850_v45, %v864_v35  ;;  %v10238_v42 = vrot.slane %v8800_v28, %v9364_v56  ;;  %v867_v9 = vcombine.low %v850_v45, %v864_v35  ;;  %v8791_v28 = vld [vmem:[#allocation5 + $0x2cc] ss:$16 sps:$4 sm:$0xff]  }
  0xe1   :  { %12654 = vst [vmem:[#allocation51_spill] sm:$0xff] %v10219_v2  ;;  %v10229_v5 = vpack.c.bf16 %v866_v61, %v794_v11  ;;  %v865_v61 = vcombine.low %v10202_v37, %v857_v29  ;;  %v8806_v37 = vld [vmem:[#allocation5 + $0xac] ss:$16 sps:$4 sm:$0xff]  }
  0xe2   :  { %v10240_v7 = vpack.c.bf16 %v868_v51, %v796_v50  ;;  %v938_v50 = vcombine.high %v10224_v23, %v10227_v17  ;;  %v8809_v29 = vld [vmem:[#allocation5 + $0x2ac] ss:$16 sps:$4 sm:$0xff]   ;;  %v8814_v51 = vld [vmem:[#allocation3 + $0x1c8] ss:$16 sps:$4 sm:$0xff]  }
  0xe3   :  { %5010 = vmatmul.mubr.bf16.gmra.mxu0 %v10187_v22  ;;  %12655 = vst [vmem:[#allocation52_spill] sm:$0xff] %v10229_v5  ;;  %v10232_v22 = vrot.slane %v8796_v43, %v9364_v56  ;;  %v795_v43 = vcombine.low %v778_v57, %v792_v44  ;;  %v8810_v57 = vld [vmem:[#allocation3 + $0x188] ss:$16 sps:$4 sm:$0xff]   ;;  %v10264_v45 = vpack.c.bf16 %v865_v61, %v793_v58  ;;  %v8820_v58 = vld [vmem:[#allocation3 + $0x1cc] ss:$16 sps:$4 sm:$0xff]  }
  0xe4   :  { %5203 = vmatmul.mubr.bf16.gmra.mxu1 %v10189_v15  ;;  %5245 = vmatprep.mubr.bf16.mxu0 %v10191_v40  ;;  %v8802_v40 = vld [vmem:[#allocation3 + $0x14c] ss:$16 sps:$4 sm:$0xff]   ;;  %12656 = vst [vmem:[#allocation53_spill] sm:$0xff] %v10240_v7  ;;  %v8812_v44 = vld [vmem:[#allocation3 + $0x1a8] ss:$16 sps:$4 sm:$0xff]  }
  0xe5   :  { %5438 = vmatprep.mubr.bf16.mxu1 %v10193_v3  ;;  %v8801_v3 = vld [vmem:[#allocation3 + $0x12c] ss:$16 sps:$4 sm:$0xff]   ;;  %v10246_v30 = vrot.slane %v8802_v40, %v9364_v56  ;;  %v1010_v40 = vcombine.high %v10232_v22, %v10235_v6  ;;  %12657 = vst [vmem:[#allocation54_spill] sm:$0xff] %v10264_v45  ;;  %v10266_v35 = vpack.c.bf16 %v867_v9, %v795_v43 }
  0xe6   :  { %v8803_v15 = vld [vmem:[#allocation3 + $0x16c] ss:$16 sps:$4 sm:$0xff]   ;;  %v10243_v36 = vrot.slane %v8801_v3, %v9364_v56  ;;  %v10279_v43 = vrot.slane %v8814_v51, %v9364_v56 }
  0xe7   :  { %v10249_v11 = vrot.slane %v8803_v15, %v9364_v56  ;;  %12658 = vst [vmem:[#allocation55_spill] sm:$0xff] %v10266_v35  ;;  %v10268_v63 = vpack.c.bf16 %v1010_v40, %v938_v50  ;;  %v8821_v61 = vld [vmem:[#allocation3 + $0x1ec] ss:$16 sps:$4 sm:$0xff]   ;;  %v8807_v50 = vld [vmem:[#allocation5 + $0x2a8] ss:$16 sps:$4 sm:$0xff]  }
  0xe8   :  { %v940_v15 = vcombine.high %v10238_v42, %v10243_v36  ;;  %v8836_v51 = vld [vmem:[#allocation3 + $0x20c] ss:$16 sps:$4 sm:$0xff]  }
  0xe9   :  { %v1012_v3 = vcombine.high %v10246_v30, %v10249_v11  ;;  %12659 = vst [vmem:[#allocation56_spill] sm:$0xff] %v10268_v63 }
  0xeb   :  { %5246 = vmatmul.mubr.bf16.vlgmr.msra.gmra.mxu0 %v10217_v54  ;;  %v8818_v54 = vld [vmem:[#allocation3 + $0x18c] ss:$16 sps:$4 sm:$0xff]   ;;  %v10270_v55 = vpack.c.bf16 %v1012_v3, %v940_v15  ;;  %v10291_v15 = vrot.slane %v8820_v58, %v9364_v56 }
  0xec   :  { %5439 = vmatmul.mubr.bf16.vlgmr.msra.gmra.mxu1 %v10219_v2  ;;  %5600 = vmatpush1.bf16.msra.mxu0 %v8768_v25  ;;  %v8816_v2 = vld [vmem:[#allocation3 + $0x1e8] ss:$16 sps:$4 sm:$0xff]   ;;  %v10273_v25 = vrot.slane %v8810_v57, %v9364_v56  ;;  %v8824_v3 = vld [vmem:[#allocation5 + $0x8c] ss:$16 sps:$4 sm:$0xff]  }
  0xed   :  { %5793 = vmatpush1.bf16.msra.mxu1 %v8771_v0  ;;  %5255 = vmatprep.mubr.bf16.mxu0 %v10229_v5  ;;  %12660 = vst [vmem:[#allocation57_spill] sm:$0xff] %v10270_v55  ;;  %v10276_v0 = vrot.slane %v8812_v44, %v9364_v56  ;;  %v10282_v9 = vrot.slane %v8816_v2, %v9364_v56  ;;  %v8832_v57 = vld [vmem:[#allocation3 + $0x248] ss:$16 sps:$4 sm:$0xff]  }
  0xee   :  { %5448 = vmatprep.mubr.bf16.mxu1 %v10240_v7  ;;  %5601 = vmatprep.subr.bf16.mxu0 %v8788_v10  ;;  %v8819_v7 = vld [vmem:[#allocation3 + $0x1ac] ss:$16 sps:$4 sm:$0xff]   ;;  %v8804_v10 = vld [vmem:[#allocation5 + $0xa8] ss:$16 sps:$4 sm:$0xff]   ;;  %v939_v2 = vcombine.low %v10238_v42, %v10243_v36 }
  0xef   :  { %5794 = vmatprep.subr.bf16.mxu1 %v8791_v28  ;;  %v10285_v28 = vrot.slane %v8818_v54, %v9364_v56  ;;  %v10288_v40 = vrot.slane %v8819_v7, %v9364_v56  ;;  %v10300_v54 = vrot.slane %v8821_v61, %v9364_v56  ;;  %v1011_v7 = vcombine.low %v10246_v30, %v10249_v11  ;;  %v8828_v30 = vld [vmem:[#allocation3 + $0x208] ss:$16 sps:$4 sm:$0xff]  }
  0xf0   :  { %5602 = vmatpush1.bf16.msra.mxu0 %v8786_v46  ;;  %v1009_v46 = vcombine.low %v10232_v22, %v10235_v6  ;;  %v1154_v22 = vcombine.high %v10279_v43, %v10282_v9  ;;  %v8825_v6 = vld [vmem:[#allocation5 + $0x288] ss:$16 sps:$4 sm:$0xff]  }
  0xf1   :  { %5795 = vmatpush1.bf16.msra.mxu1 %v8789_v16  ;;  %5603 = vmatprep.subr.bf16.mxu0 %v8806_v37  ;;  %v937_v16 = vcombine.low %v10224_v23, %v10227_v17  ;;  %v8827_v37 = vld [vmem:[#allocation5 + $0x28c] ss:$16 sps:$4 sm:$0xff]   ;;  %v1082_v23 = vcombine.high %v10273_v25, %v10276_v0  ;;  %v8822_v17 = vld [vmem:[#allocation5 + $0x88] ss:$16 sps:$4 sm:$0xff]   ;;  %v1084_v42 = vcombine.high %v10285_v28, %v10288_v40 }
  0xf2   :  { %5796 = vmatprep.subr.bf16.mxu1 %v8809_v29  ;;  %v1156_v36 = vcombine.high %v10291_v15, %v10300_v54  ;;  %v8830_v11 = vld [vmem:[#allocation3 + $0x228] ss:$16 sps:$4 sm:$0xff]   ;;  %v10318_v58 = vpack.c.bf16 %v1011_v7, %v939_v2  ;;  %v10337_v2 = vrot.slane %v8836_v51, %v9364_v56 }
  0xf3   :  { %5256 = vmatmul.mubr.bf16.gmra.mxu0 %v10264_v45  ;;  %v10316_v29 = vpack.c.bf16 %v1009_v46, %v937_v16  ;;  %v8834_v44 = vld [vmem:[#allocation3 + $0x268] ss:$16 sps:$4 sm:$0xff]   ;;  %v10320_v61 = vpack.c.bf16 %v1154_v22, %v1082_v23  ;;  %v10331_v46 = vrot.slane %v8832_v57, %v9364_v56  ;;  %v8842_v22 = vld [vmem:[#allocation5 + $0x6c] ss:$16 sps:$4 sm:$0xff]   ;;  %v1155_v57 = vcombine.low %v10291_v15, %v10300_v54 }
  0xf4   :  { %5449 = vmatmul.mubr.bf16.gmra.mxu1 %v10266_v35  ;;  %5265 = vmatprep.mubr.bf16.mxu0 %v10268_v63  ;;  %12662 = vst [vmem:[#allocation59_spill] sm:$0xff] %v10318_v58  ;;  %v10326_v63 = vrot.slane %v8830_v11, %v9364_v56  ;;  %v8839_v35 = vld [vmem:[#allocation3 + $0x26c] ss:$16 sps:$4 sm:$0xff]   ;;  %v10328_v16 = vpack.c.bf16 %v1156_v36, %v1084_v42  ;;  %v8850_v15 = vld [vmem:[#allocation3 + $0x2c8] ss:$16 sps:$4 sm:$0xff]  }
  0xf5   :  { %5458 = vmatprep.mubr.bf16.mxu1 %v10270_v55  ;;  %5604 = vmatpush1.bf16.msra.mxu0 %v8804_v10  ;;  %12661 = vst [vmem:[#allocation58_spill] sm:$0xff] %v10316_v29  ;;  %12663 = vst [vmem:[#allocation60_spill] sm:$0xff] %v10320_v61  ;;  %v10323_v55 = vrot.slane %v8828_v30, %v9364_v56  ;;  %v8837_v10 = vld [vmem:[#allocation3 + $0x22c] ss:$16 sps:$4 sm:$0xff]   ;;  %v1081_v42 = vcombine.low %v10273_v25, %v10276_v0  ;;  %v8852_v54 = vld [vmem:[#allocation3 + $0x2e8] ss:$16 sps:$4 sm:$0xff]  }
  0xf6   :  { %5797 = vmatpush1.bf16.msra.mxu1 %v8807_v50  ;;  %5605 = vmatprep.subr.bf16.mxu0 %v8824_v3  ;;  %v8838_v50 = vld [vmem:[#allocation3 + $0x24c] ss:$16 sps:$4 sm:$0xff]   ;;  %12664 = vst [vmem:[#allocation61_spill] sm:$0xff] %v10328_v16  ;;  %v10334_v3 = vrot.slane %v8834_v44, %v9364_v56  ;;  %v10340_v7 = vrot.slane %v8837_v10, %v9364_v56 }
  0xf7   :  { %5798 = vmatprep.subr.bf16.mxu1 %v8827_v37  ;;  %v8840_v37 = vld [vmem:[#allocation5 + $0x68] ss:$16 sps:$4 sm:$0xff]   ;;  %v10343_v23 = vrot.slane %v8838_v50, %v9364_v56  ;;  %v1153_v36 = vcombine.low %v10279_v43, %v10282_v9  ;;  %v1083_v30 = vcombine.low %v10285_v28, %v10288_v40  ;;  %v10352_v11 = vrot.slane %v8839_v35, %v9364_v56  ;;  %v8854_v44 = vld [vmem:[#allocation3 + $0x28c] ss:$16 sps:$4 sm:$0xff]  }
  0xf8   :  { %v1226_v25 = vcombine.high %v10323_v55, %v10326_v63  ;;  %v1298_v0 = vcombine.high %v10331_v46, %v10334_v3  ;;  %v1228_v35 = vcombine.high %v10337_v2, %v10340_v7  ;;  %v8846_v9 = vld [vmem:[#allocation3 + $0x288] ss:$16 sps:$4 sm:$0xff]  }
  0xf9   :  { %5606 = vmatpush1.bf16.msra.mxu0 %v8822_v17  ;;  %v8843_v17 = vld [vmem:[#allocation5 + $0x268] ss:$16 sps:$4 sm:$0xff]   ;;  %v1300_v43 = vcombine.high %v10343_v23, %v10352_v11  ;;  %v10368_v40 = vpack.c.bf16 %v1153_v36, %v1081_v42  ;;  %v10370_v51 = vpack.c.bf16 %v1155_v57, %v1083_v30  ;;  %v10375_v50 = vrot.slane %v8846_v9, %v9364_v56 }
  0xfa   :  { %5799 = vmatpush1.bf16.msra.mxu1 %v8825_v6  ;;  %v8845_v6 = vld [vmem:[#allocation5 + $0x26c] ss:$16 sps:$4 sm:$0xff]   ;;  %5607 = vmatprep.subr.bf16.mxu0 %v8842_v22  ;;  %v8848_v28 = vld [vmem:[#allocation3 + $0x2a8] ss:$16 sps:$4 sm:$0xff]   ;;  %v10372_v10 = vpack.c.bf16 %v1298_v0, %v1226_v25  ;;  %v10386_v36 = vrot.slane %v8852_v54, %v9364_v56  ;;  %v10389_v30 = vrot.slane %v8854_v44, %v9364_v56 }
  0xfb   :  { %5266 = vmatmul.mubr.bf16.gmra.mxu0 %v10316_v29  ;;  %5800 = vmatprep.subr.bf16.mxu1 %v8845_v6  ;;  %12665 = vst [vmem:[#allocation62_spill] sm:$0xff] %v10368_v40  ;;  %12666 = vst [vmem:[#allocation63_spill] sm:$0xff] %v10370_v51  ;;  %v8855_v22 = vld [vmem:[#allocation3 + $0x2ac] ss:$16 sps:$4 sm:$0xff]   ;;  %v10380_v42 = vpack.c.bf16 %v1300_v43, %v1228_v35  ;;  %v1225_v43 = vcombine.low %v10323_v55, %v10326_v63 }
  0xfc   :  { %5459 = vmatmul.mubr.bf16.gmra.mxu1 %v10318_v58  ;;  %5275 = vmatprep.mubr.bf16.mxu0 %v10320_v61  ;;  %12667 = vst [vmem:[#allocation64_spill] sm:$0xff] %v10372_v10  ;;  %v8856_v6 = vld [vmem:[#allocation3 + $0x2cc] ss:$16 sps:$4 sm:$0xff]   ;;  %v10392_v57 = vrot.slane %v8855_v22, %v9364_v56  ;;  %v1297_v9 = vcombine.low %v10331_v46, %v10334_v3  ;;  %v8864_v3 = vld [vmem:[#allocation3 + $0x308] ss:$16 sps:$4 sm:$0xff]  }
  0xfd   :  { %5468 = vmatprep.mubr.bf16.mxu1 %v10328_v16  ;;  %5608 = vmatpush1.bf16.msra.mxu0 %v8840_v37  ;;  %v10378_v16 = vrot.slane %v8848_v28, %v9364_v56  ;;  %v8857_v61 = vld [vmem:[#allocation3 + $0x2ec] ss:$16 sps:$4 sm:$0xff]   ;;  %12668 = vst [vmem:[#allocation65_spill] sm:$0xff] %v10380_v42  ;;  %v10383_v37 = vrot.slane %v8850_v15, %v9364_v56  ;;  %v8861_v15 = vld [vmem:[#allocation5 + $0x248] ss:$16 sps:$4 sm:$0xff]  }
  0xfe   :  { %5801 = vmatpush1.bf16.msra.mxu1 %v8843_v17  ;;  %v8858_v17 = vld [vmem:[#allocation5 + $0x48] ss:$16 sps:$4 sm:$0xff]   ;;  %v10395_v25 = vrot.slane %v8856_v6, %v9364_v56  ;;  %v10398_v0 = vrot.slane %v8857_v61, %v9364_v56  ;;  %v8860_v35 = vld [vmem:[#allocation5 + $0x4c] ss:$16 sps:$4 sm:$0xff]   ;;  %v1227_v28 = vcombine.low %v10337_v2, %v10340_v7  ;;  %v1299_v61 = vcombine.low %v10343_v23, %v10352_v11 }
  0xff   :  { %v8863_v54 = vld [vmem:[#allocation5 + $0x24c] ss:$16 sps:$4 sm:$0xff]   ;;  %v1370_v44 = vcombine.high %v10375_v50, %v10378_v16  ;;  %v1442_v55 = vcombine.high %v10383_v37, %v10386_v36  ;;  %v1372_v63 = vcombine.high %v10389_v30, %v10392_v57  ;;  %5609 = vmatprep.subr.bf16.mxu0 %v8860_v35  ;;  %v8866_v2 = vld [vmem:[#allocation3 + $0x328] ss:$16 sps:$4 sm:$0xff]   ;;  %v10420_v7 = vpack.c.bf16 %v1297_v9, %v1225_v43 }
 0x100   :  { %v1444_v46 = vcombine.high %v10395_v25, %v10398_v0  ;;  %5802 = vmatprep.subr.bf16.mxu1 %v8863_v54  ;;  %v8868_v23 = vld [vmem:[#allocation3 + $0x348] ss:$16 sps:$4 sm:$0xff]   ;;  %v8872_v22 = vld [vmem:[#allocation3 + $0x30c] ss:$16 sps:$4 sm:$0xff]   ;;  %v10422_v6 = vpack.c.bf16 %v1299_v61, %v1227_v28 }
 0x101   :  { %12669 = vst [vmem:[#allocation66_spill] sm:$0xff] %v10420_v7  ;;  %5610 = vmatpush1.bf16.msra.mxu0 %v8858_v17  ;;  %v8870_v11 = vld [vmem:[#allocation3 + $0x368] ss:$16 sps:$4 sm:$0xff]   ;;  %v8873_v35 = vld [vmem:[#allocation3 + $0x32c] ss:$16 sps:$4 sm:$0xff]   ;;  %v10435_v17 = vrot.slane %v8868_v23, %v9364_v56  ;;  %v10441_v28 = vrot.slane %v8872_v22, %v9364_v56 }
 0x102   :  { %5803 = vmatpush1.bf16.msra.mxu1 %v8861_v15  ;;  %12670 = vst [vmem:[#allocation67_spill] sm:$0xff] %v10422_v6  ;;  %v8874_v54 = vld [vmem:[#allocation3 + $0x34c] ss:$16 sps:$4 sm:$0xff]   ;;  %v10432_v43 = vpack.c.bf16 %v1444_v46, %v1372_v63  ;;  %v10438_v9 = vrot.slane %v8870_v11, %v9364_v56  ;;  %v8876_v15 = vld [vmem:[#allocation5 + $0x28] ss:$16 sps:$4 sm:$0xff]   ;;  %v10444_v61 = vrot.slane %v8873_v35, %v9364_v56 }
 0x103   :  { %5276 = vmatmul.mubr.bf16.gmra.mxu0 %v10368_v40  ;;  %v8875_v40 = vld [vmem:[#allocation3 + $0x36c] ss:$16 sps:$4 sm:$0xff]   ;;  %v1369_v46 = vcombine.low %v10375_v50, %v10378_v16  ;;  %v8879_v23 = vld [vmem:[#allocation5 + $0x228] ss:$16 sps:$4 sm:$0xff]  }
 0x104   :  { %5469 = vmatmul.mubr.bf16.gmra.mxu1 %v10370_v51  ;;  %5285 = vmatprep.mubr.bf16.mxu0 %v10372_v10  ;;  %v10427_v10 = vrot.slane %v8864_v3, %v9364_v56  ;;  %v10430_v51 = vrot.slane %v8866_v2, %v9364_v56  ;;  %12672 = vst [vmem:[#allocation69_spill] sm:$0xff] %v10432_v43  ;;  %v8878_v63 = vld [vmem:[#allocation5 + $0x2c] ss:$16 sps:$4 sm:$0xff]  }
 0x105   :  { %5478 = vmatprep.mubr.bf16.mxu1 %v10380_v42  ;;  %v10424_v42 = vpack.c.bf16 %v1442_v55, %v1370_v44  ;;  %v10447_v44 = vrot.slane %v8874_v54, %v9364_v56  ;;  %v10450_v55 = vrot.slane %v8875_v40, %v9364_v56  ;;  %v1441_v3 = vcombine.low %v10383_v37, %v10386_v36  ;;  %v8881_v11 = vld [vmem:[#allocation5 + $0x22c] ss:$16 sps:$4 sm:$0xff]   ;;  %v8882_v36 = vld [vmem:[#allocation3 + $0x388] ss:$16 sps:$4 sm:$0xff]  }
 0x106   :  { %v1371_v2 = vcombine.low %v10389_v30, %v10392_v57  ;;  %v1443_v40 = vcombine.low %v10395_v25, %v10398_v0  ;;  %v1514_v22 = vcombine.high %v10427_v10, %v10430_v51  ;;  %v1586_v16 = vcombine.high %v10435_v17, %v10438_v9  ;;  %5611 = vmatprep.subr.bf16.mxu0 %v8878_v63  ;;  %v8884_v30 = vld [vmem:[#allocation3 + $0x3a8] ss:$16 sps:$4 sm:$0xff]   ;;  %v8890_v35 = vld [vmem:[#allocation3 + $0x38c] ss:$16 sps:$4 sm:$0xff]  }
 0x107   :  { %12671 = vst [vmem:[#allocation68_spill] sm:$0xff] %v10424_v42  ;;  %v1516_v50 = vcombine.high %v10441_v28, %v10444_v61  ;;  %v1588_v37 = vcombine.high %v10447_v44, %v10450_v55  ;;  %5804 = vmatprep.subr.bf16.mxu1 %v8881_v11  ;;  %v10472_v57 = vpack.c.bf16 %v1441_v3, %v1369_v46  ;;  %v8886_v25 = vld [vmem:[#allocation3 + $0x3c8] ss:$16 sps:$4 sm:$0xff]   ;;  %v8891_v63 = vld [vmem:[#allocation3 + $0x3ac] ss:$16 sps:$4 sm:$0xff]  }
 0x108   :  { %5612 = vmatpush1.bf16.msra.mxu0 %v8876_v15  ;;  %5805 = vmatpush1.bf16.msra.mxu1 %v8879_v23  ;;  %v8888_v0 = vld [vmem:[#allocation3 + $0x3e8] ss:$16 sps:$4 sm:$0xff]   ;;  %v10474_v54 = vpack.c.bf16 %v1443_v40, %v1371_v2  ;;  %v8892_v11 = vld [vmem:[#allocation3 + $0x3cc] ss:$16 sps:$4 sm:$0xff]   ;;  %v10487_v15 = vrot.slane %v8886_v25, %v9364_v56  ;;  %v10493_v2 = vrot.slane %v8890_v35, %v9364_v56 }
 0x109   :  { %12673 = vst [vmem:[#allocation70_spill] sm:$0xff] %v10472_v57  ;;  %v10484_v46 = vpack.c.bf16 %v1588_v37, %v1516_v50  ;;  %v10490_v3 = vrot.slane %v8888_v0, %v9364_v56  ;;  %v8894_v23 = vld [vmem:[#allocation5 + $0x8] ss:$16 sps:$4 sm:$0xff]   ;;  %v10496_v40 = vrot.slane %v8891_v63, %v9364_v56  ;;  %v8896_v50 = vld [vmem:[#allocation5 + $0xc] ss:$16 sps:$4 sm:$0xff]   ;;  %v1513_v37 = vcombine.low %v10427_v10, %v10430_v51 }
 0x10a   :  { %12674 = vst [vmem:[#allocation71_spill] sm:$0xff] %v10474_v54  ;;  %v8897_v25 = vld [vmem:[#allocation5 + $0x208] ss:$16 sps:$4 sm:$0xff]   ;;  %v8899_v0 = vld [vmem:[#allocation5 + $0x20c] ss:$16 sps:$4 sm:$0xff]   ;;  %5613 = vmatprep.subr.bf16.mxu0 %v8896_v50 }
 0x10b   :  { %5286 = vmatmul.mubr.bf16.gmra.mxu0 %v10420_v7  ;;  %v8893_v7 = vld [vmem:[#allocation3 + $0x3ec] ss:$16 sps:$4 sm:$0xff]   ;;  %12676 = vst [vmem:[#allocation73_spill] sm:$0xff] %v10484_v46  ;;  %v1730_v51 = vcombine.high %v10487_v15, %v10490_v3  ;;  %v1660_v10 = vcombine.high %v10493_v2, %v10496_v40  ;;  %5806 = vmatprep.subr.bf16.mxu1 %v8899_v0 }
 0x10c   :  { %5479 = vmatmul.mubr.bf16.gmra.mxu1 %v10422_v6  ;;  %5295 = vmatprep.mubr.bf16.mxu0 %v10424_v42  ;;  %v10479_v42 = vrot.slane %v8882_v36, %v9364_v56  ;;  %v10482_v6 = vrot.slane %v8884_v30, %v9364_v56  ;;  %v1585_v36 = vcombine.low %v10435_v17, %v10438_v9  ;;  %v8900_v9 = vld [vmem:[#allocation3 + $0x408] ss:$16 sps:$4 sm:$0xff]   ;;  %v8908_v63 = vld [vmem:[#allocation3 + $0x40c] ss:$16 sps:$4 sm:$0xff]  }
 0x10d   :  { %5488 = vmatprep.mubr.bf16.mxu1 %v10432_v43  ;;  %v10476_v43 = vpack.c.bf16 %v1586_v16, %v1514_v22  ;;  %v10499_v22 = vrot.slane %v8892_v11, %v9364_v56  ;;  %v10502_v16 = vrot.slane %v8893_v7, %v9364_v56  ;;  %v1515_v30 = vcombine.low %v10441_v28, %v10444_v61  ;;  %v8902_v28 = vld [vmem:[#allocation3 + $0x428] ss:$16 sps:$4 sm:$0xff]   ;;  %v8909_v50 = vld [vmem:[#allocation3 + $0x42c] ss:$16 sps:$4 sm:$0xff]  }
 0x10e   :  { %v1587_v7 = vcombine.low %v10447_v44, %v10450_v55  ;;  %v1658_v35 = vcombine.high %v10479_v42, %v10482_v6  ;;  %v10524_v61 = vpack.c.bf16 %v1585_v36, %v1513_v37  ;;  %5614 = vmatpush1.bf16.msra.mxu0 %v8894_v23  ;;  %5807 = vmatpush1.bf16.msra.mxu1 %v8897_v25  ;;  %v8904_v44 = vld [vmem:[#allocation3 + $0x448] ss:$16 sps:$4 sm:$0xff]   ;;  %v8910_v0 = vld [vmem:[#allocation3 + $0x44c] ss:$16 sps:$4 sm:$0xff]  }
 0x10f   :  { %12675 = vst [vmem:[#allocation72_spill] sm:$0xff] %v10476_v43  ;;  %v1732_v17 = vcombine.high %v10499_v22, %v10502_v16  ;;  %v8906_v55 = vld [vmem:[#allocation3 + $0x468] ss:$16 sps:$4 sm:$0xff]   ;;  %v10539_v23 = vrot.slane %v8904_v44, %v9364_v56  ;;  %v10548_v25 = vrot.slane %v8909_v50, %v9364_v56  ;;  %v8928_v58 = vld [vmem:[#allocation3 + $0x4cc] ss:$16 sps:$4 sm:$0xff]  }
 0x110   :  { %12677 = vst [vmem:[#allocation74_spill] sm:$0xff] %v10524_v61  ;;  %v10526_v11 = vpack.c.bf16 %v1587_v7, %v1515_v30  ;;  %v10542_v36 = vrot.slane %v8906_v55, %v9364_v56  ;;  %v10545_v30 = vrot.slane %v8908_v63, %v9364_v56  ;;  %v10551_v7 = vrot.slane %v8910_v0, %v9364_v56  ;;  %v8915_v44 = vld [vmem:[#allocation5 + $0x3e8] ss:$16 sps:$4 sm:$0xff]   ;;  %v8917_v55 = vld [vmem:[#allocation5 + $0x3ec] ss:$16 sps:$4 sm:$0xff]  }
 0x111   :  { %v10536_v37 = vpack.c.bf16 %v1732_v17, %v1660_v10  ;;  %v8914_v10 = vld [vmem:[#allocation5 + $0x1ec] ss:$16 sps:$4 sm:$0xff]   ;;  %v1657_v17 = vcombine.low %v10479_v42, %v10482_v6  ;;  %5808 = vmatprep.subr.bf16.mxu1 %v8917_v55 }
 0x112   :  { %12678 = vst [vmem:[#allocation75_spill] sm:$0xff] %v10526_v11  ;;  %v1874_v42 = vcombine.high %v10539_v23, %v10542_v36  ;;  %v1804_v6 = vcombine.high %v10545_v30, %v10548_v25  ;;  %5615 = vmatprep.subr.bf16.mxu0 %v8914_v10  ;;  %5809 = vmatpush2.bf16.msra.mxu1 %v8915_v44 }
 0x113   :  { %5296 = vmatmul.mubr.bf16.gmra.mxu0 %v10472_v57  ;;  %v8911_v57 = vld [vmem:[#allocation3 + $0x46c] ss:$16 sps:$4 sm:$0xff]   ;;  %12680 = vst [vmem:[#allocation77_spill] sm:$0xff] %v10536_v37 }
 0x114   :  { %5489 = vmatmul.mubr.bf16.gmra.mxu1 %v10474_v54  ;;  %5305 = vmatprep.mubr.bf16.mxu0 %v10476_v43  ;;  %v10531_v43 = vrot.slane %v8900_v9, %v9364_v56  ;;  %v10534_v54 = vrot.slane %v8902_v28, %v9364_v56  ;;  %v1729_v9 = vcombine.low %v10487_v15, %v10490_v3  ;;  %v10577_v3 = vsub.s32 0, %v9361_v49 }
 0x115   :  { %5498 = vmatprep.mubr.bf16.mxu1 %v10484_v46  ;;  %v10528_v46 = vpack.c.bf16 %v1730_v51, %v1658_v35  ;;  %v10554_v35 = vrot.slane %v8911_v57, %v9364_v56  ;;  %v8912_v51 = vld [vmem:[#allocation5 + $0x1e8] ss:$16 sps:$4 sm:$0xff]   ;;  %v1659_v28 = vcombine.low %v10493_v2, %v10496_v40  ;;  %v1731_v57 = vcombine.low %v10499_v22, %v10502_v16 }
 0x116   :  { %v1802_v63 = vcombine.high %v10531_v43, %v10534_v54  ;;  %12681 = vst [vmem:[#allocation78_spill] sm:$0xff] %v10577_v3  ;;  %v8918_v2 = vld [vmem:[#allocation3 + $0x488] ss:$16 sps:$4 sm:$0xff]   ;;  %5616 = vmatpush2.bf16.msra.mxu0 %v8912_v51  ;;  %v10579_v50 = vpack.c.bf16 %v1729_v9, %v1657_v17  ;;  %v3525_v51 = vld [vmem:[%s12468_s2] sm:$0xf]  ;;  %v1801_v55 = vcombine.low %v10531_v43, %v10534_v54 }
 0x117   :  { %12679 = vst [vmem:[#allocation76_spill] sm:$0xff] %v10528_v46  ;;  %v1876_v15 = vcombine.high %v10551_v7, %v10554_v35  ;;  %v8920_v40 = vld [vmem:[#allocation3 + $0x4a8] ss:$16 sps:$4 sm:$0xff]   ;;  %v10581_v0 = vpack.c.bf16 %v1731_v57, %v1659_v28  ;;  %v8929_v28 = vld [vmem:[#allocation3 + $0x4ec] ss:$16 sps:$4 sm:$0xff]   ;;  %v1875_v43 = vcombine.low %v10551_v7, %v10554_v35 }
 0x118   :  { %v8922_v22 = vld [vmem:[#allocation3 + $0x4c8] ss:$16 sps:$4 sm:$0xff]   ;;  %12682 = vst [vmem:[#allocation79_spill] sm:$0xff] %v10579_v50  ;;  %v10594_v44 = vrot.slane %v8920_v40, %v9364_v56  ;;  %v1803_v40 = vcombine.low %v10545_v30, %v10548_v25  ;;  %v2016_v54 = vrot.slane %v8929_v28, %v9364_v56  ;;  %v10632_v30 = vrot.slane %v3525_v51, %v10577_v3 }
 0x119   :  { %v8924_v16 = vld [vmem:[#allocation3 + $0x4e8] ss:$16 sps:$4 sm:$0xff]   ;;  %12683 = vst [vmem:[#allocation80_spill] sm:$0xff] %v10581_v0  ;;  %v10588_v10 = vpack.c.bf16 %v1876_v15, %v1804_v6  ;;  %v10597_v17 = vrot.slane %v8922_v22, %v9364_v56  ;;  %v8932_v15 = vld [vmem:[#allocation5 + $0x1cc] ss:$16 sps:$4 sm:$0xff]   ;;  %v10635_v25 = vsub.s32 1, %v9361_v49 }
 0x11a   :  { %v10600_v9 = vrot.slane %v8924_v16, %v9364_v56  ;;  %v8930_v6 = vld [vmem:[#allocation5 + $0x1c8] ss:$16 sps:$4 sm:$0xff]   ;;  %v8935_v22 = vld [vmem:[#allocation5 + $0x3cc] ss:$16 sps:$4 sm:$0xff]   ;;  %5617 = vmatprep.subr.bf16.mxu0 %v8932_v15  ;;  %v10639_v16 = vpack.c.bf16 %v1875_v43, %v1803_v40 }
 0x11b   :  { %5306 = vmatmul.mubr.bf16.gmra.mxu0 %v10524_v61  ;;  %v8927_v61 = vld [vmem:[#allocation3 + $0x4ac] ss:$16 sps:$4 sm:$0xff]   ;;  %12685 = vst [vmem:[#allocation82_spill] sm:$0xff] %v10588_v10  ;;  %12686 = vst [vmem:[#allocation83_spill] sm:$0xff] %v10635_v25  ;;  %5810 = vmatprep.subr.bf16.mxu1 %v8935_v22  ;;  %v8936_v7 = vld [vmem:[#allocation3 + $0x508] ss:$16 sps:$4 sm:$0xff]  }
 0x11c   :  { %5499 = vmatmul.mubr.bf16.gmra.mxu1 %v10526_v11  ;;  %5315 = vmatprep.mubr.bf16.mxu0 %v10528_v46  ;;  %v10586_v46 = vrot.slane %v8918_v2, %v9364_v56  ;;  %v8926_v11 = vld [vmem:[#allocation3 + $0x48c] ss:$16 sps:$4 sm:$0xff]   ;;  %v1873_v2 = vcombine.low %v10539_v23, %v10542_v36  ;;  %12688 = vst [vmem:[#allocation85_spill] sm:$0xff] %v10639_v16 }
 0x11d   :  { %5508 = vmatprep.mubr.bf16.mxu1 %v10536_v37  ;;  %v10583_v37 = vpack.c.bf16 %v1874_v42, %v1802_v63  ;;  %v10605_v57 = vrot.slane %v8926_v11, %v9364_v56  ;;  %v10608_v63 = vrot.slane %v8927_v61, %v9364_v56  ;;  %v10611_v42 = vrot.slane %v8928_v58, %v9364_v56  ;;  %v8933_v11 = vld [vmem:[#allocation5 + $0x3c8] ss:$16 sps:$4 sm:$0xff]   ;;  %v8945_v40 = vld [vmem:[#allocation3 + $0x52c] ss:$16 sps:$4 sm:$0xff]  }
 0x11e   :  { %v1946_v58 = vcombine.high %v10586_v46, %v10594_v44  ;;  %v2018_v61 = vcombine.high %v10597_v17, %v10600_v9  ;;  %v10637_v35 = vpack.c.bf16 %v1873_v2, %v1801_v55  ;;  %v1945_v28 = vcombine.low %v10586_v46, %v10594_v44  ;;  %5618 = vmatpush2.bf16.msra.mxu0 %v8930_v6  ;;  %v8944_v2 = vld [vmem:[#allocation3 + $0x50c] ss:$16 sps:$4 sm:$0xff]  }
 0x11f   :  { %12684 = vst [vmem:[#allocation81_spill] sm:$0xff] %v10583_v37  ;;  %v1948_v23 = vcombine.high %v10605_v57, %v10608_v63  ;;  %v2020_v36 = vcombine.high %v10611_v42, %v2016_v54  ;;  %5811 = vmatpush2.bf16.msra.mxu1 %v8933_v11  ;;  %v2017_v49 = vcombine.low %v10597_v17, %v10600_v9  ;;  %v8946_v43 = vld [vmem:[#allocation3 + $0x54c] ss:$16 sps:$4 sm:$0xff]  }
 0x120   :  { %12687 = vst [vmem:[#allocation84_spill] sm:$0xff] %v10637_v35  ;;  %v10643_v3 = vpack.c.bf16 %v2018_v61, %v1946_v58  ;;  %v1947_v15 = vcombine.low %v10605_v57, %v10608_v63  ;;  %v10650_v55 = vrot.slane %v8936_v7, %v9364_v56  ;;  %v8947_v17 = vld [vmem:[#allocation3 + $0x56c] ss:$16 sps:$4 sm:$0xff]   ;;  %v2019_v9 = vcombine.low %v10611_v42, %v2016_v54  ;;  %v8951_v61 = vld [vmem:[#allocation5 + $0x3a8] ss:$16 sps:$4 sm:$0xff]  }
 0x121   :  { %v10652_v46 = vpack.c.bf16 %v2020_v36, %v1948_v23  ;;  %v10665_v57 = vrot.slane %v8944_v2, %v9364_v56  ;;  %v10668_v63 = vrot.slane %v8945_v40, %v9364_v56  ;;  %v10671_v22 = vrot.slane %v8946_v43, %v9364_v56  ;;  %v8950_v58 = vld [vmem:[#allocation5 + $0x1ac] ss:$16 sps:$4 sm:$0xff]  }
 0x122   :  { %12689 = vst [vmem:[#allocation86_spill] sm:$0xff] %v10643_v3  ;;  %v8953_v23 = vld [vmem:[#allocation5 + $0x3ac] ss:$16 sps:$4 sm:$0xff]   ;;  %v10690_v40 = vpack.c.bf16 %v2017_v49, %v1945_v28  ;;  %5619 = vmatprep.subr.bf16.mxu0 %v8950_v58 }
 0x123   :  { %5316 = vmatmul.mubr.bf16.gmra.mxu0 %v10579_v50  ;;  %12690 = vst [vmem:[#allocation87_spill] sm:$0xff] %v10652_v46  ;;  %5812 = vmatprep.subr.bf16.mxu1 %v8953_v23  ;;  %v2091_v28 = vcombine.low %v10665_v57, %v10668_v63  ;;  %v8962_v23 = vld [vmem:[#allocation3 + $0x58c] ss:$16 sps:$4 sm:$0xff]  }
 0x124   :  { %5509 = vmatmul.mubr.bf16.gmra.mxu1 %v10581_v0  ;;  %5325 = vmatprep.mubr.bf16.mxu0 %v10583_v37  ;;  %v8940_v37 = vld [vmem:[#allocation3 + $0x548] ss:$16 sps:$4 sm:$0xff]   ;;  %12691 = vst [vmem:[#allocation88_spill] sm:$0xff] %v10690_v40 }
 0x125   :  { %5518 = vmatprep.mubr.bf16.mxu1 %v10588_v10  ;;  %v8938_v10 = vld [vmem:[#allocation3 + $0x528] ss:$16 sps:$4 sm:$0xff]   ;;  %v10658_v6 = vrot.slane %v8940_v37, %v9364_v56  ;;  %v10674_v37 = vrot.slane %v3525_v51, %v10635_v25  ;;  %v2092_v51 = vcombine.high %v10665_v57, %v10668_v63  ;;  %5813 = vmatpush2.bf16.msra.mxu1 %v8951_v61  ;;  %v8964_v57 = vld [vmem:[#allocation3 + $0x5cc] ss:$16 sps:$4 sm:$0xff]  }
 0x126   :  { %v8942_v0 = vld [vmem:[#allocation3 + $0x568] ss:$16 sps:$4 sm:$0xff]   ;;  %v10655_v44 = vrot.slane %v8938_v10, %v9364_v56 }
 0x127   :  { %v10661_v11 = vrot.slane %v8942_v0, %v9364_v56  ;;  %v8948_v10 = vld [vmem:[#allocation5 + $0x1a8] ss:$16 sps:$4 sm:$0xff]   ;;  %v10677_v0 = vrot.slane %v8947_v17, %v9364_v56 }
 0x128   :  { %v2090_v36 = vcombine.high %v10650_v55, %v10655_v44  ;;  %5620 = vmatpush2.bf16.msra.mxu0 %v8948_v10 }
 0x129   :  { %v2162_v7 = vcombine.high %v10658_v6, %v10661_v11  ;;  %v2164_v43 = vcombine.high %v10671_v22, %v10677_v0  ;;  %v2161_v50 = vcombine.low %v10658_v6, %v10661_v11  ;;  %v2163_v11 = vcombine.low %v10671_v22, %v10677_v0 }
 0x12a   :  { %v10727_v0 = vrot.slane %v8962_v23, %v9364_v56  ;;  %v8971_v23 = vld [vmem:[#allocation5 + $0x38c] ss:$16 sps:$4 sm:$0xff]  }
 0x12b   :  { %v4861_v42 = vpop.f32.mrf.mxu0  ;;  %5326 = vmatmul.mubr.bf16.gmra.mxu0 %v10637_v35  ;;  %v2089_v35 = vcombine.low %v10650_v55, %v10655_v44  ;;  %v10705_v44 = vpack.c.bf16 %v2162_v7, %v2090_v36  ;;  %v10707_v6 = vpack.c.bf16 %v2164_v43, %v2092_v51  ;;  %v8965_v7 = vld [vmem:[#allocation3 + $0x5ec] ss:$16 sps:$4 sm:$0xff]   ;;  %v8966_v43 = vld [vmem:[#allocation5 + $0x188] ss:$16 sps:$4 sm:$0xff]   ;;  %5814 = vmatprep.subr.bf16.mxu1 %v8971_v23 }
 0x12c   :  { %v5054_v54 = vpop.f32.mrf.mxu1  ;;  %5519 = vmatmul.mubr.bf16.gmra.mxu1 %v10639_v16  ;;  %v4862_v2 = vadd.f32 %v4861_v42, %v10632_v30  ;;  %5335 = vmatprep.mubr.bf16.mxu0 %v10643_v3  ;;  %v10694_v16 = vpack.c.bf16 %v2019_v9, %v1947_v15  ;;  %v8954_v42 = vld [vmem:[#allocation3 + $0x588] ss:$16 sps:$4 sm:$0xff]  }
 0x12d   :  { %5528 = vmatprep.mubr.bf16.mxu1 %v10652_v46  ;;  %v4863_v17 = vpop.f32.mrf.mxu0  ;;  %v8956_v15 = vld [vmem:[#allocation3 + $0x5a8] ss:$16 sps:$4 sm:$0xff]   ;;  %12694 = vst [vmem:[#allocation91_spill] sm:$0xff] %v10705_v44  ;;  %12695 = vst [vmem:[#allocation92_spill] sm:$0xff] %v10707_v6  ;;  %v10712_v58 = vrot.slane %v8954_v42, %v9364_v56 }
 0x12e   :  { %v5056_v25 = vpop.f32.mrf.mxu1  ;;  %12692 = vst [vmem:[#allocation89_spill] sm:$0xff] %v10694_v16  ;;  %v10700_v3 = vadd.f32 %v5054_v54, %v4862_v2  ;;  %v4864_v49 = vadd.f32 %v4863_v17, %v10674_v37  ;;  %v8958_v9 = vld [vmem:[#allocation3 + $0x5c8] ss:$16 sps:$4 sm:$0xff]   ;;  %v8963_v54 = vld [vmem:[#allocation3 + $0x5ac] ss:$16 sps:$4 sm:$0xff]   ;;  %v10718_v61 = vrot.slane %v8956_v15, %v9364_v56 }
 0x12f   :  { %v8960_v46 = vld [vmem:[#allocation3 + $0x5e8] ss:$16 sps:$4 sm:$0xff]   ;;  %v4865_v29 = vpop.f32.mrf.mxu0  ;;  %v10721_v36 = vrot.slane %v8958_v9, %v9364_v56  ;;  %v8968_v17 = vld [vmem:[#allocation5 + $0x18c] ss:$16 sps:$4 sm:$0xff]  }
 0x130   :  { %12693 = vst [vmem:[#allocation90_spill] sm:$0xff] %v10700_v3  ;;  %v5058_v55 = vpop.f32.mrf.mxu1  ;;  %v10714_v63 = vadd.f32 %v5056_v25, %v4864_v49  ;;  %v4866_v10 = vadd.f32 %v4865_v29, %v10632_v30  ;;  %v10724_v22 = vrot.slane %v8960_v46, %v9364_v56  ;;  %v10730_v25 = vrot.slane %v8963_v54, %v9364_v56  ;;  %v8969_v9 = vld [vmem:[#allocation5 + $0x388] ss:$16 sps:$4 sm:$0xff]  }
 0x131   :  { %v4867_v51 = vpop.f32.mrf.mxu0  ;;  %v10733_v29 = vrot.slane %v8964_v57, %v9364_v56  ;;  %v2234_v15 = vcombine.high %v10712_v58, %v10718_v61  ;;  %v10741_v46 = vrot.slane %v8965_v7, %v9364_v56  ;;  %5621 = vmatprep.subr.bf16.mxu0 %v8968_v17  ;;  %5815 = vmatpush2.bf16.msra.mxu1 %v8969_v9  ;;  %v9032_v3 = vld [vmem:[#allocation3 + $0x7e8] ss:$16 sps:$4 sm:$0xff]  }
 0x132   :  { %12696 = vst [vmem:[#allocation93_spill] sm:$0xff] %v10714_v63  ;;  %v5060_v2 = vpop.f32.mrf.mxu1  ;;  %v10735_v42 = vadd.f32 %v5058_v55, %v4866_v10  ;;  %v4868_v49 = vadd.f32 %v4867_v51, %v10674_v37  ;;  %v2306_v55 = vcombine.high %v10721_v36, %v10724_v22  ;;  %v2236_v57 = vcombine.high %v10727_v0, %v10730_v25 }
 0x133   :  { %v4871_v45 = vpop.f32.mrf.mxu0  ;;  %5336 = vmatmul.mubr.bf16.gmra.mxu0 %v10690_v40  ;;  %v2308_v7 = vcombine.high %v10733_v29, %v10741_v46 }
 0x134   :  { %12697 = vst [vmem:[#allocation94_spill] sm:$0xff] %v10735_v42  ;;  %v5064_v54 = vpop.f32.mrf.mxu1  ;;  %5529 = vmatmul.mubr.bf16.gmra.mxu1 %v10694_v16  ;;  %v10749_v10 = vadd.f32 %v5060_v2, %v4868_v49  ;;  %v4872_v51 = vadd.f32 %v4871_v45, %v10632_v30  ;;  %5345 = vmatprep.mubr.bf16.mxu0 %v10705_v44  ;;  %v8972_v45 = vld [vmem:[#allocation3 + $0x608] ss:$16 sps:$4 sm:$0xff]  }
 0x135   :  { %5538 = vmatprep.mubr.bf16.mxu1 %v10707_v6  ;;  %v4873_v40 = vpop.f32.mrf.mxu0  ;;  %v10756_v16 = vpack.c.bf16 %v2161_v50, %v2089_v35  ;;  %v10758_v42 = vpack.c.bf16 %v2163_v11, %v2091_v28  ;;  %v10760_v63 = vpack.c.bf16 %v2306_v55, %v2234_v15  ;;  %v2233_v2 = vcombine.low %v10712_v58, %v10718_v61  ;;  %v8974_v50 = vld [vmem:[#allocation3 + $0x628] ss:$16 sps:$4 sm:$0xff]  }
 0x136   :  { %12698 = vst [vmem:[#allocation95_spill] sm:$0xff] %v10749_v10  ;;  %v5066_v5 = vpop.f32.mrf.mxu1  ;;  %v10764_v49 = vadd.f32 %v5064_v54, %v4872_v51  ;;  %v4874_v6 = vadd.f32 %v4873_v40, %v10674_v37  ;;  %v2305_v44 = vcombine.low %v10721_v36, %v10724_v22  ;;  %5622 = vmatpush2.bf16.msra.mxu0 %v8966_v43  ;;  %v8976_v35 = vld [vmem:[#allocation3 + $0x648] ss:$16 sps:$4 sm:$0xff]   ;;  %v8980_v36 = vld [vmem:[#allocation3 + $0x60c] ss:$16 sps:$4 sm:$0xff]  }
 0x137   :  { %12699 = vst [vmem:[#allocation96_spill] sm:$0xff] %v10756_v16  ;;  %12700 = vst [vmem:[#allocation97_spill] sm:$0xff] %v10758_v42  ;;  %v8978_v28 = vld [vmem:[#allocation3 + $0x668] ss:$16 sps:$4 sm:$0xff]   ;;  %v4875_v11 = vpop.f32.mrf.mxu0  ;;  %v10769_v55 = vpack.c.bf16 %v2308_v7, %v2236_v57  ;;  %v2235_v58 = vcombine.low %v10727_v0, %v10730_v25  ;;  %v2307_v61 = vcombine.low %v10733_v29, %v10741_v46  ;;  %v8981_v22 = vld [vmem:[#allocation3 + $0x62c] ss:$16 sps:$4 sm:$0xff]  }
 0x138   :  { %12701 = vst [vmem:[#allocation98_spill] sm:$0xff] %v10760_v63  ;;  %12702 = vst [vmem:[#allocation99_spill] sm:$0xff] %v10764_v49  ;;  %v5068_v15 = vpop.f32.mrf.mxu1  ;;  %v10776_v40 = vrot.slane %v8972_v45, %v9364_v56  ;;  %v8982_v43 = vld [vmem:[#allocation3 + $0x64c] ss:$16 sps:$4 sm:$0xff]   ;;  %v10778_v17 = vadd.f32 %v5066_v5, %v4874_v6  ;;  %v4876_v23 = vadd.f32 %v4875_v11, %v10632_v30  ;;  %v8984_v51 = vld [vmem:[#allocation5 + $0x168] ss:$16 sps:$4 sm:$0xff]  }
 0x139   :  { %12703 = vst [vmem:[#allocation100_spill] sm:$0xff] %v10769_v55  ;;  %v10782_v54 = vrot.slane %v8974_v50, %v9364_v56  ;;  %v10785_v57 = vrot.slane %v8976_v35, %v9364_v56  ;;  %v8983_v0 = vld [vmem:[#allocation3 + $0x66c] ss:$16 sps:$4 sm:$0xff]   ;;  %v4877_v25 = vpop.f32.mrf.mxu0  ;;  %v10788_v46 = vrot.slane %v8978_v28, %v9364_v56  ;;  %v10791_v9 = vrot.slane %v8980_v36, %v9364_v56  ;;  %v8987_v11 = vld [vmem:[#allocation5 + $0x368] ss:$16 sps:$4 sm:$0xff]  }
 0x13a   :  { %12704 = vst [vmem:[#allocation101_spill] sm:$0xff] %v10778_v17  ;;  %v5070_v29 = vpop.f32.mrf.mxu1  ;;  %v10794_v5 = vrot.slane %v8981_v22, %v9364_v56  ;;  %v10797_v6 = vrot.slane %v8982_v43, %v9364_v56  ;;  %v8986_v7 = vld [vmem:[#allocation5 + $0x16c] ss:$16 sps:$4 sm:$0xff]   ;;  %v10799_v45 = vadd.f32 %v5068_v15, %v4876_v23  ;;  %v4878_v50 = vadd.f32 %v4877_v25, %v10674_v37 }
 0x13b   :  { %v2378_v35 = vcombine.high %v10776_v40, %v10782_v54  ;;  %v10805_v28 = vrot.slane %v8983_v0, %v9364_v56  ;;  %v8989_v36 = vld [vmem:[#allocation5 + $0x36c] ss:$16 sps:$4 sm:$0xff]   ;;  %v4881_v17 = vpop.f32.mrf.mxu0  ;;  %5346 = vmatmul.mubr.bf16.gmra.mxu0 %v10756_v16  ;;  %v2450_v15 = vcombine.high %v10785_v57, %v10788_v46  ;;  %v10822_v49 = vpack.c.bf16 %v2307_v61, %v2235_v58  ;;  %v8996_v58 = vld [vmem:[#allocation3 + $0x6e8] ss:$16 sps:$4 sm:$0xff]  }
 0x13c   :  { %12705 = vst [vmem:[#allocation102_spill] sm:$0xff] %v10799_v45  ;;  %v5074_v22 = vpop.f32.mrf.mxu1  ;;  %5539 = vmatmul.mubr.bf16.gmra.mxu1 %v10758_v42  ;;  %v2380_v43 = vcombine.high %v10791_v9, %v10794_v5  ;;  %v10813_v23 = vadd.f32 %v5070_v29, %v4878_v50  ;;  %v4882_v25 = vadd.f32 %v4881_v17, %v10632_v30  ;;  %v8990_v17 = vld [vmem:[#allocation3 + $0x688] ss:$16 sps:$4 sm:$0xff]  }
 0x13d   :  { %5355 = vmatprep.mubr.bf16.mxu0 %v10760_v63  ;;  %5548 = vmatprep.mubr.bf16.mxu1 %v10769_v55  ;;  %v2452_v0 = vcombine.high %v10797_v6, %v10805_v28  ;;  %v4883_v16 = vpop.f32.mrf.mxu0  ;;  %v10820_v42 = vpack.c.bf16 %v2305_v44, %v2233_v2  ;;  %12708 = vst [vmem:[#allocation105_spill] sm:$0xff] %v10822_v49  ;;  %v8992_v44 = vld [vmem:[#allocation3 + $0x6a8] ss:$16 sps:$4 sm:$0xff]  }
 0x13e   :  { %12706 = vst [vmem:[#allocation103_spill] sm:$0xff] %v10813_v23  ;;  %v5076_v45 = vpop.f32.mrf.mxu1  ;;  %v10824_v10 = vpack.c.bf16 %v2450_v15, %v2378_v35  ;;  %v2377_v29 = vcombine.low %v10776_v40, %v10782_v54  ;;  %5623 = vmatprep.subr.bf16.mxu0 %v8986_v7  ;;  %v10828_v50 = vadd.f32 %v5074_v22, %v4882_v25  ;;  %v8994_v2 = vld [vmem:[#allocation3 + $0x6c8] ss:$16 sps:$4 sm:$0xff]  }
 0x13f   :  { %12707 = vst [vmem:[#allocation104_spill] sm:$0xff] %v10820_v42  ;;  %v4884_v55 = vadd.f32 %v4883_v16, %v10674_v37  ;;  %v2449_v63 = vcombine.low %v10785_v57, %v10788_v46  ;;  %5624 = vmatpush2.bf16.msra.mxu0 %v8984_v51  ;;  %5816 = vmatprep.subr.bf16.mxu1 %v8989_v36  ;;  %v4885_v61 = vpop.f32.mrf.mxu0  ;;  %v8998_v57 = vld [vmem:[#allocation3 + $0x68c] ss:$16 sps:$4 sm:$0xff]   ;;  %v9002_v25 = vld [vmem:[#allocation5 + $0x148] ss:$16 sps:$4 sm:$0xff]  }
 0x140   :  { %12709 = vst [vmem:[#allocation106_spill] sm:$0xff] %v10824_v10  ;;  %12710 = vst [vmem:[#allocation107_spill] sm:$0xff] %v10828_v50  ;;  %v5078_v35 = vpop.f32.mrf.mxu1  ;;  %v10833_v15 = vpack.c.bf16 %v2452_v0, %v2380_v43  ;;  %v2379_v40 = vcombine.low %v10791_v9, %v10794_v5  ;;  %v2451_v54 = vcombine.low %v10797_v6, %v10805_v28  ;;  %5817 = vmatpush2.bf16.msra.mxu1 %v8987_v11  ;;  %v8999_v46 = vld [vmem:[#allocation3 + $0x6ac] ss:$16 sps:$4 sm:$0xff]  }
 0x141   :  { %v10840_v16 = vrot.slane %v8990_v17, %v9364_v56  ;;  %v9000_v51 = vld [vmem:[#allocation3 + $0x6cc] ss:$16 sps:$4 sm:$0xff]   ;;  %v10842_v7 = vadd.f32 %v5076_v45, %v4884_v55  ;;  %v4886_v36 = vadd.f32 %v4885_v61, %v10632_v30  ;;  %v10846_v22 = vrot.slane %v8992_v44, %v9364_v56  ;;  %v4887_v5 = vpop.f32.mrf.mxu0  ;;  %v9005_v61 = vld [vmem:[#allocation5 + $0x348] ss:$16 sps:$4 sm:$0xff]  }
 0x142   :  { %12711 = vst [vmem:[#allocation108_spill] sm:$0xff] %v10833_v15  ;;  %v10849_v43 = vrot.slane %v8994_v2, %v9364_v56  ;;  %v9001_v9 = vld [vmem:[#allocation3 + $0x6ec] ss:$16 sps:$4 sm:$0xff]   ;;  %v5080_v6 = vpop.f32.mrf.mxu1  ;;  %v10852_v28 = vrot.slane %v8996_v58, %v9364_v56  ;;  %v10855_v11 = vrot.slane %v8998_v57, %v9364_v56  ;;  %v10858_v55 = vrot.slane %v8999_v46, %v9364_v56 }
 0x143   :  { %12712 = vst [vmem:[#allocation109_spill] sm:$0xff] %v10842_v7  ;;  %v10861_v45 = vrot.slane %v9000_v51, %v9364_v56  ;;  %v9004_v0 = vld [vmem:[#allocation5 + $0x14c] ss:$16 sps:$4 sm:$0xff]   ;;  %v10863_v17 = vadd.f32 %v5078_v35, %v4886_v36  ;;  %v4888_v44 = vadd.f32 %v4887_v5, %v10674_v37  ;;  %v2522_v2 = vcombine.high %v10840_v16, %v10846_v22  ;;  %v4891_v7 = vpop.f32.mrf.mxu0 }
 0x144   :  { %v10869_v58 = vrot.slane %v9001_v9, %v9364_v56  ;;  %v9007_v57 = vld [vmem:[#allocation5 + $0x34c] ss:$16 sps:$4 sm:$0xff]   ;;  %v5084_v46 = vpop.f32.mrf.mxu1  ;;  %5356 = vmatmul.mubr.bf16.gmra.mxu0 %v10820_v42  ;;  %5549 = vmatmul.mubr.bf16.gmra.mxu1 %v10822_v49  ;;  %v2594_v35 = vcombine.high %v10849_v43, %v10852_v28  ;;  %v2524_v51 = vcombine.high %v10855_v11, %v10858_v55 }
 0x145   :  { %12713 = vst [vmem:[#allocation110_spill] sm:$0xff] %v10863_v17  ;;  %v10877_v36 = vadd.f32 %v5080_v6, %v4888_v44  ;;  %v4892_v5 = vadd.f32 %v4891_v7, %v10632_v30  ;;  %5365 = vmatprep.mubr.bf16.mxu0 %v10824_v10  ;;  %5558 = vmatprep.mubr.bf16.mxu1 %v10833_v15  ;;  %v4893_v42 = vpop.f32.mrf.mxu0  ;;  %v9008_v7 = vld [vmem:[#allocation3 + $0x708] ss:$16 sps:$4 sm:$0xff]  }
 0x146   :  { %v2596_v9 = vcombine.high %v10861_v45, %v10869_v58  ;;  %v5086_v17 = vpop.f32.mrf.mxu1  ;;  %v10884_v49 = vpack.c.bf16 %v2449_v63, %v2377_v29  ;;  %v10886_v50 = vpack.c.bf16 %v2451_v54, %v2379_v40  ;;  %v10888_v23 = vpack.c.bf16 %v2594_v35, %v2522_v2  ;;  %5625 = vmatprep.subr.bf16.mxu0 %v9004_v0  ;;  %v9010_v63 = vld [vmem:[#allocation3 + $0x728] ss:$16 sps:$4 sm:$0xff]  }
 0x147   :  { %12714 = vst [vmem:[#allocation111_spill] sm:$0xff] %v10877_v36  ;;  %v2521_v6 = vcombine.low %v10840_v16, %v10846_v22  ;;  %v10892_v44 = vadd.f32 %v5084_v46, %v4892_v5  ;;  %v4894_v15 = vadd.f32 %v4893_v42, %v10674_v37  ;;  %v2593_v10 = vcombine.low %v10849_v43, %v10852_v28  ;;  %v9012_v29 = vld [vmem:[#allocation3 + $0x748] ss:$16 sps:$4 sm:$0xff]   ;;  %v4895_v54 = vpop.f32.mrf.mxu0  ;;  %v9016_v43 = vld [vmem:[#allocation3 + $0x70c] ss:$16 sps:$4 sm:$0xff]  }
 0x148   :  { %12715 = vst [vmem:[#allocation112_spill] sm:$0xff] %v10884_v49  ;;  %12716 = vst [vmem:[#allocation113_spill] sm:$0xff] %v10886_v50  ;;  %5626 = vmatpush2.bf16.msra.mxu0 %v9002_v25  ;;  %5818 = vmatprep.subr.bf16.mxu1 %v9007_v57  ;;  %v9014_v40 = vld [vmem:[#allocation3 + $0x768] ss:$16 sps:$4 sm:$0xff]   ;;  %v5088_v2 = vpop.f32.mrf.mxu1  ;;  %v10897_v35 = vpack.c.bf16 %v2596_v9, %v2524_v51  ;;  %v2523_v16 = vcombine.low %v10855_v11, %v10858_v55  ;;  %v9017_v28 = vld [vmem:[#allocation3 + $0x72c] ss:$16 sps:$4 sm:$0xff]  }
 0x149   :  { %12717 = vst [vmem:[#allocation114_spill] sm:$0xff] %v10888_v23  ;;  %12718 = vst [vmem:[#allocation115_spill] sm:$0xff] %v10892_v44  ;;  %v2595_v22 = vcombine.low %v10861_v45, %v10869_v58  ;;  %5819 = vmatpush2.bf16.msra.mxu1 %v9005_v61  ;;  %v10904_v42 = vrot.slane %v9008_v7, %v9364_v56  ;;  %v9018_v25 = vld [vmem:[#allocation3 + $0x74c] ss:$16 sps:$4 sm:$0xff]   ;;  %v10906_v0 = vadd.f32 %v5086_v17, %v4894_v15  ;;  %v4897_v55 = vpop.f32.mrf.mxu0  ;;  %v9020_v5 = vld [vmem:[#allocation5 + $0x128] ss:$16 sps:$4 sm:$0xff]  }
 0x14a   :  { %12719 = vst [vmem:[#allocation116_spill] sm:$0xff] %v10897_v35  ;;  %v4896_v57 = vadd.f32 %v4895_v54, %v10632_v30  ;;  %v10910_v46 = vrot.slane %v9010_v63, %v9364_v56  ;;  %v10913_v51 = vrot.slane %v9012_v29, %v9364_v56  ;;  %v9019_v11 = vld [vmem:[#allocation3 + $0x76c] ss:$16 sps:$4 sm:$0xff]   ;;  %v5090_v45 = vpop.f32.mrf.mxu1  ;;  %v10916_v58 = vrot.slane %v9014_v40, %v9364_v56  ;;  %v9023_v54 = vld [vmem:[#allocation5 + $0x328] ss:$16 sps:$4 sm:$0xff]  }
 0x14b   :  { %12720 = vst [vmem:[#allocation117_spill] sm:$0xff] %v10906_v0  ;;  %v10919_v61 = vrot.slane %v9016_v43, %v9364_v56  ;;  %v10922_v15 = vrot.slane %v9017_v28, %v9364_v56  ;;  %v10925_v17 = vrot.slane %v9018_v25, %v9364_v56  ;;  %v9022_v9 = vld [vmem:[#allocation5 + $0x12c] ss:$16 sps:$4 sm:$0xff]   ;;  %v4898_v63 = vadd.f32 %v4897_v55, %v10674_v37  ;;  %v4901_v0 = vpop.f32.mrf.mxu0 }
 0x14c   :  { %v10927_v7 = vadd.f32 %v5088_v2, %v4896_v57  ;;  %v2666_v29 = vcombine.high %v10904_v42, %v10910_v46  ;;  %v10933_v40 = vrot.slane %v9019_v11, %v9364_v56  ;;  %v9025_v43 = vld [vmem:[#allocation5 + $0x32c] ss:$16 sps:$4 sm:$0xff]   ;;  %v5094_v28 = vpop.f32.mrf.mxu1  ;;  %5366 = vmatmul.mubr.bf16.gmra.mxu0 %v10884_v49  ;;  %5559 = vmatmul.mubr.bf16.gmra.mxu1 %v10886_v50 }
 0x14d   :  { %v2738_v2 = vcombine.high %v10913_v51, %v10916_v58  ;;  %v2668_v25 = vcombine.high %v10919_v61, %v10922_v15  ;;  %v10941_v57 = vadd.f32 %v5090_v45, %v4898_v63  ;;  %v4902_v55 = vadd.f32 %v4901_v0, %v10632_v30  ;;  %5375 = vmatprep.mubr.bf16.mxu0 %v10888_v23  ;;  %v4903_v49 = vpop.f32.mrf.mxu0  ;;  %v9026_v45 = vld [vmem:[#allocation3 + $0x788] ss:$16 sps:$4 sm:$0xff]   ;;  %v9043_v36 = vld [vmem:[#allocation5 + $0x30c] ss:$16 sps:$4 sm:$0xff]  }
 0x14e   :  { %12721 = vst [vmem:[#allocation118_spill] sm:$0xff] %v10927_v7  ;;  %5568 = vmatprep.mubr.bf16.mxu1 %v10897_v35  ;;  %v2740_v11 = vcombine.high %v10925_v17, %v10933_v40  ;;  %v5096_v7 = vpop.f32.mrf.mxu1  ;;  %v10948_v50 = vpack.c.bf16 %v2593_v10, %v2521_v6  ;;  %v10950_v44 = vpack.c.bf16 %v2595_v22, %v2523_v16  ;;  %v9028_v35 = vld [vmem:[#allocation3 + $0x7a8] ss:$16 sps:$4 sm:$0xff]  }
 0x14f   :  { %12722 = vst [vmem:[#allocation119_spill] sm:$0xff] %v10941_v57  ;;  %5627 = vmatprep.subr.bf16.mxu0 %v9022_v9  ;;  %v10954_v63 = vadd.f32 %v5094_v28, %v4902_v55  ;;  %v4904_v0 = vadd.f32 %v4903_v49, %v10674_v37  ;;  %v10957_v23 = vpack.c.bf16 %v2738_v2, %v2666_v29  ;;  %v9030_v57 = vld [vmem:[#allocation3 + $0x7c8] ss:$16 sps:$4 sm:$0xff]   ;;  %v4905_v10 = vpop.f32.mrf.mxu0  ;;  %v9034_v29 = vld [vmem:[#allocation3 + $0x78c] ss:$16 sps:$4 sm:$0xff]  }
 0x150   :  { %12723 = vst [vmem:[#allocation120_spill] sm:$0xff] %v10948_v50  ;;  %12724 = vst [vmem:[#allocation121_spill] sm:$0xff] %v10950_v44  ;;  %5628 = vmatpush2.bf16.msra.mxu0 %v9020_v5  ;;  %5820 = vmatprep.subr.bf16.mxu1 %v9025_v43  ;;  %v5098_v6 = vpop.f32.mrf.mxu1  ;;  %v10959_v16 = vpack.c.bf16 %v2740_v11, %v2668_v25  ;;  %v2737_v22 = vcombine.low %v10913_v51, %v10916_v58  ;;  %v9035_v5 = vld [vmem:[#allocation3 + $0x7ac] ss:$16 sps:$4 sm:$0xff]  }
 0x151   :  { %12725 = vst [vmem:[#allocation122_spill] sm:$0xff] %v10954_v63  ;;  %12726 = vst [vmem:[#allocation123_spill] sm:$0xff] %v10957_v23  ;;  %v2667_v9 = vcombine.low %v10919_v61, %v10922_v15  ;;  %5821 = vmatpush2.bf16.msra.mxu1 %v9023_v54  ;;  %v10966_v49 = vrot.slane %v9026_v45, %v9364_v56  ;;  %v9036_v43 = vld [vmem:[#allocation3 + $0x7cc] ss:$16 sps:$4 sm:$0xff]   ;;  %v10968_v28 = vadd.f32 %v5096_v7, %v4904_v0  ;;  %v4907_v58 = vpop.f32.mrf.mxu0 }
 0x152   :  { %12727 = vst [vmem:[#allocation124_spill] sm:$0xff] %v10959_v16  ;;  %v4906_v2 = vadd.f32 %v4905_v10, %v10632_v30  ;;  %v10972_v25 = vrot.slane %v9028_v35, %v9364_v56  ;;  %v10975_v55 = vrot.slane %v9030_v57, %v9364_v56  ;;  %v9037_v51 = vld [vmem:[#allocation3 + $0x7ec] ss:$16 sps:$4 sm:$0xff]   ;;  %v5100_v61 = vpop.f32.mrf.mxu1  ;;  %v10978_v15 = vrot.slane %v9032_v3, %v9364_v56  ;;  %v9038_v10 = vld [vmem:[#allocation5 + $0x108] ss:$16 sps:$4 sm:$0xff]  }
 0x153   :  { %12728 = vst [vmem:[#allocation125_spill] sm:$0xff] %v10968_v28  ;;  %v10981_v54 = vrot.slane %v9034_v29, %v9364_v56  ;;  %v10984_v7 = vrot.slane %v9035_v5, %v9364_v56  ;;  %v10987_v11 = vrot.slane %v9036_v43, %v9364_v56  ;;  %v9040_v35 = vld [vmem:[#allocation5 + $0x10c] ss:$16 sps:$4 sm:$0xff]   ;;  %v4908_v57 = vadd.f32 %v4907_v58, %v10674_v37  ;;  %v4911_v29 = vpop.f32.mrf.mxu0 }
 0x154   :  { %v10989_v45 = vadd.f32 %v5098_v6, %v4906_v2  ;;  %v2739_v0 = vcombine.low %v10925_v17, %v10933_v40  ;;  %v2880_v3 = vrot.slane %v9037_v51, %v9364_v56  ;;  %v5104_v28 = vpop.f32.mrf.mxu1  ;;  %5376 = vmatmul.mubr.bf16.gmra.mxu0 %v10948_v50  ;;  %5569 = vmatmul.mubr.bf16.gmra.mxu1 %v10950_v44  ;;  %v9041_v17 = vld [vmem:[#allocation5 + $0x308] ss:$16 sps:$4 sm:$0xff]   ;;  %v9046_v51 = vld [vmem:[#allocation5 + $0x4ec] ss:$16 sps:$4 sm:$0xff]  }
 0x155   :  { %v2810_v5 = vcombine.high %v10966_v49, %v10972_v25  ;;  %v2882_v6 = vcombine.high %v10975_v55, %v10978_v15  ;;  %v2812_v43 = vcombine.high %v10981_v54, %v10984_v7  ;;  %v11003_v40 = vadd.f32 %v5100_v61, %v4908_v57  ;;  %5385 = vmatprep.mubr.bf16.mxu0 %v10957_v23  ;;  %v4913_v58 = vpop.f32.mrf.mxu0  ;;  %v9049_v50 = vld [vmem:[#allocation5 + $0x6ec] ss:$16 sps:$4 sm:$0xff]  }
 0x156   :  { %12729 = vst [vmem:[#allocation126_spill] sm:$0xff] %v10989_v45  ;;  %v4912_v56 = vadd.f32 %v4911_v29, %v10632_v30  ;;  %5578 = vmatprep.mubr.bf16.mxu1 %v10959_v16  ;;  %v2884_v2 = vcombine.high %v10987_v11, %v2880_v3  ;;  %v5106_v44 = vpop.f32.mrf.mxu1  ;;  %5629 = vmatprep.subr.bf16.mxu0 %v9040_v35 }
 0x157   :  { %12730 = vst [vmem:[#allocation127_spill] sm:$0xff] %v11003_v40  ;;  %v4914_v63 = vadd.f32 %v4913_v58, %v10674_v37  ;;  %5630 = vmatpush2.bf16.msra.mxu0 %v9038_v10  ;;  %5822 = vmatprep.subr.bf16.mxu1 %v9043_v36  ;;  %v4915_v61 = vpop.f32.mrf.mxu0  ;;  %v12731_v29 = vcombine.low %v10904_v42, %v10910_v46 }
 0x158   :  { %v11009_v45 = vadd.f32 %v5104_v28, %v4912_v56  ;;  %v5108_v57 = vpop.f32.mrf.mxu1  ;;  %v11017_v16 = vpack.c.bf16 %v2739_v0, %v2667_v9  ;;  %5823 = vmatpush2.bf16.msra.mxu1 %v9041_v17  ;;  %5985 = vmatprep.subr.bf16.mxu0 %v9046_v51  ;;  %v4916_v28 = vadd.f32 %v4915_v61, %v10632_v30 }
 0x159   :  { %v11015_v23 = vpack.c.bf16 %v2737_v22, %v12731_v29  ;;  %v11019_v40 = vadd.f32 %v5106_v44, %v4914_v63  ;;  %v11022_v35 = vpack.c.bf16 %v2882_v6, %v2810_v5  ;;  %v11024_v56 = vpack.c.bf16 %v2884_v2, %v2812_v43  ;;  %6178 = vmatprep.subr.bf16.mxu1 %v9049_v50  ;;  %v4917_v36 = vpop.f32.mrf.mxu0 }
 0x15a   :  { %12733 = vst [vmem:[#allocation129_spill] sm:$0xff] %v11017_v16  ;;  %v5110_v10 = vpop.f32.mrf.mxu1  ;;  %v11026_v58 = vadd.f32 %v5108_v57, %v4916_v28  ;;  %v4918_v42 = vadd.f32 %v4917_v36, %v10674_v37  ;;  %v2809_v46 = vcombine.low %v10966_v49, %v10972_v25  ;;  %v2881_v44 = vcombine.low %v10975_v55, %v10978_v15 }
 0x15b   :  { %12732 = vst [vmem:[#allocation128_spill] sm:$0xff] %v11015_v23  ;;  %12734 = vst [vmem:[#allocation130_spill] sm:$0xff] %v11022_v35  ;;  %v4921_v22 = vpop.f32.mrf.mxu0  ;;  %v2811_v50 = vcombine.low %v10981_v54, %v10984_v7  ;;  %v2883_v63 = vcombine.low %v10987_v11, %v2880_v3 }
 0x15c   :  { %12735 = vst [vmem:[#allocation131_spill] sm:$0xff] %v11024_v56  ;;  %v5114_v9 = vpop.f32.mrf.mxu1  ;;  %5386 = vmatmul.mubr.bf16.gmra.mxu0 %v11015_v23  ;;  %5579 = vmatmul.mubr.bf16.gmra.mxu1 %v11017_v16  ;;  %v11038_v0 = vadd.f32 %v5110_v10, %v4918_v42  ;;  %v4922_v5 = vadd.f32 %v4921_v22, %v10632_v30 }
 0x15d   :  { %5395 = vmatprep.mubr.bf16.mxu0 %v11022_v35  ;;  %5588 = vmatprep.mubr.bf16.mxu1 %v11024_v56  ;;  %v4923_v49 = vpop.f32.mrf.mxu0  ;;  %v11046_v17 = vpack.c.bf16 %v2881_v44, %v2809_v46  ;;  %v11048_v54 = vpack.c.bf16 %v2883_v63, %v2811_v50  ;;  %v9044_v50 = vld [vmem:[#allocation5 + $0x4e8] ss:$16 sps:$4 sm:$0xff]  }
 0x15e   :  { %v5116_v25 = vpop.f32.mrf.mxu1  ;;  %v11043_v6 = vadd.f32 %v5114_v9, %v4922_v5  ;;  %v4924_v43 = vadd.f32 %v4923_v49, %v10674_v37  ;;  %v9047_v49 = vld [vmem:[#allocation5 + $0x6e8] ss:$16 sps:$4 sm:$0xff]  }
 0x15f   :  { %v4925_v55 = vpop.f32.mrf.mxu0  ;;  %12736 = vst [vmem:[#allocation132_spill] sm:$0xff] %v11046_v17  ;;  %12737 = vst [vmem:[#allocation133_spill] sm:$0xff] %v11048_v54 }
 0x160   :  { %v5118_v15 = vpop.f32.mrf.mxu1  ;;  %v11050_v7 = vadd.f32 %v5116_v25, %v4924_v43  ;;  %v4926_v11 = vadd.f32 %v4925_v55, %v10632_v30 }
 0x161   :  { %v4927_v3 = vpop.f32.mrf.mxu0 }
 0x162   :  { %v5120_v2 = vpop.f32.mrf.mxu1  ;;  %v11053_v51 = vadd.f32 %v5118_v15, %v4926_v11  ;;  %v4928_v61 = vadd.f32 %v4927_v3, %v10674_v37  ;;  %v9055_v15 = vld [vmem:[#allocation5 + $0x6cc] ss:$16 sps:$4 sm:$0xff]  }
 0x163   :  { %v4931_v57 = vpop.f32.mrf.mxu0 }
 0x164   :  { %v5124_v29 = vpop.f32.mrf.mxu1  ;;  %5396 = vmatmul.mubr.bf16.gmra.mxu0 %v11046_v17  ;;  %5589 = vmatmul.mubr.bf16.gmra.mxu1 %v11048_v54  ;;  %v11058_v28 = vadd.f32 %v5120_v2, %v4928_v61  ;;  %v4932_v36 = vadd.f32 %v4931_v57, %v10632_v30  ;;  %v9050_v2 = vld [vmem:[#allocation5 + $0x4c8] ss:$16 sps:$4 sm:$0xff]  }
 0x165   :  { %5631 = vmatprep.mubr.bf16.mxu0 %v9389_v20  ;;  %5824 = vmatprep.mubr.bf16.mxu1 %v9392_v26  ;;  %v4933_v10 = vpop.f32.mrf.mxu0  ;;  %v9052_v26 = vld [vmem:[#allocation5 + $0x4cc] ss:$16 sps:$4 sm:$0xff]  }
 0x166   :  { %v5126_v42 = vpop.f32.mrf.mxu1  ;;  %v11063_v46 = vadd.f32 %v5124_v29, %v4932_v36  ;;  %v4934_v22 = vadd.f32 %v4933_v10, %v10674_v37  ;;  %v9053_v29 = vld [vmem:[#allocation5 + $0x6c8] ss:$16 sps:$4 sm:$0xff]  }
 0x167   :  { %v4935_v9 = vpop.f32.mrf.mxu0 }
 0x168   :  { %v5128_v44 = vpop.f32.mrf.mxu1  ;;  %v11066_v63 = vadd.f32 %v5126_v42, %v4934_v22  ;;  %v4936_v5 = vadd.f32 %v4935_v9, %v10632_v30  ;;  %v9058_v42 = vld [vmem:[#allocation5 + $0x4ac] ss:$16 sps:$4 sm:$0xff]  }
 0x169   :  { %v4937_v25 = vpop.f32.mrf.mxu0  ;;  %v9061_v22 = vld [vmem:[#allocation5 + $0x6ac] ss:$16 sps:$4 sm:$0xff]  }
 0x16a   :  { %v5130_v43 = vpop.f32.mrf.mxu1  ;;  %v11069_v55 = vadd.f32 %v5128_v44, %v4936_v5  ;;  %v4938_v20 = vadd.f32 %v4937_v25, %v10674_v37  ;;  %v9056_v25 = vld [vmem:[#allocation5 + $0x4a8] ss:$16 sps:$4 sm:$0xff]  }
 0x16b   :  { %v4941_v11 = vpop.f32.mrf.mxu0 }
 0x16c   :  { %v5134_v3 = vpop.f32.mrf.mxu1  ;;  %5632 = vmatmul.mubr.bf16.vlgmr.msra.gmra.mxu0 %v9429_v59  ;;  %5825 = vmatmul.mubr.bf16.vlgmr.msra.gmra.mxu1 %v9431_v60  ;;  %v11074_v61 = vadd.f32 %v5130_v43, %v4938_v20  ;;  %v4942_v57 = vadd.f32 %v4941_v11, %v10632_v30 }
 0x16d   :  { %5986 = vmatpush1.bf16.msra.mxu0 %v9044_v50  ;;  %6179 = vmatpush1.bf16.msra.mxu1 %v9047_v49  ;;  %v4943_v36 = vpop.f32.mrf.mxu0 }
 0x16e   :  { %v5136_v10 = vpop.f32.mrf.mxu1  ;;  %5641 = vmatprep.mubr.bf16.mxu0 %v9433_v1  ;;  %5834 = vmatprep.mubr.bf16.mxu1 %v9452_v12  ;;  %v11079_v9 = vadd.f32 %v5134_v3, %v4942_v57  ;;  %v4944_v59 = vadd.f32 %v4943_v36, %v10674_v37  ;;  %v9059_v12 = vld [vmem:[#allocation5 + $0x6a8] ss:$16 sps:$4 sm:$0xff]  }
 0x16f   :  { %5987 = vmatprep.subr.bf16.mxu0 %v9052_v26  ;;  %6180 = vmatprep.subr.bf16.mxu1 %v9055_v15  ;;  %v4945_v60 = vpop.f32.mrf.mxu0  ;;  %v9064_v26 = vld [vmem:[#allocation5 + $0x48c] ss:$16 sps:$4 sm:$0xff]  }
 0x170   :  { %v5138_v44 = vpop.f32.mrf.mxu1  ;;  %v11082_v5 = vadd.f32 %v5136_v10, %v4944_v59  ;;  %v4946_v50 = vadd.f32 %v4945_v60, %v10632_v30  ;;  %v9067_v15 = vld [vmem:[#allocation5 + $0x68c] ss:$16 sps:$4 sm:$0xff]   ;;  %v9062_v10 = vld [vmem:[#allocation5 + $0x488] ss:$16 sps:$4 sm:$0xff]  }
 0x171   :  { %5988 = vmatpush1.bf16.msra.mxu0 %v9050_v2  ;;  %6181 = vmatpush1.bf16.msra.mxu1 %v9053_v29  ;;  %v4947_v49 = vpop.f32.mrf.mxu0  ;;  %v9073_v59 = vld [vmem:[#allocation5 + $0x66c] ss:$16 sps:$4 sm:$0xff]  }
 0x172   :  { %v5140_v1 = vpop.f32.mrf.mxu1  ;;  %5989 = vmatprep.subr.bf16.mxu0 %v9058_v42  ;;  %6182 = vmatprep.subr.bf16.mxu1 %v9061_v22  ;;  %v11085_v43 = vadd.f32 %v5138_v44, %v4946_v50  ;;  %v4948_v20 = vadd.f32 %v4947_v49, %v10674_v37  ;;  %v9065_v42 = vld [vmem:[#allocation5 + $0x688] ss:$16 sps:$4 sm:$0xff]  }
 0x173   :  { %v4951_v11 = vpop.f32.mrf.mxu0 }
 0x174   :  { %v5144_v3 = vpop.f32.mrf.mxu1  ;;  %5642 = vmatmul.mubr.bf16.gmra.mxu0 %v9480_v33  ;;  %5835 = vmatmul.mubr.bf16.gmra.mxu1 %v9482_v34  ;;  %v11090_v2 = vadd.f32 %v5140_v1, %v4948_v20  ;;  %v4952_v57 = vadd.f32 %v4951_v11, %v10632_v30  ;;  %v9070_v34 = vld [vmem:[#allocation5 + $0x46c] ss:$16 sps:$4 sm:$0xff]   ;;  %v9068_v1 = vld [vmem:[#allocation5 + $0x468] ss:$16 sps:$4 sm:$0xff]  }
 0x175   :  { %5651 = vmatprep.mubr.bf16.mxu0 %v9484_v38  ;;  %5844 = vmatprep.mubr.bf16.mxu1 %v9486_v39  ;;  %v4953_v29 = vpop.f32.mrf.mxu0 }
 0x176   :  { %v5146_v36 = vpop.f32.mrf.mxu1  ;;  %5990 = vmatpush1.bf16.msra.mxu0 %v9056_v25  ;;  %6183 = vmatpush1.bf16.msra.mxu1 %v9059_v12  ;;  %v11095_v22 = vadd.f32 %v5144_v3, %v4952_v57  ;;  %v4954_v33 = vadd.f32 %v4953_v29, %v10674_v37  ;;  %v9071_v25 = vld [vmem:[#allocation5 + $0x668] ss:$16 sps:$4 sm:$0xff]  }
 0x177   :  { %5991 = vmatprep.subr.bf16.mxu0 %v9064_v26  ;;  %6184 = vmatprep.subr.bf16.mxu1 %v9067_v15  ;;  %v4955_v60 = vpop.f32.mrf.mxu0  ;;  %v9076_v26 = vld [vmem:[#allocation5 + $0x44c] ss:$16 sps:$4 sm:$0xff]   ;;  %v9074_v57 = vld [vmem:[#allocation5 + $0x448] ss:$16 sps:$4 sm:$0xff]  }
 0x178   :  { %v5148_v44 = vpop.f32.mrf.mxu1  ;;  %v11098_v50 = vadd.f32 %v5146_v36, %v4954_v33  ;;  %v4956_v38 = vadd.f32 %v4955_v60, %v10632_v30  ;;  %v9079_v15 = vld [vmem:[#allocation5 + $0x64c] ss:$16 sps:$4 sm:$0xff]  }
 0x179   :  { %v4957_v39 = vpop.f32.mrf.mxu0 }
 0x17a   :  { %v5150_v49 = vpop.f32.mrf.mxu1  ;;  %5992 = vmatpush1.bf16.msra.mxu0 %v9062_v10  ;;  %6185 = vmatpush1.bf16.msra.mxu1 %v9065_v42  ;;  %v11101_v12 = vadd.f32 %v5148_v44, %v4956_v38  ;;  %v4958_v20 = vadd.f32 %v4957_v39, %v10674_v37  ;;  %v9077_v10 = vld [vmem:[#allocation5 + $0x648] ss:$16 sps:$4 sm:$0xff]  }
 0x17b   :  { %5993 = vmatprep.subr.bf16.mxu0 %v9070_v34  ;;  %6186 = vmatprep.subr.bf16.mxu1 %v9073_v59  ;;  %v4961_v11 = vpop.f32.mrf.mxu0  ;;  %v9082_v34 = vld [vmem:[#allocation5 + $0x42c] ss:$16 sps:$4 sm:$0xff]   ;;  %v9080_v38 = vld [vmem:[#allocation5 + $0x428] ss:$16 sps:$4 sm:$0xff]  }
 0x17c   :  { %v5154_v3 = vpop.f32.mrf.mxu1  ;;  %5652 = vmatmul.mubr.bf16.gmra.mxu0 %v9532_v8  ;;  %5845 = vmatmul.mubr.bf16.gmra.mxu1 %v9534_v13  ;;  %v11106_v29 = vadd.f32 %v5150_v49, %v4958_v20  ;;  %v4962_v36 = vadd.f32 %v4961_v11, %v10632_v30  ;;  %v9085_v59 = vld [vmem:[#allocation5 + $0x62c] ss:$16 sps:$4 sm:$0xff]   ;;  %v9083_v39 = vld [vmem:[#allocation5 + $0x628] ss:$16 sps:$4 sm:$0xff]  }
 0x17d   :  { %5661 = vmatprep.mubr.bf16.mxu0 %v9536_v14  ;;  %5854 = vmatprep.mubr.bf16.mxu1 %v9544_v21  ;;  %v4963_v42 = vpop.f32.mrf.mxu0  ;;  %v9088_v49 = vld [vmem:[#allocation5 + $0x40c] ss:$16 sps:$4 sm:$0xff]  }
 0x17e   :  { %v5156_v33 = vpop.f32.mrf.mxu1  ;;  %5994 = vmatpush1.bf16.msra.mxu0 %v9068_v1  ;;  %6187 = vmatpush1.bf16.msra.mxu1 %v9071_v25  ;;  %v11111_v60 = vadd.f32 %v5154_v3, %v4962_v36  ;;  %v4964_v8 = vadd.f32 %v4963_v42, %v10674_v37  ;;  %v9091_v20 = vld [vmem:[#allocation5 + $0x60c] ss:$16 sps:$4 sm:$0xff]   ;;  %v9086_v36 = vld [vmem:[#allocation5 + $0x408] ss:$16 sps:$4 sm:$0xff]  }
 0x17f   :  { %5995 = vmatprep.subr.bf16.mxu0 %v9076_v26  ;;  %6188 = vmatprep.subr.bf16.mxu1 %v9079_v15  ;;  %v4965_v13 = vpop.f32.mrf.mxu0  ;;  %v9089_v42 = vld [vmem:[#allocation5 + $0x608] ss:$16 sps:$4 sm:$0xff]  }
 0x180   :  { %v5158_v44 = vpop.f32.mrf.mxu1  ;;  %v11114_v14 = vadd.f32 %v5156_v33, %v4964_v8  ;;  %v4966_v21 = vadd.f32 %v4965_v13, %v10632_v30 }
 0x181   :  { %v4967_v1 = vpop.f32.mrf.mxu0 }
 0x182   :  { %v5160_v25 = vpop.f32.mrf.mxu1  ;;  %5996 = vmatpush1.bf16.msra.mxu0 %v9074_v57  ;;  %6189 = vmatpush1.bf16.msra.mxu1 %v9077_v10  ;;  %v11117_v11 = vadd.f32 %v5158_v44, %v4966_v21  ;;  %v4968_v3 = vadd.f32 %v4967_v1, %v10674_v37  ;;  %v9094_v57 = vld [vmem:[#allocation5 + $0x5ec] ss:$16 sps:$4 sm:$0xff]   ;;  %v9092_v21 = vld [vmem:[#allocation5 + $0x5e8] ss:$16 sps:$4 sm:$0xff]  }
 0x183   :  { %5997 = vmatprep.subr.bf16.mxu0 %v9082_v34  ;;  %6190 = vmatprep.subr.bf16.mxu1 %v9085_v59  ;;  %v4971_v26 = vpop.f32.mrf.mxu0  ;;  %v9097_v10 = vld [vmem:[#allocation5 + $0x7ec] ss:$16 sps:$4 sm:$0xff]   ;;  %v9095_v1 = vld [vmem:[#allocation5 + $0x7e8] ss:$16 sps:$4 sm:$0xff]  }
 0x184   :  { %v5164_v15 = vpop.f32.mrf.mxu1  ;;  %5662 = vmatmul.mubr.bf16.gmra.mxu0 %v9584_v47  ;;  %5855 = vmatmul.mubr.bf16.gmra.mxu1 %v9586_v52  ;;  %v11122_v33 = vadd.f32 %v5160_v25, %v4968_v3  ;;  %v4972_v8 = vadd.f32 %v4971_v26, %v10632_v30  ;;  %v9103_v3 = vld [vmem:[#allocation5 + $0x7cc] ss:$16 sps:$4 sm:$0xff]  }
 0x185   :  { %5671 = vmatprep.mubr.bf16.mxu0 %v9588_v53  ;;  %5864 = vmatprep.mubr.bf16.mxu1 %v9596_v62  ;;  %v4973_v34 = vpop.f32.mrf.mxu0  ;;  %v9100_v62 = vld [vmem:[#allocation5 + $0x5cc] ss:$16 sps:$4 sm:$0xff]  }
 0x186   :  { %v5166_v59 = vpop.f32.mrf.mxu1  ;;  %5998 = vmatpush1.bf16.msra.mxu0 %v9080_v38  ;;  %6191 = vmatpush1.bf16.msra.mxu1 %v9083_v39  ;;  %v11127_v13 = vadd.f32 %v5164_v15, %v4972_v8  ;;  %v4974_v47 = vadd.f32 %v4973_v34, %v10674_v37  ;;  %v9098_v15 = vld [vmem:[#allocation5 + $0x5c8] ss:$16 sps:$4 sm:$0xff]  }
 0x187   :  { %5999 = vmatprep.subr.bf16.mxu0 %v9088_v49  ;;  %6192 = vmatprep.subr.bf16.mxu1 %v9091_v20  ;;  %v4975_v52 = vpop.f32.mrf.mxu0  ;;  %v9101_v8 = vld [vmem:[#allocation5 + $0x7c8] ss:$16 sps:$4 sm:$0xff]  }
 0x188   :  { %v5168_v44 = vpop.f32.mrf.mxu1  ;;  %v11130_v25 = vadd.f32 %v5166_v59, %v4974_v47  ;;  %v4976_v53 = vadd.f32 %v4975_v52, %v10632_v30  ;;  %v9104_v52 = vld [vmem:[#allocation5 + $0x5a8] ss:$16 sps:$4 sm:$0xff]  }
 0x189   :  { %v4977_v26 = vpop.f32.mrf.mxu0 }
 0x18a   :  { %v5170_v54 = vpop.f32.mrf.mxu1  ;;  %6000 = vmatpush1.bf16.msra.mxu0 %v9086_v36  ;;  %6193 = vmatpush1.bf16.msra.mxu1 %v9089_v42  ;;  %v11133_v38 = vadd.f32 %v5168_v44, %v4976_v53  ;;  %v4978_v39 = vadd.f32 %v4977_v26, %v10674_v37  ;;  %v9106_v36 = vld [vmem:[#allocation5 + $0x5ac] ss:$16 sps:$4 sm:$0xff]   ;;  %v9107_v44 = vld [vmem:[#allocation5 + $0x7a8] ss:$16 sps:$4 sm:$0xff]  }
 0x18b   :  { %6001 = vmatprep.subr.bf16.mxu0 %v9094_v57  ;;  %6194 = vmatprep.subr.bf16.mxu1 %v9097_v10  ;;  %v4981_v49 = vpop.f32.mrf.mxu0  ;;  %v9109_v42 = vld [vmem:[#allocation5 + $0x7ac] ss:$16 sps:$4 sm:$0xff]  }
 0x18c   :  { %v5174_v20 = vpop.f32.mrf.mxu1  ;;  %5672 = vmatmul.mubr.bf16.gmra.mxu0 %v9636_v27  ;;  %5865 = vmatmul.mubr.bf16.gmra.mxu1 %v9638_v31  ;;  %v11138_v34 = vadd.f32 %v5170_v54, %v4978_v39  ;;  %v4982_v59 = vadd.f32 %v4981_v49, %v10632_v30  ;;  %v9115_v26 = vld [vmem:[#allocation5 + $0x78c] ss:$16 sps:$4 sm:$0xff]  }
 0x18d   :  { %5681 = vmatprep.mubr.bf16.mxu0 %v9640_v32  ;;  %5874 = vmatprep.mubr.bf16.mxu1 %v9648_v41  ;;  %v4983_v57 = vpop.f32.mrf.mxu0  ;;  %v9112_v41 = vld [vmem:[#allocation5 + $0x58c] ss:$16 sps:$4 sm:$0xff]  }
 0x18e   :  { %v5176_v10 = vpop.f32.mrf.mxu1  ;;  %6002 = vmatpush2.bf16.msra.mxu0 %v9092_v21  ;;  %6195 = vmatpush2.bf16.msra.mxu1 %v9095_v1  ;;  %v11143_v47 = vadd.f32 %v5174_v20, %v4982_v59  ;;  %v4984_v27 = vadd.f32 %v4983_v57, %v10674_v37 }
 0x18f   :  { %6003 = vmatprep.subr.bf16.mxu0 %v9100_v62  ;;  %6196 = vmatprep.subr.bf16.mxu1 %v9103_v3  ;;  %v4985_v31 = vpop.f32.mrf.mxu0 }
 0x190   :  { %v5178_v54 = vpop.f32.mrf.mxu1  ;;  %v11146_v53 = vadd.f32 %v5176_v10, %v4984_v27  ;;  %v4986_v32 = vadd.f32 %v4985_v31, %v10632_v30  ;;  %v9121_v10 = vld [vmem:[#allocation5 + $0x76c] ss:$16 sps:$4 sm:$0xff]  }
 0x191   :  { %v4987_v39 = vpop.f32.mrf.mxu0 }
 0x192   :  { %v5180_v49 = vpop.f32.mrf.mxu1  ;;  %6004 = vmatpush2.bf16.msra.mxu0 %v9098_v15  ;;  %6197 = vmatpush2.bf16.msra.mxu1 %v9101_v8  ;;  %v11149_v21 = vadd.f32 %v5178_v54, %v4986_v32  ;;  %v4988_v1 = vadd.f32 %v4987_v39, %v10674_v37 }
 0x193   :  { %6005 = vmatprep.subr.bf16.mxu0 %v9106_v36  ;;  %6198 = vmatprep.subr.bf16.mxu1 %v9109_v42  ;;  %v4991_v62 = vpop.f32.mrf.mxu0  ;;  %v9110_v36 = vld [vmem:[#allocation5 + $0x588] ss:$16 sps:$4 sm:$0xff]  }
 0x194   :  { %v5184_v3 = vpop.f32.mrf.mxu1  ;;  %5682 = vmatmul.mubr.bf16.gmra.mxu0 %v9688_v4  ;;  %5875 = vmatmul.mubr.bf16.gmra.mxu1 %v9690_v18  ;;  %v11154_v20 = vadd.f32 %v5180_v49, %v4988_v1  ;;  %v4992_v59 = vadd.f32 %v4991_v62, %v10632_v30  ;;  %v9113_v42 = vld [vmem:[#allocation5 + $0x788] ss:$16 sps:$4 sm:$0xff]   ;;  %v9118_v18 = vld [vmem:[#allocation5 + $0x56c] ss:$16 sps:$4 sm:$0xff]  }
 0x195   :  { %5691 = vmatprep.mubr.bf16.mxu0 %v9692_v19  ;;  %5884 = vmatprep.mubr.bf16.mxu1 %v9700_v24  ;;  %v4993_v15 = vpop.f32.mrf.mxu0 }
 0x196   :  { %v5186_v8 = vpop.f32.mrf.mxu1  ;;  %6006 = vmatpush2.bf16.msra.mxu0 %v9104_v52  ;;  %6199 = vmatpush2.bf16.msra.mxu1 %v9107_v44  ;;  %v11159_v57 = vadd.f32 %v5184_v3, %v4992_v59  ;;  %v4994_v4 = vadd.f32 %v4993_v15, %v10674_v37  ;;  %v9116_v52 = vld [vmem:[#allocation5 + $0x568] ss:$16 sps:$4 sm:$0xff]  }
 0x197   :  { %6007 = vmatprep.subr.bf16.mxu0 %v9112_v41  ;;  %6200 = vmatprep.subr.bf16.mxu1 %v9115_v26  ;;  %v4995_v27 = vpop.f32.mrf.mxu0  ;;  %v9119_v44 = vld [vmem:[#allocation5 + $0x768] ss:$16 sps:$4 sm:$0xff]   ;;  %v9124_v41 = vld [vmem:[#allocation5 + $0x54c] ss:$16 sps:$4 sm:$0xff]  }
 0x198   :  { %v5188_v31 = vpop.f32.mrf.mxu1  ;;  %v11162_v54 = vadd.f32 %v5186_v8, %v4994_v4  ;;  %v4996_v19 = vadd.f32 %v4995_v27, %v10632_v30  ;;  %v9127_v26 = vld [vmem:[#allocation5 + $0x74c] ss:$16 sps:$4 sm:$0xff]   ;;  %v12739_v8 = vld [vmem:[#allocation12_spill] sm:$0xff] }
 0x199   :  { %v4997_v24 = vpop.f32.mrf.mxu0  ;;  %v12738_v3 = vld [vmem:[#allocation11_spill] sm:$0xff] }
 0x19a   :  { %v5190_v32 = vpop.f32.mrf.mxu1  ;;  %6008 = vmatpush2.bf16.msra.mxu0 %v9110_v36  ;;  %6201 = vmatpush2.bf16.msra.mxu1 %v9113_v42  ;;  %v11165_v39 = vadd.f32 %v5188_v31, %v4996_v19  ;;  %v4998_v49 = vadd.f32 %v4997_v24, %v10674_v37  ;;  %v12740_v36 = vld [vmem:[#allocation13_spill] sm:$0xff] }
 0x19b   :  { %6009 = vmatprep.subr.bf16.mxu0 %v9118_v18  ;;  %6202 = vmatprep.subr.bf16.mxu1 %v9121_v10  ;;  %v5001_v1 = vpop.f32.mrf.mxu0  ;;  %v9122_v18 = vld [vmem:[#allocation5 + $0x548] ss:$16 sps:$4 sm:$0xff]   ;;  %v9130_v31 = vld [vmem:[#allocation5 + $0x52c] ss:$16 sps:$4 sm:$0xff]  }
 0x19c   :  { %v5194_v62 = vpop.f32.mrf.mxu1  ;;  %5692 = vmatmul.mubr.bf16.gmra.mxu0 %v9740_v48  ;;  %5885 = vmatmul.mubr.bf16.gmra.mxu1 %v12738_v3  ;;  %v11170_v59 = vadd.f32 %v5190_v32, %v4998_v49  ;;  %v5002_v15 = vadd.f32 %v5001_v1, %v10632_v30  ;;  %v9125_v10 = vld [vmem:[#allocation5 + $0x748] ss:$16 sps:$4 sm:$0xff]   ;;  %v9133_v19 = vld [vmem:[#allocation5 + $0x72c] ss:$16 sps:$4 sm:$0xff]  }
 0x19d   :  { %5701 = vmatprep.mubr.bf16.mxu0 %v12739_v8  ;;  %5894 = vmatprep.mubr.bf16.mxu1 %v12740_v36  ;;  %v5003_v42 = vpop.f32.mrf.mxu0 }
 0x19e   :  { %v5196_v4 = vpop.f32.mrf.mxu1  ;;  %6010 = vmatpush2.bf16.msra.mxu0 %v9116_v52  ;;  %6203 = vmatpush2.bf16.msra.mxu1 %v9119_v44  ;;  %v11175_v27 = vadd.f32 %v5194_v62, %v5002_v15  ;;  %v5004_v48 = vadd.f32 %v5003_v42, %v10674_v37  ;;  %v9128_v52 = vld [vmem:[#allocation5 + $0x528] ss:$16 sps:$4 sm:$0xff]  }
 0x19f   :  { %6011 = vmatprep.subr.bf16.mxu0 %v9124_v41  ;;  %6204 = vmatprep.subr.bf16.mxu1 %v9127_v26  ;;  %v5005_v24 = vpop.f32.mrf.mxu0  ;;  %v9131_v44 = vld [vmem:[#allocation5 + $0x728] ss:$16 sps:$4 sm:$0xff]   ;;  %v9136_v41 = vld [vmem:[#allocation5 + $0x50c] ss:$16 sps:$4 sm:$0xff]  }
 0x1a0   :  { %v5198_v32 = vpop.f32.mrf.mxu1  ;;  %v11178_v49 = vadd.f32 %v5196_v4, %v5004_v48  ;;  %v5006_v1 = vadd.f32 %v5005_v24, %v10632_v30  ;;  %v9139_v26 = vld [vmem:[#allocation5 + $0x70c] ss:$16 sps:$4 sm:$0xff]   ;;  %v12741_v4 = vld [vmem:[#allocation14_spill] sm:$0xff] }
 0x1a1   :  { %v5007_v3 = vpop.f32.mrf.mxu0  ;;  %v12742_v48 = vld [vmem:[#allocation15_spill] sm:$0xff] }
 0x1a2   :  { %v5200_v8 = vpop.f32.mrf.mxu1  ;;  %6012 = vmatpush2.bf16.msra.mxu0 %v9122_v18  ;;  %6205 = vmatpush2.bf16.msra.mxu1 %v9125_v10  ;;  %v11181_v62 = vadd.f32 %v5198_v32, %v5006_v1  ;;  %v5008_v15 = vadd.f32 %v5007_v3, %v10674_v37  ;;  %v12744_v10 = vld [vmem:[#allocation16_spill] sm:$0xff]  ;;  %v12745_v32 = vld [vmem:[#allocation17_spill] sm:$0xff] }
 0x1a3   :  { %6013 = vmatprep.subr.bf16.mxu0 %v9130_v31  ;;  %6206 = vmatprep.subr.bf16.mxu1 %v9133_v19  ;;  %v5011_v36 = vpop.f32.mrf.mxu0  ;;  %v9134_v31 = vld [vmem:[#allocation5 + $0x508] ss:$16 sps:$4 sm:$0xff]  }
 0x1a4   :  { %v5204_v42 = vpop.f32.mrf.mxu1  ;;  %5702 = vmatmul.mubr.bf16.gmra.mxu0 %v12741_v4  ;;  %5895 = vmatmul.mubr.bf16.gmra.mxu1 %v12742_v48  ;;  %v11186_v24 = vadd.f32 %v5200_v8, %v5008_v15  ;;  %v5012_v18 = vadd.f32 %v5011_v36, %v10632_v30  ;;  %v9137_v19 = vld [vmem:[#allocation5 + $0x708] ss:$16 sps:$4 sm:$0xff]  }
 0x1a5   :  { %5711 = vmatprep.mubr.bf16.mxu0 %v12744_v10  ;;  %5904 = vmatprep.mubr.bf16.mxu1 %v12745_v32  ;;  %v5013_v1 = vpop.f32.mrf.mxu0 }
 0x1a6   :  { %12743 = vst [vmem:[#allocation11_spill] sm:$0xff] %v11186_v24  ;;  %v5206_v3 = vpop.f32.mrf.mxu1  ;;  %6014 = vmatpush2.bf16.msra.mxu0 %v9128_v52  ;;  %6207 = vmatpush2.bf16.msra.mxu1 %v9131_v44  ;;  %v11191_v17 = vadd.f32 %v5204_v42, %v5012_v18  ;;  %v5014_v4 = vadd.f32 %v5013_v1, %v10674_v37  ;;  %v9142_v42 = vld [vmem:[#allocation7 + $0x74] ss:$8 sps:$4 sm:$0xff]   ;;  %v12749_v1 = vld [vmem:[#allocation18_spill] sm:$0xff] }
 0x1a7   :  { %6015 = vmatprep.subr.bf16.mxu0 %v9136_v41  ;;  %6208 = vmatprep.subr.bf16.mxu1 %v9139_v26  ;;  %v5015_v8 = vpop.f32.mrf.mxu0  ;;  %v12750_v41 = vld [vmem:[#allocation19_spill] sm:$0xff] }
 0x1a8   :  { %12746 = vst [vmem:[#allocation12_spill] sm:$0xff] %v11191_v17  ;;  %v5208_v15 = vpop.f32.mrf.mxu1  ;;  %v11194_v48 = vadd.f32 %v5206_v3, %v5014_v4  ;;  %v5016_v36 = vadd.f32 %v5015_v8, %v10632_v30  ;;  %v12752_v3 = vld [vmem:[#allocation90_spill] sm:$0xff]  ;;  %v12753_v30 = vld [vmem:[#allocation20_spill] sm:$0xff]  ;;  %v12754_v8 = vld [vmem:[#allocation21_spill] sm:$0xff] }
 0x1a9   :  { %v5017_v10 = vpop.f32.mrf.mxu0 }
 0x1aa   :  { %12747 = vst [vmem:[#allocation13_spill] sm:$0xff] %v11194_v48  ;;  %v5210_v32 = vpop.f32.mrf.mxu1  ;;  %6016 = vmatpush2.bf16.msra.mxu0 %v9134_v31  ;;  %6209 = vmatpush2.bf16.msra.mxu1 %v9137_v19  ;;  %v11197_v52 = vadd.f32 %v5208_v15, %v5016_v36  ;;  %v5018_v44 = vadd.f32 %v5017_v10, %v10674_v37  ;;  %v12755_v37 = vld [vmem:[#allocation93_spill] sm:$0xff] }
 0x1ab   :  { %v5247_v18 = vpop.f32.mrf.mxu0  ;;  %7215 = vmatprep.subr.bf16.mxu0 %v9142_v42  ;;  %v12759_v42 = vld [vmem:[#allocation23_spill] sm:$0xff] }
 0x1ac   :  { %12748 = vst [vmem:[#allocation14_spill] sm:$0xff] %v11197_v52  ;;  %v5440_v56 = vpop.f32.mrf.mxu1  ;;  %5712 = vmatmul.mubr.bf16.gmra.mxu0 %v12749_v1  ;;  %5905 = vmatmul.mubr.bf16.gmra.mxu1 %v12750_v41  ;;  %v11202_v26 = vadd.f32 %v5210_v32, %v5018_v44  ;;  %v5248_v4 = vadd.f32 %v5247_v18, %v12752_v3  ;;  %v12756_v1 = vld [vmem:[#allocation94_spill] sm:$0xff]  ;;  %v12757_v3 = vld [vmem:[#allocation95_spill] sm:$0xff] }
 0x1ad   :  { %5721 = vmatprep.mubr.bf16.mxu0 %v12753_v30  ;;  %5914 = vmatprep.mubr.bf16.mxu1 %v12754_v8  ;;  %v5249_v31 = vpop.f32.mrf.mxu0  ;;  %v12758_v52 = vld [vmem:[#allocation22_spill] sm:$0xff] }
 0x1ae   :  { %12751 = vst [vmem:[#allocation15_spill] sm:$0xff] %v11202_v26  ;;  %v5442_v19 = vpop.f32.mrf.mxu1  ;;  %v5441_v15 = vadd.f32 %v5440_v56, %v5248_v4  ;;  %v5250_v36 = vadd.f32 %v5249_v31, %v12755_v37  ;;  %v12760_v4 = vld [vmem:[#allocation99_spill] sm:$0xff]  ;;  %v12762_v37 = vld [vmem:[#allocation25_spill] sm:$0xff] }
 0x1af   :  { %v5251_v10 = vpop.f32.mrf.mxu0 }
 0x1b0   :  { %v5444_v35 = vpop.f32.mrf.mxu1  ;;  %v5443_v16 = vadd.f32 %v5442_v19, %v5250_v36  ;;  %v5252_v23 = vadd.f32 %v5251_v10, %v12756_v1  ;;  %v6499_v41 = vmul.f32 0.2, %v5441_v15  ;;  %vm6371_vm0 = vcmp.gt.f32.partialorder %v5441_v15, 0.0  ;;  %v12761_v19 = vld [vmem:[#allocation24_spill] sm:$0xff] }
 0x1b1   :  { %v5253_v32 = vpop.f32.mrf.mxu0 }
 0x1b2   :  { %v5446_v44 = vpop.f32.mrf.mxu1  ;;  %v5445_v18 = vadd.f32 %v5444_v35, %v5252_v23  ;;  %v5254_v30 = vadd.f32 %v5253_v32, %v12757_v3  ;;  %v11215_v36 = vsel %vm6371_vm0, %v5441_v15, %v6499_v41  ;;  %v6500_v1 = vmul.f32 0.2, %v5443_v16  ;;  %v12766_v15 = vld [vmem:[#allocation102_spill] sm:$0xff] }
 0x1b3   :  { %v5257_v26 = vpop.f32.mrf.mxu0  ;;  %12763 = vst [vmem:[#allocation16_spill] sm:$0xff] %v11215_v36  ;;  %vm6372_vm2 = vcmp.gt.f32.partialorder %v5443_v16, 0.0  ;;  %v12771_v36 = vld [vmem:[#allocation27_spill] sm:$0xff] }
 0x1b4   :  { %v5450_v8 = vpop.f32.mrf.mxu1  ;;  %5722 = vmatmul.mubr.bf16.gmra.mxu0 %v12758_v52  ;;  %5915 = vmatmul.mubr.bf16.gmra.mxu1 %v12759_v42  ;;  %vm6375_vm1 = vcmp.gt.f32.partialorder %v5445_v18, 0.0  ;;  %v6503_v56 = vmul.f32 0.2, %v5445_v18  ;;  %v5258_v31 = vadd.f32 %v5257_v26, %v12760_v4  ;;  %v5447_v10 = vadd.f32 %v5446_v44, %v5254_v30  ;;  %v12765_v52 = vld [vmem:[#allocation101_spill] sm:$0xff]  ;;  %v12770_v42 = vld [vmem:[#allocation26_spill] sm:$0xff] }
 0x1b5   :  { %5731 = vmatprep.mubr.bf16.mxu0 %v12761_v19  ;;  %5924 = vmatprep.mubr.bf16.mxu1 %v12762_v37  ;;  %v5259_v23 = vpop.f32.mrf.mxu0 }
 0x1b6   :  { %v5452_v35 = vpop.f32.mrf.mxu1  ;;  %v11217_v32 = vsel %vm6375_vm1, %v5445_v18, %v6503_v56  ;;  %v5451_v3 = vadd.f32 %v5450_v8, %v5258_v31  ;;  %v5260_v48 = vadd.f32 %v5259_v23, %v12765_v52  ;;  %vm6376_vm3 = vcmp.gt.f32.partialorder %v5447_v10, 0.0  ;;  %v12769_v56 = vld [vmem:[#allocation103_spill] sm:$0xff] }
 0x1b7   :  { %12764 = vst [vmem:[#allocation17_spill] sm:$0xff] %v11217_v32  ;;  %v6504_v26 = vmul.f32 0.2, %v5447_v10  ;;  %v5261_v4 = vpop.f32.mrf.mxu0  ;;  %v11225_v8 = vsel %vm6372_vm2, %v5443_v16, %v6500_v1 }
 0x1b8   :  { %v5454_v19 = vpop.f32.mrf.mxu1  ;;  %v5453_v37 = vadd.f32 %v5452_v35, %v5260_v48  ;;  %v5262_v41 = vadd.f32 %v5261_v4, %v12766_v15  ;;  %v6507_v44 = vmul.f32 0.2, %v5451_v3  ;;  %vm6379_vm4 = vcmp.gt.f32.partialorder %v5451_v3, 0.0  ;;  %12768 = vst [vmem:[#allocation19_spill] sm:$0xff] %v11225_v8  ;;  %v12772_v4 = vld [vmem:[#allocation107_spill] sm:$0xff] }
 0x1b9   :  { %v5263_v30 = vpop.f32.mrf.mxu0  ;;  %v11223_v24 = vsel %vm6376_vm3, %v5447_v10, %v6504_v26  ;;  %v12773_v26 = vld [vmem:[#allocation28_spill] sm:$0xff] }
 0x1ba   :  { %v5456_v17 = vpop.f32.mrf.mxu1  ;;  %12767 = vst [vmem:[#allocation18_spill] sm:$0xff] %v11223_v24  ;;  %v5455_v18 = vadd.f32 %v5454_v19, %v5262_v41  ;;  %v5264_v31 = vadd.f32 %v5263_v30, %v12769_v56  ;;  %v12774_v19 = vld [vmem:[#allocation29_spill] sm:$0xff]  ;;  %v11235_v16 = vsel %vm6379_vm4, %v5451_v3, %v6507_v44  ;;  %v6508_v30 = vmul.f32 0.2, %v5453_v37  ;;  %v12778_v44 = vld [vmem:[#allocation110_spill] sm:$0xff]  ;;  %v12783_v24 = vld [vmem:[#allocation31_spill] sm:$0xff] }
 0x1bb   :  { %v5267_v23 = vpop.f32.mrf.mxu0  ;;  %12775 = vst [vmem:[#allocation90_spill] sm:$0xff] %v11235_v16  ;;  %v12777_v56 = vld [vmem:[#allocation109_spill] sm:$0xff]  ;;  %vm6380_vm6 = vcmp.gt.f32.partialorder %v5453_v37, 0.0 }
 0x1bc   :  { %v5460_v52 = vpop.f32.mrf.mxu1  ;;  %5732 = vmatmul.mubr.bf16.gmra.mxu0 %v12770_v42  ;;  %5925 = vmatmul.mubr.bf16.gmra.mxu1 %v12771_v36  ;;  %vm6383_vm5 = vcmp.gt.f32.partialorder %v5455_v18, 0.0  ;;  %v6511_v35 = vmul.f32 0.2, %v5455_v18  ;;  %v5268_v10 = vadd.f32 %v5267_v23, %v12772_v4  ;;  %v5457_v1 = vadd.f32 %v5456_v17, %v5264_v31  ;;  %v9157_v48 = vld [vmem:[#allocation7 + $0x174] ss:$8 sps:$4 sm:$0xff]  }
 0x1bd   :  { %5741 = vmatprep.mubr.bf16.mxu0 %v12773_v26  ;;  %5934 = vmatprep.mubr.bf16.mxu1 %v12774_v19  ;;  %v5269_v15 = vpop.f32.mrf.mxu0 }
 0x1be   :  { %v5462_v41 = vpop.f32.mrf.mxu1  ;;  %v11237_v42 = vsel %vm6383_vm5, %v5455_v18, %v6511_v35  ;;  %v5461_v36 = vadd.f32 %v5460_v52, %v5268_v10  ;;  %v5270_v32 = vadd.f32 %v5269_v15, %v12777_v56  ;;  %vm6384_vm7 = vcmp.gt.f32.partialorder %v5457_v1, 0.0  ;;  %7408 = vmatprep.subr.bf16.mxu1 %v9157_v48  ;;  %v12781_v15 = vld [vmem:[#allocation111_spill] sm:$0xff] }
 0x1bf   :  { %12776 = vst [vmem:[#allocation20_spill] sm:$0xff] %v11237_v42  ;;  %v6512_v4 = vmul.f32 0.2, %v5457_v1  ;;  %v5271_v26 = vpop.f32.mrf.mxu0  ;;  %v11245_v10 = vsel %vm6380_vm6, %v5453_v37, %v6508_v30  ;;  %v12782_v42 = vld [vmem:[#allocation30_spill] sm:$0xff] }
 0x1c0   :  { %v5464_v19 = vpop.f32.mrf.mxu1  ;;  %v5463_v3 = vadd.f32 %v5462_v41, %v5270_v32  ;;  %v5272_v17 = vadd.f32 %v5271_v26, %v12778_v44  ;;  %v6515_v31 = vmul.f32 0.2, %v5461_v36  ;;  %vm6387_vm8 = vcmp.gt.f32.partialorder %v5461_v36, 0.0  ;;  %12780 = vst [vmem:[#allocation93_spill] sm:$0xff] %v11245_v10  ;;  %v12784_v41 = vld [vmem:[#allocation115_spill] sm:$0xff]  ;;  %v12786_v26 = vld [vmem:[#allocation33_spill] sm:$0xff] }
 0x1c1   :  { %v5273_v8 = vpop.f32.mrf.mxu0  ;;  %v11243_v35 = vsel %vm6384_vm7, %v5457_v1, %v6512_v4  ;;  %v12785_v4 = vld [vmem:[#allocation32_spill] sm:$0xff]  ;;  %v12794_v32 = vld [vmem:[#allocation34_spill] sm:$0xff] }
 0x1c2   :  { %v5466_v18 = vpop.f32.mrf.mxu1  ;;  %12779 = vst [vmem:[#allocation21_spill] sm:$0xff] %v11243_v35  ;;  %v5465_v52 = vadd.f32 %v5464_v19, %v5272_v17  ;;  %v5274_v56 = vadd.f32 %v5273_v8, %v12781_v15  ;;  %v11255_v37 = vsel %vm6387_vm8, %v5461_v36, %v6515_v31  ;;  %v6516_v44 = vmul.f32 0.2, %v5463_v3  ;;  %v12789_v17 = vld [vmem:[#allocation117_spill] sm:$0xff]  ;;  %v12790_v36 = vld [vmem:[#allocation118_spill] sm:$0xff] }
 0x1c3   :  { %v5277_v23 = vpop.f32.mrf.mxu0  ;;  %12787 = vst [vmem:[#allocation94_spill] sm:$0xff] %v11255_v37  ;;  %vm6388_vm10 = vcmp.gt.f32.partialorder %v5463_v3, 0.0  ;;  %v12795_v37 = vld [vmem:[#allocation35_spill] sm:$0xff] }
 0x1c4   :  { %v5470_v16 = vpop.f32.mrf.mxu1  ;;  %5742 = vmatmul.mubr.bf16.gmra.mxu0 %v12782_v42  ;;  %5935 = vmatmul.mubr.bf16.gmra.mxu1 %v12783_v24  ;;  %vm6391_vm9 = vcmp.gt.f32.partialorder %v5465_v52, 0.0  ;;  %v6519_v48 = vmul.f32 0.2, %v5465_v52  ;;  %v5278_v1 = vadd.f32 %v5277_v23, %v12784_v41  ;;  %v5467_v8 = vadd.f32 %v5466_v18, %v5274_v56 }
 0x1c5   :  { %5751 = vmatprep.mubr.bf16.mxu0 %v12785_v4  ;;  %5944 = vmatprep.mubr.bf16.mxu1 %v12786_v26  ;;  %v5279_v30 = vpop.f32.mrf.mxu0 }
 0x1c6   :  { %v5472_v19 = vpop.f32.mrf.mxu1  ;;  %v11257_v42 = vsel %vm6391_vm9, %v5465_v52, %v6519_v48  ;;  %v5471_v24 = vadd.f32 %v5470_v16, %v5278_v1  ;;  %v5280_v15 = vadd.f32 %v5279_v30, %v12789_v17  ;;  %vm6392_vm11 = vcmp.gt.f32.partialorder %v5467_v8, 0.0  ;;  %v12793_v48 = vld [vmem:[#allocation119_spill] sm:$0xff] }
 0x1c7   :  { %12788 = vst [vmem:[#allocation95_spill] sm:$0xff] %v11257_v42  ;;  %v6520_v23 = vmul.f32 0.2, %v5467_v8  ;;  %v5281_v41 = vpop.f32.mrf.mxu0  ;;  %v11265_v52 = vsel %vm6388_vm10, %v5463_v3, %v6516_v44 }
 0x1c8   :  { %v5474_v4 = vpop.f32.mrf.mxu1  ;;  %v5473_v26 = vadd.f32 %v5472_v19, %v5280_v15  ;;  %v5282_v31 = vadd.f32 %v5281_v41, %v12790_v36  ;;  %v6523_v18 = vmul.f32 0.2, %v5471_v24  ;;  %vm6395_vm12 = vcmp.gt.f32.partialorder %v5471_v24, 0.0  ;;  %12792 = vst [vmem:[#allocation23_spill] sm:$0xff] %v11265_v52  ;;  %v12796_v41 = vld [vmem:[#allocation122_spill] sm:$0xff] }
 0x1c9   :  { %v5283_v56 = vpop.f32.mrf.mxu0  ;;  %v11263_v35 = vsel %vm6392_vm11, %v5467_v8, %v6520_v23  ;;  %v12797_v23 = vld [vmem:[#allocation36_spill] sm:$0xff]  ;;  %v12803_v19 = vld [vmem:[#allocation38_spill] sm:$0xff] }
 0x1ca   :  { %v5476_v10 = vpop.f32.mrf.mxu1  ;;  %12791 = vst [vmem:[#allocation22_spill] sm:$0xff] %v11263_v35  ;;  %v5475_v16 = vadd.f32 %v5474_v4, %v5282_v31  ;;  %v5284_v1 = vadd.f32 %v5283_v56, %v12793_v48  ;;  %v12798_v4 = vld [vmem:[#allocation37_spill] sm:$0xff]  ;;  %v11275_v3 = vsel %vm6395_vm12, %v5471_v24, %v6523_v18  ;;  %v6524_v56 = vmul.f32 0.2, %v5473_v26  ;;  %v12801_v24 = vld [vmem:[#allocation126_spill] sm:$0xff] }
 0x1cb   :  { %v5287_v30 = vpop.f32.mrf.mxu0  ;;  %12799 = vst [vmem:[#allocation99_spill] sm:$0xff] %v11275_v3  ;;  %v12800_v48 = vld [vmem:[#allocation125_spill] sm:$0xff]  ;;  %vm6396_vm14 = vcmp.gt.f32.partialorder %v5473_v26, 0.0  ;;  %v12804_v3 = vld [vmem:[#allocation39_spill] sm:$0xff] }
 0x1cc   :  { %v5480_v17 = vpop.f32.mrf.mxu1  ;;  %5752 = vmatmul.mubr.bf16.gmra.mxu0 %v12794_v32  ;;  %5945 = vmatmul.mubr.bf16.gmra.mxu1 %v12795_v37  ;;  %vm6399_vm13 = vcmp.gt.f32.partialorder %v5475_v16, 0.0  ;;  %v6527_v15 = vmul.f32 0.2, %v5475_v16  ;;  %v5288_v8 = vadd.f32 %v5287_v30, %v12796_v41  ;;  %v5477_v44 = vadd.f32 %v5476_v10, %v5284_v1 }
 0x1cd   :  { %5761 = vmatprep.mubr.bf16.mxu0 %v12797_v23  ;;  %5954 = vmatprep.mubr.bf16.mxu1 %v12798_v4  ;;  %v5289_v36 = vpop.f32.mrf.mxu0 }
 0x1ce   :  { %v5482_v31 = vpop.f32.mrf.mxu1  ;;  %v11277_v32 = vsel %vm6399_vm13, %v5475_v16, %v6527_v15  ;;  %v5481_v37 = vadd.f32 %v5480_v17, %v5288_v8  ;;  %v5290_v42 = vadd.f32 %v5289_v36, %v12800_v48  ;;  %vm6400_vm15 = vcmp.gt.f32.partialorder %v5477_v44, 0.0  ;;  %v12802_v15 = vld [vmem:[#allocation127_spill] sm:$0xff] }
 0x1cf   :  { %v6528_v30 = vmul.f32 0.2, %v5477_v44  ;;  %v5291_v41 = vpop.f32.mrf.mxu0  ;;  %v11285_v17 = vsel %vm6396_vm14, %v5473_v26, %v6524_v56 }
 0x1d0   :  { %v5484_v23 = vpop.f32.mrf.mxu1  ;;  %v5483_v4 = vadd.f32 %v5482_v31, %v5290_v42  ;;  %v5292_v18 = vadd.f32 %v5291_v41, %v12801_v24  ;;  %v6531_v10 = vmul.f32 0.2, %v5481_v37  ;;  %vm6403_vm0 = vcmp.gt.f32.partialorder %v5481_v37, 0.0  ;;  %v12806_v41 = vld [vmem:[#allocation41_spill] sm:$0xff] }
 0x1d1   :  { %v5293_v1 = vpop.f32.mrf.mxu0  ;;  %v11283_v35 = vsel %vm6400_vm15, %v5477_v44, %v6528_v30  ;;  %v12805_v30 = vld [vmem:[#allocation40_spill] sm:$0xff] }
 0x1d2   :  { %v5486_v52 = vpop.f32.mrf.mxu1  ;;  %v5485_v16 = vadd.f32 %v5484_v23, %v5292_v18  ;;  %v5294_v8 = vadd.f32 %v5293_v1, %v12802_v15  ;;  %v11295_v26 = vsel %vm6403_vm0, %v5481_v37, %v6531_v10  ;;  %v6532_v18 = vmul.f32 0.2, %v5483_v4  ;;  %v12808_v15 = vld [vmem:[#allocation43_spill] sm:$0xff] }
 0x1d3   :  { %v5297_v36 = vpop.f32.mrf.mxu0  ;;  %vm6404_vm2 = vcmp.gt.f32.partialorder %v5483_v4, 0.0 }
 0x1d4   :  { %v5490_v48 = vpop.f32.mrf.mxu1  ;;  %5762 = vmatmul.mubr.bf16.gmra.mxu0 %v12803_v19  ;;  %5955 = vmatmul.mubr.bf16.gmra.mxu1 %v12804_v3  ;;  %vm6407_vm1 = vcmp.gt.f32.partialorder %v5485_v16, 0.0  ;;  %v6535_v31 = vmul.f32 0.2, %v5485_v16  ;;  %v5298_v44 = vadd.f32 %v5297_v36, %v11009_v45  ;;  %v5487_v56 = vadd.f32 %v5486_v52, %v5294_v8 }
 0x1d5   :  { %5771 = vmatprep.mubr.bf16.mxu0 %v12805_v30  ;;  %5964 = vmatprep.mubr.bf16.mxu1 %v12806_v41  ;;  %v5299_v23 = vpop.f32.mrf.mxu0 }
 0x1d6   :  { %v5492_v24 = vpop.f32.mrf.mxu1  ;;  %v11297_v19 = vsel %vm6407_vm1, %v5485_v16, %v6535_v31  ;;  %v5491_v3 = vadd.f32 %v5490_v48, %v5298_v44  ;;  %v5300_v1 = vadd.f32 %v5299_v23, %v11019_v40  ;;  %vm6408_vm3 = vcmp.gt.f32.partialorder %v5487_v56, 0.0  ;;  %v12807_v23 = vld [vmem:[#allocation42_spill] sm:$0xff] }
 0x1d7   :  { %v6536_v45 = vmul.f32 0.2, %v5487_v56  ;;  %v5301_v36 = vpop.f32.mrf.mxu0  ;;  %v11305_v48 = vsel %vm6404_vm2, %v5483_v4, %v6532_v18 }
 0x1d8   :  { %v5494_v30 = vpop.f32.mrf.mxu1  ;;  %v5493_v41 = vadd.f32 %v5492_v24, %v5300_v1  ;;  %v5302_v37 = vadd.f32 %v5301_v36, %v11026_v58  ;;  %v6539_v52 = vmul.f32 0.2, %v5491_v3  ;;  %vm6411_vm4 = vcmp.gt.f32.partialorder %v5491_v3, 0.0  ;;  %v12809_v1 = vld [vmem:[#allocation44_spill] sm:$0xff] }
 0x1d9   :  { %v5303_v10 = vpop.f32.mrf.mxu0  ;;  %v11303_v42 = vsel %vm6408_vm3, %v5487_v56, %v6536_v45  ;;  %v12810_v45 = vld [vmem:[#allocation45_spill] sm:$0xff] }
 0x1da   :  { %v5496_v8 = vpop.f32.mrf.mxu1  ;;  %v5495_v16 = vadd.f32 %v5494_v30, %v5302_v37  ;;  %v5304_v40 = vadd.f32 %v5303_v10, %v11038_v0  ;;  %v11315_v4 = vsel %vm6411_vm4, %v5491_v3, %v6539_v52  ;;  %v6540_v30 = vmul.f32 0.2, %v5493_v41 }
 0x1db   :  { %v5307_v31 = vpop.f32.mrf.mxu0  ;;  %vm6412_vm6 = vcmp.gt.f32.partialorder %v5493_v41, 0.0 }
 0x1dc   :  { %v5500_v44 = vpop.f32.mrf.mxu1  ;;  %5772 = vmatmul.mubr.bf16.gmra.mxu0 %v12807_v23  ;;  %5965 = vmatmul.mubr.bf16.gmra.mxu1 %v12808_v15  ;;  %vm6415_vm5 = vcmp.gt.f32.partialorder %v5495_v16, 0.0  ;;  %v6543_v24 = vmul.f32 0.2, %v5495_v16  ;;  %v5308_v56 = vadd.f32 %v5307_v31, %v11043_v6  ;;  %v5497_v0 = vadd.f32 %v5496_v8, %v5304_v40  ;;  %v12812_v23 = vld [vmem:[#allocation47_spill] sm:$0xff] }
 0x1dd   :  { %5781 = vmatprep.mubr.bf16.mxu0 %v12809_v1  ;;  %5974 = vmatprep.mubr.bf16.mxu1 %v12810_v45  ;;  %v5309_v18 = vpop.f32.mrf.mxu0 }
 0x1de   :  { %v5502_v36 = vpop.f32.mrf.mxu1  ;;  %v11317_v37 = vsel %vm6415_vm5, %v5495_v16, %v6543_v24  ;;  %v5501_v15 = vadd.f32 %v5500_v44, %v5308_v56  ;;  %v5310_v10 = vadd.f32 %v5309_v18, %v11050_v7  ;;  %vm6416_vm7 = vcmp.gt.f32.partialorder %v5497_v0, 0.0  ;;  %v12811_v18 = vld [vmem:[#allocation46_spill] sm:$0xff] }
 0x1df   :  { %v6544_v6 = vmul.f32 0.2, %v5497_v0  ;;  %v5311_v31 = vpop.f32.mrf.mxu0  ;;  %v11325_v44 = vsel %vm6412_vm6, %v5493_v41, %v6540_v30 }
 0x1e0   :  { %v5504_v1 = vpop.f32.mrf.mxu1  ;;  %v5503_v45 = vadd.f32 %v5502_v36, %v5310_v10  ;;  %v5312_v3 = vadd.f32 %v5311_v31, %v11053_v51  ;;  %v6547_v52 = vmul.f32 0.2, %v5501_v15  ;;  %vm6419_vm8 = vcmp.gt.f32.partialorder %v5501_v15, 0.0  ;;  %v12813_v10 = vld [vmem:[#allocation48_spill] sm:$0xff] }
 0x1e1   :  { %v5313_v8 = vpop.f32.mrf.mxu0  ;;  %v11323_v58 = vsel %vm6416_vm7, %v5497_v0, %v6544_v6  ;;  %v12814_v6 = vld [vmem:[#allocation49_spill] sm:$0xff] }
 0x1e2   :  { %v5506_v40 = vpop.f32.mrf.mxu1  ;;  %v5505_v16 = vadd.f32 %v5504_v1, %v5312_v3  ;;  %v5314_v7 = vadd.f32 %v5313_v8, %v11058_v28  ;;  %v11335_v41 = vsel %vm6419_vm8, %v5501_v15, %v6547_v52  ;;  %v6548_v1 = vmul.f32 0.2, %v5503_v45 }
 0x1e3   :  { %v5317_v24 = vpop.f32.mrf.mxu0  ;;  %12815 = vst [vmem:[#allocation24_spill] sm:$0xff] %v11335_v41  ;;  %vm6420_vm10 = vcmp.gt.f32.partialorder %v5503_v45, 0.0  ;;  %v12818_v41 = vld [vmem:[#allocation50_spill] sm:$0xff] }
 0x1e4   :  { %v5510_v56 = vpop.f32.mrf.mxu1  ;;  %5782 = vmatmul.mubr.bf16.gmra.mxu0 %v12811_v18  ;;  %5975 = vmatmul.mubr.bf16.gmra.mxu1 %v12812_v23  ;;  %vm6423_vm9 = vcmp.gt.f32.partialorder %v5505_v16, 0.0  ;;  %v6551_v36 = vmul.f32 0.2, %v5505_v16  ;;  %v5318_v0 = vadd.f32 %v5317_v24, %v11063_v46  ;;  %v5507_v28 = vadd.f32 %v5506_v40, %v5314_v7 }
 0x1e5   :  { %6017 = vmatprep.mubr.bf16.mxu0 %v12813_v10  ;;  %6210 = vmatprep.mubr.bf16.mxu1 %v12814_v6  ;;  %v5319_v30 = vpop.f32.mrf.mxu0  ;;  %v11348_v18 = vsel %vm6420_vm10, %v5503_v45, %v6548_v1 }
 0x1e6   :  { %v5512_v31 = vpop.f32.mrf.mxu1  ;;  %v11337_v3 = vsel %vm6423_vm9, %v5505_v16, %v6551_v36  ;;  %v5511_v23 = vadd.f32 %v5510_v56, %v5318_v0  ;;  %v5320_v8 = vadd.f32 %v5319_v30, %v11066_v63  ;;  %vm6424_vm11 = vcmp.gt.f32.partialorder %v5507_v28, 0.0  ;;  %v9140_v16 = vld [vmem:[#allocation7 + $0x70] ss:$8 sps:$4 sm:$0xff]   ;;  %v9145_v0 = vld [vmem:[#allocation7 + $0x64] ss:$8 sps:$4 sm:$0xff]   ;;  %12817 = vst [vmem:[#allocation101_spill] sm:$0xff] %v11348_v18 }
 0x1e7   :  { %12816 = vst [vmem:[#allocation25_spill] sm:$0xff] %v11337_v3  ;;  %v6552_v46 = vmul.f32 0.2, %v5507_v28  ;;  %v5321_v24 = vpop.f32.mrf.mxu0  ;;  %v9155_v36 = vld [vmem:[#allocation7 + $0x170] ss:$8 sps:$4 sm:$0xff]  }
 0x1e8   :  { %v5514_v10 = vpop.f32.mrf.mxu1  ;;  %v11342_v6 = vadd.f32 %v5512_v31, %v5320_v8  ;;  %v5322_v15 = vadd.f32 %v5321_v24, %v11069_v55  ;;  %v6555_v52 = vmul.f32 0.2, %v5511_v23  ;;  %vm6427_vm12 = vcmp.gt.f32.partialorder %v5511_v23, 0.0  ;;  %v9166_v30 = vld [vmem:[#allocation7 + $0x164] ss:$8 sps:$4 sm:$0xff]  }
 0x1e9   :  { %v5323_v40 = vpop.f32.mrf.mxu0  ;;  %v11345_v56 = vsel %vm6424_vm11, %v5507_v28, %v6552_v46  ;;  %v12819_v55 = vld [vmem:[#allocation51_spill] sm:$0xff] }
 0x1ea   :  { %v5516_v7 = vpop.f32.mrf.mxu1  ;;  %v5515_v63 = vadd.f32 %v5514_v10, %v5322_v15  ;;  %v5324_v51 = vadd.f32 %v5323_v40, %v11074_v61  ;;  %v12820_v10 = vld [vmem:[#allocation52_spill] sm:$0xff]  ;;  %v12821_v15 = vld [vmem:[#allocation53_spill] sm:$0xff]  ;;  %v11359_v45 = vsel %vm6427_vm12, %v5511_v23, %v6555_v52  ;;  %v6556_v24 = vmul.f32 0.2, %v11342_v6 }
 0x1eb   :  { %v5327_v31 = vpop.f32.mrf.mxu0  ;;  %vm6428_vm14 = vcmp.gt.f32.partialorder %v11342_v6, 0.0 }
 0x1ec   :  { %v5520_v8 = vpop.f32.mrf.mxu1  ;;  %6018 = vmatmul.mubr.bf16.vlgmr.msra.gmra.mxu0 %v12818_v41  ;;  %6211 = vmatmul.mubr.bf16.vlgmr.msra.gmra.mxu1 %v12819_v55  ;;  %vm6431_vm13 = vcmp.gt.f32.partialorder %v5515_v63, 0.0  ;;  %v6559_v28 = vmul.f32 0.2, %v5515_v63  ;;  %v5328_v46 = vadd.f32 %v5327_v31, %v11079_v9  ;;  %v5517_v61 = vadd.f32 %v5516_v7, %v5324_v51  ;;  %v9143_v41 = vld [vmem:[#allocation7 + $0x60] ss:$8 sps:$4 sm:$0xff]  }
 0x1ed   :  { %6027 = vmatprep.mubr.bf16.mxu0 %v12820_v10  ;;  %6220 = vmatprep.mubr.bf16.mxu1 %v12821_v15  ;;  %v5329_v1 = vpop.f32.mrf.mxu0  ;;  %v9164_v55 = vld [vmem:[#allocation7 + $0x160] ss:$8 sps:$4 sm:$0xff]   ;;  %v9148_v31 = vld [vmem:[#allocation7 + $0x54] ss:$8 sps:$4 sm:$0xff]   ;;  %v9151_v15 = vld [vmem:[#allocation7 + $0x44] ss:$8 sps:$4 sm:$0xff]  }
 0x1ee   :  { %v5522_v40 = vpop.f32.mrf.mxu1  ;;  %7216 = vmatpush1.bf16.msra.mxu0 %v9140_v16  ;;  %7409 = vmatpush1.bf16.msra.mxu1 %v9155_v36  ;;  %v11362_v3 = vsel %vm6431_vm13, %v5515_v63, %v6559_v28  ;;  %v5521_v18 = vadd.f32 %v5520_v8, %v5328_v46  ;;  %v5330_v9 = vadd.f32 %v5329_v1, %v11082_v5  ;;  %v9175_v10 = vld [vmem:[#allocation7 + $0x154] ss:$8 sps:$4 sm:$0xff]   ;;  %vm6432_vm15 = vcmp.gt.f32.partialorder %v5517_v61, 0.0  ;;  %v9184_v1 = vld [vmem:[#allocation7 + $0x144] ss:$8 sps:$4 sm:$0xff]  }
 0x1ef   :  { %7217 = vmatprep.subr.bf16.mxu0 %v9145_v0  ;;  %7410 = vmatprep.subr.bf16.mxu1 %v9166_v30  ;;  %v6560_v23 = vmul.f32 0.2, %v5517_v61  ;;  %v5331_v52 = vpop.f32.mrf.mxu0  ;;  %v9146_v0 = vld [vmem:[#allocation7 + $0x50] ss:$8 sps:$4 sm:$0xff]  }
 0x1f0   :  { %v5524_v7 = vpop.f32.mrf.mxu1  ;;  %v11368_v16 = vadd.f32 %v5522_v40, %v5330_v9  ;;  %v5332_v36 = vadd.f32 %v5331_v52, %v11085_v43  ;;  %v6563_v63 = vmul.f32 0.2, %v5521_v18  ;;  %v9173_v30 = vld [vmem:[#allocation7 + $0x150] ss:$8 sps:$4 sm:$0xff]   ;;  %vm6435_vm0 = vcmp.gt.f32.partialorder %v5521_v18, 0.0  ;;  %v12822_v52 = vld [vmem:[#allocation54_spill] sm:$0xff] }
 0x1f1   :  { %v5333_v8 = vpop.f32.mrf.mxu0  ;;  %v11371_v28 = vsel %vm6432_vm15, %v5517_v61, %v6560_v23  ;;  %v11376_v40 = vsel %vm6428_vm14, %v11342_v6, %v6556_v24  ;;  %v12824_v23 = vld [vmem:[#allocation56_spill] sm:$0xff] }
 0x1f2   :  { %v5526_v5 = vpop.f32.mrf.mxu1  ;;  %7218 = vmatpush1.bf16.msra.mxu0 %v9143_v41  ;;  %7411 = vmatpush1.bf16.msra.mxu1 %v9164_v55  ;;  %v5525_v46 = vadd.f32 %v5524_v7, %v5332_v36  ;;  %v5334_v43 = vadd.f32 %v5333_v8, %v11090_v2  ;;  %v12823_v55 = vld [vmem:[#allocation55_spill] sm:$0xff]  ;;  %v12825_v7 = vld [vmem:[#allocation57_spill] sm:$0xff]  ;;  %v11387_v6 = vsel %vm6435_vm0, %v5521_v18, %v6563_v63  ;;  %vm6436_vm2 = vcmp.gt.f32.partialorder %v11368_v16, 0.0 }
 0x1f3   :  { %7219 = vmatprep.subr.bf16.mxu0 %v9148_v31  ;;  %7412 = vmatprep.subr.bf16.mxu1 %v9175_v10  ;;  %v5337_v9 = vpop.f32.mrf.mxu0  ;;  %v9149_v8 = vld [vmem:[#allocation7 + $0x40] ss:$8 sps:$4 sm:$0xff]  }
 0x1f4   :  { %v5530_v41 = vpop.f32.mrf.mxu1  ;;  %6028 = vmatmul.mubr.bf16.gmra.mxu0 %v12822_v52  ;;  %6221 = vmatmul.mubr.bf16.gmra.mxu1 %v12823_v55  ;;  %vm6439_vm1 = vcmp.gt.f32.partialorder %v5525_v46, 0.0  ;;  %v6567_v31 = vmul.f32 0.2, %v5525_v46  ;;  %v5338_v10 = vadd.f32 %v5337_v9, %v11095_v22  ;;  %v5527_v2 = vadd.f32 %v5526_v5, %v5334_v43  ;;  %v9182_v52 = vld [vmem:[#allocation7 + $0x140] ss:$8 sps:$4 sm:$0xff]  }
 0x1f5   :  { %6037 = vmatprep.mubr.bf16.mxu0 %v12824_v23  ;;  %6230 = vmatprep.mubr.bf16.mxu1 %v12825_v7  ;;  %v5339_v24 = vpop.f32.mrf.mxu0  ;;  %v6564_v55 = vmul.f32 0.2, %v11368_v16  ;;  %v9154_v9 = vld [vmem:[#allocation7 + $0x34] ss:$8 sps:$4 sm:$0xff]   ;;  %v9160_v7 = vld [vmem:[#allocation7 + $0x24] ss:$8 sps:$4 sm:$0xff]  }
 0x1f6   :  { %v5532_v36 = vpop.f32.mrf.mxu1  ;;  %7220 = vmatpush1.bf16.msra.mxu0 %v9146_v0  ;;  %7413 = vmatpush1.bf16.msra.mxu1 %v9173_v30  ;;  %v11390_v51 = vsel %vm6439_vm1, %v5525_v46, %v6567_v31  ;;  %v5531_v61 = vadd.f32 %v5530_v41, %v5338_v10  ;;  %v5340_v22 = vadd.f32 %v5339_v24, %v11098_v50  ;;  %v9193_v23 = vld [vmem:[#allocation7 + $0x134] ss:$8 sps:$4 sm:$0xff]   ;;  %vm6440_vm3 = vcmp.gt.f32.partialorder %v5527_v2, 0.0  ;;  %v9202_v24 = vld [vmem:[#allocation7 + $0x124] ss:$8 sps:$4 sm:$0xff]  }
 0x1f7   :  { %7221 = vmatprep.subr.bf16.mxu0 %v9151_v15  ;;  %7414 = vmatprep.subr.bf16.mxu1 %v9184_v1  ;;  %v6568_v63 = vmul.f32 0.2, %v5527_v2  ;;  %v5341_v5 = vpop.f32.mrf.mxu0  ;;  %v9152_v15 = vld [vmem:[#allocation7 + $0x30] ss:$8 sps:$4 sm:$0xff]  }
 0x1f8   :  { %v5534_v0 = vpop.f32.mrf.mxu1  ;;  %v11396_v30 = vadd.f32 %v5532_v36, %v5340_v22  ;;  %v5342_v46 = vadd.f32 %v5341_v5, %v11101_v12  ;;  %v6571_v43 = vmul.f32 0.2, %v5531_v61  ;;  %v9191_v1 = vld [vmem:[#allocation7 + $0x130] ss:$8 sps:$4 sm:$0xff]   ;;  %vm6443_vm4 = vcmp.gt.f32.partialorder %v5531_v61, 0.0  ;;  %v12826_v5 = vld [vmem:[#allocation58_spill] sm:$0xff] }
 0x1f9   :  { %v5343_v41 = vpop.f32.mrf.mxu0  ;;  %v11399_v31 = vsel %vm6440_vm3, %v5527_v2, %v6568_v63  ;;  %v11404_v36 = vsel %vm6436_vm2, %v11368_v16, %v6564_v55  ;;  %v12828_v63 = vld [vmem:[#allocation60_spill] sm:$0xff] }
 0x1fa   :  { %v5536_v50 = vpop.f32.mrf.mxu1  ;;  %7222 = vmatpush1.bf16.msra.mxu0 %v9149_v8  ;;  %7415 = vmatpush1.bf16.msra.mxu1 %v9182_v52  ;;  %v5535_v10 = vadd.f32 %v5534_v0, %v5342_v46  ;;  %v5344_v12 = vadd.f32 %v5343_v41, %v11106_v29  ;;  %v12827_v52 = vld [vmem:[#allocation59_spill] sm:$0xff]  ;;  %v12829_v0 = vld [vmem:[#allocation61_spill] sm:$0xff]  ;;  %v11415_v16 = vsel %vm6443_vm4, %v5531_v61, %v6571_v43  ;;  %vm6444_vm6 = vcmp.gt.f32.partialorder %v11396_v30, 0.0 }
 0x1fb   :  { %7223 = vmatprep.subr.bf16.mxu0 %v9154_v9  ;;  %7416 = vmatprep.subr.bf16.mxu1 %v9193_v23  ;;  %v5347_v22 = vpop.f32.mrf.mxu0  ;;  %v9158_v41 = vld [vmem:[#allocation7 + $0x20] ss:$8 sps:$4 sm:$0xff]  }
 0x1fc   :  { %v5540_v8 = vpop.f32.mrf.mxu1  ;;  %6038 = vmatmul.mubr.bf16.gmra.mxu0 %v12826_v5  ;;  %6231 = vmatmul.mubr.bf16.gmra.mxu1 %v12827_v52  ;;  %vm6447_vm5 = vcmp.gt.f32.partialorder %v5535_v10, 0.0  ;;  %v6575_v9 = vmul.f32 0.2, %v5535_v10  ;;  %v5348_v23 = vadd.f32 %v5347_v22, %v11111_v60  ;;  %v5537_v29 = vadd.f32 %v5536_v50, %v5344_v12  ;;  %v9200_v5 = vld [vmem:[#allocation7 + $0x120] ss:$8 sps:$4 sm:$0xff]  }
 0x1fd   :  { %6047 = vmatprep.mubr.bf16.mxu0 %v12828_v63  ;;  %6240 = vmatprep.mubr.bf16.mxu1 %v12829_v0  ;;  %v5349_v55 = vpop.f32.mrf.mxu0  ;;  %v6572_v52 = vmul.f32 0.2, %v11396_v30  ;;  %v9163_v22 = vld [vmem:[#allocation7 + $0x14] ss:$8 sps:$4 sm:$0xff]   ;;  %v9169_v0 = vld [vmem:[#allocation7 + $0x4] ss:$8 sps:$4 sm:$0xff]  }
 0x1fe   :  { %v5542_v46 = vpop.f32.mrf.mxu1  ;;  %7224 = vmatpush1.bf16.msra.mxu0 %v9152_v15  ;;  %7417 = vmatpush1.bf16.msra.mxu1 %v9191_v1  ;;  %v11418_v18 = vsel %vm6447_vm5, %v5535_v10, %v6575_v9  ;;  %v5541_v2 = vadd.f32 %v5540_v8, %v5348_v23  ;;  %v5350_v60 = vadd.f32 %v5349_v55, %v11114_v14  ;;  %v9208_v63 = vld [vmem:[#allocation7 + $0x114] ss:$8 sps:$4 sm:$0xff]   ;;  %vm6448_vm7 = vcmp.gt.f32.partialorder %v5537_v29, 0.0  ;;  %v9211_v55 = vld [vmem:[#allocation7 + $0x104] ss:$8 sps:$4 sm:$0xff]  }
 0x1ff   :  { %7225 = vmatprep.subr.bf16.mxu0 %v9160_v7  ;;  %7418 = vmatprep.subr.bf16.mxu1 %v9202_v24  ;;  %v6576_v43 = vmul.f32 0.2, %v5537_v29  ;;  %v5351_v50 = vpop.f32.mrf.mxu0  ;;  %v9161_v7 = vld [vmem:[#allocation7 + $0x10] ss:$8 sps:$4 sm:$0xff]  }
 0x200   :  { %v5544_v15 = vpop.f32.mrf.mxu1  ;;  %v11424_v1 = vadd.f32 %v5542_v46, %v5350_v60  ;;  %v5352_v10 = vadd.f32 %v5351_v50, %v11117_v11  ;;  %v6579_v12 = vmul.f32 0.2, %v5541_v2  ;;  %v9206_v24 = vld [vmem:[#allocation7 + $0x110] ss:$8 sps:$4 sm:$0xff]   ;;  %vm6451_vm8 = vcmp.gt.f32.partialorder %v5541_v2, 0.0  ;;  %v12830_v50 = vld [vmem:[#allocation62_spill] sm:$0xff] }
 0x201   :  { %v5353_v8 = vpop.f32.mrf.mxu0  ;;  %v11427_v9 = vsel %vm6448_vm7, %v5537_v29, %v6576_v43  ;;  %v11432_v46 = vsel %vm6444_vm6, %v11396_v30, %v6572_v52  ;;  %v12832_v43 = vld [vmem:[#allocation64_spill] sm:$0xff] }
 0x202   :  { %v5546_v14 = vpop.f32.mrf.mxu1  ;;  %7226 = vmatpush1.bf16.msra.mxu0 %v9158_v41  ;;  %7419 = vmatpush1.bf16.msra.mxu1 %v9200_v5  ;;  %v5545_v23 = vadd.f32 %v5544_v15, %v5352_v10  ;;  %v5354_v11 = vadd.f32 %v5353_v8, %v11122_v33  ;;  %v12831_v5 = vld [vmem:[#allocation63_spill] sm:$0xff]  ;;  %v12833_v15 = vld [vmem:[#allocation65_spill] sm:$0xff]  ;;  %v11443_v30 = vsel %vm6451_vm8, %v5541_v2, %v6579_v12  ;;  %vm6452_vm10 = vcmp.gt.f32.partialorder %v11424_v1, 0.0 }
 0x203   :  { %7227 = vmatprep.subr.bf16.mxu0 %v9163_v22  ;;  %7420 = vmatprep.subr.bf16.mxu1 %v9208_v63  ;;  %v9167_v8 = vld [vmem:[#allocation7] ss:$8 sps:$4 sm:$0xff]  }
 0x204   :  { %v5357_v60 = vpop.f32.mrf.mxu0  ;;  %v5550_v41 = vpop.f32.mrf.mxu1  ;;  %6048 = vmatmul.mubr.bf16.gmra.mxu0 %v12830_v50  ;;  %6241 = vmatmul.mubr.bf16.gmra.mxu1 %v12831_v5  ;;  %vm6455_vm9 = vcmp.gt.f32.partialorder %v5545_v23, 0.0  ;;  %v6583_v22 = vmul.f32 0.2, %v5545_v23  ;;  %v5547_v33 = vadd.f32 %v5546_v14, %v5354_v11  ;;  %v9209_v50 = vld [vmem:[#allocation7 + $0x100] ss:$8 sps:$4 sm:$0xff]  }
 0x205   :  { %v5358_v63 = vadd.f32 %v5357_v60, %v11127_v13  ;;  %6057 = vmatprep.mubr.bf16.mxu0 %v12832_v43  ;;  %6250 = vmatprep.mubr.bf16.mxu1 %v12833_v15  ;;  %v6580_v5 = vmul.f32 0.2, %v11424_v1  ;;  %v9172_v60 = vld [vmem:[#allocation7 + $0xf4] ss:$8 sps:$4 sm:$0xff]   ;;  %v9178_v15 = vld [vmem:[#allocation7 + $0xe4] ss:$8 sps:$4 sm:$0xff]  }
 0x206   :  { %v5359_v52 = vpop.f32.mrf.mxu0  ;;  %v5552_v10 = vpop.f32.mrf.mxu1  ;;  %7228 = vmatpush1.bf16.msra.mxu0 %v9161_v7  ;;  %7421 = vmatpush1.bf16.msra.mxu1 %v9206_v24  ;;  %v11446_v61 = vsel %vm6455_vm9, %v5545_v23, %v6583_v22  ;;  %v9214_v43 = vld [vmem:[#allocation7 + $0x1f4] ss:$8 sps:$4 sm:$0xff]   ;;  %vm6456_vm11 = vcmp.gt.f32.partialorder %v5547_v33, 0.0  ;;  %v6584_v12 = vmul.f32 0.2, %v5547_v33 }
 0x207   :  { %v5551_v29 = vadd.f32 %v5550_v41, %v5358_v63  ;;  %v5360_v13 = vadd.f32 %v5359_v52, %v11130_v25  ;;  %7229 = vmatprep.subr.bf16.mxu0 %v9169_v0  ;;  %7422 = vmatprep.subr.bf16.mxu1 %v9211_v55  ;;  %v9170_v0 = vld [vmem:[#allocation7 + $0xf0] ss:$8 sps:$4 sm:$0xff]   ;;  %v9217_v52 = vld [vmem:[#allocation7 + $0x1e4] ss:$8 sps:$4 sm:$0xff]  }
 0x208   :  { %v5361_v14 = vpop.f32.mrf.mxu0  ;;  %v5554_v7 = vpop.f32.mrf.mxu1  ;;  %v9212_v55 = vld [vmem:[#allocation7 + $0x1f0] ss:$8 sps:$4 sm:$0xff]   ;;  %v11455_v22 = vsel %vm6456_vm11, %v5547_v33, %v6584_v12 }
 0x209   :  { %v11452_v24 = vadd.f32 %v5552_v10, %v5360_v13  ;;  %v5362_v23 = vadd.f32 %v5361_v14, %v11133_v38  ;;  %v6587_v11 = vmul.f32 0.2, %v5551_v29  ;;  %vm6459_vm12 = vcmp.gt.f32.partialorder %v5551_v29, 0.0  ;;  %v12834_v14 = vld [vmem:[#allocation66_spill] sm:$0xff]  ;;  %v12836_v12 = vld [vmem:[#allocation68_spill] sm:$0xff] }
 0x20a   :  { %v5363_v41 = vpop.f32.mrf.mxu0  ;;  %v5556_v25 = vpop.f32.mrf.mxu1  ;;  %7230 = vmatpush1.bf16.msra.mxu0 %v9167_v8  ;;  %7423 = vmatpush1.bf16.msra.mxu1 %v9209_v50  ;;  %v11460_v10 = vsel %vm6452_vm10, %v11424_v1, %v6580_v5  ;;  %v12835_v50 = vld [vmem:[#allocation67_spill] sm:$0xff] }
 0x20b   :  { %v5555_v63 = vadd.f32 %v5554_v7, %v5362_v23  ;;  %7231 = vmatprep.subr.bf16.mxu0 %v9172_v60  ;;  %7424 = vmatprep.subr.bf16.mxu1 %v9214_v43  ;;  %v5364_v38 = vadd.f32 %v5363_v41, %v11138_v34  ;;  %v12837_v7 = vld [vmem:[#allocation69_spill] sm:$0xff]  ;;  %v11471_v1 = vsel %vm6459_vm12, %v5551_v29, %v6587_v11  ;;  %v9176_v41 = vld [vmem:[#allocation7 + $0xe0] ss:$8 sps:$4 sm:$0xff]   ;;  %vm6460_vm14 = vcmp.gt.f32.partialorder %v11452_v24, 0.0 }
 0x20c   :  { %v5367_v13 = vpop.f32.mrf.mxu0  ;;  %v5560_v8 = vpop.f32.mrf.mxu1  ;;  %6058 = vmatmul.mubr.bf16.gmra.mxu0 %v12834_v14  ;;  %6251 = vmatmul.mubr.bf16.gmra.mxu1 %v12835_v50  ;;  %v9215_v14 = vld [vmem:[#allocation7 + $0x1e0] ss:$8 sps:$4 sm:$0xff]   ;;  %v6588_v50 = vmul.f32 0.2, %v11452_v24 }
 0x20d   :  { %vm6463_vm13 = vcmp.gt.f32.partialorder %v5555_v63, 0.0  ;;  %v6591_v60 = vmul.f32 0.2, %v5555_v63  ;;  %v5368_v43 = vadd.f32 %v5367_v13, %v11143_v47  ;;  %6067 = vmatprep.mubr.bf16.mxu0 %v12836_v12  ;;  %6260 = vmatprep.mubr.bf16.mxu1 %v12837_v7  ;;  %v5557_v34 = vadd.f32 %v5556_v25, %v5364_v38  ;;  %v9181_v13 = vld [vmem:[#allocation7 + $0xd4] ss:$8 sps:$4 sm:$0xff]  }
 0x20e   :  { %v5369_v5 = vpop.f32.mrf.mxu0  ;;  %v5562_v23 = vpop.f32.mrf.mxu1  ;;  %7232 = vmatpush2.bf16.msra.mxu0 %v9170_v0  ;;  %7425 = vmatpush2.bf16.msra.mxu1 %v9212_v55  ;;  %v9220_v12 = vld [vmem:[#allocation7 + $0x1d4] ss:$8 sps:$4 sm:$0xff]   ;;  %v9187_v7 = vld [vmem:[#allocation7 + $0xc4] ss:$8 sps:$4 sm:$0xff]  }
 0x20f   :  { %v11474_v2 = vsel %vm6463_vm13, %v5555_v63, %v6591_v60  ;;  %v5561_v33 = vadd.f32 %v5560_v8, %v5368_v43  ;;  %v5370_v47 = vadd.f32 %v5369_v5, %v11146_v53  ;;  %7233 = vmatprep.subr.bf16.mxu0 %v9178_v15  ;;  %7426 = vmatprep.subr.bf16.mxu1 %v9217_v52  ;;  %vm6464_vm15 = vcmp.gt.f32.partialorder %v5557_v34, 0.0  ;;  %v9179_v15 = vld [vmem:[#allocation7 + $0xd0] ss:$8 sps:$4 sm:$0xff]  }
 0x210   :  { %v6592_v11 = vmul.f32 0.2, %v5557_v34  ;;  %v5371_v25 = vpop.f32.mrf.mxu0  ;;  %v5564_v0 = vpop.f32.mrf.mxu1  ;;  %v9218_v52 = vld [vmem:[#allocation7 + $0x1d0] ss:$8 sps:$4 sm:$0xff]   ;;  %v11488_v5 = vsel %vm6460_vm14, %v11452_v24, %v6588_v50 }
 0x211   :  { %v11480_v55 = vadd.f32 %v5562_v23, %v5370_v47  ;;  %v5372_v63 = vadd.f32 %v5371_v25, %v11149_v21  ;;  %v6595_v38 = vmul.f32 0.2, %v5561_v33  ;;  %vm6467_vm0 = vcmp.gt.f32.partialorder %v5561_v33, 0.0  ;;  %v12841_v25 = vld [vmem:[#allocation73_spill] sm:$0xff] }
 0x212   :  { %v5373_v8 = vpop.f32.mrf.mxu0  ;;  %v5566_v53 = vpop.f32.mrf.mxu1  ;;  %7234 = vmatpush2.bf16.msra.mxu0 %v9176_v41  ;;  %7427 = vmatpush2.bf16.msra.mxu1 %v9215_v14  ;;  %v11483_v60 = vsel %vm6464_vm15, %v5557_v34, %v6592_v11  ;;  %v12838_v41 = vld [vmem:[#allocation70_spill] sm:$0xff]  ;;  %v12839_v14 = vld [vmem:[#allocation71_spill] sm:$0xff]  ;;  %v12840_v11 = vld [vmem:[#allocation72_spill] sm:$0xff] }
 0x213   :  { %v5565_v43 = vadd.f32 %v5564_v0, %v5372_v63  ;;  %7235 = vmatprep.subr.bf16.mxu0 %v9181_v13  ;;  %7428 = vmatprep.subr.bf16.mxu1 %v9220_v12  ;;  %v5374_v21 = vadd.f32 %v5373_v8, %v11154_v20  ;;  %v11499_v24 = vsel %vm6467_vm0, %v5561_v33, %v6595_v38  ;;  %v9185_v63 = vld [vmem:[#allocation7 + $0xc0] ss:$8 sps:$4 sm:$0xff]   ;;  %v9190_v8 = vld [vmem:[#allocation7 + $0xb4] ss:$8 sps:$4 sm:$0xff]   ;;  %vm6468_vm2 = vcmp.gt.f32.partialorder %v11480_v55, 0.0 }
 0x214   :  { %v5377_v23 = vpop.f32.mrf.mxu0  ;;  %v5570_v47 = vpop.f32.mrf.mxu1  ;;  %6068 = vmatmul.mubr.bf16.gmra.mxu0 %v12838_v41  ;;  %6261 = vmatmul.mubr.bf16.gmra.mxu1 %v12839_v14  ;;  %12842 = vst [vmem:[#allocation102_spill] sm:$0xff] %v11499_v24  ;;  %v6596_v41 = vmul.f32 0.2, %v11480_v55 }
 0x215   :  { %vm6471_vm1 = vcmp.gt.f32.partialorder %v5565_v43, 0.0  ;;  %v6599_v13 = vmul.f32 0.2, %v5565_v43  ;;  %v5378_v12 = vadd.f32 %v5377_v23, %v11159_v57  ;;  %6077 = vmatprep.mubr.bf16.mxu0 %v12840_v11  ;;  %6270 = vmatprep.mubr.bf16.mxu1 %v12841_v25  ;;  %v5567_v20 = vadd.f32 %v5566_v53, %v5374_v21  ;;  %v9221_v23 = vld [vmem:[#allocation7 + $0x1c0] ss:$8 sps:$4 sm:$0xff]  }
 0x216   :  { %v5379_v50 = vpop.f32.mrf.mxu0  ;;  %v5572_v0 = vpop.f32.mrf.mxu1  ;;  %7236 = vmatpush2.bf16.msra.mxu0 %v9179_v15  ;;  %7429 = vmatpush2.bf16.msra.mxu1 %v9218_v52  ;;  %v9223_v11 = vld [vmem:[#allocation7 + $0x1c4] ss:$8 sps:$4 sm:$0xff]  }
 0x217   :  { %v11502_v14 = vsel %vm6471_vm1, %v5565_v43, %v6599_v13  ;;  %v5571_v29 = vadd.f32 %v5570_v47, %v5378_v12  ;;  %v5380_v57 = vadd.f32 %v5379_v50, %v11162_v54  ;;  %7237 = vmatprep.subr.bf16.mxu0 %v9187_v7  ;;  %vm6472_vm3 = vcmp.gt.f32.partialorder %v5567_v20, 0.0  ;;  %7430 = vmatprep.subr.bf16.mxu1 %v9223_v11  ;;  %v9188_v54 = vld [vmem:[#allocation7 + $0xb0] ss:$8 sps:$4 sm:$0xff]   ;;  %v9196_v25 = vld [vmem:[#allocation7 + $0xa4] ss:$8 sps:$4 sm:$0xff]  }
 0x218   :  { %12843 = vst [vmem:[#allocation103_spill] sm:$0xff] %v11502_v14  ;;  %v6600_v38 = vmul.f32 0.2, %v5567_v20  ;;  %v5381_v53 = vpop.f32.mrf.mxu0  ;;  %v5574_v15 = vpop.f32.mrf.mxu1  ;;  %v11514_v50 = vsel %vm6468_vm2, %v11480_v55, %v6596_v41  ;;  %v12846_v11 = vld [vmem:[#allocation74_spill] sm:$0xff] }
 0x219   :  { %v5573_v52 = vadd.f32 %v5572_v0, %v5380_v57  ;;  %v5382_v21 = vadd.f32 %v5381_v53, %v11165_v39  ;;  %v6603_v43 = vmul.f32 0.2, %v5571_v29  ;;  %vm6475_vm4 = vcmp.gt.f32.partialorder %v5571_v29, 0.0  ;;  %12845 = vst [vmem:[#allocation27_spill] sm:$0xff] %v11514_v50  ;;  %v12849_v53 = vld [vmem:[#allocation77_spill] sm:$0xff]  ;;  %v12890_v50 = vld [vmem:[#allocation112_spill] sm:$0xff] }
 0x21a   :  { %v5383_v47 = vpop.f32.mrf.mxu0  ;;  %v5576_v13 = vpop.f32.mrf.mxu1  ;;  %7238 = vmatpush2.bf16.msra.mxu0 %v9185_v63  ;;  %7431 = vmatpush2.bf16.msra.mxu1 %v9221_v23  ;;  %v11509_v7 = vsel %vm6472_vm3, %v5567_v20, %v6600_v38  ;;  %v12847_v63 = vld [vmem:[#allocation75_spill] sm:$0xff]  ;;  %v12848_v38 = vld [vmem:[#allocation76_spill] sm:$0xff] }
 0x21b   :  { %12844 = vst [vmem:[#allocation26_spill] sm:$0xff] %v11509_v7  ;;  %v5575_v12 = vadd.f32 %v5574_v15, %v5382_v21  ;;  %7239 = vmatprep.subr.bf16.mxu0 %v9190_v8  ;;  %v5384_v39 = vadd.f32 %v5383_v47, %v11170_v59  ;;  %v11525_v55 = vsel %vm6475_vm4, %v5571_v29, %v6603_v43  ;;  %v9194_v21 = vld [vmem:[#allocation7 + $0xa0] ss:$8 sps:$4 sm:$0xff]   ;;  %v9199_v47 = vld [vmem:[#allocation7 + $0x94] ss:$8 sps:$4 sm:$0xff]   ;;  %vm6476_vm6 = vcmp.gt.f32.partialorder %v5573_v52, 0.0 }
 0x21c   :  { %v5387_v0 = vpop.f32.mrf.mxu0  ;;  %v5580_v57 = vpop.f32.mrf.mxu1  ;;  %6078 = vmatmul.mubr.bf16.gmra.mxu0 %v12846_v11  ;;  %6271 = vmatmul.mubr.bf16.gmra.mxu1 %v12847_v63  ;;  %12850 = vst [vmem:[#allocation107_spill] sm:$0xff] %v11525_v55  ;;  %v6604_v11 = vmul.f32 0.2, %v5573_v52  ;;  %v12854_v29 = vld [vmem:[#allocation11_spill] sm:$0xff] }
 0x21d   :  { %vm6479_vm5 = vcmp.gt.f32.partialorder %v5575_v12, 0.0  ;;  %v6607_v23 = vmul.f32 0.2, %v5575_v12  ;;  %v5388_v8 = vadd.f32 %v5387_v0, %v11175_v27  ;;  %6087 = vmatprep.mubr.bf16.mxu0 %v12848_v38  ;;  %6280 = vmatprep.mubr.bf16.mxu1 %v12849_v53  ;;  %v5577_v59 = vadd.f32 %v5576_v13, %v5384_v39  ;;  %v9224_v27 = vld [vmem:[#allocation7 + $0x1b0] ss:$8 sps:$4 sm:$0xff]  }
 0x21e   :  { %v5389_v41 = vpop.f32.mrf.mxu0  ;;  %v5582_v15 = vpop.f32.mrf.mxu1  ;;  %7240 = vmatpush2.bf16.msra.mxu0 %v9188_v54  ;;  %v9226_v0 = vld [vmem:[#allocation7 + $0x1b4] ss:$8 sps:$4 sm:$0xff]   ;;  %v9205_v53 = vld [vmem:[#allocation7 + $0x84] ss:$8 sps:$4 sm:$0xff]  }
 0x21f   :  { %v11527_v63 = vsel %vm6479_vm5, %v5575_v12, %v6607_v23  ;;  %v5581_v33 = vadd.f32 %v5580_v57, %v5388_v8  ;;  %v5390_v20 = vadd.f32 %v5389_v41, %v11178_v49  ;;  %7241 = vmatprep.subr.bf16.mxu0 %v9196_v25  ;;  %vm6480_vm7 = vcmp.gt.f32.partialorder %v5577_v59, 0.0  ;;  %7432 = vmatprep.subr.bf16.mxu1 %v9226_v0  ;;  %v9197_v49 = vld [vmem:[#allocation7 + $0x90] ss:$8 sps:$4 sm:$0xff]   ;;  %v12855_v0 = vld [vmem:[#allocation79_spill] sm:$0xff] }
 0x220   :  { %12851 = vst [vmem:[#allocation28_spill] sm:$0xff] %v11527_v63  ;;  %v6608_v43 = vmul.f32 0.2, %v5577_v59  ;;  %v5391_v13 = vpop.f32.mrf.mxu0  ;;  %v5584_v39 = vpop.f32.mrf.mxu1  ;;  %7433 = vmatpush2.bf16.msra.mxu1 %v9224_v27  ;;  %v11536_v41 = vsel %vm6476_vm6, %v5573_v52, %v6604_v11  ;;  %v12857_v27 = vld [vmem:[#allocation12_spill] sm:$0xff]  ;;  %v12860_v52 = vld [vmem:[#allocation10_spill] sm:$0xff] }
 0x221   :  { %v5583_v54 = vadd.f32 %v5582_v15, %v5390_v20  ;;  %v5392_v38 = vadd.f32 %v5391_v13, %v11181_v62  ;;  %v6611_v12 = vmul.f32 0.2, %v5581_v33  ;;  %vm6483_vm8 = vcmp.gt.f32.partialorder %v5581_v33, 0.0  ;;  %12853 = vst [vmem:[#allocation109_spill] sm:$0xff] %v11536_v41  ;;  %v12856_v13 = vld [vmem:[#allocation80_spill] sm:$0xff] }
 0x222   :  { %v5393_v23 = vpop.f32.mrf.mxu0  ;;  %v5586_v57 = vpop.f32.mrf.mxu1  ;;  %7242 = vmatpush2.bf16.msra.mxu0 %v9194_v21  ;;  %v11533_v25 = vsel %vm6480_vm7, %v5577_v59, %v6608_v43  ;;  %v3537_v11 = vsub.s32 2, %v12860_v52  ;;  %v9203_v21 = vld [vmem:[#allocation7 + $0x80] ss:$8 sps:$4 sm:$0xff]   ;;  %v9229_v63 = vld [vmem:[#allocation7 + $0x1a4] ss:$8 sps:$4 sm:$0xff]  }
 0x223   :  { %12852 = vst [vmem:[#allocation29_spill] sm:$0xff] %v11533_v25  ;;  %v5585_v8 = vadd.f32 %v5584_v39, %v5392_v38  ;;  %7243 = vmatprep.subr.bf16.mxu0 %v9199_v47  ;;  %v5394_v20 = vadd.f32 %v5393_v23, %v12854_v29  ;;  %v12858_v47 = vld [vmem:[#allocation81_spill] sm:$0xff]  ;;  %v12859_v39 = vld [vmem:[#allocation82_spill] sm:$0xff]  ;;  %v11548_v29 = vsel %vm6483_vm8, %v5581_v33, %v6611_v12  ;;  %v6612_v34 = vmul.f32 0.2, %v5583_v54  ;;  %v12884_v25 = vld [vmem:[#allocation104_spill] sm:$0xff] }
 0x224   :  { %v5397_v15 = vpop.f32.mrf.mxu0  ;;  %v5590_v62 = vpop.f32.mrf.mxu1  ;;  %6088 = vmatmul.mubr.bf16.gmra.mxu0 %v12855_v0  ;;  %6281 = vmatmul.mubr.bf16.gmra.mxu1 %v12856_v13  ;;  %12861 = vst [vmem:[#allocation110_spill] sm:$0xff] %v11548_v29  ;;  %v3541_v13 = vsub.s32 3, %v12860_v52  ;;  %vm6484_vm10 = vcmp.gt.f32.partialorder %v5583_v54, 0.0  ;;  %v12868_v29 = vld [vmem:[#allocation84_spill] sm:$0xff] }
 0x225   :  { %vm6487_vm9 = vcmp.gt.f32.partialorder %v5585_v8, 0.0  ;;  %v6615_v59 = vmul.f32 0.2, %v5585_v8  ;;  %v5398_v43 = vadd.f32 %v5397_v15, %v12857_v27  ;;  %6097 = vmatprep.mubr.bf16.mxu0 %v12858_v47  ;;  %6290 = vmatprep.mubr.bf16.mxu1 %v12859_v39  ;;  %v5587_v38 = vadd.f32 %v5586_v57, %v5394_v20  ;;  %v12863_v27 = vld [vmem:[#allocation13_spill] sm:$0xff]  ;;  %v9227_v39 = vld [vmem:[#allocation7 + $0x1a0] ss:$8 sps:$4 sm:$0xff]  }
 0x226   :  { %v5399_v23 = vpop.f32.mrf.mxu0  ;;  %v5592_v0 = vpop.f32.mrf.mxu1  ;;  %7244 = vmatpush2.bf16.msra.mxu0 %v9197_v49  ;;  %v12864_v49 = vld [vmem:[#allocation14_spill] sm:$0xff]  ;;  %7434 = vmatprep.subr.bf16.mxu1 %v9229_v63  ;;  %v12869_v63 = vld [vmem:[#allocation85_spill] sm:$0xff] }
 0x227   :  { %v11551_v55 = vsel %vm6487_vm9, %v5585_v8, %v6615_v59  ;;  %v5591_v15 = vadd.f32 %v5590_v62, %v5398_v43  ;;  %v5400_v47 = vadd.f32 %v5399_v23, %v12863_v27  ;;  %7245 = vmatprep.subr.bf16.mxu0 %v9205_v53  ;;  %vm6488_vm11 = vcmp.gt.f32.partialorder %v5587_v38, 0.0  ;;  %v9236_v8 = vld [vmem:[%s12468_s2] sm:$0xf]  ;;  %7435 = vmatpush2.bf16.msra.mxu1 %v9227_v39  ;;  %v12871_v39 = vld [vmem:[#allocation87_spill] sm:$0xff] }
 0x228   :  { %12862 = vst [vmem:[#allocation111_spill] sm:$0xff] %v11551_v55  ;;  %v6616_v12 = vmul.f32 0.2, %v5587_v38  ;;  %v5401_v57 = vpop.f32.mrf.mxu0  ;;  %v5594_v20 = vpop.f32.mrf.mxu1  ;;  %v11560_v62 = vrot.slane %v9236_v8, %v3537_v11  ;;  %v11564_v33 = vrot.slane %v9236_v8, %v3541_v13  ;;  %v12870_v13 = vld [vmem:[#allocation86_spill] sm:$0xff] }
 0x229   :  { %v5593_v52 = vadd.f32 %v5592_v0, %v5400_v47  ;;  %v5402_v41 = vadd.f32 %v5401_v57, %v12864_v49  ;;  %v6619_v53 = vmul.f32 0.2, %v5591_v15  ;;  %vm6491_vm12 = vcmp.gt.f32.partialorder %v5591_v15, 0.0  ;;  %v12867_v47 = vld [vmem:[#allocation15_spill] sm:$0xff] }
 0x22a   :  { %v5403_v59 = vpop.f32.mrf.mxu0  ;;  %v5596_v43 = vpop.f32.mrf.mxu1  ;;  %7246 = vmatpush2.bf16.msra.mxu0 %v9203_v21  ;;  %v11562_v23 = vsel %vm6488_vm11, %v5587_v38, %v6616_v12  ;;  %v11567_v0 = vsel %vm6484_vm10, %v5583_v54, %v6612_v34 }
 0x22b   :  { %12865 = vst [vmem:[#allocation30_spill] sm:$0xff] %v11562_v23  ;;  %v5595_v27 = vadd.f32 %v5594_v20, %v5402_v41  ;;  %12866 = vst [vmem:[#allocation31_spill] sm:$0xff] %v11567_v0  ;;  %v5404_v57 = vadd.f32 %v5403_v59, %v12867_v47  ;;  %v11577_v34 = vsel %vm6491_vm12, %v5591_v15, %v6619_v53  ;;  %v6620_v54 = vmul.f32 0.2, %v5593_v52 }
 0x22c   :  { %v5633_v49 = vpop.f32.mrf.mxu0  ;;  %v5826_v11 = vpop.f32.mrf.mxu1  ;;  %6098 = vmatmul.mubr.bf16.gmra.mxu0 %v12868_v29  ;;  %6291 = vmatmul.mubr.bf16.gmra.mxu1 %v12869_v63  ;;  %12872 = vst [vmem:[#allocation115_spill] sm:$0xff] %v11577_v34  ;;  %vm6492_vm14 = vcmp.gt.f32.partialorder %v5593_v52, 0.0 }
 0x22d   :  { %vm6495_vm13 = vcmp.gt.f32.partialorder %v5595_v27, 0.0  ;;  %v6623_v38 = vmul.f32 0.2, %v5595_v27  ;;  %v5634_v41 = vadd.f32 %v5633_v49, %v11560_v62  ;;  %6107 = vmatprep.mubr.bf16.mxu0 %v12870_v13  ;;  %6300 = vmatprep.mubr.bf16.mxu1 %v12871_v39  ;;  %v5597_v12 = vadd.f32 %v5596_v43, %v5404_v57 }
 0x22e   :  { %v5635_v20 = vpop.f32.mrf.mxu0  ;;  %v5828_v8 = vpop.f32.mrf.mxu1  ;;  %v11589_v21 = vsel %vm6492_vm14, %v5593_v52, %v6620_v54  ;;  %v12878_v54 = vld [vmem:[#allocation91_spill] sm:$0xff] }
 0x22f   :  { %v11579_v29 = vsel %vm6495_vm13, %v5595_v27, %v6623_v38  ;;  %v11581_v59 = vadd.f32 %v5826_v11, %v5634_v41  ;;  %v5636_v47 = vadd.f32 %v5635_v20, %v11564_v33  ;;  %vm6496_vm15 = vcmp.gt.f32.partialorder %v5597_v12, 0.0  ;;  %12874 = vst [vmem:[#allocation33_spill] sm:$0xff] %v11589_v21  ;;  %v9230_v41 = vld [vmem:[#allocation7 + $0x190] ss:$8 sps:$4 sm:$0xff]   ;;  %v9232_v20 = vld [vmem:[#allocation7 + $0x194] ss:$8 sps:$4 sm:$0xff]  }
 0x230   :  { %12873 = vst [vmem:[#allocation32_spill] sm:$0xff] %v11579_v29  ;;  %v6624_v63 = vmul.f32 0.2, %v5597_v12  ;;  %v5637_v13 = vpop.f32.mrf.mxu0  ;;  %v5830_v39 = vpop.f32.mrf.mxu1  ;;  %7436 = vmatprep.subr.bf16.mxu1 %v9232_v20 }
 0x231   :  { %v11586_v15 = vadd.f32 %v5828_v8, %v5636_v47  ;;  %v5638_v53 = vadd.f32 %v5637_v13, %v11560_v62  ;;  %v12876_v47 = vld [vmem:[#allocation88_spill] sm:$0xff]  ;;  %v12877_v13 = vld [vmem:[#allocation89_spill] sm:$0xff]  ;;  %7437 = vmatpush2.bf16.msra.mxu1 %v9230_v41 }
 0x232   :  { %v5639_v43 = vpop.f32.mrf.mxu0  ;;  %v5832_v57 = vpop.f32.mrf.mxu1  ;;  %v11591_v27 = vsel %vm6496_vm15, %v5597_v12, %v6624_v63  ;;  %v12879_v12 = vld [vmem:[#allocation92_spill] sm:$0xff]  ;;  %v12881_v41 = vld [vmem:[#allocation97_spill] sm:$0xff] }
 0x233   :  { %12875 = vst [vmem:[#allocation117_spill] sm:$0xff] %v11591_v27  ;;  %v11593_v11 = vadd.f32 %v5830_v39, %v5638_v53  ;;  %v5640_v38 = vadd.f32 %v5639_v43, %v11564_v33 }
 0x234   :  { %v5643_v34 = vpop.f32.mrf.mxu0  ;;  %v5836_v8 = vpop.f32.mrf.mxu1  ;;  %6108 = vmatmul.mubr.bf16.gmra.mxu0 %v12876_v47  ;;  %6301 = vmatmul.mubr.bf16.gmra.mxu1 %v12877_v13 }
 0x235   :  { %v11600_v29 = vadd.f32 %v5832_v57, %v5640_v38  ;;  %v5644_v52 = vadd.f32 %v5643_v34, %v11560_v62  ;;  %6117 = vmatprep.mubr.bf16.mxu0 %v12878_v54  ;;  %6310 = vmatprep.mubr.bf16.mxu1 %v12879_v12  ;;  %v9235_v38 = vld [vmem:[#allocation7 + $0x184] ss:$8 sps:$4 sm:$0xff]   ;;  %v9233_v54 = vld [vmem:[#allocation7 + $0x180] ss:$8 sps:$4 sm:$0xff]  }
 0x236   :  { %v5645_v63 = vpop.f32.mrf.mxu0  ;;  %v5838_v39 = vpop.f32.mrf.mxu1  ;;  %7438 = vmatprep.subr.bf16.mxu1 %v9235_v38 }
 0x237   :  { %v11605_v53 = vadd.f32 %v5836_v8, %v5644_v52  ;;  %v5646_v43 = vadd.f32 %v5645_v63, %v11564_v33  ;;  %v12880_v52 = vld [vmem:[#allocation96_spill] sm:$0xff]  ;;  %7439 = vmatpush2.bf16.msra.mxu1 %v9233_v54  ;;  %v12885_v54 = vld [vmem:[#allocation105_spill] sm:$0xff] }
 0x238   :  { %v5647_v49 = vpop.f32.mrf.mxu0  ;;  %v5840_v47 = vpop.f32.mrf.mxu1 }
 0x239   :  { %v11608_v21 = vadd.f32 %v5838_v39, %v5646_v43  ;;  %v5648_v57 = vadd.f32 %v5647_v49, %v11560_v62  ;;  %v12882_v49 = vld [vmem:[#allocation98_spill] sm:$0xff]  ;;  %v12883_v43 = vld [vmem:[#allocation100_spill] sm:$0xff] }
 0x23a   :  { %v5649_v34 = vpop.f32.mrf.mxu0  ;;  %v5842_v13 = vpop.f32.mrf.mxu1 }
 0x23b   :  { %v11611_v27 = vadd.f32 %v5840_v47, %v5648_v57  ;;  %v5650_v12 = vadd.f32 %v5649_v34, %v11564_v33 }
 0x23c   :  { %v5653_v20 = vpop.f32.mrf.mxu0  ;;  %v5846_v8 = vpop.f32.mrf.mxu1  ;;  %6118 = vmatmul.mubr.bf16.gmra.mxu0 %v12880_v52  ;;  %6311 = vmatmul.mubr.bf16.gmra.mxu1 %v12881_v41 }
 0x23d   :  { %v11616_v63 = vadd.f32 %v5842_v13, %v5650_v12  ;;  %v5654_v39 = vadd.f32 %v5653_v20, %v11560_v62  ;;  %6127 = vmatprep.mubr.bf16.mxu0 %v12882_v49  ;;  %6320 = vmatprep.mubr.bf16.mxu1 %v12883_v43 }
 0x23e   :  { %v5655_v55 = vpop.f32.mrf.mxu0  ;;  %v5848_v47 = vpop.f32.mrf.mxu1 }
 0x23f   :  { %v11621_v57 = vadd.f32 %v5846_v8, %v5654_v39  ;;  %v5656_v38 = vadd.f32 %v5655_v55, %v11564_v33  ;;  %v12886_v39 = vld [vmem:[#allocation106_spill] sm:$0xff] }
 0x240   :  { %v5657_v34 = vpop.f32.mrf.mxu0  ;;  %v5850_v0 = vpop.f32.mrf.mxu1 }
 0x241   :  { %v11624_v52 = vadd.f32 %v5848_v47, %v5656_v38  ;;  %v5658_v13 = vadd.f32 %v5657_v34, %v11560_v62  ;;  %v12887_v47 = vld [vmem:[#allocation108_spill] sm:$0xff] }
 0x242   :  { %v5659_v12 = vpop.f32.mrf.mxu0  ;;  %v5852_v41 = vpop.f32.mrf.mxu1 }
 0x243   :  { %v11627_v20 = vadd.f32 %v5850_v0, %v5658_v13  ;;  %v5660_v49 = vadd.f32 %v5659_v12, %v11564_v33 }
 0x244   :  { %v5663_v43 = vpop.f32.mrf.mxu0  ;;  %v5856_v23 = vpop.f32.mrf.mxu1  ;;  %6128 = vmatmul.mubr.bf16.gmra.mxu0 %v12884_v25  ;;  %6321 = vmatmul.mubr.bf16.gmra.mxu1 %v12885_v54 }
 0x245   :  { %v11632_v8 = vadd.f32 %v5852_v41, %v5660_v49  ;;  %v5664_v55 = vadd.f32 %v5663_v43, %v11560_v62  ;;  %6137 = vmatprep.mubr.bf16.mxu0 %v12886_v39  ;;  %6330 = vmatprep.mubr.bf16.mxu1 %v12887_v47 }
 0x246   :  { %v5665_v38 = vpop.f32.mrf.mxu0  ;;  %v5858_v34 = vpop.f32.mrf.mxu1 }
 0x247   :  { %v11637_v0 = vadd.f32 %v5856_v23, %v5664_v55  ;;  %v5666_v13 = vadd.f32 %v5665_v38, %v11564_v33  ;;  %v12891_v23 = vld [vmem:[#allocation113_spill] sm:$0xff] }
 0x248   :  { %v5667_v12 = vpop.f32.mrf.mxu0  ;;  %v5860_v24 = vpop.f32.mrf.mxu1 }
 0x249   :  { %v11640_v14 = vadd.f32 %v5858_v34, %v5666_v13  ;;  %v5668_v25 = vadd.f32 %v5667_v12, %v11560_v62  ;;  %v12893_v34 = vld [vmem:[#allocation114_spill] sm:$0xff]  ;;  %v12894_v13 = vld [vmem:[#allocation116_spill] sm:$0xff] }
 0x24a   :  { %v5669_v41 = vpop.f32.mrf.mxu0  ;;  %v5862_v49 = vpop.f32.mrf.mxu1 }
 0x24b   :  { %12888 = vst [vmem:[#allocation118_spill] sm:$0xff] %v11640_v14  ;;  %v11643_v54 = vadd.f32 %v5860_v24, %v5668_v25  ;;  %v5670_v43 = vadd.f32 %v5669_v41, %v11564_v33 }
 0x24c   :  { %v5673_v39 = vpop.f32.mrf.mxu0  ;;  %v5866_v47 = vpop.f32.mrf.mxu1  ;;  %6138 = vmatmul.mubr.bf16.gmra.mxu0 %v12890_v50  ;;  %6331 = vmatmul.mubr.bf16.gmra.mxu1 %v12891_v23 }
 0x24d   :  { %12889 = vst [vmem:[#allocation119_spill] sm:$0xff] %v11643_v54  ;;  %v11648_v55 = vadd.f32 %v5862_v49, %v5670_v43  ;;  %v5674_v38 = vadd.f32 %v5673_v39, %v11560_v62  ;;  %6147 = vmatprep.mubr.bf16.mxu0 %v12893_v34  ;;  %6340 = vmatprep.mubr.bf16.mxu1 %v12894_v13  ;;  %v12900_v13 = vld [vmem:[#allocation120_spill] sm:$0xff] }
 0x24e   :  { %v5675_v12 = vpop.f32.mrf.mxu0  ;;  %v5868_v14 = vpop.f32.mrf.mxu1 }
 0x24f   :  { %12892 = vst [vmem:[#allocation34_spill] sm:$0xff] %v11648_v55  ;;  %v11653_v24 = vadd.f32 %v5866_v47, %v5674_v38  ;;  %v5676_v25 = vadd.f32 %v5675_v12, %v11564_v33  ;;  %v12901_v47 = vld [vmem:[#allocation121_spill] sm:$0xff]  ;;  %v12902_v12 = vld [vmem:[#allocation123_spill] sm:$0xff]  ;;  %v12929_v55 = vld [vmem:[#allocation16_spill] sm:$0xff] }
 0x250   :  { %v5677_v41 = vpop.f32.mrf.mxu0  ;;  %v5870_v54 = vpop.f32.mrf.mxu1 }
 0x251   :  { %12895 = vst [vmem:[#allocation35_spill] sm:$0xff] %v11653_v24  ;;  %v11656_v7 = vadd.f32 %v5868_v14, %v5676_v25  ;;  %v5678_v50 = vadd.f32 %v5677_v41, %v11560_v62  ;;  %v12903_v14 = vld [vmem:[#allocation124_spill] sm:$0xff] }
 0x252   :  { %v11659_v49 = vpop.f32.mrf.mxu0  ;;  %v11661_v43 = vpop.f32.mrf.mxu1  ;;  %v12909_v24 = vld [vmem:[#allocation128_spill] sm:$0xff] }
 0x253   :  { %12896 = vst [vmem:[#allocation122_spill] sm:$0xff] %v11656_v7  ;;  %12897 = vst [vmem:[#allocation36_spill] sm:$0xff] %v11659_v49  ;;  %v11663_v39 = vadd.f32 %v5870_v54, %v5678_v50 }
 0x254   :  { %12898 = vst [vmem:[#allocation37_spill] sm:$0xff] %v11661_v43  ;;  %v5683_v23 = vpop.f32.mrf.mxu0  ;;  %v5876_v34 = vpop.f32.mrf.mxu1  ;;  %6148 = vmatmul.mubr.bf16.gmra.mxu0 %v12900_v13  ;;  %6341 = vmatmul.mubr.bf16.gmra.mxu1 %v12901_v47 }
 0x255   :  { %12899 = vst [vmem:[#allocation125_spill] sm:$0xff] %v11663_v39  ;;  %v5684_v38 = vadd.f32 %v5683_v23, %v11560_v62  ;;  %6157 = vmatprep.mubr.bf16.mxu0 %v12902_v12  ;;  %6350 = vmatprep.mubr.bf16.mxu1 %v12903_v14 }
 0x256   :  { %v5685_v25 = vpop.f32.mrf.mxu0  ;;  %v5878_v41 = vpop.f32.mrf.mxu1 }
 0x257   :  { %v11670_v7 = vadd.f32 %v5876_v34, %v5684_v38  ;;  %v5686_v43 = vadd.f32 %v5685_v25, %v11564_v33  ;;  %v12910_v34 = vld [vmem:[#allocation129_spill] sm:$0xff]  ;;  %v12911_v25 = vld [vmem:[#allocation130_spill] sm:$0xff] }
 0x258   :  { %v5687_v54 = vpop.f32.mrf.mxu0  ;;  %v5880_v50 = vpop.f32.mrf.mxu1 }
 0x259   :  { %12904 = vst [vmem:[#allocation126_spill] sm:$0xff] %v11670_v7  ;;  %v11673_v39 = vadd.f32 %v5878_v41, %v5686_v43  ;;  %v5688_v13 = vadd.f32 %v5687_v54, %v11560_v62  ;;  %v12912_v43 = vld [vmem:[#allocation131_spill] sm:$0xff]  ;;  %v12918_v7 = vld [vmem:[#allocation132_spill] sm:$0xff] }
 0x25a   :  { %v11676_v49 = vpop.f32.mrf.mxu0  ;;  %v11678_v47 = vpop.f32.mrf.mxu1 }
 0x25b   :  { %12905 = vst [vmem:[#allocation127_spill] sm:$0xff] %v11673_v39  ;;  %12906 = vst [vmem:[#allocation38_spill] sm:$0xff] %v11676_v49  ;;  %v11680_v23 = vadd.f32 %v5880_v50, %v5688_v13 }
 0x25c   :  { %12907 = vst [vmem:[#allocation39_spill] sm:$0xff] %v11678_v47  ;;  %v5693_v12 = vpop.f32.mrf.mxu0  ;;  %v5886_v14 = vpop.f32.mrf.mxu1  ;;  %6158 = vmatmul.mubr.bf16.gmra.mxu0 %v12909_v24  ;;  %6351 = vmatmul.mubr.bf16.gmra.mxu1 %v12910_v34 }
 0x25d   :  { %12908 = vst [vmem:[#allocation40_spill] sm:$0xff] %v11680_v23  ;;  %v5694_v38 = vadd.f32 %v5693_v12, %v11560_v62  ;;  %6167 = vmatprep.mubr.bf16.mxu0 %v12911_v25  ;;  %6360 = vmatprep.mubr.bf16.mxu1 %v12912_v43 }
 0x25e   :  { %v5695_v41 = vpop.f32.mrf.mxu0  ;;  %v5888_v54 = vpop.f32.mrf.mxu1 }
 0x25f   :  { %v11687_v39 = vadd.f32 %v5886_v14, %v5694_v38  ;;  %v5696_v47 = vadd.f32 %v5695_v41, %v11564_v33  ;;  %v12919_v14 = vld [vmem:[#allocation133_spill] sm:$0xff]  ;;  %v12920_v41 = vld [vmem:[#allocation18_spill] sm:$0xff] }
 0x260   :  { %v5697_v50 = vpop.f32.mrf.mxu0  ;;  %v5890_v13 = vpop.f32.mrf.mxu1 }
 0x261   :  { %12913 = vst [vmem:[#allocation41_spill] sm:$0xff] %v11687_v39  ;;  %v11690_v23 = vadd.f32 %v5888_v54, %v5696_v47  ;;  %v5698_v24 = vadd.f32 %v5697_v50, %v11560_v62  ;;  %v12921_v39 = vld [vmem:[#allocation19_spill] sm:$0xff] }
 0x262   :  { %v11693_v49 = vpop.f32.mrf.mxu0  ;;  %v11695_v34 = vpop.f32.mrf.mxu1  ;;  %v12922_v47 = vpack.c.bf16 %v12920_v41, %v12921_v39 }
 0x263   :  { %12914 = vst [vmem:[#allocation42_spill] sm:$0xff] %v11690_v23  ;;  %12915 = vst [vmem:[#allocation43_spill] sm:$0xff] %v11693_v49  ;;  %v11697_v12 = vadd.f32 %v5890_v13, %v5698_v24 }
 0x264   :  { %12916 = vst [vmem:[#allocation44_spill] sm:$0xff] %v11695_v34  ;;  %v5703_v25 = vpop.f32.mrf.mxu0  ;;  %v5896_v43 = vpop.f32.mrf.mxu1  ;;  %6168 = vmatmul.mubr.bf16.gmra.mxu0 %v12918_v7  ;;  %6361 = vmatmul.mubr.bf16.gmra.mxu1 %v12919_v14 }
 0x265   :  { %12917 = vst [vmem:[#allocation45_spill] sm:$0xff] %v11697_v12  ;;  %v5704_v38 = vadd.f32 %v5703_v25, %v11560_v62  ;;  %7247 = vmatprep.mubr.bf16.mxu0 %v12922_v47  ;;  %v12928_v47 = vld [vmem:[#allocation17_spill] sm:$0xff] }
 0x266   :  { %v5705_v54 = vpop.f32.mrf.mxu0  ;;  %v5898_v50 = vpop.f32.mrf.mxu1 }
 0x267   :  { %v11705_v23 = vadd.f32 %v5896_v43, %v5704_v38  ;;  %v5706_v34 = vadd.f32 %v5705_v54, %v11564_v33  ;;  %v12930_v43 = vpack.c.bf16 %v12928_v47, %v12929_v55  ;;  %v12931_v54 = vld [vmem:[#allocation21_spill] sm:$0xff] }
 0x268   :  { %v5707_v13 = vpop.f32.mrf.mxu0  ;;  %v5900_v24 = vpop.f32.mrf.mxu1 }
 0x269   :  { %12923 = vst [vmem:[#allocation46_spill] sm:$0xff] %v11705_v23  ;;  %v11708_v12 = vadd.f32 %v5898_v50, %v5706_v34  ;;  %v5708_v7 = vadd.f32 %v5707_v13, %v11560_v62  ;;  %v12932_v23 = vld [vmem:[#allocation93_spill] sm:$0xff] }
 0x26a   :  { %v11711_v49 = vpop.f32.mrf.mxu0  ;;  %v11713_v14 = vpop.f32.mrf.mxu1  ;;  %v12933_v34 = vpack.c.bf16 %v12931_v54, %v12932_v23  ;;  %v12939_v54 = vld [vmem:[#allocation20_spill] sm:$0xff] }
 0x26b   :  { %12924 = vst [vmem:[#allocation47_spill] sm:$0xff] %v11708_v12  ;;  %12925 = vst [vmem:[#allocation48_spill] sm:$0xff] %v11711_v49  ;;  %v11715_v25 = vadd.f32 %v5900_v24, %v5708_v7 }
 0x26c   :  { %12926 = vst [vmem:[#allocation49_spill] sm:$0xff] %v11713_v14  ;;  %v5713_v39 = vpop.f32.mrf.mxu0  ;;  %v5906_v41 = vpop.f32.mrf.mxu1  ;;  %7248 = vmatmul.mubr.bf16.vlgmr.msra.gmra.mxu0 %v12930_v43 }
 0x26d   :  { %12927 = vst [vmem:[#allocation50_spill] sm:$0xff] %v11715_v25  ;;  %v5714_v38 = vadd.f32 %v5713_v39, %v11560_v62  ;;  %7257 = vmatprep.mubr.bf16.mxu0 %v12933_v34  ;;  %v12940_v34 = vld [vmem:[#allocation90_spill] sm:$0xff] }
 0x26e   :  { %v5715_v50 = vpop.f32.mrf.mxu0  ;;  %v5908_v13 = vpop.f32.mrf.mxu1 }
 0x26f   :  { %v11724_v12 = vadd.f32 %v5906_v41, %v5714_v38  ;;  %v5716_v14 = vadd.f32 %v5715_v50, %v11564_v33  ;;  %v12941_v41 = vpack.c.bf16 %v12939_v54, %v12940_v34  ;;  %v12942_v50 = vld [vmem:[#allocation22_spill] sm:$0xff] }
 0x270   :  { %v5717_v24 = vpop.f32.mrf.mxu0  ;;  %v5910_v7 = vpop.f32.mrf.mxu1 }
 0x271   :  { %12934 = vst [vmem:[#allocation51_spill] sm:$0xff] %v11724_v12  ;;  %v11727_v25 = vadd.f32 %v5908_v13, %v5716_v14  ;;  %v5718_v49 = vadd.f32 %v5717_v24, %v11560_v62  ;;  %v12943_v12 = vld [vmem:[#allocation23_spill] sm:$0xff] }
 0x272   :  { %v11730_v55 = vpop.f32.mrf.mxu0  ;;  %v11732_v47 = vpop.f32.mrf.mxu1  ;;  %v12944_v14 = vpack.c.bf16 %v12942_v50, %v12943_v12  ;;  %v12948_v50 = vld [vmem:[#allocation95_spill] sm:$0xff] }
 0x273   :  { %12935 = vst [vmem:[#allocation52_spill] sm:$0xff] %v11727_v25  ;;  %12936 = vst [vmem:[#allocation53_spill] sm:$0xff] %v11730_v55  ;;  %v11734_v39 = vadd.f32 %v5910_v7, %v5718_v49 }
 0x274   :  { %12937 = vst [vmem:[#allocation54_spill] sm:$0xff] %v11732_v47  ;;  %v5723_v23 = vpop.f32.mrf.mxu0  ;;  %v5916_v43 = vpop.f32.mrf.mxu1  ;;  %7258 = vmatmul.mubr.bf16.gmra.mxu0 %v12941_v41 }
 0x275   :  { %12938 = vst [vmem:[#allocation55_spill] sm:$0xff] %v11734_v39  ;;  %v5724_v38 = vadd.f32 %v5723_v23, %v11560_v62  ;;  %7267 = vmatprep.mubr.bf16.mxu0 %v12944_v14  ;;  %v12949_v14 = vld [vmem:[#allocation94_spill] sm:$0xff] }
 0x276   :  { %v5725_v13 = vpop.f32.mrf.mxu0  ;;  %v5918_v24 = vpop.f32.mrf.mxu1 }
 0x277   :  { %v11743_v25 = vadd.f32 %v5916_v43, %v5724_v38  ;;  %v5726_v47 = vadd.f32 %v5725_v13, %v11564_v33  ;;  %v12950_v43 = vpack.c.bf16 %v12948_v50, %v12949_v14 }
 0x278   :  { %v5727_v49 = vpop.f32.mrf.mxu0  ;;  %v5920_v7 = vpop.f32.mrf.mxu1 }
 0x279   :  { %v11746_v39 = vadd.f32 %v5918_v24, %v5726_v47  ;;  %v5728_v55 = vadd.f32 %v5727_v49, %v11560_v62  ;;  %v12951_v47 = vpack.c.bf16 %v11283_v35, %v11285_v17 }
 0x27a   :  { %v11749_v54 = vpop.f32.mrf.mxu0  ;;  %v11751_v34 = vpop.f32.mrf.mxu1 }
 0x27b   :  { %12945 = vst [vmem:[#allocation56_spill] sm:$0xff] %v11746_v39  ;;  %12946 = vst [vmem:[#allocation57_spill] sm:$0xff] %v11751_v34  ;;  %v11753_v23 = vadd.f32 %v5920_v7, %v5728_v55 }
 0x27c   :  { %v5733_v12 = vpop.f32.mrf.mxu0  ;;  %v5926_v41 = vpop.f32.mrf.mxu1  ;;  %7268 = vmatmul.mubr.bf16.gmra.mxu0 %v12950_v43  ;;  %v12954_v43 = vld [vmem:[#allocation99_spill] sm:$0xff] }
 0x27d   :  { %12947 = vst [vmem:[#allocation58_spill] sm:$0xff] %v11753_v23  ;;  %v5734_v38 = vadd.f32 %v5733_v12, %v11560_v62  ;;  %7277 = vmatprep.mubr.bf16.mxu0 %v12951_v47 }
 0x27e   :  { %v5735_v13 = vpop.f32.mrf.mxu0  ;;  %v5928_v24 = vpop.f32.mrf.mxu1 }
 0x27f   :  { %v11762_v49 = vadd.f32 %v5926_v41, %v5734_v38  ;;  %v5736_v34 = vadd.f32 %v5735_v13, %v11564_v33  ;;  %v12955_v41 = vpack.c.bf16 %v11277_v32, %v12954_v43 }
 0x280   :  { %v5737_v55 = vpop.f32.mrf.mxu0  ;;  %v5930_v7 = vpop.f32.mrf.mxu1 }
 0x281   :  { %v11765_v23 = vadd.f32 %v5928_v24, %v5736_v34  ;;  %v5738_v39 = vadd.f32 %v5737_v55, %v11560_v62  ;;  %v12956_v34 = vpack.c.bf16 %v11303_v42, %v11305_v48 }
 0x282   :  { %v11768_v50 = vpop.f32.mrf.mxu0  ;;  %v11770_v14 = vpop.f32.mrf.mxu1 }
 0x283   :  { %12952 = vst [vmem:[#allocation59_spill] sm:$0xff] %v11770_v14  ;;  %v11772_v12 = vadd.f32 %v5930_v7, %v5738_v39 }
 0x284   :  { %v5743_v35 = vpop.f32.mrf.mxu0  ;;  %v5936_v17 = vpop.f32.mrf.mxu1  ;;  %7278 = vmatmul.mubr.bf16.gmra.mxu0 %v12955_v41 }
 0x285   :  { %12953 = vst [vmem:[#allocation60_spill] sm:$0xff] %v11772_v12  ;;  %v5744_v38 = vadd.f32 %v5743_v35, %v11560_v62  ;;  %7287 = vmatprep.mubr.bf16.mxu0 %v12956_v34 }
 0x286   :  { %v5745_v47 = vpop.f32.mrf.mxu0  ;;  %v5938_v13 = vpop.f32.mrf.mxu1 }
 0x287   :  { %v11781_v24 = vadd.f32 %v5936_v17, %v5744_v38  ;;  %v5746_v55 = vadd.f32 %v5745_v47, %v11564_v33  ;;  %v12958_v17 = vpack.c.bf16 %v11297_v19, %v11295_v26  ;;  %v12959_v38 = vpack.c.bf16 %v11323_v58, %v11325_v44 }
 0x288   :  { %v5747_v39 = vpop.f32.mrf.mxu0  ;;  %v5940_v7 = vpop.f32.mrf.mxu1 }
 0x289   :  { %v11784_v14 = vadd.f32 %v5938_v13, %v5746_v55  ;;  %v5748_v12 = vadd.f32 %v5747_v39, %v11560_v62 }
 0x28a   :  { %v11787_v32 = vpop.f32.mrf.mxu0  ;;  %v11789_v43 = vpop.f32.mrf.mxu1 }
 0x28b   :  { %12957 = vst [vmem:[#allocation61_spill] sm:$0xff] %v11789_v43  ;;  %v11791_v35 = vadd.f32 %v5940_v7, %v5748_v12 }
 0x28c   :  { %v5753_v42 = vpop.f32.mrf.mxu0  ;;  %v5946_v48 = vpop.f32.mrf.mxu1  ;;  %7288 = vmatmul.mubr.bf16.gmra.mxu0 %v12958_v17 }
 0x28d   :  { %v5754_v41 = vadd.f32 %v5753_v42, %v11560_v62  ;;  %7297 = vmatprep.mubr.bf16.mxu0 %v12959_v38 }
 0x28e   :  { %v5755_v34 = vpop.f32.mrf.mxu0  ;;  %v5948_v47 = vpop.f32.mrf.mxu1 }
 0x28f   :  { %v11800_v13 = vadd.f32 %v5946_v48, %v5754_v41  ;;  %v5756_v55 = vadd.f32 %v5755_v34, %v11564_v33  ;;  %v12962_v48 = vpack.c.bf16 %v11317_v37, %v11315_v4  ;;  %v12963_v41 = vld [vmem:[#allocation101_spill] sm:$0xff] }
 0x290   :  { %v5757_v12 = vpop.f32.mrf.mxu0  ;;  %v5950_v39 = vpop.f32.mrf.mxu1  ;;  %v12964_v38 = vpack.c.bf16 %v11345_v56, %v12963_v41  ;;  %v12968_v41 = vld [vmem:[#allocation25_spill] sm:$0xff] }
 0x291   :  { %v11803_v7 = vadd.f32 %v5948_v47, %v5756_v55  ;;  %v5758_v43 = vadd.f32 %v5757_v12, %v11560_v62 }
 0x292   :  { %v11806_v26 = vpop.f32.mrf.mxu0  ;;  %v11808_v19 = vpop.f32.mrf.mxu1 }
 0x293   :  { %12960 = vst [vmem:[#allocation62_spill] sm:$0xff] %v11808_v19  ;;  %v11810_v42 = vadd.f32 %v5950_v39, %v5758_v43 }
 0x294   :  { %v5763_v58 = vpop.f32.mrf.mxu0  ;;  %v5956_v44 = vpop.f32.mrf.mxu1  ;;  %7298 = vmatmul.mubr.bf16.gmra.mxu0 %v12962_v48 }
 0x295   :  { %12961 = vst [vmem:[#allocation63_spill] sm:$0xff] %v11810_v42  ;;  %v5764_v17 = vadd.f32 %v5763_v58, %v11560_v62  ;;  %7307 = vmatprep.mubr.bf16.mxu0 %v12964_v38  ;;  %v12969_v38 = vld [vmem:[#allocation24_spill] sm:$0xff] }
 0x296   :  { %v5765_v34 = vpop.f32.mrf.mxu0  ;;  %v5958_v47 = vpop.f32.mrf.mxu1 }
 0x297   :  { %v11819_v55 = vadd.f32 %v5956_v44, %v5764_v17  ;;  %v5766_v12 = vadd.f32 %v5765_v34, %v11564_v33  ;;  %v12970_v44 = vpack.c.bf16 %v12968_v41, %v12969_v38  ;;  %v12971_v34 = vpack.c.bf16 %v11371_v28, %v11376_v40 }
 0x298   :  { %v5767_v43 = vpop.f32.mrf.mxu0  ;;  %v5960_v39 = vpop.f32.mrf.mxu1 }
 0x299   :  { %v11822_v19 = vadd.f32 %v5958_v47, %v5766_v12  ;;  %v5768_v42 = vadd.f32 %v5767_v43, %v11560_v62 }
 0x29a   :  { %v11825_v4 = vpop.f32.mrf.mxu0  ;;  %v11827_v37 = vpop.f32.mrf.mxu1 }
 0x29b   :  { %12965 = vst [vmem:[#allocation64_spill] sm:$0xff] %v11822_v19  ;;  %12966 = vst [vmem:[#allocation65_spill] sm:$0xff] %v11827_v37  ;;  %v11829_v58 = vadd.f32 %v5960_v39, %v5768_v42 }
 0x29c   :  { %v5773_v56 = vpop.f32.mrf.mxu0  ;;  %v5966_v48 = vpop.f32.mrf.mxu1  ;;  %7308 = vmatmul.mubr.bf16.gmra.mxu0 %v12970_v44 }
 0x29d   :  { %12967 = vst [vmem:[#allocation66_spill] sm:$0xff] %v11829_v58  ;;  %v5774_v17 = vadd.f32 %v5773_v56, %v11560_v62  ;;  %7317 = vmatprep.mubr.bf16.mxu0 %v12971_v34 }
 0x29e   :  { %v5775_v47 = vpop.f32.mrf.mxu0  ;;  %v5968_v12 = vpop.f32.mrf.mxu1 }
 0x29f   :  { %v11838_v43 = vadd.f32 %v5966_v48, %v5774_v17  ;;  %v5776_v37 = vadd.f32 %v5775_v47, %v11564_v33  ;;  %v12973_v48 = vpack.c.bf16 %v11362_v3, %v11359_v45 }
 0x2a0   :  { %v5777_v42 = vpop.f32.mrf.mxu0  ;;  %v5970_v39 = vpop.f32.mrf.mxu1 }
 0x2a1   :  { %v11841_v58 = vadd.f32 %v5968_v12, %v5776_v37  ;;  %v5778_v19 = vadd.f32 %v5777_v42, %v11560_v62  ;;  %v12974_v37 = vpack.c.bf16 %v11399_v31, %v11404_v36 }
 0x2a2   :  { %v11844_v41 = vpop.f32.mrf.mxu0  ;;  %v11846_v38 = vpop.f32.mrf.mxu1 }
 0x2a3   :  { %12972 = vst [vmem:[#allocation67_spill] sm:$0xff] %v11846_v38  ;;  %v11848_v56 = vadd.f32 %v5970_v39, %v5778_v19 }
 0x2a4   :  { %v5783_v28 = vpop.f32.mrf.mxu0  ;;  %v5976_v40 = vpop.f32.mrf.mxu1  ;;  %7318 = vmatmul.mubr.bf16.gmra.mxu0 %v12973_v48 }
 0x2a5   :  { %v5784_v44 = vadd.f32 %v5783_v28, %v11560_v62  ;;  %7327 = vmatprep.mubr.bf16.mxu0 %v12974_v37 }
 0x2a6   :  { %v5785_v17 = vpop.f32.mrf.mxu0  ;;  %v5978_v34 = vpop.f32.mrf.mxu1 }
 0x2a7   :  { %v11857_v47 = vadd.f32 %v5976_v40, %v5784_v44  ;;  %v5786_v12 = vadd.f32 %v5785_v17, %v11564_v33  ;;  %v12977_v40 = vpack.c.bf16 %v11390_v51, %v11387_v6  ;;  %v12978_v44 = vpack.c.bf16 %v11427_v9, %v11432_v46 }
 0x2a8   :  { %v5787_v19 = vpop.f32.mrf.mxu0  ;;  %v5980_v42 = vpop.f32.mrf.mxu1  ;;  %v12979_v46 = vpack.c.bf16 %v11418_v18, %v11415_v16 }
 0x2a9   :  { %v11860_v39 = vadd.f32 %v5978_v34, %v5786_v12  ;;  %v5788_v38 = vadd.f32 %v5787_v19, %v11560_v62 }
 0x2aa   :  { %v11863_v3 = vpop.f32.mrf.mxu0  ;;  %v11865_v45 = vpop.f32.mrf.mxu1 }
 0x2ab   :  { %12975 = vst [vmem:[#allocation68_spill] sm:$0xff] %v11865_v45  ;;  %v11867_v28 = vadd.f32 %v5980_v42, %v5788_v38 }
 0x2ac   :  { %v6019_v31 = vpop.f32.mrf.mxu0  ;;  %v6212_v36 = vpop.f32.mrf.mxu1  ;;  %7328 = vmatmul.mubr.bf16.gmra.mxu0 %v12977_v40 }
 0x2ad   :  { %12976 = vst [vmem:[#allocation69_spill] sm:$0xff] %v11867_v28  ;;  %v6020_v48 = vadd.f32 %v6019_v31, %v11581_v59  ;;  %7337 = vmatprep.mubr.bf16.mxu0 %v12978_v44 }
 0x2ae   :  { %v6021_v37 = vpop.f32.mrf.mxu0  ;;  %v6214_v62 = vpop.f32.mrf.mxu1 }
 0x2af   :  { %v6213_v17 = vadd.f32 %v6212_v36, %v6020_v48  ;;  %v6022_v34 = vadd.f32 %v6021_v37, %v11586_v15 }
 0x2b0   :  { %v6023_v12 = vpop.f32.mrf.mxu0  ;;  %v6216_v38 = vpop.f32.mrf.mxu1 }
 0x2b1   :  { %v6024_v19 = vadd.f32 %v6023_v12, %v11593_v11  ;;  %v6501_v42 = vmul.f32 0.2, %v6213_v17  ;;  %vm6373_vm0 = vcmp.gt.f32.partialorder %v6213_v17, 0.0  ;;  %v6215_v51 = vadd.f32 %v6214_v62, %v6022_v34 }
 0x2b2   :  { %v6025_v45 = vpop.f32.mrf.mxu0  ;;  %v6218_v28 = vpop.f32.mrf.mxu1  ;;  %v12980_v11 = vpack.c.bf16 %v11455_v22, %v11460_v10 }
 0x2b3   :  { %v6217_v6 = vadd.f32 %v6216_v38, %v6024_v19  ;;  %v6026_v59 = vadd.f32 %v6025_v45, %v11600_v29  ;;  %v6629_v40 = vsel %vm6373_vm0, %v6213_v17, %v6501_v42  ;;  %v6502_v62 = vmul.f32 0.2, %v6215_v51 }
 0x2b4   :  { %v6029_v31 = vpop.f32.mrf.mxu0  ;;  %v6222_v9 = vpop.f32.mrf.mxu1  ;;  %7338 = vmatmul.mubr.bf16.gmra.mxu0 %v12979_v46  ;;  %vm6374_vm2 = vcmp.gt.f32.partialorder %v6215_v51, 0.0 }
 0x2b5   :  { %vm6377_vm1 = vcmp.gt.f32.partialorder %v6217_v6, 0.0  ;;  %v6505_v15 = vmul.f32 0.2, %v6217_v6  ;;  %v6030_v36 = vadd.f32 %v6029_v31, %v11605_v53  ;;  %7347 = vmatprep.mubr.bf16.mxu0 %v12980_v11  ;;  %v6219_v48 = vadd.f32 %v6218_v28, %v6026_v59 }
 0x2b6   :  { %v6031_v44 = vpop.f32.mrf.mxu0  ;;  %v6224_v37 = vpop.f32.mrf.mxu1  ;;  %v6630_v59 = vsel %vm6374_vm2, %v6215_v51, %v6502_v62 }
 0x2b7   :  { %v6633_v29 = vsel %vm6377_vm1, %v6217_v6, %v6505_v15  ;;  %v6223_v45 = vadd.f32 %v6222_v9, %v6030_v36  ;;  %v6032_v34 = vadd.f32 %v6031_v44, %v11608_v21  ;;  %vm6378_vm3 = vcmp.gt.f32.partialorder %v6219_v48, 0.0 }
 0x2b8   :  { %v6757_v18 = vpack.c.bf16 %v6633_v29, %v6629_v40  ;;  %v6506_v16 = vmul.f32 0.2, %v6219_v48  ;;  %v6033_v12 = vpop.f32.mrf.mxu0  ;;  %v6226_v38 = vpop.f32.mrf.mxu1  ;;  %v12981_v9 = vpack.c.bf16 %v11446_v61, %v11443_v30  ;;  %v12982_v36 = vpack.c.bf16 %v11483_v60, %v11488_v5 }
 0x2b9   :  { %v6034_v53 = vadd.f32 %v6033_v12, %v11611_v27  ;;  %v6509_v19 = vmul.f32 0.2, %v6223_v45  ;;  %vm6381_vm4 = vcmp.gt.f32.partialorder %v6223_v45, 0.0  ;;  %v6225_v28 = vadd.f32 %v6224_v37, %v6032_v34 }
 0x2ba   :  { %v6035_v22 = vpop.f32.mrf.mxu0  ;;  %v6228_v10 = vpop.f32.mrf.mxu1  ;;  %v6634_v17 = vsel %vm6378_vm3, %v6219_v48, %v6506_v16 }
 0x2bb   :  { %v6227_v42 = vadd.f32 %v6226_v38, %v6034_v53  ;;  %v6036_v6 = vadd.f32 %v6035_v22, %v11616_v63  ;;  %v6758_v46 = vpack.c.bf16 %v6634_v17, %v6630_v59  ;;  %v6637_v11 = vsel %vm6381_vm4, %v6223_v45, %v6509_v19  ;;  %v12985_v59 = vld [vmem:[#allocation27_spill] sm:$0xff] }
 0x2bc   :  { %v6039_v31 = vpop.f32.mrf.mxu0  ;;  %v6232_v21 = vpop.f32.mrf.mxu1  ;;  %7348 = vmatmul.mubr.bf16.gmra.mxu0 %v12981_v9  ;;  %v6510_v48 = vmul.f32 0.2, %v6225_v28  ;;  %vm6382_vm6 = vcmp.gt.f32.partialorder %v6225_v28, 0.0  ;;  %v12983_v22 = vpack.c.bf16 %v11474_v2, %v11471_v1  ;;  %v12987_v2 = vld [vmem:[#allocation118_spill] sm:$0xff] }
 0x2bd   :  { %vm6385_vm5 = vcmp.gt.f32.partialorder %v6227_v42, 0.0  ;;  %v6513_v15 = vmul.f32 0.2, %v6227_v42  ;;  %v6040_v27 = vadd.f32 %v6039_v31, %v11621_v57  ;;  %7357 = vmatprep.mubr.bf16.mxu0 %v12982_v36  ;;  %v6229_v40 = vadd.f32 %v6228_v10, %v6036_v6  ;;  %7440 = vmatprep.mubr.bf16.mxu1 %v6758_v46 }
 0x2be   :  { %v6041_v51 = vpop.f32.mrf.mxu0  ;;  %v6234_v63 = vpop.f32.mrf.mxu1  ;;  %7441 = vmatmul.mubr.bf16.vlgmr.msra.gmra.mxu1 %v6757_v18  ;;  %v6638_v53 = vsel %vm6382_vm6, %v6225_v28, %v6510_v48 }
 0x2bf   :  { %v6641_v44 = vsel %vm6385_vm5, %v6227_v42, %v6513_v15  ;;  %v6233_v37 = vadd.f32 %v6232_v21, %v6040_v27  ;;  %v6042_v61 = vadd.f32 %v6041_v51, %v11624_v52  ;;  %vm6386_vm7 = vcmp.gt.f32.partialorder %v6229_v40, 0.0  ;;  %v12984_v42 = vld [vmem:[#allocation26_spill] sm:$0xff] }
 0x2c0   :  { %v6761_v30 = vpack.c.bf16 %v6641_v44, %v6637_v11  ;;  %v6514_v62 = vmul.f32 0.2, %v6229_v40  ;;  %v6043_v57 = vpop.f32.mrf.mxu0  ;;  %v6236_v29 = vpop.f32.mrf.mxu1  ;;  %v12986_v6 = vpack.c.bf16 %v12984_v42, %v12985_v59 }
 0x2c1   :  { %v6044_v60 = vadd.f32 %v6043_v57, %v11627_v20  ;;  %v6517_v5 = vmul.f32 0.2, %v6233_v37  ;;  %vm6389_vm8 = vcmp.gt.f32.partialorder %v6233_v37, 0.0  ;;  %v6235_v12 = vadd.f32 %v6234_v63, %v6042_v61 }
 0x2c2   :  { %v6045_v45 = vpop.f32.mrf.mxu0  ;;  %v6238_v34 = vpop.f32.mrf.mxu1  ;;  %v6642_v16 = vsel %vm6386_vm7, %v6229_v40, %v6514_v62  ;;  %v12988_v40 = vld [vmem:[#allocation119_spill] sm:$0xff] }
 0x2c3   :  { %v6237_v38 = vadd.f32 %v6236_v29, %v6044_v60  ;;  %v6046_v18 = vadd.f32 %v6045_v45, %v11632_v8  ;;  %v6762_v10 = vpack.c.bf16 %v6642_v16, %v6638_v53  ;;  %v6645_v31 = vsel %vm6389_vm8, %v6233_v37, %v6517_v5  ;;  %v12989_v29 = vld [vmem:[#allocation34_spill] sm:$0xff]  ;;  %v12990_v45 = vld [vmem:[#allocation103_spill] sm:$0xff] }
 0x2c4   :  { %v6049_v19 = vpop.f32.mrf.mxu0  ;;  %v6242_v52 = vpop.f32.mrf.mxu1  ;;  %7358 = vmatmul.mubr.bf16.gmra.mxu0 %v12983_v22  ;;  %v6518_v9 = vmul.f32 0.2, %v6235_v12  ;;  %vm6390_vm10 = vcmp.gt.f32.partialorder %v6235_v12, 0.0  ;;  %v12995_v22 = vld [vmem:[#allocation109_spill] sm:$0xff] }
 0x2c5   :  { %vm6393_vm9 = vcmp.gt.f32.partialorder %v6237_v38, 0.0  ;;  %v6521_v17 = vmul.f32 0.2, %v6237_v38  ;;  %v6050_v20 = vadd.f32 %v6049_v19, %v11637_v0  ;;  %7367 = vmatprep.mubr.bf16.mxu0 %v12986_v6  ;;  %v6239_v21 = vadd.f32 %v6238_v34, %v6046_v18  ;;  %7450 = vmatprep.mubr.bf16.mxu1 %v6762_v10  ;;  %v12991_v34 = vld [vmem:[#allocation102_spill] sm:$0xff]  ;;  %v12993_v18 = vld [vmem:[#allocation35_spill] sm:$0xff] }
 0x2c6   :  { %v6051_v28 = vpop.f32.mrf.mxu0  ;;  %v6244_v8 = vpop.f32.mrf.mxu1  ;;  %7451 = vmatmul.mubr.bf16.gmra.mxu1 %v6761_v30  ;;  %v6646_v57 = vsel %vm6390_vm10, %v6235_v12, %v6518_v9  ;;  %v12992_v16 = vpack.c.bf16 %v12990_v45, %v12991_v34 }
 0x2c7   :  { %v6649_v46 = vsel %vm6393_vm9, %v6237_v38, %v6521_v17  ;;  %v6243_v15 = vadd.f32 %v6242_v52, %v6050_v20  ;;  %v6052_v1 = vadd.f32 %v6051_v28, %v12987_v2  ;;  %vm6394_vm11 = vcmp.gt.f32.partialorder %v6239_v21, 0.0  ;;  %v12994_v52 = vld [vmem:[#allocation29_spill] sm:$0xff]  ;;  %v12997_v17 = vld [vmem:[#allocation36_spill] sm:$0xff] }
 0x2c8   :  { %v6765_v27 = vpack.c.bf16 %v6649_v46, %v6645_v31  ;;  %v6522_v36 = vmul.f32 0.2, %v6239_v21  ;;  %v6053_v0 = vpop.f32.mrf.mxu0  ;;  %v6246_v11 = vpop.f32.mrf.mxu1  ;;  %v12996_v10 = vpack.c.bf16 %v12994_v52, %v12995_v22  ;;  %v5680_v12 = vadd.f32 %v12997_v17, %v11564_v33  ;;  %v13008_v22 = vld [vmem:[#allocation38_spill] sm:$0xff] }
 0x2c9   :  { %v6054_v51 = vadd.f32 %v6053_v0, %v12988_v40  ;;  %v6525_v63 = vmul.f32 0.2, %v6243_v15  ;;  %vm6397_vm12 = vcmp.gt.f32.partialorder %v6243_v15, 0.0  ;;  %v6245_v61 = vadd.f32 %v6244_v8, %v6052_v1  ;;  %v12998_v8 = vld [vmem:[#allocation122_spill] sm:$0xff]  ;;  %v12999_v0 = vld [vmem:[#allocation125_spill] sm:$0xff] }
 0x2ca   :  { %v6055_v48 = vpop.f32.mrf.mxu0  ;;  %v6248_v44 = vpop.f32.mrf.mxu1  ;;  %v6650_v37 = vsel %vm6394_vm11, %v6239_v21, %v6522_v36  ;;  %v13000_v40 = vld [vmem:[#allocation37_spill] sm:$0xff] }
 0x2cb   :  { %v6247_v62 = vadd.f32 %v6246_v11, %v6054_v51  ;;  %v6056_v30 = vadd.f32 %v6055_v48, %v12989_v29  ;;  %v6766_v38 = vpack.c.bf16 %v6650_v37, %v6646_v57  ;;  %v6653_v20 = vsel %vm6397_vm12, %v6243_v15, %v6525_v63 }
 0x2cc   :  { %v6059_v60 = vpop.f32.mrf.mxu0  ;;  %v6252_v5 = vpop.f32.mrf.mxu1  ;;  %7368 = vmatmul.mubr.bf16.gmra.mxu0 %v12992_v16  ;;  %v6526_v31 = vmul.f32 0.2, %v6245_v61  ;;  %vm6398_vm14 = vcmp.gt.f32.partialorder %v6245_v61, 0.0  ;;  %v5873_v15 = vadd.f32 %v13000_v40, %v5680_v12 }
 0x2cd   :  { %vm6401_vm13 = vcmp.gt.f32.partialorder %v6247_v62, 0.0  ;;  %v6529_v53 = vmul.f32 0.2, %v6247_v62  ;;  %v6060_v19 = vadd.f32 %v6059_v60, %v12993_v18  ;;  %7377 = vmatprep.mubr.bf16.mxu0 %v12996_v10  ;;  %v6249_v42 = vadd.f32 %v6248_v44, %v6056_v30  ;;  %7460 = vmatprep.mubr.bf16.mxu1 %v6766_v38  ;;  %v13001_v60 = vld [vmem:[#allocation28_spill] sm:$0xff]  ;;  %v13004_v38 = vld [vmem:[#allocation126_spill] sm:$0xff] }
 0x2ce   :  { %v6061_v59 = vpop.f32.mrf.mxu0  ;;  %v6254_v6 = vpop.f32.mrf.mxu1  ;;  %7461 = vmatmul.mubr.bf16.gmra.mxu1 %v6765_v27  ;;  %v6654_v27 = vsel %vm6398_vm14, %v6245_v61, %v6526_v31  ;;  %v13005_v18 = vld [vmem:[#allocation30_spill] sm:$0xff]  ;;  %v5690_v10 = vadd.f32 %v13008_v22, %v11564_v33  ;;  %v13009_v31 = vld [vmem:[#allocation127_spill] sm:$0xff] }
 0x2cf   :  { %v6657_v21 = vsel %vm6401_vm13, %v6247_v62, %v6529_v53  ;;  %v6253_v28 = vadd.f32 %v6252_v5, %v6060_v19  ;;  %v6062_v9 = vadd.f32 %v6061_v59, %v12998_v8  ;;  %vm6402_vm15 = vcmp.gt.f32.partialorder %v6249_v42, 0.0  ;;  %v13002_v5 = vld [vmem:[#allocation107_spill] sm:$0xff] }
 0x2d0   :  { %v6769_v46 = vpack.c.bf16 %v6657_v21, %v6653_v20  ;;  %v6530_v2 = vmul.f32 0.2, %v6249_v42  ;;  %v6063_v1 = vpop.f32.mrf.mxu0  ;;  %v6256_v36 = vpop.f32.mrf.mxu1  ;;  %v13003_v45 = vpack.c.bf16 %v13001_v60, %v13002_v5  ;;  %v13006_v19 = vld [vmem:[#allocation31_spill] sm:$0xff] }
 0x2d1   :  { %v6064_v11 = vadd.f32 %v6063_v1, %v12999_v0  ;;  %v6533_v51 = vmul.f32 0.2, %v6253_v28  ;;  %vm6405_vm0 = vcmp.gt.f32.partialorder %v6253_v28, 0.0  ;;  %v6255_v37 = vadd.f32 %v6254_v6, %v6062_v9 }
 0x2d2   :  { %v6065_v63 = vpop.f32.mrf.mxu0  ;;  %v6258_v48 = vpop.f32.mrf.mxu1  ;;  %v6658_v44 = vsel %vm6402_vm15, %v6249_v42, %v6530_v2  ;;  %v13007_v52 = vpack.c.bf16 %v13005_v18, %v13006_v19  ;;  %v13019_v19 = vld [vmem:[#allocation43_spill] sm:$0xff] }
 0x2d3   :  { %v6257_v62 = vadd.f32 %v6256_v36, %v6064_v11  ;;  %v6066_v57 = vadd.f32 %v6065_v63, %v5873_v15  ;;  %v6770_v34 = vpack.c.bf16 %v6658_v44, %v6654_v27  ;;  %v6661_v61 = vsel %vm6405_vm0, %v6253_v28, %v6533_v51  ;;  %v13010_v36 = vld [vmem:[#allocation40_spill] sm:$0xff]  ;;  %v13011_v11 = vld [vmem:[#allocation39_spill] sm:$0xff] }
 0x2d4   :  { %v6069_v29 = vpop.f32.mrf.mxu0  ;;  %v6262_v30 = vpop.f32.mrf.mxu1  ;;  %7378 = vmatmul.mubr.bf16.gmra.mxu0 %v13003_v45  ;;  %v6534_v42 = vmul.f32 0.2, %v6255_v37  ;;  %vm6406_vm2 = vcmp.gt.f32.partialorder %v6255_v37, 0.0  ;;  %v5883_v28 = vadd.f32 %v13011_v11, %v5690_v10 }
 0x2d5   :  { %vm6409_vm1 = vcmp.gt.f32.partialorder %v6257_v62, 0.0  ;;  %v6537_v16 = vmul.f32 0.2, %v6257_v62  ;;  %v6070_v53 = vadd.f32 %v6069_v29, %v13004_v38  ;;  %7387 = vmatprep.mubr.bf16.mxu0 %v13007_v52  ;;  %v6259_v17 = vadd.f32 %v6258_v48, %v6066_v57  ;;  %7470 = vmatprep.mubr.bf16.mxu1 %v6770_v34  ;;  %v13012_v29 = vld [vmem:[#allocation111_spill] sm:$0xff]  ;;  %v13015_v34 = vld [vmem:[#allocation41_spill] sm:$0xff] }
 0x2d6   :  { %v6071_v12 = vpop.f32.mrf.mxu0  ;;  %v6264_v20 = vpop.f32.mrf.mxu1  ;;  %7471 = vmatmul.mubr.bf16.gmra.mxu1 %v6769_v46  ;;  %v6662_v46 = vsel %vm6406_vm2, %v6255_v37, %v6534_v42  ;;  %v13016_v38 = vld [vmem:[#allocation117_spill] sm:$0xff]  ;;  %v5700_v52 = vadd.f32 %v13019_v19, %v11564_v33  ;;  %v13020_v42 = vld [vmem:[#allocation42_spill] sm:$0xff] }
 0x2d7   :  { %v6665_v59 = vsel %vm6409_vm1, %v6257_v62, %v6537_v16  ;;  %v6263_v6 = vadd.f32 %v6262_v30, %v6070_v53  ;;  %v6072_v21 = vadd.f32 %v6071_v12, %v13009_v31  ;;  %vm6410_vm3 = vcmp.gt.f32.partialorder %v6259_v17, 0.0  ;;  %v13013_v30 = vld [vmem:[#allocation110_spill] sm:$0xff]  ;;  %v13017_v53 = vld [vmem:[#allocation33_spill] sm:$0xff] }
 0x2d8   :  { %v6773_v8 = vpack.c.bf16 %v6665_v59, %v6661_v61  ;;  %v6538_v9 = vmul.f32 0.2, %v6259_v17  ;;  %v6073_v2 = vpop.f32.mrf.mxu0  ;;  %v6266_v1 = vpop.f32.mrf.mxu1  ;;  %v13014_v60 = vpack.c.bf16 %v13012_v29, %v13013_v30  ;;  %v13018_v18 = vpack.c.bf16 %v13016_v38, %v13017_v53 }
 0x2d9   :  { %v6074_v0 = vadd.f32 %v6073_v2, %v13010_v36  ;;  %v6541_v40 = vmul.f32 0.2, %v6263_v6  ;;  %vm6413_vm4 = vcmp.gt.f32.partialorder %v6263_v6, 0.0  ;;  %v6265_v48 = vadd.f32 %v6264_v20, %v6072_v21 }
 0x2da   :  { %v6075_v15 = vpop.f32.mrf.mxu0  ;;  %v6268_v51 = vpop.f32.mrf.mxu1  ;;  %v6666_v63 = vsel %vm6410_vm3, %v6259_v17, %v6538_v9 }
 0x2db   :  { %v6267_v44 = vadd.f32 %v6266_v1, %v6074_v0  ;;  %v6076_v62 = vadd.f32 %v6075_v15, %v5883_v28  ;;  %v6774_v5 = vpack.c.bf16 %v6666_v63, %v6662_v46  ;;  %v6669_v37 = vsel %vm6413_vm4, %v6263_v6, %v6541_v40  ;;  %v13021_v1 = vld [vmem:[#allocation45_spill] sm:$0xff]  ;;  %v13022_v0 = vld [vmem:[#allocation44_spill] sm:$0xff] }
 0x2dc   :  { %v6079_v27 = vpop.f32.mrf.mxu0  ;;  %v6272_v57 = vpop.f32.mrf.mxu1  ;;  %7388 = vmatmul.mubr.bf16.gmra.mxu0 %v13014_v60  ;;  %v6542_v17 = vmul.f32 0.2, %v6265_v48  ;;  %vm6414_vm6 = vcmp.gt.f32.partialorder %v6265_v48, 0.0  ;;  %v5893_v6 = vadd.f32 %v13022_v0, %v5700_v52 }
 0x2dd   :  { %vm6417_vm5 = vcmp.gt.f32.partialorder %v6267_v44, 0.0  ;;  %v6545_v45 = vmul.f32 0.2, %v6267_v44  ;;  %v6080_v16 = vadd.f32 %v6079_v27, %v13015_v34  ;;  %7397 = vmatprep.mubr.bf16.mxu0 %v13018_v18  ;;  %v6269_v22 = vadd.f32 %v6268_v51, %v6076_v62  ;;  %7480 = vmatprep.mubr.bf16.mxu1 %v6774_v5  ;;  %v13023_v27 = vld [vmem:[#allocation32_spill] sm:$0xff]  ;;  %v13026_v5 = vld [vmem:[#allocation46_spill] sm:$0xff] }
 0x2de   :  { %v6081_v10 = vpop.f32.mrf.mxu0  ;;  %v6274_v61 = vpop.f32.mrf.mxu1  ;;  %7481 = vmatmul.mubr.bf16.gmra.mxu1 %v6773_v8  ;;  %v6670_v8 = vsel %vm6414_vm6, %v6265_v48, %v6542_v17  ;;  %v13027_v34 = vld [vmem:[#allocation48_spill] sm:$0xff] }
 0x2df   :  { %v6673_v12 = vsel %vm6417_vm5, %v6267_v44, %v6545_v45  ;;  %v6273_v20 = vadd.f32 %v6272_v57, %v6080_v16  ;;  %v6082_v59 = vadd.f32 %v6081_v10, %v13020_v42  ;;  %vm6418_vm7 = vcmp.gt.f32.partialorder %v6269_v22, 0.0  ;;  %v13024_v57 = vld [vmem:[#allocation115_spill] sm:$0xff] }
 0x2e0   :  { %v6777_v31 = vpack.c.bf16 %v6673_v12, %v6669_v37  ;;  %v6546_v21 = vmul.f32 0.2, %v6269_v22  ;;  %v6083_v9 = vpop.f32.mrf.mxu0  ;;  %v6276_v2 = vpop.f32.mrf.mxu1  ;;  %v13025_v29 = vpack.c.bf16 %v13023_v27, %v13024_v57  ;;  %v5710_v16 = vadd.f32 %v13027_v34, %v11564_v33 }
 0x2e1   :  { %v6084_v36 = vadd.f32 %v6083_v9, %v13021_v1  ;;  %v6549_v11 = vmul.f32 0.2, %v6273_v20  ;;  %vm6421_vm8 = vcmp.gt.f32.partialorder %v6273_v20, 0.0  ;;  %v6275_v51 = vadd.f32 %v6274_v61, %v6082_v59  ;;  %v13029_v59 = vld [vmem:[#allocation50_spill] sm:$0xff]  ;;  %v13030_v9 = vld [vmem:[#allocation49_spill] sm:$0xff] }
 0x2e2   :  { %v6085_v28 = vpop.f32.mrf.mxu0  ;;  %v6278_v40 = vpop.f32.mrf.mxu1  ;;  %v6674_v15 = vsel %vm6418_vm7, %v6269_v22, %v6546_v21  ;;  %v13028_v22 = vld [vmem:[#allocation47_spill] sm:$0xff] }
 0x2e3   :  { %v6277_v63 = vadd.f32 %v6276_v2, %v6084_v36  ;;  %v6086_v44 = vadd.f32 %v6085_v28, %v5893_v6  ;;  %v6778_v30 = vpack.c.bf16 %v6674_v15, %v6670_v8  ;;  %v6677_v38 = vsel %vm6421_vm8, %v6273_v20, %v6549_v11 }
 0x2e4   :  { %v6089_v46 = vpop.f32.mrf.mxu0  ;;  %v6282_v62 = vpop.f32.mrf.mxu1  ;;  %7398 = vmatmul.mubr.bf16.gmra.mxu0 %v13025_v29  ;;  %v6550_v19 = vmul.f32 0.2, %v6275_v51  ;;  %vm6422_vm10 = vcmp.gt.f32.partialorder %v6275_v51, 0.0  ;;  %v5903_v20 = vadd.f32 %v13030_v9, %v5710_v16 }
 0x2e5   :  { %vm6425_vm9 = vcmp.gt.f32.partialorder %v6277_v63, 0.0  ;;  %v6553_v60 = vmul.f32 0.2, %v6277_v63  ;;  %v6090_v45 = vadd.f32 %v6089_v46, %v13026_v5  ;;  %v6279_v53 = vadd.f32 %v6278_v40, %v6086_v44  ;;  %7490 = vmatprep.mubr.bf16.mxu1 %v6778_v30  ;;  %v13031_v44 = vld [vmem:[#allocation51_spill] sm:$0xff] }
 0x2e6   :  { %v6091_v18 = vpop.f32.mrf.mxu0  ;;  %v6284_v48 = vpop.f32.mrf.mxu1  ;;  %7491 = vmatmul.mubr.bf16.gmra.mxu1 %v6777_v31  ;;  %v6678_v31 = vsel %vm6422_vm10, %v6275_v51, %v6550_v19  ;;  %v13033_v51 = vld [vmem:[#allocation52_spill] sm:$0xff]  ;;  %v13034_v19 = vld [vmem:[#allocation55_spill] sm:$0xff] }
 0x2e7   :  { %v6681_v52 = vsel %vm6425_vm9, %v6277_v63, %v6553_v60  ;;  %v6283_v37 = vadd.f32 %v6282_v62, %v6090_v45  ;;  %v6092_v10 = vadd.f32 %v6091_v18, %v13028_v22  ;;  %vm6426_vm11 = vcmp.gt.f32.partialorder %v6279_v53, 0.0  ;;  %v13032_v62 = vld [vmem:[#allocation53_spill] sm:$0xff]  ;;  %v13035_v22 = vld [vmem:[#allocation54_spill] sm:$0xff] }
 0x2e8   :  { %v6781_v61 = vpack.c.bf16 %v6681_v52, %v6677_v38  ;;  %v6554_v17 = vmul.f32 0.2, %v6279_v53  ;;  %v6093_v12 = vpop.f32.mrf.mxu0  ;;  %v6286_v42 = vpop.f32.mrf.mxu1  ;;  %v5720_v27 = vadd.f32 %v13032_v62, %v11564_v33 }
 0x2e9   :  { %v6094_v21 = vadd.f32 %v6093_v12, %v13029_v59  ;;  %v6557_v2 = vmul.f32 0.2, %v6283_v37  ;;  %vm6429_vm12 = vcmp.gt.f32.partialorder %v6283_v37, 0.0  ;;  %v6285_v6 = vadd.f32 %v6284_v48, %v6092_v10 }
 0x2ea   :  { %v6095_v1 = vpop.f32.mrf.mxu0  ;;  %v6288_v36 = vpop.f32.mrf.mxu1  ;;  %v6682_v0 = vsel %vm6426_vm11, %v6279_v53, %v6554_v17 }
 0x2eb   :  { %v6287_v11 = vadd.f32 %v6286_v42, %v6094_v21  ;;  %v6096_v28 = vadd.f32 %v6095_v1, %v5903_v20  ;;  %v6782_v63 = vpack.c.bf16 %v6682_v0, %v6678_v31  ;;  %v6685_v57 = vsel %vm6429_vm12, %v6283_v37, %v6557_v2 }
 0x2ec   :  { %v6099_v40 = vpop.f32.mrf.mxu0  ;;  %v6292_v15 = vpop.f32.mrf.mxu1  ;;  %v6558_v5 = vmul.f32 0.2, %v6285_v6  ;;  %vm6430_vm14 = vcmp.gt.f32.partialorder %v6285_v6, 0.0  ;;  %v5913_v37 = vadd.f32 %v13035_v22, %v5720_v27 }
 0x2ed   :  { %vm6433_vm13 = vcmp.gt.f32.partialorder %v6287_v11, 0.0  ;;  %v6561_v8 = vmul.f32 0.2, %v6287_v11  ;;  %v6100_v46 = vadd.f32 %v6099_v40, %v13031_v44  ;;  %v6289_v29 = vadd.f32 %v6288_v36, %v6096_v28  ;;  %7500 = vmatprep.mubr.bf16.mxu1 %v6782_v63 }
 0x2ee   :  { %v6101_v30 = vpop.f32.mrf.mxu0  ;;  %v6294_v60 = vpop.f32.mrf.mxu1  ;;  %7501 = vmatmul.mubr.bf16.gmra.mxu1 %v6781_v61  ;;  %v6686_v61 = vsel %vm6430_vm14, %v6285_v6, %v6558_v5  ;;  %v13036_v6 = vld [vmem:[#allocation56_spill] sm:$0xff] }
 0x2ef   :  { %v6689_v45 = vsel %vm6433_vm13, %v6287_v11, %v6561_v8  ;;  %v6293_v34 = vadd.f32 %v6292_v15, %v6100_v46  ;;  %v6102_v16 = vadd.f32 %v6101_v30, %v13033_v51  ;;  %vm6434_vm15 = vcmp.gt.f32.partialorder %v6289_v29, 0.0 }
 0x2f0   :  { %v6785_v38 = vpack.c.bf16 %v6689_v45, %v6685_v57  ;;  %v6562_v53 = vmul.f32 0.2, %v6289_v29  ;;  %v6103_v18 = vpop.f32.mrf.mxu0  ;;  %v6296_v48 = vpop.f32.mrf.mxu1  ;;  %v5730_v11 = vadd.f32 %v11749_v54, %v11564_v33  ;;  %v13038_v54 = vld [vmem:[#allocation57_spill] sm:$0xff] }
 0x2f1   :  { %v6104_v52 = vadd.f32 %v6103_v18, %v13034_v19  ;;  %v6565_v10 = vmul.f32 0.2, %v6293_v34  ;;  %vm6437_vm0 = vcmp.gt.f32.partialorder %v6293_v34, 0.0  ;;  %v6295_v59 = vadd.f32 %v6294_v60, %v6102_v16 }
 0x2f2   :  { %v6105_v17 = vpop.f32.mrf.mxu0  ;;  %v6298_v12 = vpop.f32.mrf.mxu1  ;;  %v6690_v42 = vsel %vm6434_vm15, %v6289_v29, %v6562_v53  ;;  %v13037_v29 = vld [vmem:[#allocation58_spill] sm:$0xff]  ;;  %v5923_v60 = vadd.f32 %v13038_v54, %v5730_v11 }
 0x2f3   :  { %v6297_v21 = vadd.f32 %v6296_v48, %v6104_v52  ;;  %v6106_v9 = vadd.f32 %v6105_v17, %v5913_v37  ;;  %v6786_v1 = vpack.c.bf16 %v6690_v42, %v6686_v61  ;;  %v6693_v31 = vsel %vm6437_vm0, %v6293_v34, %v6565_v10 }
 0x2f4   :  { %v6109_v20 = vpop.f32.mrf.mxu0  ;;  %v6302_v2 = vpop.f32.mrf.mxu1  ;;  %v6566_v63 = vmul.f32 0.2, %v6295_v59  ;;  %vm6438_vm2 = vcmp.gt.f32.partialorder %v6295_v59, 0.0  ;;  %v5740_v10 = vadd.f32 %v11768_v50, %v11564_v33  ;;  %v13040_v50 = vld [vmem:[#allocation59_spill] sm:$0xff] }
 0x2f5   :  { %vm6441_vm1 = vcmp.gt.f32.partialorder %v6297_v21, 0.0  ;;  %v6569_v36 = vmul.f32 0.2, %v6297_v21  ;;  %v6110_v0 = vadd.f32 %v6109_v20, %v11743_v25  ;;  %v6299_v28 = vadd.f32 %v6298_v12, %v6106_v9  ;;  %7510 = vmatprep.mubr.bf16.mxu1 %v6786_v1 }
 0x2f6   :  { %v6111_v40 = vpop.f32.mrf.mxu0  ;;  %v6304_v15 = vpop.f32.mrf.mxu1  ;;  %7511 = vmatmul.mubr.bf16.gmra.mxu1 %v6785_v38  ;;  %v6694_v38 = vsel %vm6438_vm2, %v6295_v59, %v6566_v63 }
 0x2f7   :  { %v6697_v8 = vsel %vm6441_vm1, %v6297_v21, %v6569_v36  ;;  %v6303_v44 = vadd.f32 %v6302_v2, %v6110_v0  ;;  %v6112_v46 = vadd.f32 %v6111_v40, %v13036_v6  ;;  %vm6442_vm3 = vcmp.gt.f32.partialorder %v6299_v28, 0.0  ;;  %v13039_v0 = vld [vmem:[#allocation60_spill] sm:$0xff] }
 0x2f8   :  { %v6789_v62 = vpack.c.bf16 %v6697_v8, %v6693_v31  ;;  %v6570_v27 = vmul.f32 0.2, %v6299_v28  ;;  %v6113_v57 = vpop.f32.mrf.mxu0  ;;  %v6306_v25 = vpop.f32.mrf.mxu1  ;;  %v5933_v31 = vadd.f32 %v13040_v50, %v5740_v10 }
 0x2f9   :  { %v6114_v30 = vadd.f32 %v6113_v57, %v13037_v29  ;;  %v6573_v5 = vmul.f32 0.2, %v6303_v44  ;;  %vm6445_vm4 = vcmp.gt.f32.partialorder %v6303_v44, 0.0  ;;  %v6305_v16 = vadd.f32 %v6304_v15, %v6112_v46 }
 0x2fa   :  { %v6115_v45 = vpop.f32.mrf.mxu0  ;;  %v6308_v34 = vpop.f32.mrf.mxu1  ;;  %v6698_v51 = vsel %vm6442_vm3, %v6299_v28, %v6570_v27  ;;  %v5750_v29 = vadd.f32 %v11787_v32, %v11564_v33  ;;  %v13041_v32 = vld [vmem:[#allocation61_spill] sm:$0xff] }
 0x2fb   :  { %v6307_v53 = vadd.f32 %v6306_v25, %v6114_v30  ;;  %v6116_v18 = vadd.f32 %v6115_v45, %v5923_v60  ;;  %v6790_v52 = vpack.c.bf16 %v6698_v51, %v6694_v38  ;;  %v6701_v17 = vsel %vm6445_vm4, %v6303_v44, %v6573_v5 }
 0x2fc   :  { %v6119_v48 = vpop.f32.mrf.mxu0  ;;  %v6312_v19 = vpop.f32.mrf.mxu1  ;;  %v6574_v61 = vmul.f32 0.2, %v6305_v16  ;;  %vm6446_vm6 = vcmp.gt.f32.partialorder %v6305_v16, 0.0 }
 0x2fd   :  { %vm6449_vm5 = vcmp.gt.f32.partialorder %v6307_v53, 0.0  ;;  %v6577_v22 = vmul.f32 0.2, %v6307_v53  ;;  %v6120_v37 = vadd.f32 %v6119_v48, %v11762_v49  ;;  %v6309_v12 = vadd.f32 %v6308_v34, %v6116_v18  ;;  %7520 = vmatprep.mubr.bf16.mxu1 %v6790_v52 }
 0x2fe   :  { %v6121_v42 = vpop.f32.mrf.mxu0  ;;  %v6314_v21 = vpop.f32.mrf.mxu1  ;;  %7521 = vmatmul.mubr.bf16.gmra.mxu1 %v6789_v62  ;;  %v6702_v6 = vsel %vm6446_vm6, %v6305_v16, %v6574_v61 }
 0x2ff   :  { %v6705_v9 = vsel %vm6449_vm5, %v6307_v53, %v6577_v22  ;;  %v6313_v20 = vadd.f32 %v6312_v19, %v6120_v37  ;;  %v6122_v59 = vadd.f32 %v6121_v42, %v11765_v23  ;;  %vm6450_vm7 = vcmp.gt.f32.partialorder %v6309_v12, 0.0 }
 0x300   :  { %v6793_v2 = vpack.c.bf16 %v6705_v9, %v6701_v17  ;;  %v6578_v1 = vmul.f32 0.2, %v6309_v12  ;;  %v6123_v36 = vpop.f32.mrf.mxu0  ;;  %v6316_v49 = vpop.f32.mrf.mxu1  ;;  %v5943_v19 = vadd.f32 %v13041_v32, %v5750_v29 }
 0x301   :  { %v6124_v11 = vadd.f32 %v6123_v36, %v13039_v0  ;;  %v6581_v28 = vmul.f32 0.2, %v6313_v20  ;;  %vm6453_vm8 = vcmp.gt.f32.partialorder %v6313_v20, 0.0  ;;  %v6315_v8 = vadd.f32 %v6314_v21, %v6122_v59 }
 0x302   :  { %v6125_v40 = vpop.f32.mrf.mxu0  ;;  %v6318_v15 = vpop.f32.mrf.mxu1  ;;  %v6706_v63 = vsel %vm6450_vm7, %v6309_v12, %v6578_v1 }
 0x303   :  { %v6317_v44 = vadd.f32 %v6316_v49, %v6124_v11  ;;  %v6126_v46 = vadd.f32 %v6125_v40, %v5933_v31  ;;  %v6794_v27 = vpack.c.bf16 %v6706_v63, %v6702_v6  ;;  %v6709_v30 = vsel %vm6453_vm8, %v6313_v20, %v6581_v28  ;;  %v13042_v63 = vld [vmem:[#allocation63_spill] sm:$0xff] }
 0x304   :  { %v6129_v23 = vpop.f32.mrf.mxu0  ;;  %v6322_v62 = vpop.f32.mrf.mxu1  ;;  %v6582_v45 = vmul.f32 0.2, %v6315_v8  ;;  %vm6454_vm10 = vcmp.gt.f32.partialorder %v6315_v8, 0.0 }
 0x305   :  { %vm6457_vm9 = vcmp.gt.f32.partialorder %v6317_v44, 0.0  ;;  %v6585_v57 = vmul.f32 0.2, %v6317_v44  ;;  %v6130_v25 = vadd.f32 %v6129_v23, %v11781_v24  ;;  %v6319_v54 = vadd.f32 %v6318_v15, %v6126_v46  ;;  %7530 = vmatprep.mubr.bf16.mxu1 %v6794_v27 }
 0x306   :  { %v6131_v60 = vpop.f32.mrf.mxu0  ;;  %v6324_v5 = vpop.f32.mrf.mxu1  ;;  %7531 = vmatmul.mubr.bf16.gmra.mxu1 %v6793_v2  ;;  %v6710_v42 = vsel %vm6454_vm10, %v6315_v8, %v6582_v45  ;;  %v5770_v45 = vadd.f32 %v11825_v4, %v11564_v33  ;;  %v13046_v4 = vld [vmem:[#allocation65_spill] sm:$0xff] }
 0x307   :  { %v6713_v34 = vsel %vm6457_vm9, %v6317_v44, %v6585_v57  ;;  %v6323_v51 = vadd.f32 %v6322_v62, %v6130_v25  ;;  %v6132_v16 = vadd.f32 %v6131_v60, %v11784_v14  ;;  %vm6458_vm11 = vcmp.gt.f32.partialorder %v6319_v54, 0.0 }
 0x308   :  { %v6797_v53 = vpack.c.bf16 %v6713_v34, %v6709_v30  ;;  %v6586_v38 = vmul.f32 0.2, %v6319_v54  ;;  %v6133_v18 = vpop.f32.mrf.mxu0  ;;  %v6326_v24 = vpop.f32.mrf.mxu1 }
 0x309   :  { %v6134_v48 = vadd.f32 %v6133_v18, %v11791_v35  ;;  %v6589_v52 = vmul.f32 0.2, %v6323_v51  ;;  %vm6461_vm12 = vcmp.gt.f32.partialorder %v6323_v51, 0.0  ;;  %v6325_v17 = vadd.f32 %v6324_v5, %v6132_v16 }
 0x30a   :  { %v6135_v22 = vpop.f32.mrf.mxu0  ;;  %v6328_v37 = vpop.f32.mrf.mxu1  ;;  %v6714_v10 = vsel %vm6458_vm11, %v6319_v54, %v6586_v38  ;;  %v5760_v35 = vadd.f32 %v11806_v26, %v11564_v33  ;;  %v13043_v26 = vld [vmem:[#allocation62_spill] sm:$0xff] }
 0x30b   :  { %v6327_v12 = vadd.f32 %v6326_v24, %v6134_v48  ;;  %v6136_v21 = vadd.f32 %v6135_v22, %v5943_v19  ;;  %v6798_v9 = vpack.c.bf16 %v6714_v10, %v6710_v42  ;;  %v6717_v2 = vsel %vm6461_vm12, %v6323_v51, %v6589_v52  ;;  %v13044_v48 = vld [vmem:[#allocation64_spill] sm:$0xff] }
 0x30c   :  { %v6139_v14 = vpop.f32.mrf.mxu0  ;;  %v6332_v61 = vpop.f32.mrf.mxu1  ;;  %v6590_v0 = vmul.f32 0.2, %v6325_v17  ;;  %vm6462_vm14 = vcmp.gt.f32.partialorder %v6325_v17, 0.0  ;;  %v5953_v44 = vadd.f32 %v13043_v26, %v5760_v35 }
 0x30d   :  { %vm6465_vm13 = vcmp.gt.f32.partialorder %v6327_v12, 0.0  ;;  %v6593_v20 = vmul.f32 0.2, %v6327_v12  ;;  %v6140_v59 = vadd.f32 %v6139_v14, %v11800_v13  ;;  %v6329_v1 = vadd.f32 %v6328_v37, %v6136_v21  ;;  %7540 = vmatprep.mubr.bf16.mxu1 %v6798_v9  ;;  %v13045_v37 = vld [vmem:[#allocation66_spill] sm:$0xff] }
 0x30e   :  { %v6141_v36 = vpop.f32.mrf.mxu0  ;;  %v6334_v49 = vpop.f32.mrf.mxu1  ;;  %7541 = vmatmul.mubr.bf16.gmra.mxu1 %v6797_v53  ;;  %v6718_v25 = vsel %vm6462_vm14, %v6325_v17, %v6590_v0  ;;  %v5963_v17 = vadd.f32 %v13046_v4, %v5770_v45  ;;  %v5780_v0 = vadd.f32 %v11844_v41, %v11564_v33  ;;  %v13047_v41 = vld [vmem:[#allocation67_spill] sm:$0xff] }
 0x30f   :  { %v6721_v11 = vsel %vm6465_vm13, %v6327_v12, %v6593_v20  ;;  %v6333_v50 = vadd.f32 %v6332_v61, %v6140_v59  ;;  %v6142_v31 = vadd.f32 %v6141_v36, %v11803_v7  ;;  %vm6466_vm15 = vcmp.gt.f32.partialorder %v6329_v1, 0.0 }
 0x310   :  { %v6801_v28 = vpack.c.bf16 %v6721_v11, %v6717_v2  ;;  %v6594_v40 = vmul.f32 0.2, %v6329_v1  ;;  %v6143_v15 = vpop.f32.mrf.mxu0  ;;  %v6336_v13 = vpop.f32.mrf.mxu1 }
 0x311   :  { %v6144_v8 = vadd.f32 %v6143_v15, %v13042_v63  ;;  %v6597_v6 = vmul.f32 0.2, %v6333_v50  ;;  %vm6469_vm0 = vcmp.gt.f32.partialorder %v6333_v50, 0.0  ;;  %v6335_v27 = vadd.f32 %v6334_v49, %v6142_v31 }
 0x312   :  { %v6145_v46 = vpop.f32.mrf.mxu0  ;;  %v6338_v23 = vpop.f32.mrf.mxu1  ;;  %v6722_v62 = vsel %vm6466_vm15, %v6329_v1, %v6594_v40 }
 0x313   :  { %v6337_v57 = vadd.f32 %v6336_v13, %v6144_v8  ;;  %v6146_v29 = vadd.f32 %v6145_v46, %v5953_v44  ;;  %v6802_v54 = vpack.c.bf16 %v6722_v62, %v6718_v25  ;;  %v6725_v34 = vsel %vm6469_vm0, %v6333_v50, %v6597_v6 }
 0x314   :  { %v6149_v7 = vpop.f32.mrf.mxu0  ;;  %v6342_v30 = vpop.f32.mrf.mxu1  ;;  %v6598_v38 = vmul.f32 0.2, %v6335_v27  ;;  %vm6470_vm2 = vcmp.gt.f32.partialorder %v6335_v27, 0.0  ;;  %v5973_v46 = vadd.f32 %v13047_v41, %v5780_v0 }
 0x315   :  { %vm6473_vm1 = vcmp.gt.f32.partialorder %v6337_v57, 0.0  ;;  %v6601_v60 = vmul.f32 0.2, %v6337_v57  ;;  %v6150_v5 = vadd.f32 %v6149_v7, %v11819_v55  ;;  %v6339_v51 = vadd.f32 %v6338_v23, %v6146_v29  ;;  %7550 = vmatprep.mubr.bf16.mxu1 %v6802_v54 }
 0x316   :  { %v6151_v16 = vpop.f32.mrf.mxu0  ;;  %v6344_v53 = vpop.f32.mrf.mxu1  ;;  %7551 = vmatmul.mubr.bf16.gmra.mxu1 %v6801_v28  ;;  %v6726_v20 = vsel %vm6470_vm2, %v6335_v27, %v6598_v38 }
 0x317   :  { %v6729_v18 = vsel %vm6473_vm1, %v6337_v57, %v6601_v60  ;;  %v6343_v24 = vadd.f32 %v6342_v30, %v6150_v5  ;;  %v6152_v32 = vadd.f32 %v6151_v16, %v13044_v48  ;;  %vm6474_vm3 = vcmp.gt.f32.partialorder %v6339_v51, 0.0 }
 0x318   :  { %v6805_v19 = vpack.c.bf16 %v6729_v18, %v6725_v34  ;;  %v6602_v52 = vmul.f32 0.2, %v6339_v51  ;;  %v6153_v22 = vpop.f32.mrf.mxu0  ;;  %v6346_v55 = vpop.f32.mrf.mxu1 }
 0x319   :  { %v6154_v10 = vadd.f32 %v6153_v22, %v13045_v37  ;;  %v6605_v12 = vmul.f32 0.2, %v6343_v24  ;;  %vm6477_vm4 = vcmp.gt.f32.partialorder %v6343_v24, 0.0  ;;  %v6345_v61 = vadd.f32 %v6344_v53, %v6152_v32 }
 0x31a   :  { %v6155_v42 = vpop.f32.mrf.mxu0  ;;  %v6348_v21 = vpop.f32.mrf.mxu1  ;;  %v6730_v14 = vsel %vm6474_vm3, %v6339_v51, %v6602_v52 }
 0x31b   :  { %v6347_v9 = vadd.f32 %v6346_v55, %v6154_v10  ;;  %v6156_v59 = vadd.f32 %v6155_v42, %v5963_v17  ;;  %v6806_v1 = vpack.c.bf16 %v6730_v14, %v6726_v20  ;;  %v6733_v11 = vsel %vm6477_vm4, %v6343_v24, %v6605_v12 }
 0x31c   :  { %v6159_v35 = vpop.f32.mrf.mxu0  ;;  %v6352_v2 = vpop.f32.mrf.mxu1  ;;  %v6606_v40 = vmul.f32 0.2, %v6345_v61  ;;  %vm6478_vm6 = vcmp.gt.f32.partialorder %v6345_v61, 0.0 }
 0x31d   :  { %vm6481_vm5 = vcmp.gt.f32.partialorder %v6347_v9, 0.0  ;;  %v6609_v36 = vmul.f32 0.2, %v6347_v9  ;;  %v6160_v49 = vadd.f32 %v6159_v35, %v11838_v43  ;;  %v6349_v50 = vadd.f32 %v6348_v21, %v6156_v59  ;;  %7560 = vmatprep.mubr.bf16.mxu1 %v6806_v1 }
 0x31e   :  { %v6161_v31 = vpop.f32.mrf.mxu0  ;;  %v6354_v28 = vpop.f32.mrf.mxu1  ;;  %7561 = vmatmul.mubr.bf16.gmra.mxu1 %v6805_v19  ;;  %v6734_v7 = vsel %vm6478_vm6, %v6345_v61, %v6606_v40 }
 0x31f   :  { %v6737_v15 = vsel %vm6481_vm5, %v6347_v9, %v6609_v36  ;;  %v6353_v13 = vadd.f32 %v6352_v2, %v6160_v49  ;;  %v6162_v63 = vadd.f32 %v6161_v31, %v11841_v58  ;;  %vm6482_vm7 = vcmp.gt.f32.partialorder %v6349_v50, 0.0 }
 0x320   :  { %v6809_v8 = vpack.c.bf16 %v6737_v15, %v6733_v11  ;;  %v6610_v26 = vmul.f32 0.2, %v6349_v50  ;;  %v6163_v44 = vpop.f32.mrf.mxu0  ;;  %v6356_v43 = vpop.f32.mrf.mxu1 }
 0x321   :  { %v6164_v6 = vadd.f32 %v6163_v44, %v11848_v56  ;;  %v6613_v23 = vmul.f32 0.2, %v6353_v13  ;;  %vm6485_vm8 = vcmp.gt.f32.partialorder %v6353_v13, 0.0  ;;  %v6355_v25 = vadd.f32 %v6354_v28, %v6162_v63 }
 0x322   :  { %v6165_v62 = vpop.f32.mrf.mxu0  ;;  %v6358_v27 = vpop.f32.mrf.mxu1  ;;  %v6738_v57 = vsel %vm6482_vm7, %v6349_v50, %v6610_v26  ;;  %v5790_v56 = vadd.f32 %v11863_v3, %v11564_v33  ;;  %v13049_v33 = vld [vmem:[#allocation68_spill] sm:$0xff] }
 0x323   :  { %v6357_v29 = vadd.f32 %v6356_v43, %v6164_v6  ;;  %v6166_v30 = vadd.f32 %v6165_v62, %v5973_v46  ;;  %v6810_v60 = vpack.c.bf16 %v6738_v57, %v6734_v7  ;;  %v6741_v34 = vsel %vm6485_vm8, %v6353_v13, %v6613_v23 }
 0x324   :  { %v6169_v58 = vpop.f32.mrf.mxu0  ;;  %v6362_v54 = vpop.f32.mrf.mxu1  ;;  %v6614_v38 = vmul.f32 0.2, %v6355_v25  ;;  %vm6486_vm10 = vcmp.gt.f32.partialorder %v6355_v25, 0.0  ;;  %v5983_v3 = vadd.f32 %v13049_v33, %v5790_v56  ;;  %v7793_v33 = vld [vmem:[%s12471_s5] sm:$0x3] }
 0x325   :  { %vm6489_vm9 = vcmp.gt.f32.partialorder %v6357_v29, 0.0  ;;  %v6617_v5 = vmul.f32 0.2, %v6357_v29  ;;  %v6170_v45 = vadd.f32 %v6169_v58, %v11857_v47  ;;  %v6359_v51 = vadd.f32 %v6358_v27, %v6166_v30  ;;  %7570 = vmatprep.mubr.bf16.mxu1 %v6810_v60  ;;  %v13048_v47 = vld [vmem:[#allocation69_spill] sm:$0xff] }
 0x326   :  { %v6171_v16 = vpop.f32.mrf.mxu0  ;;  %v6364_v53 = vpop.f32.mrf.mxu1  ;;  %7571 = vmatmul.mubr.bf16.gmra.mxu1 %v6809_v8  ;;  %v6742_v42 = vsel %vm6486_vm10, %v6355_v25, %v6614_v38  ;;  %v13050_v38 = vld [vmem:[#allocation78_spill] sm:$0xff] }
 0x327   :  { %v6745_v18 = vsel %vm6489_vm9, %v6357_v29, %v6617_v5  ;;  %v6363_v24 = vadd.f32 %v6362_v54, %v6170_v45  ;;  %v6172_v48 = vadd.f32 %v6171_v16, %v11860_v39  ;;  %vm6490_vm11 = vcmp.gt.f32.partialorder %v6359_v51, 0.0  ;;  %v6883_v16 = vld [vmem:[%s12470_s4] sm:$0x3] }
 0x328   :  { %v6813_v32 = vpack.c.bf16 %v6745_v18, %v6741_v34  ;;  %v6618_v19 = vmul.f32 0.2, %v6359_v51  ;;  %v6173_v52 = vpop.f32.mrf.mxu0  ;;  %v6366_v55 = vpop.f32.mrf.mxu1  ;;  %v12058_v18 = vrot.slane %v6883_v16, %v13050_v38 }
 0x329   :  { %v6174_v22 = vadd.f32 %v6173_v52, %v13048_v47  ;;  %v6365_v37 = vadd.f32 %v6364_v53, %v6172_v48  ;;  %v6621_v17 = vmul.f32 0.2, %v6363_v24  ;;  %vm6493_vm12 = vcmp.gt.f32.partialorder %v6363_v24, 0.0 }
 0x32a   :  { %v6175_v10 = vpop.f32.mrf.mxu0  ;;  %v6746_v4 = vsel %vm6490_vm11, %v6359_v51, %v6618_v19  ;;  %v6368_v9 = vpop.f32.mrf.mxu1 }
 0x32b   :  { %v6367_v12 = vadd.f32 %v6366_v55, %v6174_v22  ;;  %v6176_v21 = vadd.f32 %v6175_v10, %v5983_v3  ;;  %v6814_v39 = vpack.c.bf16 %v6746_v4, %v6742_v42  ;;  %v6622_v20 = vmul.f32 0.2, %v6365_v37 }
 0x32c   :  { %v7249_v14 = vpop.f32.mrf.mxu0  ;;  %v6749_v2 = vsel %vm6493_vm12, %v6363_v24, %v6621_v17  ;;  %vm6494_vm14 = vcmp.gt.f32.partialorder %v6365_v37, 0.0  ;;  %v13051_v24 = vld [vmem:[#allocation83_spill] sm:$0xff]  ;;  %v12075_v42 = vrot.slane %v7793_v33, %v13050_v38 }
 0x32d   :  { %vm6497_vm13 = vcmp.gt.f32.partialorder %v6367_v12, 0.0  ;;  %v6625_v61 = vmul.f32 0.2, %v6367_v12  ;;  %v6369_v59 = vadd.f32 %v6368_v9, %v6176_v21  ;;  %7580 = vmatprep.mubr.bf16.mxu1 %v6814_v39  ;;  %v6750_v50 = vsel %vm6494_vm14, %v6365_v37, %v6622_v20 }
 0x32e   :  { %v7251_v35 = vpop.f32.mrf.mxu0  ;;  %7581 = vmatmul.mubr.bf16.gmra.mxu1 %v6813_v32  ;;  %v12061_v48 = vrot.slane %v6883_v16, %v13051_v24  ;;  %v7250_v19 = vadd.f32 %v7249_v14, %v12058_v18  ;;  %v12078_v21 = vrot.slane %v7793_v33, %v13051_v24 }
 0x32f   :  { %v6753_v1 = vsel %vm6497_vm13, %v6367_v12, %v6625_v61  ;;  %vm6498_vm15 = vcmp.gt.f32.partialorder %v6369_v59, 0.0  ;;  %v6626_v49 = vmul.f32 0.2, %v6369_v59 }
 0x330   :  { %v6817_v36 = vpack.c.bf16 %v6753_v1, %v6749_v2  ;;  %v7253_v0 = vpop.f32.mrf.mxu0  ;;  %v7252_v47 = vadd.f32 %v7251_v35, %v12061_v48 }
 0x331   :  { %v6754_v31 = vsel %vm6498_vm15, %v6369_v59, %v6626_v49  ;;  %v7254_v37 = vadd.f32 %v7253_v0, %v12058_v18 }
 0x332   :  { %v7255_v11 = vpop.f32.mrf.mxu0  ;;  %v6818_v28 = vpack.c.bf16 %v6754_v31, %v6750_v50 }
 0x333   :  { %v7256_v17 = vadd.f32 %v7255_v11, %v12061_v48 }
 0x334   :  { %v7259_v40 = vpop.f32.mrf.mxu0  ;;  %7590 = vmatprep.mubr.bf16.mxu1 %v6818_v28 }
 0x335   :  { %v7260_v20 = vadd.f32 %v7259_v40, %v12058_v18 }
 0x336   :  { %v7261_v15 = vpop.f32.mrf.mxu0  ;;  %7591 = vmatmul.mubr.bf16.gmra.mxu1 %v6817_v36 }
 0x337   :  { %v7262_v36 = vadd.f32 %v7261_v15, %v12061_v48 }
 0x338   :  { %v12002_v13 = vpop.f32.mrf.mxu0 }
 0x339   :  { %v7264_v40 = vadd.f32 %v12002_v13, %v12058_v18 }
 0x33a   :  { %v12004_v63 = vpop.f32.mrf.mxu0 }
 0x33c   :  { %v12006_v8 = vpop.f32.mrf.mxu0 }
 0x33e   :  { %v12008_v26 = vpop.f32.mrf.mxu0 }
 0x340   :  { %v12010_v44 = vpop.f32.mrf.mxu0 }
 0x342   :  { %v12012_v43 = vpop.f32.mrf.mxu0 }
 0x344   :  { %v12014_v6 = vpop.f32.mrf.mxu0 }
 0x346   :  { %v12016_v41 = vpop.f32.mrf.mxu0 }
 0x348   :  { %v12018_v46 = vpop.f32.mrf.mxu0 }
 0x34a   :  { %v12020_v23 = vpop.f32.mrf.mxu0 }
 0x34c   :  { %v12022_v62 = vpop.f32.mrf.mxu0 }
 0x34e   :  { %v12024_v27 = vpop.f32.mrf.mxu0 }
 0x350   :  { %v12026_v57 = vpop.f32.mrf.mxu0 }
 0x352   :  { %v12028_v25 = vpop.f32.mrf.mxu0 }
 0x354   :  { %v12030_v29 = vpop.f32.mrf.mxu0 }
 0x356   :  { %v12032_v7 = vpop.f32.mrf.mxu0 }
 0x358   :  { %v12034_v30 = vpop.f32.mrf.mxu0 }
 0x35a   :  { %v12036_v58 = vpop.f32.mrf.mxu0 }
 0x35c   :  { %v12038_v54 = vpop.f32.mrf.mxu0 }
 0x35e   :  { %v12040_v60 = vpop.f32.mrf.mxu0 }
 0x360   :  { %v12042_v5 = vpop.f32.mrf.mxu0 }
 0x362   :  { %v12044_v45 = vpop.f32.mrf.mxu0 }
 0x364   :  { %v12046_v56 = vpop.f32.mrf.mxu0 }
 0x366   :  { %v12048_v34 = vpop.f32.mrf.mxu0 }
 0x368   :  { %v12050_v51 = vpop.f32.mrf.mxu0 }
 0x36a   :  { %v12055_v53 = vpop.f32.mrf.mxu0 }
 0x36c   :  { %v12063_v32 = vpop.f32.mrf.mxu0 }
 0x36e   :  { %v12067_v22 = vpop.f32.mrf.mxu0 }
 0x370   :  { %v12080_v14 = vpop.f32.mrf.mxu0 }
 0x372   :  { %v12086_v50 = vpop.f32.mrf.mxu0 }
 0x37e   :  { %v7442_v52 = vpop.f32.mrf.mxu1 }
 0x37f   :  { %v7443_v55 = vadd.f32 %v7442_v52, %v7250_v19 }
 0x380   :  { %v7444_v3 = vpop.f32.mrf.mxu1 }
 0x381   :  { %vm7601_vm0 = vcmp.gt.f32.partialorder %v7443_v55, 0.0  ;;  %v7665_v10 = vmul.f32 0.2, %v7443_v55  ;;  %v7445_v4 = vadd.f32 %v7444_v3, %v7252_v47  ;;  %v7266_v47 = vadd.f32 %v12004_v63, %v12061_v48 }
 0x382   :  { %v7446_v12 = vpop.f32.mrf.mxu1 }
 0x383   :  { %vm7602_vm1 = vcmp.gt.f32.partialorder %v7445_v4, 0.0  ;;  %v7666_v39 = vmul.f32 0.2, %v7445_v4  ;;  %v7447_v61 = vadd.f32 %v7446_v12, %v7254_v37  ;;  %v7729_v9 = vsel %vm7601_vm0, %v7443_v55, %v7665_v10  ;;  %v12094_v37 = vpop.f32.mrf.mxu0 }
 0x384   :  { %v7448_v59 = vpop.f32.mrf.mxu1  ;;  %v7805_v0 = vmul.f32 %v12075_v42, %v7729_v9 }
 0x385   :  { %vm7603_vm2 = vcmp.gt.f32.partialorder %v7447_v61, 0.0  ;;  %v7667_v35 = vmul.f32 0.2, %v7447_v61  ;;  %v7449_v2 = vadd.f32 %v7448_v59, %v7256_v17  ;;  %v7730_v1 = vsel %vm7602_vm1, %v7445_v4, %v7666_v39 }
 0x386   :  { %v7452_v49 = vpop.f32.mrf.mxu1  ;;  %v7806_v11 = vmul.f32 %v12078_v21, %v7730_v1  ;;  %v7270_v17 = vadd.f32 %v12006_v8, %v12058_v18  ;;  %v12102_v1 = vpop.f32.mrf.mxu0 }
 0x387   :  { %vm7604_vm3 = vcmp.gt.f32.partialorder %v7449_v2, 0.0  ;;  %v7668_v31 = vmul.f32 0.2, %v7449_v2  ;;  %v7453_v28 = vadd.f32 %v7452_v49, %v7260_v20  ;;  %v7731_v16 = vsel %vm7603_vm2, %v7447_v61, %v7667_v35 }
 0x388   :  { %v7454_v38 = vpop.f32.mrf.mxu1  ;;  %v7869_v24 = vadd.f32 %v7806_v11, %v7805_v0  ;;  %v7807_v33 = vmul.f32 %v12075_v42, %v7731_v16  ;;  %v7272_v20 = vadd.f32 %v12008_v26, %v12061_v48  ;;  %v7274_v0 = vadd.f32 %v12010_v44, %v12058_v18 }
 0x389   :  { %vm7605_vm4 = vcmp.gt.f32.partialorder %v7453_v28, 0.0  ;;  %v7669_v19 = vmul.f32 0.2, %v7453_v28  ;;  %v7455_v52 = vadd.f32 %v7454_v38, %v7262_v36  ;;  %v7732_v15 = vsel %vm7604_vm3, %v7449_v2, %v7668_v31 }
 0x38a   :  { %v7456_v55 = vpop.f32.mrf.mxu1  ;;  %7870 = vadd.xlane.f32.xlu0 %v7869_v24  ;;  %v7808_v3 = vmul.f32 %v12078_v21, %v7732_v15 }
 0x38b   :  { %vm7606_vm5 = vcmp.gt.f32.partialorder %v7455_v52, 0.0  ;;  %v7670_v10 = vmul.f32 0.2, %v7455_v52  ;;  %v7457_v13 = vadd.f32 %v7456_v55, %v7264_v40  ;;  %v7733_v4 = vsel %vm7605_vm4, %v7453_v28, %v7669_v19 }
 0x38c   :  { %v7458_v12 = vpop.f32.mrf.mxu1  ;;  %v7872_v39 = vadd.f32 %v7808_v3, %v7807_v33  ;;  %v7809_v35 = vmul.f32 %v12075_v42, %v7733_v4  ;;  %v7276_v40 = vadd.f32 %v12012_v43, %v12061_v48  ;;  %v7280_v55 = vadd.f32 %v12014_v6, %v12058_v18 }
 0x38d   :  { %vm7607_vm6 = vcmp.gt.f32.partialorder %v7457_v13, 0.0  ;;  %v7671_v61 = vmul.f32 0.2, %v7457_v13  ;;  %v7459_v63 = vadd.f32 %v7458_v12, %v7266_v47  ;;  %v7734_v9 = vsel %vm7606_vm5, %v7455_v52, %v7670_v10  ;;  %v12110_v52 = vpop.f32.mrf.mxu0 }
 0x38e   :  { %v7462_v59 = vpop.f32.mrf.mxu1  ;;  %7873 = vadd.xlane.f32.xlu0 %v7872_v39  ;;  %v7810_v2 = vmul.f32 %v12078_v21, %v7734_v9  ;;  %v7282_v4 = vadd.f32 %v12016_v41, %v12061_v48 }
 0x38f   :  { %vm7608_vm7 = vcmp.gt.f32.partialorder %v7459_v63, 0.0  ;;  %v7672_v36 = vmul.f32 0.2, %v7459_v63  ;;  %v7463_v8 = vadd.f32 %v7462_v59, %v7270_v17  ;;  %v7735_v49 = vsel %vm7607_vm6, %v7457_v13, %v7671_v61  ;;  %v12118_v61 = vpop.f32.mrf.mxu0 }
 0x390   :  { %v7464_v11 = vpop.f32.mrf.mxu1  ;;  %v7875_v31 = vadd.f32 %v7810_v2, %v7809_v35  ;;  %v7811_v24 = vmul.f32 %v12075_v42, %v7735_v49 }
 0x391   :  { %vm7609_vm8 = vcmp.gt.f32.partialorder %v7463_v8, 0.0  ;;  %v7673_v28 = vmul.f32 0.2, %v7463_v8  ;;  %v7465_v26 = vadd.f32 %v7464_v11, %v7272_v20  ;;  %v7736_v16 = vsel %vm7608_vm7, %v7459_v63, %v7672_v36 }
 0x392   :  { %v7466_v38 = vpop.f32.mrf.mxu1  ;;  %7876 = vadd.xlane.f32.xlu1 %v7875_v31  ;;  %v7812_v19 = vmul.f32 %v12078_v21, %v7736_v16  ;;  %v7284_v20 = vadd.f32 %v12018_v46, %v12058_v18  ;;  %v12126_v31 = vpop.f32.mrf.mxu0  ;;  %v7290_v16 = vadd.f32 %v12022_v62, %v12058_v18 }
 0x393   :  { %vm7610_vm9 = vcmp.gt.f32.partialorder %v7465_v26, 0.0  ;;  %v7674_v15 = vmul.f32 0.2, %v7465_v26  ;;  %v7467_v44 = vadd.f32 %v7466_v38, %v7274_v0  ;;  %v7737_v47 = vsel %vm7609_vm8, %v7463_v8, %v7673_v28 }
 0x394   :  { %v7468_v33 = vpop.f32.mrf.mxu1  ;;  %v7878_v3 = vadd.f32 %v7812_v19, %v7811_v24  ;;  %v7813_v12 = vmul.f32 %v12075_v42, %v7737_v47  ;;  %v7286_v8 = vadd.f32 %v12020_v23, %v12061_v48 }
 0x395   :  { %vm7611_vm10 = vcmp.gt.f32.partialorder %v7467_v44, 0.0  ;;  %v7675_v10 = vmul.f32 0.2, %v7467_v44  ;;  %v7469_v43 = vadd.f32 %v7468_v33, %v7276_v40  ;;  %v7738_v13 = vsel %vm7610_vm9, %v7465_v26, %v7674_v15  ;;  %v12134_v33 = vpop.f32.mrf.mxu0 }
 0x396   :  { %v7472_v17 = vpop.f32.mrf.mxu1  ;;  %7879 = vadd.xlane.f32.xlu1 %v7878_v3  ;;  %v7814_v39 = vmul.f32 %v12078_v21, %v7738_v13  ;;  %v7292_v15 = vadd.f32 %v12024_v27, %v12061_v48 }
 0x397   :  { %vm7612_vm11 = vcmp.gt.f32.partialorder %v7469_v43, 0.0  ;;  %v7676_v63 = vmul.f32 0.2, %v7469_v43  ;;  %v7473_v6 = vadd.f32 %v7472_v17, %v7280_v55  ;;  %v7739_v9 = vsel %vm7611_vm10, %v7467_v44, %v7675_v10 }
 0x398   :  { %v7474_v59 = vpop.f32.mrf.mxu1  ;;  %v7881_v35 = vadd.f32 %v7814_v39, %v7813_v12  ;;  %v7815_v0 = vmul.f32 %v12075_v42, %v7739_v9  ;;  %v7296_v39 = vadd.f32 %v12028_v25, %v12061_v48 }
 0x399   :  { %vm7613_vm12 = vcmp.gt.f32.partialorder %v7473_v6, 0.0  ;;  %v7677_v2 = vmul.f32 0.2, %v7473_v6  ;;  %v7475_v41 = vadd.f32 %v7474_v59, %v7282_v4  ;;  %v7740_v36 = vsel %vm7612_vm11, %v7469_v43, %v7676_v63 }
 0x39a   :  { %v7476_v49 = vpop.f32.mrf.mxu1  ;;  %7882 = vadd.xlane.f32.xlu0 %v7881_v35  ;;  %v7816_v11 = vmul.f32 %v12078_v21, %v7740_v36  ;;  %v7294_v43 = vadd.f32 %v12026_v57, %v12058_v18 }
 0x39b   :  { %vm7614_vm13 = vcmp.gt.f32.partialorder %v7475_v41, 0.0  ;;  %v7678_v28 = vmul.f32 0.2, %v7475_v41  ;;  %v7477_v46 = vadd.f32 %v7476_v49, %v7284_v20  ;;  %v7741_v26 = vsel %vm7613_vm12, %v7473_v6, %v7677_v2  ;;  %v12142_v20 = vpop.f32.mrf.mxu0 }
 0x39c   :  { %v7478_v40 = vpop.f32.mrf.mxu1  ;;  %v7884_v38 = vadd.f32 %v7816_v11, %v7815_v0  ;;  %v7817_v47 = vmul.f32 %v12075_v42, %v7741_v26  ;;  %v7300_v2 = vadd.f32 %v12030_v29, %v12058_v18  ;;  %v7302_v0 = vadd.f32 %v12032_v7, %v12061_v48 }
 0x39d   :  { %vm7615_vm14 = vcmp.gt.f32.partialorder %v7477_v46, 0.0  ;;  %v7679_v24 = vmul.f32 0.2, %v7477_v46  ;;  %v7479_v23 = vadd.f32 %v7478_v40, %v7286_v8  ;;  %v7742_v19 = vsel %vm7614_vm13, %v7475_v41, %v7678_v28  ;;  %v12150_v26 = vpop.f32.mrf.mxu0 }
 0x39e   :  { %v7482_v44 = vpop.f32.mrf.mxu1  ;;  %7885 = vadd.xlane.f32.xlu1 %v7884_v38  ;;  %v7818_v55 = vmul.f32 %v12078_v21, %v7742_v19  ;;  %v7304_v38 = vadd.f32 %v12034_v30, %v12058_v18 }
 0x39f   :  { %vm7616_vm15 = vcmp.gt.f32.partialorder %v7479_v23, 0.0  ;;  %v7680_v3 = vmul.f32 0.2, %v7479_v23  ;;  %v7483_v62 = vadd.f32 %v7482_v44, %v7290_v16  ;;  %v7743_v10 = vsel %vm7615_vm14, %v7477_v46, %v7679_v24 }
 0x3a0   :  { %v7484_v13 = vpop.f32.mrf.mxu1  ;;  %v7887_v4 = vadd.f32 %v7818_v55, %v7817_v47  ;;  %v7819_v6 = vmul.f32 %v12075_v42, %v7743_v10  ;;  %v7306_v44 = vadd.f32 %v12036_v58, %v12061_v48 }
 0x3a1   :  { %vm7617_vm0 = vcmp.gt.f32.partialorder %v7483_v62, 0.0  ;;  %v7681_v17 = vmul.f32 0.2, %v7483_v62  ;;  %v7485_v27 = vadd.f32 %v7484_v13, %v7292_v15  ;;  %v7744_v12 = vsel %vm7616_vm15, %v7479_v23, %v7680_v3 }
 0x3a2   :  { %v7486_v63 = vpop.f32.mrf.mxu1  ;;  %7888 = vadd.xlane.f32.xlu0 %v7887_v4  ;;  %v7820_v9 = vmul.f32 %v12078_v21, %v7744_v12  ;;  %v7310_v13 = vadd.f32 %v12038_v54, %v12058_v18 }
 0x3a3   :  { %vm7618_vm1 = vcmp.gt.f32.partialorder %v7485_v27, 0.0  ;;  %v7682_v59 = vmul.f32 0.2, %v7485_v27  ;;  %v7487_v57 = vadd.f32 %v7486_v63, %v7294_v43  ;;  %v7745_v35 = vsel %vm7617_vm0, %v7483_v62, %v7681_v17  ;;  %v12158_v62 = vpop.f32.mrf.mxu0 }
 0x3a4   :  { %v7488_v41 = vpop.f32.mrf.mxu1  ;;  %v7890_v36 = vadd.f32 %v7820_v9, %v7819_v6  ;;  %v7821_v28 = vmul.f32 %v12075_v42, %v7745_v35 }
 0x3a5   :  { %vm7619_vm2 = vcmp.gt.f32.partialorder %v7487_v57, 0.0  ;;  %v7683_v8 = vmul.f32 0.2, %v7487_v57  ;;  %v7489_v25 = vadd.f32 %v7488_v41, %v7296_v39  ;;  %v7746_v49 = vsel %vm7618_vm1, %v7485_v27, %v7682_v59  ;;  %v12166_v59 = vpop.f32.mrf.mxu0 }
 0x3a6   :  { %v7492_v11 = vpop.f32.mrf.mxu1  ;;  %7891 = vadd.xlane.f32.xlu1 %v7890_v36  ;;  %v7822_v46 = vmul.f32 %v12078_v21, %v7746_v49  ;;  %v7312_v39 = vadd.f32 %v12040_v60, %v12061_v48  ;;  %v7316_v49 = vadd.f32 %v12044_v45, %v12061_v48 }
 0x3a7   :  { %vm7620_vm3 = vcmp.gt.f32.partialorder %v7489_v25, 0.0  ;;  %v7684_v16 = vmul.f32 0.2, %v7489_v25  ;;  %v7493_v29 = vadd.f32 %v7492_v11, %v7300_v2  ;;  %v7747_v40 = vsel %vm7619_vm2, %v7487_v57, %v7683_v8 }
 0x3a8   :  { %v7494_v24 = vpop.f32.mrf.mxu1  ;;  %v7893_v23 = vadd.f32 %v7822_v46, %v7821_v28  ;;  %v7823_v55 = vmul.f32 %v12075_v42, %v7747_v40  ;;  %v7314_v2 = vadd.f32 %v12042_v5, %v12058_v18  ;;  %v12174_v46 = vpop.f32.mrf.mxu0  ;;  %v7320_v40 = vadd.f32 %v12046_v56, %v12058_v18 }
 0x3a9   :  { %vm7621_vm4 = vcmp.gt.f32.partialorder %v7493_v29, 0.0  ;;  %v7685_v19 = vmul.f32 0.2, %v7493_v29  ;;  %v7495_v7 = vadd.f32 %v7494_v24, %v7302_v0  ;;  %v7748_v15 = vsel %vm7620_vm3, %v7489_v25, %v7684_v16 }
 0x3aa   :  { %v7496_v47 = vpop.f32.mrf.mxu1  ;;  %7894 = vadd.xlane.f32.xlu0 %v7893_v23  ;;  %v7824_v3 = vmul.f32 %v12078_v21, %v7748_v15 }
 0x3ab   :  { %vm7622_vm5 = vcmp.gt.f32.partialorder %v7495_v7, 0.0  ;;  %v7686_v10 = vmul.f32 0.2, %v7495_v7  ;;  %v7497_v30 = vadd.f32 %v7496_v47, %v7304_v38  ;;  %v7749_v43 = vsel %vm7621_vm4, %v7493_v29, %v7685_v19 }
 0x3ac   :  { %v7498_v4 = vpop.f32.mrf.mxu1  ;;  %v7896_v17 = vadd.f32 %v7824_v3, %v7823_v55  ;;  %v7825_v6 = vmul.f32 %v12075_v42, %v7749_v43  ;;  %v12182_v55 = vpop.f32.mrf.mxu0 }
 0x3ad   :  { %vm7623_vm6 = vcmp.gt.f32.partialorder %v7497_v30, 0.0  ;;  %v7687_v27 = vmul.f32 0.2, %v7497_v30  ;;  %v7499_v58 = vadd.f32 %v7498_v4, %v7306_v44  ;;  %v7750_v12 = vsel %vm7622_vm5, %v7495_v7, %v7686_v10 }
 0x3ae   :  { %v7502_v63 = vpop.f32.mrf.mxu1  ;;  %7897 = vadd.xlane.f32.xlu1 %v7896_v17  ;;  %v7826_v9 = vmul.f32 %v12078_v21, %v7750_v12  ;;  %v7322_v7 = vadd.f32 %v12048_v34, %v12061_v48 }
 0x3af   :  { %vm7624_vm7 = vcmp.gt.f32.partialorder %v7499_v58, 0.0  ;;  %v7688_v57 = vmul.f32 0.2, %v7499_v58  ;;  %v7503_v54 = vadd.f32 %v7502_v63, %v7310_v13  ;;  %v7751_v35 = vsel %vm7623_vm6, %v7497_v30, %v7687_v27  ;;  %v12190_v63 = vpop.f32.mrf.mxu0 }
 0x3b0   :  { %v7504_v41 = vpop.f32.mrf.mxu1  ;;  %v7899_v36 = vadd.f32 %v7826_v9, %v7825_v6  ;;  %v7827_v11 = vmul.f32 %v12075_v42, %v7751_v35  ;;  %v7324_v30 = vadd.f32 %v12050_v51, %v12058_v18  ;;  %v7326_v27 = vadd.f32 %v12055_v53, %v12061_v48 }
 0x3b1   :  { %vm7625_vm8 = vcmp.gt.f32.partialorder %v7503_v54, 0.0  ;;  %v7689_v8 = vmul.f32 0.2, %v7503_v54  ;;  %v7505_v60 = vadd.f32 %v7504_v41, %v7312_v39  ;;  %v7752_v25 = vsel %vm7624_vm7, %v7499_v58, %v7688_v57 }
 0x3b2   :  { %v7506_v0 = vpop.f32.mrf.mxu1  ;;  %7900 = vadd.xlane.f32.xlu0 %v7899_v36  ;;  %v7828_v28 = vmul.f32 %v12078_v21, %v7752_v25  ;;  %v7330_v57 = vadd.f32 %v12063_v32, %v12058_v18  ;;  %v7332_v36 = vadd.f32 %v12067_v22, %v12061_v48 }
 0x3b3   :  { %vm7626_vm9 = vcmp.gt.f32.partialorder %v7505_v60, 0.0  ;;  %v7690_v16 = vmul.f32 0.2, %v7505_v60  ;;  %v7507_v5 = vadd.f32 %v7506_v0, %v7314_v2  ;;  %v7753_v29 = vsel %vm7625_vm8, %v7503_v54, %v7689_v8 }
 0x3b4   :  { %v7508_v38 = vpop.f32.mrf.mxu1  ;;  %v7902_v24 = vadd.f32 %v7828_v28, %v7827_v11  ;;  %v7829_v44 = vmul.f32 %v12075_v42, %v7753_v29  ;;  %v7334_v28 = vadd.f32 %v12080_v14, %v12058_v18 }
 0x3b5   :  { %vm7627_vm10 = vcmp.gt.f32.partialorder %v7507_v5, 0.0  ;;  %v7691_v23 = vmul.f32 0.2, %v7507_v5  ;;  %v7509_v45 = vadd.f32 %v7508_v38, %v7316_v49  ;;  %v7754_v19 = vsel %vm7626_vm9, %v7505_v60, %v7690_v16  ;;  %v12198_v49 = vpop.f32.mrf.mxu0 }
 0x3b6   :  { %v7512_v15 = vpop.f32.mrf.mxu1  ;;  %7903 = vadd.xlane.f32.xlu1 %v7902_v24  ;;  %v7830_v47 = vmul.f32 %v12078_v21, %v7754_v19  ;;  %v7336_v38 = vadd.f32 %v12086_v50, %v12061_v48 }
 0x3b7   :  { %vm7628_vm11 = vcmp.gt.f32.partialorder %v7509_v45, 0.0  ;;  %v7692_v3 = vmul.f32 0.2, %v7509_v45  ;;  %v7513_v56 = vadd.f32 %v7512_v15, %v7320_v40  ;;  %v7755_v10 = vsel %vm7627_vm10, %v7507_v5, %v7691_v23  ;;  %v12206_v19 = vpop.f32.mrf.mxu0 }
 0x3b8   :  { %v7514_v43 = vpop.f32.mrf.mxu1  ;;  %v7905_v13 = vadd.f32 %v7830_v47, %v7829_v44  ;;  %v7831_v12 = vmul.f32 %v12075_v42, %v7755_v10  ;;  %v7340_v44 = vadd.f32 %v12094_v37, %v12058_v18 }
 0x3b9   :  { %vm7629_vm12 = vcmp.gt.f32.partialorder %v7513_v56, 0.0  ;;  %v7693_v4 = vmul.f32 0.2, %v7513_v56  ;;  %v7515_v34 = vadd.f32 %v7514_v43, %v7322_v7  ;;  %v7756_v17 = vsel %vm7628_vm11, %v7509_v45, %v7692_v3 }
 0x3ba   :  { %v7516_v58 = vpop.f32.mrf.mxu1  ;;  %7906 = vadd.xlane.f32.xlu0 %v7905_v13  ;;  %v7832_v39 = vmul.f32 %v12078_v21, %v7756_v17 }
 0x3bb   :  { %vm7630_vm13 = vcmp.gt.f32.partialorder %v7515_v34, 0.0  ;;  %v7694_v6 = vmul.f32 0.2, %v7515_v34  ;;  %v7517_v51 = vadd.f32 %v7516_v58, %v7324_v30  ;;  %v7757_v9 = vsel %vm7629_vm12, %v7513_v56, %v7693_v4 }
 0x3bc   :  { %v7518_v54 = vpop.f32.mrf.mxu1  ;;  %v7908_v35 = vadd.f32 %v7832_v39, %v7831_v12  ;;  %v7833_v60 = vmul.f32 %v12075_v42, %v7757_v9  ;;  %v7342_v30 = vadd.f32 %v12102_v1, %v12061_v48  ;;  %v7344_v58 = vadd.f32 %v12110_v52, %v12058_v18 }
 0x3bd   :  { %vm7631_vm14 = vcmp.gt.f32.partialorder %v7517_v51, 0.0  ;;  %v7695_v2 = vmul.f32 0.2, %v7517_v51  ;;  %v7519_v53 = vadd.f32 %v7518_v54, %v7326_v27  ;;  %v7758_v41 = vsel %vm7630_vm13, %v7515_v34, %v7694_v6  ;;  %v12214_v34 = vpop.f32.mrf.mxu0 }
 0x3be   :  { %v7522_v8 = vpop.f32.mrf.mxu1  ;;  %7909 = vadd.xlane.f32.xlu1 %v7908_v35  ;;  %v7834_v25 = vmul.f32 %v12078_v21, %v7758_v41  ;;  %v7346_v9 = vadd.f32 %v12118_v61, %v12061_v48 }
 0x3bf   :  { %vm7632_vm15 = vcmp.gt.f32.partialorder %v7519_v53, 0.0  ;;  %v7696_v0 = vmul.f32 0.2, %v7519_v53  ;;  %v7523_v32 = vadd.f32 %v7522_v8, %v7330_v57  ;;  %v7759_v11 = vsel %vm7631_vm14, %v7517_v51, %v7695_v2  ;;  %v12222_v2 = vpop.f32.mrf.mxu0 }
 0x3c0   :  { %v7524_v16 = vpop.f32.mrf.mxu1  ;;  %v7911_v5 = vadd.f32 %v7834_v25, %v7833_v60  ;;  %v7835_v23 = vmul.f32 %v12075_v42, %v7759_v11 }
 0x3c1   :  { %vm7633_vm0 = vcmp.gt.f32.partialorder %v7523_v32, 0.0  ;;  %v7697_v29 = vmul.f32 0.2, %v7523_v32  ;;  %v7525_v22 = vadd.f32 %v7524_v16, %v7332_v36  ;;  %v7760_v40 = vsel %vm7632_vm15, %v7519_v53, %v7696_v0 }
 0x3c2   :  { %v7526_v24 = vpop.f32.mrf.mxu1  ;;  %7912 = vadd.xlane.f32.xlu0 %v7911_v5  ;;  %v7836_v45 = vmul.f32 %v12078_v21, %v7760_v40  ;;  %v7350_v36 = vadd.f32 %v12126_v31, %v12058_v18  ;;  %v12230_v5 = vpop.f32.mrf.mxu0  ;;  %v7354_v40 = vadd.f32 %v12142_v20, %v12058_v18 }
 0x3c3   :  { %vm7634_vm1 = vcmp.gt.f32.partialorder %v7525_v22, 0.0  ;;  %v7698_v7 = vmul.f32 0.2, %v7525_v22  ;;  %v7527_v14 = vadd.f32 %v7526_v24, %v7334_v28  ;;  %v7761_v15 = vsel %vm7633_vm0, %v7523_v32, %v7697_v29 }
 0x3c4   :  { %v7528_v47 = vpop.f32.mrf.mxu1  ;;  %v7914_v3 = vadd.f32 %v7836_v45, %v7835_v23  ;;  %v7837_v13 = vmul.f32 %v12075_v42, %v7761_v15  ;;  %v7352_v32 = vadd.f32 %v12134_v33, %v12061_v48 }
 0x3c5   :  { %vm7635_vm2 = vcmp.gt.f32.partialorder %v7527_v14, 0.0  ;;  %v7699_v56 = vmul.f32 0.2, %v7527_v14  ;;  %v7529_v50 = vadd.f32 %v7528_v47, %v7336_v38  ;;  %v7762_v10 = vsel %vm7634_vm1, %v7525_v22, %v7698_v7  ;;  %v12238_v47 = vpop.f32.mrf.mxu0 }
 0x3c6   :  { %v7532_v43 = vpop.f32.mrf.mxu1  ;;  %7915 = vadd.xlane.f32.xlu1 %v7914_v3  ;;  %v7838_v4 = vmul.f32 %v12078_v21, %v7762_v10  ;;  %v7356_v7 = vadd.f32 %v12150_v26, %v12061_v48 }
 0x3c7   :  { %vm7636_vm3 = vcmp.gt.f32.partialorder %v7529_v50, 0.0  ;;  %v7700_v17 = vmul.f32 0.2, %v7529_v50  ;;  %v7533_v37 = vadd.f32 %v7532_v43, %v7340_v44  ;;  %v7763_v27 = vsel %vm7635_vm2, %v7527_v14, %v7699_v56 }
 0x3c8   :  { %v7534_v12 = vpop.f32.mrf.mxu1  ;;  %v7917_v39 = vadd.f32 %v7838_v4, %v7837_v13  ;;  %v7839_v54 = vmul.f32 %v12075_v42, %v7763_v27  ;;  %v7362_v4 = vadd.f32 %v12166_v59, %v12061_v48 }
 0x3c9   :  { %vm7637_vm4 = vcmp.gt.f32.partialorder %v7533_v37, 0.0  ;;  %v7701_v6 = vmul.f32 0.2, %v7533_v37  ;;  %v7535_v1 = vadd.f32 %v7534_v12, %v7342_v30  ;;  %v7764_v51 = vsel %vm7636_vm3, %v7529_v50, %v7700_v17 }
 0x3ca   :  { %v7536_v57 = vpop.f32.mrf.mxu1  ;;  %7918 = vadd.xlane.f32.xlu0 %v7917_v39  ;;  %v7840_v35 = vmul.f32 %v12078_v21, %v7764_v51  ;;  %v7360_v50 = vadd.f32 %v12158_v62, %v12058_v18 }
 0x3cb   :  { %vm7638_vm5 = vcmp.gt.f32.partialorder %v7535_v1, 0.0  ;;  %v7702_v53 = vmul.f32 0.2, %v7535_v1  ;;  %v7537_v52 = vadd.f32 %v7536_v57, %v7344_v58  ;;  %v7765_v41 = vsel %vm7637_vm4, %v7533_v37, %v7701_v6  ;;  %v12246_v58 = vpop.f32.mrf.mxu0 }
 0x3cc   :  { %v7538_v8 = vpop.f32.mrf.mxu1  ;;  %v7920_v60 = vadd.f32 %v7840_v35, %v7839_v54  ;;  %v7841_v28 = vmul.f32 %v12075_v42, %v7765_v41  ;;  %v7364_v6 = vadd.f32 %v12174_v46, %v12058_v18  ;;  %v7366_v54 = vadd.f32 %v12182_v55, %v12061_v48 }
 0x3cd   :  { %vm7639_vm6 = vcmp.gt.f32.partialorder %v7537_v52, 0.0  ;;  %v7703_v25 = vmul.f32 0.2, %v7537_v52  ;;  %v7539_v61 = vadd.f32 %v7538_v8, %v7346_v9  ;;  %v7766_v0 = vsel %vm7638_vm5, %v7535_v1, %v7702_v53  ;;  %v12254_v41 = vpop.f32.mrf.mxu0 }
 0x3ce   :  { %v7542_v11 = vpop.f32.mrf.mxu1  ;;  %7921 = vadd.xlane.f32.xlu1 %v7920_v60  ;;  %v7842_v16 = vmul.f32 %v12078_v21, %v7766_v0  ;;  %v7370_v60 = vadd.f32 %v12190_v63, %v12058_v18 }
 0x3cf   :  { %vm7640_vm7 = vcmp.gt.f32.partialorder %v7539_v61, 0.0  ;;  %v7704_v29 = vmul.f32 0.2, %v7539_v61  ;;  %v7543_v31 = vadd.f32 %v7542_v11, %v7350_v36  ;;  %v7767_v22 = vsel %vm7639_vm6, %v7537_v52, %v7703_v25 }
 0x3d0   :  { %v7544_v38 = vpop.f32.mrf.mxu1  ;;  %v7923_v24 = vadd.f32 %v7842_v16, %v7841_v28  ;;  %v7843_v15 = vmul.f32 %v12075_v42, %v7767_v22  ;;  %v7372_v11 = vadd.f32 %v12198_v49, %v12061_v48 }
 0x3d1   :  { %vm7641_vm8 = vcmp.gt.f32.partialorder %v7543_v31, 0.0  ;;  %v7705_v23 = vmul.f32 0.2, %v7543_v31  ;;  %v7545_v33 = vadd.f32 %v7544_v38, %v7352_v32  ;;  %v7768_v45 = vsel %vm7640_vm7, %v7539_v61, %v7704_v29 }
 0x3d2   :  { %v7546_v14 = vpop.f32.mrf.mxu1  ;;  %7924 = vadd.xlane.f32.xlu0 %v7923_v24  ;;  %v7844_v44 = vmul.f32 %v12078_v21, %v7768_v45  ;;  %v7374_v38 = vadd.f32 %v12206_v19, %v12058_v18 }
 0x3d3   :  { %vm7642_vm9 = vcmp.gt.f32.partialorder %v7545_v33, 0.0  ;;  %v7706_v3 = vmul.f32 0.2, %v7545_v33  ;;  %v7547_v20 = vadd.f32 %v7546_v14, %v7354_v40  ;;  %v7769_v56 = vsel %vm7641_vm8, %v7543_v31, %v7705_v23  ;;  %v12262_v31 = vpop.f32.mrf.mxu0 }
 0x3d4   :  { %v7548_v10 = vpop.f32.mrf.mxu1  ;;  %v7926_v30 = vadd.f32 %v7844_v44, %v7843_v15  ;;  %v7845_v37 = vmul.f32 %v12075_v42, %v7769_v56 }
 0x3d5   :  { %vm7643_vm10 = vcmp.gt.f32.partialorder %v7547_v20, 0.0  ;;  %v7707_v43 = vmul.f32 0.2, %v7547_v20  ;;  %v7549_v26 = vadd.f32 %v7548_v10, %v7356_v7  ;;  %v7770_v13 = vsel %vm7642_vm9, %v7545_v33, %v7706_v3  ;;  %v7393_v3 = vpop.f32.mrf.mxu0 }
 0x3d6   :  { %v7552_v17 = vpop.f32.mrf.mxu1  ;;  %7927 = vadd.xlane.f32.xlu1 %v7926_v30  ;;  %v7846_v27 = vmul.f32 %v12078_v21, %v7770_v13  ;;  %v7376_v7 = vadd.f32 %v12214_v34, %v12061_v48  ;;  %v7382_v13 = vadd.f32 %v12230_v5, %v12061_v48 }
 0x3d7   :  { %vm7644_vm11 = vcmp.gt.f32.partialorder %v7549_v26, 0.0  ;;  %v7708_v12 = vmul.f32 0.2, %v7549_v26  ;;  %v7553_v62 = vadd.f32 %v7552_v17, %v7360_v50  ;;  %v7771_v39 = vsel %vm7643_vm10, %v7547_v20, %v7707_v43 }
 0x3d8   :  { %v7554_v1 = vpop.f32.mrf.mxu1  ;;  %v7929_v51 = vadd.f32 %v7846_v27, %v7845_v37  ;;  %v7847_v53 = vmul.f32 %v12075_v42, %v7771_v39  ;;  %v7380_v50 = vadd.f32 %v12222_v2, %v12058_v18  ;;  %v7395_v27 = vpop.f32.mrf.mxu0  ;;  %v7384_v39 = vadd.f32 %v12238_v47, %v12058_v18 }
 0x3d9   :  { %vm7645_vm12 = vcmp.gt.f32.partialorder %v7553_v62, 0.0  ;;  %v7709_v9 = vmul.f32 0.2, %v7553_v62  ;;  %v7555_v59 = vadd.f32 %v7554_v1, %v7362_v4  ;;  %v7772_v57 = vsel %vm7644_vm11, %v7549_v26, %v7708_v12 }
 0x3da   :  { %v7556_v35 = vpop.f32.mrf.mxu1  ;;  %7930 = vadd.xlane.f32.xlu0 %v7929_v51  ;;  %v7848_v52 = vmul.f32 %v12078_v21, %v7772_v57 }
 0x3db   :  { %vm7646_vm13 = vcmp.gt.f32.partialorder %v7555_v59, 0.0  ;;  %v7710_v36 = vmul.f32 0.2, %v7555_v59  ;;  %v7557_v46 = vadd.f32 %v7556_v35, %v7364_v6  ;;  %v7773_v8 = vsel %vm7645_vm12, %v7553_v62, %v7709_v9 }
 0x3dc   :  { %v7558_v25 = vpop.f32.mrf.mxu1  ;;  %v7932_v61 = vadd.f32 %v7848_v52, %v7847_v53  ;;  %v7849_v16 = vmul.f32 %v12075_v42, %v7773_v8  ;;  %v7399_v53 = vpop.f32.mrf.mxu0 }
 0x3dd   :  { %vm7647_vm14 = vcmp.gt.f32.partialorder %v7557_v46, 0.0  ;;  %v7711_v0 = vmul.f32 0.2, %v7557_v46  ;;  %v7559_v55 = vadd.f32 %v7558_v25, %v7366_v54  ;;  %v7774_v32 = vsel %vm7646_vm13, %v7555_v59, %v7710_v36 }
 0x3de   :  { %v7562_v28 = vpop.f32.mrf.mxu1  ;;  %7933 = vadd.xlane.f32.xlu1 %v7932_v61  ;;  %v7850_v29 = vmul.f32 %v12078_v21, %v7774_v32  ;;  %v7386_v59 = vadd.f32 %v12246_v58, %v12061_v48 }
 0x3df   :  { %vm7648_vm15 = vcmp.gt.f32.partialorder %v7559_v55, 0.0  ;;  %v7712_v22 = vmul.f32 0.2, %v7559_v55  ;;  %v7563_v63 = vadd.f32 %v7562_v28, %v7370_v60  ;;  %v7775_v40 = vsel %vm7647_vm14, %v7557_v46, %v7711_v0  ;;  %v7401_v28 = vpop.f32.mrf.mxu0 }
 0x3e0   :  { %v7564_v24 = vpop.f32.mrf.mxu1  ;;  %v7935_v23 = vadd.f32 %v7850_v29, %v7849_v16  ;;  %v7851_v15 = vmul.f32 %v12075_v42, %v7775_v40  ;;  %v7390_v46 = vadd.f32 %v12254_v41, %v12058_v18  ;;  %v7392_v0 = vadd.f32 %v12262_v31, %v12061_v48 }
 0x3e1   :  { %vm7649_vm0 = vcmp.gt.f32.partialorder %v7563_v63, 0.0  ;;  %v7713_v33 = vmul.f32 0.2, %v7563_v63  ;;  %v7565_v49 = vadd.f32 %v7564_v24, %v7372_v11  ;;  %v7776_v45 = vsel %vm7648_vm15, %v7559_v55, %v7712_v22 }
 0x3e2   :  { %v7566_v14 = vpop.f32.mrf.mxu1  ;;  %7936 = vadd.xlane.f32.xlu0 %v7935_v23  ;;  %v7852_v44 = vmul.f32 %v12078_v21, %v7776_v45  ;;  %v7394_v22 = vadd.f32 %v7393_v3, %v12058_v18  ;;  %v7396_v31 = vadd.f32 %v7395_v27, %v12061_v48  ;;  %v7400_v3 = vadd.f32 %v7399_v53, %v12058_v18 }
 0x3e3   :  { %vm7650_vm1 = vcmp.gt.f32.partialorder %v7565_v49, 0.0  ;;  %v7714_v20 = vmul.f32 0.2, %v7565_v49  ;;  %v7567_v56 = vadd.f32 %v7566_v14, %v7374_v38  ;;  %v7777_v19 = vsel %vm7649_vm0, %v7563_v63, %v7713_v33 }
 0x3e4   :  { %v7568_v10 = vpop.f32.mrf.mxu1  ;;  %v7938_v30 = vadd.f32 %v7852_v44, %v7851_v15  ;;  %v7853_v17 = vmul.f32 %v12075_v42, %v7777_v19  ;;  %vm8004_vm0 = vcmask 7168  }
 0x3e5   :  { %vm7651_vm2 = vcmp.gt.f32.partialorder %v7567_v56, 0.0  ;;  %v7715_v43 = vmul.f32 0.2, %v7567_v56  ;;  %v7569_v26 = vadd.f32 %v7568_v10, %v7376_v7  ;;  %v7778_v34 = vsel %vm7650_vm1, %v7565_v49, %v7714_v20  ;;  %v7403_v7 = vpop.f32.mrf.mxu0 }
 0x3e6   :  { %v7572_v4 = vpop.f32.mrf.mxu1  ;;  %7939 = vadd.xlane.f32.xlu1 %v7938_v30  ;;  %v7854_v37 = vmul.f32 %v12078_v21, %v7778_v34  ;;  %v7402_v30 = vadd.f32 %v7401_v28, %v12061_v48  ;;  %v7404_v27 = vadd.f32 %v7403_v7, %v12058_v18 }
 0x3e7   :  { %vm7652_vm3 = vcmp.gt.f32.partialorder %v7569_v26, 0.0  ;;  %v7716_v12 = vmul.f32 0.2, %v7569_v26  ;;  %v7573_v62 = vadd.f32 %v7572_v4, %v7380_v50  ;;  %v7779_v2 = vsel %vm7651_vm2, %v7567_v56, %v7715_v43 }
 0x3e8   :  { %v7574_v6 = vpop.f32.mrf.mxu1  ;;  %v7941_v1 = vadd.f32 %v7854_v37, %v7853_v17  ;;  %v7855_v54 = vmul.f32 %v12075_v42, %v7779_v2 }
 0x3e9   :  { %vm7653_vm4 = vcmp.gt.f32.partialorder %v7573_v62, 0.0  ;;  %v7717_v51 = vmul.f32 0.2, %v7573_v62  ;;  %v7575_v9 = vadd.f32 %v7574_v6, %v7382_v13  ;;  %v7780_v5 = vsel %vm7652_vm3, %v7569_v26, %v7716_v12  ;;  %v7405_v13 = vpop.f32.mrf.mxu0 }
 0x3ea   :  { %v7576_v57 = vpop.f32.mrf.mxu1  ;;  %7942 = vadd.xlane.f32.xlu0 %v7941_v1  ;;  %v7856_v35 = vmul.f32 %v12078_v21, %v7780_v5  ;;  %v7406_v1 = vadd.f32 %v7405_v13, %v12061_v48 }
 0x3eb   :  { %vm7654_vm5 = vcmp.gt.f32.partialorder %v7575_v9, 0.0  ;;  %v7718_v52 = vmul.f32 0.2, %v7575_v9  ;;  %v7577_v36 = vadd.f32 %v7576_v57, %v7384_v39  ;;  %v7781_v47 = vsel %vm7653_vm4, %v7573_v62, %v7717_v51 }
 0x3ec   :  { %v7578_v8 = vpop.f32.mrf.mxu1  ;;  %v7944_v60 = vadd.f32 %v7856_v35, %v7855_v54  ;;  %v7857_v32 = vmul.f32 %v12075_v42, %v7781_v47 }
 0x3ed   :  { %vm7655_vm6 = vcmp.gt.f32.partialorder %v7577_v36, 0.0  ;;  %v7719_v25 = vmul.f32 0.2, %v7577_v36  ;;  %v7579_v61 = vadd.f32 %v7578_v8, %v7386_v59  ;;  %v7782_v58 = vsel %vm7654_vm5, %v7575_v9, %v7718_v52 }
 0x3ee   :  { %v7582_v55 = vpop.f32.mrf.mxu1  ;;  %7945 = vadd.xlane.f32.xlu1 %v7944_v60  ;;  %v7858_v11 = vmul.f32 %v12078_v21, %v7782_v58 }
 0x3ef   :  { %vm7656_vm7 = vcmp.gt.f32.partialorder %v7579_v61, 0.0  ;;  %v7720_v16 = vmul.f32 0.2, %v7579_v61  ;;  %v7583_v29 = vadd.f32 %v7582_v55, %v7390_v46  ;;  %v7783_v41 = vsel %vm7655_vm6, %v7577_v36, %v7719_v25  ;;  %v12304_v55 = vld [vmem:[#allocation2] ss:$0 sm:$0xff] }
 0x3f0   :  { %v7584_v63 = vpop.f32.mrf.mxu1  ;;  %v7947_v40 = vadd.f32 %v7858_v11, %v7857_v32  ;;  %v7859_v49 = vmul.f32 %v12075_v42, %v7783_v41 }
 0x3f1   :  { %vm7657_vm8 = vcmp.gt.f32.partialorder %v7583_v29, 0.0  ;;  %v7721_v38 = vmul.f32 0.2, %v7583_v29  ;;  %v7585_v24 = vadd.f32 %v7584_v63, %v7392_v0  ;;  %v7784_v23 = vsel %vm7656_vm7, %v7579_v61, %v7720_v16 }
 0x3f2   :  { %v7586_v33 = vpop.f32.mrf.mxu1  ;;  %7948 = vadd.xlane.f32.xlu0 %v7947_v40  ;;  %v7860_v45 = vmul.f32 %v12078_v21, %v7784_v23 }
 0x3f3   :  { %vm7658_vm9 = vcmp.gt.f32.partialorder %v7585_v24, 0.0  ;;  %v7722_v14 = vmul.f32 0.2, %v7585_v24  ;;  %v7587_v15 = vadd.f32 %v7586_v33, %v7394_v22  ;;  %v7785_v44 = vsel %vm7657_vm8, %v7583_v29, %v7721_v38 }
 0x3f4   :  { %v7588_v20 = vpop.f32.mrf.mxu1  ;;  %v7950_v56 = vadd.f32 %v7860_v45, %v7859_v49  ;;  %v7861_v26 = vmul.f32 %v12075_v42, %v7785_v44 }
 0x3f5   :  { %vm7659_vm10 = vcmp.gt.f32.partialorder %v7587_v15, 0.0  ;;  %v7723_v19 = vmul.f32 0.2, %v7587_v15  ;;  %v7589_v50 = vadd.f32 %v7588_v20, %v7396_v31  ;;  %v7786_v10 = vsel %vm7658_vm9, %v7585_v24, %v7722_v14 }
 0x3f6   :  { %v7592_v43 = vpop.f32.mrf.mxu1  ;;  %7951 = vadd.xlane.f32.xlu1 %v7950_v56  ;;  %v7862_v34 = vmul.f32 %v12078_v21, %v7786_v10 }
 0x3f7   :  { %vm7660_vm11 = vcmp.gt.f32.partialorder %v7589_v50, 0.0  ;;  %v7724_v4 = vmul.f32 0.2, %v7589_v50  ;;  %v7593_v17 = vadd.f32 %v7592_v43, %v7400_v3  ;;  %v7787_v37 = vsel %vm7659_vm10, %v7587_v15, %v7723_v19 }
 0x3f8   :  { %v7594_v12 = vpop.f32.mrf.mxu1  ;;  %v7953_v62 = vadd.f32 %v7862_v34, %v7861_v26  ;;  %v7863_v9 = vmul.f32 %v12075_v42, %v7787_v37 }
 0x3f9   :  { %vm7661_vm12 = vcmp.gt.f32.partialorder %v7593_v17, 0.0  ;;  %v7725_v2 = vmul.f32 0.2, %v7593_v17  ;;  %v7595_v39 = vadd.f32 %v7594_v12, %v7402_v30  ;;  %v7788_v6 = vsel %vm7660_vm11, %v7589_v50, %v7724_v4 }
 0x3fa   :  { %v7596_v51 = vpop.f32.mrf.mxu1  ;;  %7954 = vadd.xlane.f32.xlu0 %v7953_v62  ;;  %v7864_v5 = vmul.f32 %v12078_v21, %v7788_v6 }
 0x3fb   :  { %vm7662_vm13 = vcmp.gt.f32.partialorder %v7595_v39, 0.0  ;;  %v7726_v59 = vmul.f32 0.2, %v7595_v39  ;;  %v7597_v57 = vadd.f32 %v7596_v51, %v7404_v27  ;;  %v7789_v54 = vsel %vm7661_vm12, %v7593_v17, %v7725_v2 }
 0x3fc   :  { %v7598_v35 = vpop.f32.mrf.mxu1  ;;  %v7956_v18 = vadd.f32 %v7864_v5, %v7863_v9  ;;  %v7865_v47 = vmul.f32 %v12075_v42, %v7789_v54 }
 0x3fd   :  { %vm7663_vm14 = vcmp.gt.f32.partialorder %v7597_v57, 0.0  ;;  %v7727_v53 = vmul.f32 0.2, %v7597_v57  ;;  %v7599_v52 = vadd.f32 %v7598_v35, %v7406_v1  ;;  %v7790_v36 = vsel %vm7662_vm13, %v7595_v39, %v7726_v59 }
 0x3fe   :  { %7957 = vadd.xlane.f32.xlu1 %v7956_v18  ;;  %v7866_v48 = vmul.f32 %v12078_v21, %v7790_v36 }
 0x3ff   :  { %vm7664_vm15 = vcmp.gt.f32.partialorder %v7599_v52, 0.0  ;;  %v7728_v46 = vmul.f32 0.2, %v7599_v52  ;;  %v7791_v8 = vsel %vm7663_vm14, %v7597_v57, %v7727_v53 }
 0x400   :  { %v7959_v60 = vadd.f32 %v7866_v48, %v7865_v47  ;;  %v7867_v61 = vmul.f32 %v12075_v42, %v7791_v8 }
 0x401   :  { %v7792_v25 = vsel %vm7664_vm15, %v7599_v52, %v7728_v46 }
 0x402   :  { %7960 = vadd.xlane.f32.xlu0 %v7959_v60  ;;  %v7868_v58 = vmul.f32 %v12078_v21, %v7792_v25 }
 0x404   :  { %v7962_v0 = vadd.f32 %v7868_v58, %v7867_v61 }
 0x406   :  { %7963 = vadd.xlane.f32.xlu1 %v7962_v0 }
 0x413   :  { %v7871_v32 = vpop.xlane.xlu0 %7870 }
 0x414   :  { %v7972_v11 = vadd.f32 %v12304_v55, %v7871_v32 }
 0x416   :  { %8005 = vst.msk [vmem:[%s12473_s7] sm:$0xff] %vm8004_vm0, %v7972_v11 }
 0x417   :  { %v7874_v28 = vpop.xlane.xlu0 %7873 }
 0x418   :  { %v7973_v16 = vadd.f32 %v12304_v55, %v7874_v28 }
 0x41a   :  { %8006 = vst.msk [vmem:[%s12473_s7 + $0x8] sm:$0xff] %vm8004_vm0, %v7973_v16 }
 0x41b   :  { %v7877_v42 = vpop.xlane.xlu1 %7876 }
 0x41c   :  { %v7974_v21 = vadd.f32 %v12304_v55, %v7877_v42 }
 0x41e   :  { %8007 = vst.msk [vmem:[%s12473_s7 + $0x10] sm:$0xff] %vm8004_vm0, %v7974_v21 }
 0x41f   :  { %v7880_v29 = vpop.xlane.xlu1 %7879 }
 0x420   :  { %v7975_v41 = vadd.f32 %v12304_v55, %v7880_v29 }
 0x422   :  { %8008 = vst.msk [vmem:[%s12473_s7 + $0x18] sm:$0xff] %vm8004_vm0, %v7975_v41 }
 0x423   :  { %v7883_v22 = vpop.xlane.xlu0 %7882 }
 0x424   :  { %v7976_v63 = vadd.f32 %v12304_v55, %v7883_v22 }
 0x426   :  { %8009 = vst.msk [vmem:[%s12473_s7 + $0x20] sm:$0xff] %vm8004_vm0, %v7976_v63 }
 0x427   :  { %v7886_v40 = vpop.xlane.xlu1 %7885 }
 0x428   :  { %v7977_v38 = vadd.f32 %v12304_v55, %v7886_v40 }
 0x42a   :  { %8010 = vst.msk [vmem:[%s12473_s7 + $0x28] sm:$0xff] %vm8004_vm0, %v7977_v38 }
 0x42b   :  { %v7889_v24 = vpop.xlane.xlu0 %7888 }
 0x42c   :  { %v7978_v23 = vadd.f32 %v12304_v55, %v7889_v24 }
 0x42e   :  { %8011 = vst.msk [vmem:[%s12473_s7 + $0x30] sm:$0xff] %vm8004_vm0, %v7978_v23 }
 0x42f   :  { %v7892_v31 = vpop.xlane.xlu1 %7891 }
 0x430   :  { %v7979_v33 = vadd.f32 %v12304_v55, %v7892_v31 }
 0x432   :  { %8012 = vst.msk [vmem:[%s12473_s7 + $0x38] sm:$0xff] %vm8004_vm0, %v7979_v33 }
 0x433   :  { %v7895_v49 = vpop.xlane.xlu0 %7894 }
 0x434   :  { %v7980_v45 = vadd.f32 %v12304_v55, %v7895_v49 }
 0x436   :  { %8013 = vst.msk [vmem:[%s12473_s7 + $0x40] sm:$0xff] %vm8004_vm0, %v7980_v45 }
 0x437   :  { %v7898_v7 = vpop.xlane.xlu1 %7897 }
 0x438   :  { %v7981_v14 = vadd.f32 %v12304_v55, %v7898_v7 }
 0x43a   :  { %8014 = vst.msk [vmem:[%s12473_s7 + $0x48] sm:$0xff] %vm8004_vm0, %v7981_v14 }
 0x43b   :  { %v7901_v15 = vpop.xlane.xlu0 %7900 }
 0x43c   :  { %v7982_v44 = vadd.f32 %v12304_v55, %v7901_v15 }
 0x43e   :  { %8015 = vst.msk [vmem:[%s12473_s7 + $0x50] sm:$0xff] %vm8004_vm0, %v7982_v44 }
 0x43f   :  { %v7904_v3 = vpop.xlane.xlu1 %7903 }
 0x440   :  { %v7983_v20 = vadd.f32 %v12304_v55, %v7904_v3 }
 0x442   :  { %8016 = vst.msk [vmem:[%s12473_s7 + $0x58] sm:$0xff] %vm8004_vm0, %v7983_v20 }
 0x443   :  { %v7907_v56 = vpop.xlane.xlu0 %7906 }
 0x444   :  { %v7984_v19 = vadd.f32 %v12304_v55, %v7907_v56 }
 0x446   :  { %8017 = vst.msk [vmem:[%s12473_s7 + $0x60] sm:$0xff] %vm8004_vm0, %v7984_v19 }
 0x447   :  { %v7910_v50 = vpop.xlane.xlu1 %7909 }
 0x448   :  { %v7985_v10 = vadd.f32 %v12304_v55, %v7910_v50 }
 0x44a   :  { %8018 = vst.msk [vmem:[%s12473_s7 + $0x68] sm:$0xff] %vm8004_vm0, %v7985_v10 }
 0x44b   :  { %v7913_v30 = vpop.xlane.xlu0 %7912 }
 0x44c   :  { %v7986_v43 = vadd.f32 %v12304_v55, %v7913_v30 }
 0x44e   :  { %8019 = vst.msk [vmem:[%s12473_s7 + $0x70] sm:$0xff] %vm8004_vm0, %v7986_v43 }
 0x44f   :  { %v7916_v26 = vpop.xlane.xlu1 %7915 }
 0x450   :  { %v7987_v34 = vadd.f32 %v12304_v55, %v7916_v26 }
 0x452   :  { %8020 = vst.msk [vmem:[%s12473_s7 + $0x78] sm:$0xff] %vm8004_vm0, %v7987_v34 }
 0x453   :  { %v7919_v13 = vpop.xlane.xlu0 %7918 }
 0x454   :  { %v7988_v4 = vadd.f32 %v12304_v55, %v7919_v13 }
 0x456   :  { %8021 = vst.msk [vmem:[%s12473_s7 + $0x80] sm:$0xff] %vm8004_vm0, %v7988_v4 }
 0x457   :  { %v7922_v17 = vpop.xlane.xlu1 %7921 }
 0x458   :  { %v7989_v37 = vadd.f32 %v12304_v55, %v7922_v17 }
 0x45a   :  { %8022 = vst.msk [vmem:[%s12473_s7 + $0x88] sm:$0xff] %vm8004_vm0, %v7989_v37 }
 0x45b   :  { %v7925_v27 = vpop.xlane.xlu0 %7924 }
 0x45c   :  { %v7990_v12 = vadd.f32 %v12304_v55, %v7925_v27 }
 0x45e   :  { %8023 = vst.msk [vmem:[%s12473_s7 + $0x90] sm:$0xff] %vm8004_vm0, %v7990_v12 }
 0x45f   :  { %v7928_v62 = vpop.xlane.xlu1 %7927 }
 0x460   :  { %v7991_v2 = vadd.f32 %v12304_v55, %v7928_v62 }
 0x462   :  { %8024 = vst.msk [vmem:[%s12473_s7 + $0x98] sm:$0xff] %vm8004_vm0, %v7991_v2 }
 0x463   :  { %v7931_v39 = vpop.xlane.xlu0 %7930 }
 0x464   :  { %v7992_v6 = vadd.f32 %v12304_v55, %v7931_v39 }
 0x466   :  { %8025 = vst.msk [vmem:[%s12473_s7 + $0xa0] sm:$0xff] %vm8004_vm0, %v7992_v6 }
 0x467   :  { %v7934_v1 = vpop.xlane.xlu1 %7933 }
 0x468   :  { %v7993_v51 = vadd.f32 %v12304_v55, %v7934_v1 }
 0x46a   :  { %8026 = vst.msk [vmem:[%s12473_s7 + $0xa8] sm:$0xff] %vm8004_vm0, %v7993_v51 }
 0x46b   :  { %v7937_v9 = vpop.xlane.xlu0 %7936 }
 0x46c   :  { %v7994_v5 = vadd.f32 %v12304_v55, %v7937_v9 }
 0x46e   :  { %8027 = vst.msk [vmem:[%s12473_s7 + $0xb0] sm:$0xff] %vm8004_vm0, %v7994_v5 }
 0x46f   :  { %v7940_v59 = vpop.xlane.xlu1 %7939 }
 0x470   :  { %v7995_v57 = vadd.f32 %v12304_v55, %v7940_v59 }
 0x472   :  { %8028 = vst.msk [vmem:[%s12473_s7 + $0xb8] sm:$0xff] %vm8004_vm0, %v7995_v57 }
 0x473   :  { %v7943_v54 = vpop.xlane.xlu0 %7942 }
 0x474   :  { %v7996_v35 = vadd.f32 %v12304_v55, %v7943_v54 }
 0x476   :  { %8029 = vst.msk [vmem:[%s12473_s7 + $0xc0] sm:$0xff] %vm8004_vm0, %v7996_v35 }
 0x477   :  { %v7946_v18 = vpop.xlane.xlu1 %7945 }
 0x478   :  { %v7997_v53 = vadd.f32 %v12304_v55, %v7946_v18 }
 0x47a   :  { %8030 = vst.msk [vmem:[%s12473_s7 + $0xc8] sm:$0xff] %vm8004_vm0, %v7997_v53 }
 0x47b   :  { %v7949_v52 = vpop.xlane.xlu0 %7948 }
 0x47c   :  { %v7998_v36 = vadd.f32 %v12304_v55, %v7949_v52 }
 0x47e   :  { %8031 = vst.msk [vmem:[%s12473_s7 + $0xd0] sm:$0xff] %vm8004_vm0, %v7998_v36 }
 0x47f   :  { %v7952_v47 = vpop.xlane.xlu1 %7951 }
 0x480   :  { %v7999_v48 = vadd.f32 %v12304_v55, %v7952_v47 }
 0x482   :  { %8032 = vst.msk [vmem:[%s12473_s7 + $0xd8] sm:$0xff] %vm8004_vm0, %v7999_v48 }
 0x483   :  { %v7955_v46 = vpop.xlane.xlu0 %7954 }
 0x484   :  { %v8000_v8 = vadd.f32 %v12304_v55, %v7955_v46 }
 0x486   :  { %8033 = vst.msk [vmem:[%s12473_s7 + $0xe0] sm:$0xff] %vm8004_vm0, %v8000_v8 }
 0x487   :  { %v7958_v60 = vpop.xlane.xlu1 %7957 }
 0x488   :  { %v8001_v25 = vadd.f32 %v12304_v55, %v7958_v60 }
 0x48a   :  { %8034 = vst.msk [vmem:[%s12473_s7 + $0xe8] sm:$0xff] %vm8004_vm0, %v8001_v25 }
 0x48b   :  { %v7961_v61 = vpop.xlane.xlu0 %7960 }
 0x48c   :  { %v8002_v58 = vadd.f32 %v12304_v55, %v7961_v61 }
 0x48e   :  { %8035 = vst.msk [vmem:[%s12473_s7 + $0xf0] sm:$0xff] %vm8004_vm0, %v8002_v58 }
 0x48f   :  { %v7964_v0 = vpop.xlane.xlu1 %7963 }
 0x490   :  { %v8003_v32 = vadd.f32 %v12304_v55, %v7964_v0 }
 0x492   :  { %8036 = vst.msk [vmem:[%s12473_s7 + $0xf8] sm:$0xff] %vm8004_vm0, %v8003_v32 }
 0x493   :  { %8041 = vsyncpa [#allocation4], 1 }
 0x494   :  { %8042 = vsyncpa [#allocation6], 1 }

</bundles_post_ra>
